<compile_context>
chip_gen: v5e
topology: v5e:2x2
jax: 0.10.0
libtpu: 0.0.40
codegen_flags: <defaults>
</compile_context>

<pallas_src>
import jax
import jax.numpy as jnp
from jax import lax
from jax.experimental import pallas as pl
from jax.experimental.pallas import tpu as pltpu

GROUPS = 8
GN_EPS = 1e-5   # nn.GroupNorm default eps
WS_EPS = 1e-5   # WeightStandardizedConv2d eps for float32 inputs


# ----------------------------------------------------------------------------
# Fused kernel: whole ResidualBlock for one batch element per grid step.
# In-kernel activation layout: (H, W*C)  -- lane-dense, channel fastest.
# ----------------------------------------------------------------------------
def residual_block_kernel(
    x_ref,              # (1, H, W*Cin)
    temb_ref,           # (1, 1, Td)
    cemb_ref,           # (1, 1, Cd)
    shift_mats_ref,     # (2, H, H): [0] row i <- i-1 (zero fill), [1] row i <- i+1
    band_a_ref,         # (3, W*Cin,  W*Cout)  banded conv weights, block_a
    bias_a_ref, gamma_a_ref, beta_a_ref,      # (1, W*Cout) each (W-tiled)
    band_b_ref,         # (3, W*Cout, W*Cout)  banded conv weights, block_b
    bias_b_ref, gamma_b_ref, beta_b_ref,      # (1, W*Cout) each
    band_r_ref,         # (W*Cin, W*Cout)  block-diagonal 1x1 residual proj
    bias_r_ref,         # (1, W*Cout)
    wt_ref, bt_ref,     # temb_proj linear: (Td, Cout), (1, Cout)
    w1_ref, b1_ref,     # cemb_proj fc1:   (Cd, Cout), (1, Cout)
    w2_ref, b2_ref,     # cemb_proj fc2:   (Cout, Cout), (1, Cout)
    cbcast_ref,         # (Cout, W*Cout)  per-channel -> lane-packed broadcast
    gnmat_ref,          # (W*Cout, W*Cout)  group indicator / (H*W*cpg)
    o_ref,              # (1, H, W*Cout)
):
    f32 = jnp.float32
    H = x_ref.shape[1]
    x = x_ref[0]                                   # (H, W*Cin)
    s_dn = shift_mats_ref[0]
    s_up = shift_mats_ref[1]
    ones_h = jnp.ones((1, H), f32)

    # --- temb / cemb projections (fused; tiny matmuls) ----------------------
    # temb_proj = Linear(SiLU(temb)); cemb_proj = Linear(SiLU(Linear(cemb)))
    shift_c = jnp.dot(jax.nn.silu(temb_ref[0]), wt_ref[...],
                      preferred_element_type=f32) + bt_ref[...]        # (1, Cout)
    h1 = jnp.dot(cemb_ref[0], w1_ref[...],
                 preferred_element_type=f32) + b1_ref[...]
    scale_c = jnp.dot(jax.nn.silu(h1), w2_ref[...],
                      preferred_element_type=f32) + b2_ref[...]        # (1, Cout)
    # Broadcast (1, Cout) -> lane-packed (1, W*Cout) on the MXU.
    scale = jnp.dot(scale_c, cbcast_ref[...], preferred_element_type=f32)
    shift = jnp.dot(shift_c, cbcast_ref[...], preferred_element_type=f32)

    def conv3x3(h, band_ref, bias):
        # Vertical taps via zero-filled row shifts; horizontal taps, channel
        # contraction and W zero-padding are folded into the banded matrices.
        h_dn = jnp.dot(s_dn, h, preferred_element_type=f32)    # row i <- h[i-1]
        h_up = jnp.dot(s_up, h, preferred_element_type=f32)    # row i <- h[i+1]
        acc = jnp.dot(h_dn, band_ref[0], preferred_element_type=f32)
        acc = acc + jnp.dot(h, band_ref[1], preferred_element_type=f32)
        acc = acc + jnp.dot(h_up, band_ref[2], preferred_element_type=f32)
        return acc + bias

    def group_norm_silu(h, gamma, beta):
        # PyTorch GroupNorm (biased variance) on the (H, W*C) packed layout.
        col_sum = jnp.dot(ones_h, h, preferred_element_type=f32)       # (1, WC)
        mean = jnp.dot(col_sum, gnmat_ref[...], preferred_element_type=f32)
        d = h - mean
        sq_sum = jnp.dot(ones_h, d * d, preferred_element_type=f32)
        var = jnp.dot(sq_sum, gnmat_ref[...], preferred_element_type=f32)
        y = d * lax.rsqrt(var + GN_EPS) * gamma + beta
        return y * jax.nn.sigmoid(y)                                    # SiLU

    # --- block_a + modulation (scale/shift AFTER block_a's SiLU, per spec) --
    ha = conv3x3(x, band_a_ref, bias_a_ref[...])
    ha = group_norm_silu(ha, gamma_a_ref[...], beta_a_ref[...])
    ha = ha * scale + shift

    # --- block_b -------------------------------------------------------------
    hb = conv3x3(ha, band_b_ref, bias_b_ref[...])
    hb = group_norm_silu(hb, gamma_b_ref[...], beta_b_ref[...])

    # --- residual projection + add ------------------------------------------
    res = jnp.dot(x, band_r_ref[...], preferred_element_type=f32) + bias_r_ref[...]
    o_ref[0] = (hb + res).astype(o_ref.dtype)


# ----------------------------------------------------------------------------
# Host-side constant construction (weights only; no activation traffic).
# ----------------------------------------------------------------------------
def weight_standardize(w, eps=WS_EPS):
    # w: (KH, KW, Cin, Cout); standardize over (KH, KW, Cin) per output channel
    mean = jnp.mean(w, axis=(0, 1, 2), keepdims=True)
    var = jnp.mean((w - mean) ** 2, axis=(0, 1, 2), keepdims=True)
    return (w - mean) * lax.rsqrt(var + eps)


def build_conv_band(w, W):
    """(3, 3, Ci, Co) -> (3, W*Ci, W*Co) banded block-Toeplitz matrices.

    band[dy, p*Ci + c, j*Co + co] = w[dy, p - j + 1, c, co]  for 0 <= p-j+1 < 3,
    folding the horizontal taps, the channel contraction and the W-direction
    zero padding into a single contraction (K) dimension.
    """
    KH, KW, Ci, Co = w.shape
    bands = []
    for dy in range(KH):
        m = jnp.zeros((W * Ci, W * Co), w.dtype)
        for dx in range(KW):
            m = m + jnp.kron(jnp.eye(W, W, k=1 - dx, dtype=w.dtype), w[dy, dx])
        bands.append(m)
    return jnp.stack(bands)


def _tile_w(v, W):
    # (C,) -> (1, W*C) in the lane-packed layout (lane = j*C + c).
    return jnp.tile(v.reshape(1, -1), (1, W))


def _const_spec(shape):
    n = len(shape)
    return pl.BlockSpec(shape, lambda i, _n=n: (0,) * _n)


# ----------------------------------------------------------------------------
# Forward wrapper
# ----------------------------------------------------------------------------
def residual_block_forward(x_nchw, temb, cemb, params, groups=GROUPS):
    B, Cin, H, W = x_nchw.shape
    Cout = params["ba"].shape[0]
    Td, Cd = temb.shape[1], cemb.shape[1]
    WCi, WCo = W * Cin, W * Cout
    f32 = jnp.float32

    # NCHW -> lane-packed (B, H, W*Cin)
    x = jnp.transpose(x_nchw, (0, 2, 3, 1)).astype(f32).reshape(B, H, WCi)

    # Banded conv weights (weight-standardized), residual 1x1 block-diagonal.
    band_a = build_conv_band(weight_standardize(params["wa"]).astype(f32), W)
    band_b = build_conv_band(weight_standardize(params["wb"]).astype(f32), W)
    if "wr" in params:                       # residual_proj (Cin != Cout)
        wr, br = params["wr"].astype(f32), params["br"].astype(f32)
    else:                                    # nn.Identity
        wr, br = jnp.eye(Cout, dtype=f32), jnp.zeros((Cout,), f32)
    band_r = jnp.kron(jnp.eye(W, dtype=f32), wr)                 # (W*Cin, W*Cout)

    bias_a = _tile_w(params["ba"], W)
    gamma_a = _tile_w(params["ga"], W)
    beta_a = _tile_w(params["bta"], W)
    bias_b = _tile_w(params["bb"], W)
    gamma_b = _tile_w(params["gb"], W)
    beta_b = _tile_w(params["btb"], W)
    bias_r = _tile_w(br, W)

    # Channel -> lane broadcast matrix and GroupNorm group-indicator matrix.
    cbcast = jnp.kron(jnp.ones((1, W), f32), jnp.eye(Cout, dtype=f32))
    lane_g = (jnp.arange(WCo) % Cout) // (Cout // groups)
    gnmat = (lane_g[:, None] == lane_g[None, :]).astype(f32)
    gnmat = gnmat / float(H * W * (Cout // groups))

    # Zero-filled row-shift matrices for the vertical conv taps.
    shift_mats = jnp.stack([jnp.eye(H, k=-1, dtype=f32),
                            jnp.eye(H, k=1, dtype=f32)])

    per_batch = lambda i: (i, 0, 0)
    args = (
        x,
        temb.astype(f32).reshape(B, 1, Td),
        cemb.astype(f32).reshape(B, 1, Cd),
        shift_mats,
        band_a, bias_a, gamma_a, beta_a,
        band_b, bias_b, gamma_b, beta_b,
        band_r, bias_r,
        params["wt"].astype(f32), params["bt"].reshape(1, Cout).astype(f32),
        params["w1"].astype(f32), params["b1"].reshape(1, Cout).astype(f32),
        params["w2"].astype(f32), params["b2"].reshape(1, Cout).astype(f32),
        cbcast, gnmat,
    )
    in_specs = [
        pl.BlockSpec((1, H, WCi), per_batch),
        pl.BlockSpec((1, 1, Td), per_batch),
        pl.BlockSpec((1, 1, Cd), per_batch),
    ] + [_const_spec(a.shape) for a in args[3:]]

    out = pl.pallas_call(
        residual_block_kernel,
        out_shape=jax.ShapeDtypeStruct((B, H, WCo), f32),
        grid=(B,),
        in_specs=in_specs,
        out_specs=pl.BlockSpec((1, H, WCo), per_batch),
        compiler_params=pltpu.CompilerParams(
            dimension_semantics=("parallel",),
            vmem_limit_bytes=32 * 1024 * 1024,
        ),
    )(*args)

    # (B, H, W*Cout) -> NCHW
    return jnp.transpose(out.reshape(B, H, W, Cout), (0, 3, 1, 2))


# ----------------------------------------------------------------------------
# Plain-JAX reference (mirrors the PyTorch ResidualBlock forward)
# ----------------------------------------------------------------------------
def residual_block_reference(x_nchw, temb, cemb, params, groups=GROUPS):
    x = jnp.transpose(x_nchw, (0, 2, 3, 1)).astype(jnp.float32)   # NHWC

    def conv3x3(h, w, b):
        y = lax.conv_general_dilated(h, w, window_strides=(1, 1),
                                     padding=((1, 1), (1, 1)),
                                     dimension_numbers=("NHWC", "HWIO", "NHWC"))
        return y + b

    def group_norm(h, gamma, beta):
        Bn, Hn, Wn, C = h.shape
        hg = h.reshape(Bn, Hn, Wn, groups, C // groups)
        mean = jnp.mean(hg, axis=(1, 2, 4), keepdims=True)
        var = jnp.mean((hg - mean) ** 2, axis=(1, 2, 4), keepdims=True)
        hn = ((hg - mean) * lax.rsqrt(var + GN_EPS)).reshape(Bn, Hn, Wn, C)
        return hn * gamma + beta

    h = conv3x3(x, weight_standardize(params["wa"]), params["ba"])
    h = jax.nn.silu(group_norm(h, params["ga"], params["bta"]))
    shift = jnp.dot(jax.nn.silu(temb), params["wt"]) + params["bt"]
    scale = jnp.dot(jax.nn.silu(jnp.dot(cemb, params["w1"]) + params["b1"]),
                    params["w2"]) + params["b2"]
    h = h * scale[:, None, None, :] + shift[:, None, None, :]
    h = conv3x3(h, weight_standardize(params["wb"]), params["bb"])
    h = jax.nn.silu(group_norm(h, params["gb"], params["btb"]))
    if "wr" in params:
        res = jnp.einsum("bhwc,cd->bhwd", x, params["wr"]) + params["br"]
    else:
        res = x
    return jnp.transpose(h + res, (0, 3, 1, 2))


def init_params(key, Cin, Cout, temb_dim, cemb_dim):
    keys = iter(jax.random.split(key, 32))

    def nrm(shape, s=0.1):
        return s * jax.random.normal(next(keys), shape, jnp.float32)

    p = {
        "wa": nrm((3, 3, Cin, Cout)), "ba": nrm((Cout,)),
        "ga": 1.0 + nrm((Cout,)), "bta": nrm((Cout,)),
        "wb": nrm((3, 3, Cout, Cout)), "bb": nrm((Cout,)),
        "gb": 1.0 + nrm((Cout,)), "btb": nrm((Cout,)),
        "wt": nrm((temb_dim, Cout)), "bt": nrm((Cout,)),
        "w1": nrm((cemb_dim, Cout)), "b1": nrm((Cout,)),
        "w2": nrm((Cout, Cout)), "b2": nrm((Cout,)),
    }
    if Cin != Cout:
        p["wr"] = nrm((Cin, Cout))
        p["br"] = nrm((Cout,))
    return p


if __name__ == "__main__":
    B, Cin, Cout, H, W = 2, 4, 32, 16, 16
    temb_dim, cemb_dim = 32, 32

    key = jax.random.PRNGKey(0)
    kx, kt, kc, kp = jax.random.split(key, 4)
    x = jax.random.normal(kx, (B, Cin, H, W), jnp.float32)   # NCHW (PyTorch-style)
    temb = jax.random.normal(kt, (B, temb_dim), jnp.float32)
    cemb = jax.random.normal(kc, (B, cemb_dim), jnp.float32)
    params = init_params(kp, Cin, Cout, temb_dim, cemb_dim)

    out = jax.jit(residual_block_forward)(x, temb, cemb, params)
    out = jax.block_until_ready(out)

    assert out.shape == (B, Cout, H, W), out.shape
    assert bool(jnp.all(jnp.isfinite(out)))

    ref = jax.block_until_ready(
        jax.jit(residual_block_reference)(x, temb, cemb, params))
    max_err = float(jnp.max(jnp.abs(out - ref)))
    assert bool(jnp.allclose(out, ref, rtol=5e-2, atol=5e-2)), max_err

    print("KERNEL_OK")
</pallas_src>

<mosaic_0001>
module attributes {stable_mosaic.version = 11 : i64} {
  func.func @residual_block_kernel(%arg0: i32, %arg1: memref<1x16x64xf32, #tpu.memory_space<vmem>>, %arg2: memref<1x1x32xf32, #tpu.memory_space<vmem>>, %arg3: memref<1x1x32xf32, #tpu.memory_space<vmem>>, %arg4: memref<2x16x16xf32, #tpu.memory_space<vmem>>, %arg5: memref<3x64x512xf32, #tpu.memory_space<vmem>>, %arg6: memref<1x512xf32, #tpu.memory_space<vmem>>, %arg7: memref<1x512xf32, #tpu.memory_space<vmem>>, %arg8: memref<1x512xf32, #tpu.memory_space<vmem>>, %arg9: memref<3x512x512xf32, #tpu.memory_space<vmem>>, %arg10: memref<1x512xf32, #tpu.memory_space<vmem>>, %arg11: memref<1x512xf32, #tpu.memory_space<vmem>>, %arg12: memref<1x512xf32, #tpu.memory_space<vmem>>, %arg13: memref<64x512xf32, #tpu.memory_space<vmem>>, %arg14: memref<1x512xf32, #tpu.memory_space<vmem>>, %arg15: memref<32x32xf32, #tpu.memory_space<vmem>>, %arg16: memref<1x32xf32, #tpu.memory_space<vmem>>, %arg17: memref<32x32xf32, #tpu.memory_space<vmem>>, %arg18: memref<1x32xf32, #tpu.memory_space<vmem>>, %arg19: memref<32x32xf32, #tpu.memory_space<vmem>>, %arg20: memref<1x32xf32, #tpu.memory_space<vmem>>, %arg21: memref<32x512xf32, #tpu.memory_space<vmem>>, %arg22: memref<512x512xf32, #tpu.memory_space<vmem>>, %arg23: memref<1x16x512xf32, #tpu.memory_space<vmem>>) attributes {dimension_semantics = [#tpu.dimension_semantics<parallel>], iteration_bounds = array<i64: 2>, scalar_prefetch = 0 : i64, scratch_operands = 0 : i64, tpu.core_type = #tpu.core_type<tc>, window_params = [{transform_indices = @transform_0, window_bounds = array<i64: 1, 16, 64>}, {transform_indices = @transform_1, window_bounds = array<i64: 1, 1, 32>}, {transform_indices = @transform_2, window_bounds = array<i64: 1, 1, 32>}, {pipeline_mode = #tpu.pipeline_mode<synchronous>, transform_indices = @transform_3, window_bounds = array<i64: 2, 16, 16>}, {pipeline_mode = #tpu.pipeline_mode<synchronous>, transform_indices = @transform_4, window_bounds = array<i64: 3, 64, 512>}, {pipeline_mode = #tpu.pipeline_mode<synchronous>, transform_indices = @transform_5, window_bounds = array<i64: 1, 512>}, {pipeline_mode = #tpu.pipeline_mode<synchronous>, transform_indices = @transform_6, window_bounds = array<i64: 1, 512>}, {pipeline_mode = #tpu.pipeline_mode<synchronous>, transform_indices = @transform_7, window_bounds = array<i64: 1, 512>}, {pipeline_mode = #tpu.pipeline_mode<synchronous>, transform_indices = @transform_8, window_bounds = array<i64: 3, 512, 512>}, {pipeline_mode = #tpu.pipeline_mode<synchronous>, transform_indices = @transform_9, window_bounds = array<i64: 1, 512>}, {pipeline_mode = #tpu.pipeline_mode<synchronous>, transform_indices = @transform_10, window_bounds = array<i64: 1, 512>}, {pipeline_mode = #tpu.pipeline_mode<synchronous>, transform_indices = @transform_11, window_bounds = array<i64: 1, 512>}, {pipeline_mode = #tpu.pipeline_mode<synchronous>, transform_indices = @transform_12, window_bounds = array<i64: 64, 512>}, {pipeline_mode = #tpu.pipeline_mode<synchronous>, transform_indices = @transform_13, window_bounds = array<i64: 1, 512>}, {pipeline_mode = #tpu.pipeline_mode<synchronous>, transform_indices = @transform_14, window_bounds = array<i64: 32, 32>}, {pipeline_mode = #tpu.pipeline_mode<synchronous>, transform_indices = @transform_15, window_bounds = array<i64: 1, 32>}, {pipeline_mode = #tpu.pipeline_mode<synchronous>, transform_indices = @transform_16, window_bounds = array<i64: 32, 32>}, {pipeline_mode = #tpu.pipeline_mode<synchronous>, transform_indices = @transform_17, window_bounds = array<i64: 1, 32>}, {pipeline_mode = #tpu.pipeline_mode<synchronous>, transform_indices = @transform_18, window_bounds = array<i64: 32, 32>}, {pipeline_mode = #tpu.pipeline_mode<synchronous>, transform_indices = @transform_19, window_bounds = array<i64: 1, 32>}, {pipeline_mode = #tpu.pipeline_mode<synchronous>, transform_indices = @transform_20, window_bounds = array<i64: 32, 512>}, {pipeline_mode = #tpu.pipeline_mode<synchronous>, transform_indices = @transform_21, window_bounds = array<i64: 512, 512>}, {transform_indices = @transform_22, window_bounds = array<i64: 1, 16, 512>}]} {
    %c0 = arith.constant 0 : index
    %c0_0 = arith.constant 0 : index
    %c0_1 = arith.constant 0 : index
    %0 = vector.load %arg1[%c0, %c0_0, %c0_1] : memref<1x16x64xf32, #tpu.memory_space<vmem>>, vector<1x16x64xf32>
    %1 = vector.shape_cast %0 : vector<1x16x64xf32> to vector<16x64xf32>
    %c0_2 = arith.constant 0 : index
    %c0_3 = arith.constant 0 : index
    %c0_4 = arith.constant 0 : index
    %2 = vector.load %arg4[%c0_2, %c0_3, %c0_4] : memref<2x16x16xf32, #tpu.memory_space<vmem>>, vector<1x16x16xf32>
    %3 = vector.shape_cast %2 : vector<1x16x16xf32> to vector<16x16xf32>
    %c1 = arith.constant 1 : index
    %c0_5 = arith.constant 0 : index
    %c0_6 = arith.constant 0 : index
    %4 = vector.load %arg4[%c1, %c0_5, %c0_6] : memref<2x16x16xf32, #tpu.memory_space<vmem>>, vector<1x16x16xf32>
    %5 = vector.shape_cast %4 : vector<1x16x16xf32> to vector<16x16xf32>
    %cst = arith.constant 1.000000e+00 : f32
    %6 = vector.broadcast %cst : f32 to vector<1x16xf32>
    %c0_7 = arith.constant 0 : index
    %c0_8 = arith.constant 0 : index
    %c0_9 = arith.constant 0 : index
    %7 = vector.load %arg2[%c0_7, %c0_8, %c0_9] : memref<1x1x32xf32, #tpu.memory_space<vmem>>, vector<1x1x32xf32>
    %8 = vector.shape_cast %7 : vector<1x1x32xf32> to vector<1x32xf32>
    %9 = arith.negf %8 : vector<1x32xf32>
    %10 = math.exp %9 : vector<1x32xf32>
    %cst_10 = arith.constant 1.000000e+00 : f32
    %11 = vector.broadcast %cst_10 : f32 to vector<1x32xf32>
    %12 = arith.addf %11, %10 : vector<1x32xf32>
    %13 = arith.divf %11, %12 : vector<1x32xf32>
    %14 = arith.mulf %8, %13 : vector<1x32xf32>
    %c0_11 = arith.constant 0 : index
    %c0_12 = arith.constant 0 : index
    %15 = vector.load %arg15[%c0_11, %c0_12] : memref<32x32xf32, #tpu.memory_space<vmem>>, vector<32x32xf32>
    %cst_13 = arith.constant dense<0.000000e+00> : vector<1x32xf32>
    %16 = tpu.matmul %14, %15, %cst_13 {dimension_numbers = #tpu.dot_dimension_numbers<[1], [0], [0], [1], [0, 0, 1, 1], [], []>} : vector<1x32xf32>, vector<32x32xf32>, vector<1x32xf32> -> vector<1x32xf32>
    %c0_14 = arith.constant 0 : index
    %c0_15 = arith.constant 0 : index
    %17 = vector.load %arg16[%c0_14, %c0_15] : memref<1x32xf32, #tpu.memory_space<vmem>>, vector<1x32xf32>
    %18 = arith.addf %16, %17 : vector<1x32xf32>
    %c0_16 = arith.constant 0 : index
    %c0_17 = arith.constant 0 : index
    %c0_18 = arith.constant 0 : index
    %19 = vector.load %arg3[%c0_16, %c0_17, %c0_18] : memref<1x1x32xf32, #tpu.memory_space<vmem>>, vector<1x1x32xf32>
    %20 = vector.shape_cast %19 : vector<1x1x32xf32> to vector<1x32xf32>
    %c0_19 = arith.constant 0 : index
    %c0_20 = arith.constant 0 : index
    %21 = vector.load %arg17[%c0_19, %c0_20] : memref<32x32xf32, #tpu.memory_space<vmem>>, vector<32x32xf32>
    %cst_21 = arith.constant dense<0.000000e+00> : vector<1x32xf32>
    %22 = tpu.matmul %20, %21, %cst_21 {dimension_numbers = #tpu.dot_dimension_numbers<[1], [0], [0], [1], [0, 0, 1, 1], [], []>} : vector<1x32xf32>, vector<32x32xf32>, vector<1x32xf32> -> vector<1x32xf32>
    %c0_22 = arith.constant 0 : index
    %c0_23 = arith.constant 0 : index
    %23 = vector.load %arg18[%c0_22, %c0_23] : memref<1x32xf32, #tpu.memory_space<vmem>>, vector<1x32xf32>
    %24 = arith.addf %22, %23 : vector<1x32xf32>
    %25 = arith.negf %24 : vector<1x32xf32>
    %26 = math.exp %25 : vector<1x32xf32>
    %cst_24 = arith.constant 1.000000e+00 : f32
    %27 = vector.broadcast %cst_24 : f32 to vector<1x32xf32>
    %28 = arith.addf %27, %26 : vector<1x32xf32>
    %29 = arith.divf %27, %28 : vector<1x32xf32>
    %30 = arith.mulf %24, %29 : vector<1x32xf32>
    %c0_25 = arith.constant 0 : index
    %c0_26 = arith.constant 0 : index
    %31 = vector.load %arg19[%c0_25, %c0_26] : memref<32x32xf32, #tpu.memory_space<vmem>>, vector<32x32xf32>
    %cst_27 = arith.constant dense<0.000000e+00> : vector<1x32xf32>
    %32 = tpu.matmul %30, %31, %cst_27 {dimension_numbers = #tpu.dot_dimension_numbers<[1], [0], [0], [1], [0, 0, 1, 1], [], []>} : vector<1x32xf32>, vector<32x32xf32>, vector<1x32xf32> -> vector<1x32xf32>
    %c0_28 = arith.constant 0 : index
    %c0_29 = arith.constant 0 : index
    %33 = vector.load %arg20[%c0_28, %c0_29] : memref<1x32xf32, #tpu.memory_space<vmem>>, vector<1x32xf32>
    %34 = arith.addf %32, %33 : vector<1x32xf32>
    %c0_30 = arith.constant 0 : index
    %c0_31 = arith.constant 0 : index
    %35 = vector.load %arg21[%c0_30, %c0_31] : memref<32x512xf32, #tpu.memory_space<vmem>>, vector<32x512xf32>
    %cst_32 = arith.constant dense<0.000000e+00> : vector<1x512xf32>
    %36 = tpu.matmul %34, %35, %cst_32 {dimension_numbers = #tpu.dot_dimension_numbers<[1], [0], [0], [1], [0, 0, 1, 1], [], []>} : vector<1x32xf32>, vector<32x512xf32>, vector<1x512xf32> -> vector<1x512xf32>
    %c0_33 = arith.constant 0 : index
    %c0_34 = arith.constant 0 : index
    %37 = vector.load %arg21[%c0_33, %c0_34] : memref<32x512xf32, #tpu.memory_space<vmem>>, vector<32x512xf32>
    %cst_35 = arith.constant dense<0.000000e+00> : vector<1x512xf32>
    %38 = tpu.matmul %18, %37, %cst_35 {dimension_numbers = #tpu.dot_dimension_numbers<[1], [0], [0], [1], [0, 0, 1, 1], [], []>} : vector<1x32xf32>, vector<32x512xf32>, vector<1x512xf32> -> vector<1x512xf32>
    %c0_36 = arith.constant 0 : index
    %c0_37 = arith.constant 0 : index
    %39 = vector.load %arg6[%c0_36, %c0_37] : memref<1x512xf32, #tpu.memory_space<vmem>>, vector<1x512xf32>
    %cst_38 = arith.constant dense<0.000000e+00> : vector<16x64xf32>
    %40 = tpu.matmul %3, %1, %cst_38 {dimension_numbers = #tpu.dot_dimension_numbers<[1], [0], [0], [1], [0, 0, 1, 1], [], []>} : vector<16x16xf32>, vector<16x64xf32>, vector<16x64xf32> -> vector<16x64xf32>
    %cst_39 = arith.constant dense<0.000000e+00> : vector<16x64xf32>
    %41 = tpu.matmul %5, %1, %cst_39 {dimension_numbers = #tpu.dot_dimension_numbers<[1], [0], [0], [1], [0, 0, 1, 1], [], []>} : vector<16x16xf32>, vector<16x64xf32>, vector<16x64xf32> -> vector<16x64xf32>
    %c0_40 = arith.constant 0 : index
    %c0_41 = arith.constant 0 : index
    %c0_42 = arith.constant 0 : index
    %42 = vector.load %arg5[%c0_40, %c0_41, %c0_42] : memref<3x64x512xf32, #tpu.memory_space<vmem>>, vector<1x64x512xf32>
    %43 = vector.shape_cast %42 : vector<1x64x512xf32> to vector<64x512xf32>
    %cst_43 = arith.constant dense<0.000000e+00> : vector<16x512xf32>
    %44 = tpu.matmul %40, %43, %cst_43 {dimension_numbers = #tpu.dot_dimension_numbers<[1], [0], [0], [1], [0, 0, 1, 1], [], []>} : vector<16x64xf32>, vector<64x512xf32>, vector<16x512xf32> -> vector<16x512xf32>
    %c1_44 = arith.constant 1 : index
    %c0_45 = arith.constant 0 : index
    %c0_46 = arith.constant 0 : index
    %45 = vector.load %arg5[%c1_44, %c0_45, %c0_46] : memref<3x64x512xf32, #tpu.memory_space<vmem>>, vector<1x64x512xf32>
    %46 = vector.shape_cast %45 : vector<1x64x512xf32> to vector<64x512xf32>
    %cst_47 = arith.constant dense<0.000000e+00> : vector<16x512xf32>
    %47 = tpu.matmul %1, %46, %cst_47 {dimension_numbers = #tpu.dot_dimension_numbers<[1], [0], [0], [1], [0, 0, 1, 1], [], []>} : vector<16x64xf32>, vector<64x512xf32>, vector<16x512xf32> -> vector<16x512xf32>
    %48 = arith.addf %44, %47 : vector<16x512xf32>
    %c2 = arith.constant 2 : index
    %c0_48 = arith.constant 0 : index
    %c0_49 = arith.constant 0 : index
    %49 = vector.load %arg5[%c2, %c0_48, %c0_49] : memref<3x64x512xf32, #tpu.memory_space<vmem>>, vector<1x64x512xf32>
    %50 = vector.shape_cast %49 : vector<1x64x512xf32> to vector<64x512xf32>
    %cst_50 = arith.constant dense<0.000000e+00> : vector<16x512xf32>
    %51 = tpu.matmul %41, %50, %cst_50 {dimension_numbers = #tpu.dot_dimension_numbers<[1], [0], [0], [1], [0, 0, 1, 1], [], []>} : vector<16x64xf32>, vector<64x512xf32>, vector<16x512xf32> -> vector<16x512xf32>
    %52 = arith.addf %48, %51 : vector<16x512xf32>
    %53 = vector.broadcast %39 : vector<1x512xf32> to vector<16x512xf32>
    %54 = arith.addf %52, %53 : vector<16x512xf32>
    %c0_51 = arith.constant 0 : index
    %c0_52 = arith.constant 0 : index
    %55 = vector.load %arg7[%c0_51, %c0_52] : memref<1x512xf32, #tpu.memory_space<vmem>>, vector<1x512xf32>
    %c0_53 = arith.constant 0 : index
    %c0_54 = arith.constant 0 : index
    %56 = vector.load %arg8[%c0_53, %c0_54] : memref<1x512xf32, #tpu.memory_space<vmem>>, vector<1x512xf32>
    %cst_55 = arith.constant dense<0.000000e+00> : vector<1x512xf32>
    %57 = tpu.matmul %6, %54, %cst_55 {dimension_numbers = #tpu.dot_dimension_numbers<[1], [0], [0], [1], [0, 0, 1, 1], [], []>} : vector<1x16xf32>, vector<16x512xf32>, vector<1x512xf32> -> vector<1x512xf32>
    %c0_56 = arith.constant 0 : index
    %c0_57 = arith.constant 0 : index
    %58 = vector.load %arg22[%c0_56, %c0_57] : memref<512x512xf32, #tpu.memory_space<vmem>>, vector<512x512xf32>
    %cst_58 = arith.constant dense<0.000000e+00> : vector<1x512xf32>
    %59 = tpu.matmul %57, %58, %cst_58 {dimension_numbers = #tpu.dot_dimension_numbers<[1], [0], [0], [1], [0, 0, 1, 1], [], []>} : vector<1x512xf32>, vector<512x512xf32>, vector<1x512xf32> -> vector<1x512xf32>
    %60 = vector.broadcast %59 : vector<1x512xf32> to vector<16x512xf32>
    %61 = arith.subf %54, %60 : vector<16x512xf32>
    %62 = arith.mulf %61, %61 : vector<16x512xf32>
    %cst_59 = arith.constant dense<0.000000e+00> : vector<1x512xf32>
    %63 = tpu.matmul %6, %62, %cst_59 {dimension_numbers = #tpu.dot_dimension_numbers<[1], [0], [0], [1], [0, 0, 1, 1], [], []>} : vector<1x16xf32>, vector<16x512xf32>, vector<1x512xf32> -> vector<1x512xf32>
    %c0_60 = arith.constant 0 : index
    %c0_61 = arith.constant 0 : index
    %64 = vector.load %arg22[%c0_60, %c0_61] : memref<512x512xf32, #tpu.memory_space<vmem>>, vector<512x512xf32>
    %cst_62 = arith.constant dense<0.000000e+00> : vector<1x512xf32>
    %65 = tpu.matmul %63, %64, %cst_62 {dimension_numbers = #tpu.dot_dimension_numbers<[1], [0], [0], [1], [0, 0, 1, 1], [], []>} : vector<1x512xf32>, vector<512x512xf32>, vector<1x512xf32> -> vector<1x512xf32>
    %cst_63 = arith.constant 9.99999974E-6 : f32
    %66 = vector.broadcast %cst_63 : f32 to vector<1x512xf32>
    %67 = arith.addf %65, %66 : vector<1x512xf32>
    %68 = math.rsqrt %67 : vector<1x512xf32>
    %69 = vector.broadcast %68 : vector<1x512xf32> to vector<16x512xf32>
    %70 = arith.mulf %61, %69 : vector<16x512xf32>
    %71 = vector.broadcast %55 : vector<1x512xf32> to vector<16x512xf32>
    %72 = arith.mulf %70, %71 : vector<16x512xf32>
    %73 = vector.broadcast %56 : vector<1x512xf32> to vector<16x512xf32>
    %74 = arith.addf %72, %73 : vector<16x512xf32>
    %75 = arith.negf %74 : vector<16x512xf32>
    %76 = math.exp %75 : vector<16x512xf32>
    %cst_64 = arith.constant 1.000000e+00 : f32
    %77 = vector.broadcast %cst_64 : f32 to vector<16x512xf32>
    %78 = arith.addf %77, %76 : vector<16x512xf32>
    %79 = arith.divf %77, %78 : vector<16x512xf32>
    %80 = arith.mulf %74, %79 : vector<16x512xf32>
    %81 = vector.broadcast %36 : vector<1x512xf32> to vector<16x512xf32>
    %82 = arith.mulf %80, %81 : vector<16x512xf32>
    %83 = vector.broadcast %38 : vector<1x512xf32> to vector<16x512xf32>
    %84 = arith.addf %82, %83 : vector<16x512xf32>
    %c0_65 = arith.constant 0 : index
    %c0_66 = arith.constant 0 : index
    %85 = vector.load %arg10[%c0_65, %c0_66] : memref<1x512xf32, #tpu.memory_space<vmem>>, vector<1x512xf32>
    %cst_67 = arith.constant dense<0.000000e+00> : vector<16x512xf32>
    %86 = tpu.matmul %3, %84, %cst_67 {dimension_numbers = #tpu.dot_dimension_numbers<[1], [0], [0], [1], [0, 0, 1, 1], [], []>} : vector<16x16xf32>, vector<16x512xf32>, vector<16x512xf32> -> vector<16x512xf32>
    %cst_68 = arith.constant dense<0.000000e+00> : vector<16x512xf32>
    %87 = tpu.matmul %5, %84, %cst_68 {dimension_numbers = #tpu.dot_dimension_numbers<[1], [0], [0], [1], [0, 0, 1, 1], [], []>} : vector<16x16xf32>, vector<16x512xf32>, vector<16x512xf32> -> vector<16x512xf32>
    %c0_69 = arith.constant 0 : index
    %c0_70 = arith.constant 0 : index
    %c0_71 = arith.constant 0 : index
    %88 = vector.load %arg9[%c0_69, %c0_70, %c0_71] : memref<3x512x512xf32, #tpu.memory_space<vmem>>, vector<1x512x512xf32>
    %89 = vector.shape_cast %88 : vector<1x512x512xf32> to vector<512x512xf32>
    %cst_72 = arith.constant dense<0.000000e+00> : vector<16x512xf32>
    %90 = tpu.matmul %86, %89, %cst_72 {dimension_numbers = #tpu.dot_dimension_numbers<[1], [0], [0], [1], [0, 0, 1, 1], [], []>} : vector<16x512xf32>, vector<512x512xf32>, vector<16x512xf32> -> vector<16x512xf32>
    %c1_73 = arith.constant 1 : index
    %c0_74 = arith.constant 0 : index
    %c0_75 = arith.constant 0 : index
    %91 = vector.load %arg9[%c1_73, %c0_74, %c0_75] : memref<3x512x512xf32, #tpu.memory_space<vmem>>, vector<1x512x512xf32>
    %92 = vector.shape_cast %91 : vector<1x512x512xf32> to vector<512x512xf32>
    %cst_76 = arith.constant dense<0.000000e+00> : vector<16x512xf32>
    %93 = tpu.matmul %84, %92, %cst_76 {dimension_numbers = #tpu.dot_dimension_numbers<[1], [0], [0], [1], [0, 0, 1, 1], [], []>} : vector<16x512xf32>, vector<512x512xf32>, vector<16x512xf32> -> vector<16x512xf32>
    %94 = arith.addf %90, %93 : vector<16x512xf32>
    %c2_77 = arith.constant 2 : index
    %c0_78 = arith.constant 0 : index
    %c0_79 = arith.constant 0 : index
    %95 = vector.load %arg9[%c2_77, %c0_78, %c0_79] : memref<3x512x512xf32, #tpu.memory_space<vmem>>, vector<1x512x512xf32>
    %96 = vector.shape_cast %95 : vector<1x512x512xf32> to vector<512x512xf32>
    %cst_80 = arith.constant dense<0.000000e+00> : vector<16x512xf32>
    %97 = tpu.matmul %87, %96, %cst_80 {dimension_numbers = #tpu.dot_dimension_numbers<[1], [0], [0], [1], [0, 0, 1, 1], [], []>} : vector<16x512xf32>, vector<512x512xf32>, vector<16x512xf32> -> vector<16x512xf32>
    %98 = arith.addf %94, %97 : vector<16x512xf32>
    %99 = vector.broadcast %85 : vector<1x512xf32> to vector<16x512xf32>
    %100 = arith.addf %98, %99 : vector<16x512xf32>
    %c0_81 = arith.constant 0 : index
    %c0_82 = arith.constant 0 : index
    %101 = vector.load %arg11[%c0_81, %c0_82] : memref<1x512xf32, #tpu.memory_space<vmem>>, vector<1x512xf32>
    %c0_83 = arith.constant 0 : index
    %c0_84 = arith.constant 0 : index
    %102 = vector.load %arg12[%c0_83, %c0_84] : memref<1x512xf32, #tpu.memory_space<vmem>>, vector<1x512xf32>
    %cst_85 = arith.constant dense<0.000000e+00> : vector<1x512xf32>
    %103 = tpu.matmul %6, %100, %cst_85 {dimension_numbers = #tpu.dot_dimension_numbers<[1], [0], [0], [1], [0, 0, 1, 1], [], []>} : vector<1x16xf32>, vector<16x512xf32>, vector<1x512xf32> -> vector<1x512xf32>
    %c0_86 = arith.constant 0 : index
    %c0_87 = arith.constant 0 : index
    %104 = vector.load %arg22[%c0_86, %c0_87] : memref<512x512xf32, #tpu.memory_space<vmem>>, vector<512x512xf32>
    %cst_88 = arith.constant dense<0.000000e+00> : vector<1x512xf32>
    %105 = tpu.matmul %103, %104, %cst_88 {dimension_numbers = #tpu.dot_dimension_numbers<[1], [0], [0], [1], [0, 0, 1, 1], [], []>} : vector<1x512xf32>, vector<512x512xf32>, vector<1x512xf32> -> vector<1x512xf32>
    %106 = vector.broadcast %105 : vector<1x512xf32> to vector<16x512xf32>
    %107 = arith.subf %100, %106 : vector<16x512xf32>
    %108 = arith.mulf %107, %107 : vector<16x512xf32>
    %cst_89 = arith.constant dense<0.000000e+00> : vector<1x512xf32>
    %109 = tpu.matmul %6, %108, %cst_89 {dimension_numbers = #tpu.dot_dimension_numbers<[1], [0], [0], [1], [0, 0, 1, 1], [], []>} : vector<1x16xf32>, vector<16x512xf32>, vector<1x512xf32> -> vector<1x512xf32>
    %c0_90 = arith.constant 0 : index
    %c0_91 = arith.constant 0 : index
    %110 = vector.load %arg22[%c0_90, %c0_91] : memref<512x512xf32, #tpu.memory_space<vmem>>, vector<512x512xf32>
    %cst_92 = arith.constant dense<0.000000e+00> : vector<1x512xf32>
    %111 = tpu.matmul %109, %110, %cst_92 {dimension_numbers = #tpu.dot_dimension_numbers<[1], [0], [0], [1], [0, 0, 1, 1], [], []>} : vector<1x512xf32>, vector<512x512xf32>, vector<1x512xf32> -> vector<1x512xf32>
    %cst_93 = arith.constant 9.99999974E-6 : f32
    %112 = vector.broadcast %cst_93 : f32 to vector<1x512xf32>
    %113 = arith.addf %111, %112 : vector<1x512xf32>
    %114 = math.rsqrt %113 : vector<1x512xf32>
    %115 = vector.broadcast %114 : vector<1x512xf32> to vector<16x512xf32>
    %116 = arith.mulf %107, %115 : vector<16x512xf32>
    %117 = vector.broadcast %101 : vector<1x512xf32> to vector<16x512xf32>
    %118 = arith.mulf %116, %117 : vector<16x512xf32>
    %119 = vector.broadcast %102 : vector<1x512xf32> to vector<16x512xf32>
    %120 = arith.addf %118, %119 : vector<16x512xf32>
    %121 = arith.negf %120 : vector<16x512xf32>
    %122 = math.exp %121 : vector<16x512xf32>
    %cst_94 = arith.constant 1.000000e+00 : f32
    %123 = vector.broadcast %cst_94 : f32 to vector<16x512xf32>
    %124 = arith.addf %123, %122 : vector<16x512xf32>
    %125 = arith.divf %123, %124 : vector<16x512xf32>
    %126 = arith.mulf %120, %125 : vector<16x512xf32>
    %c0_95 = arith.constant 0 : index
    %c0_96 = arith.constant 0 : index
    %127 = vector.load %arg13[%c0_95, %c0_96] : memref<64x512xf32, #tpu.memory_space<vmem>>, vector<64x512xf32>
    %cst_97 = arith.constant dense<0.000000e+00> : vector<16x512xf32>
    %128 = tpu.matmul %1, %127, %cst_97 {dimension_numbers = #tpu.dot_dimension_numbers<[1], [0], [0], [1], [0, 0, 1, 1], [], []>} : vector<16x64xf32>, vector<64x512xf32>, vector<16x512xf32> -> vector<16x512xf32>
    %c0_98 = arith.constant 0 : index
    %c0_99 = arith.constant 0 : index
    %129 = vector.load %arg14[%c0_98, %c0_99] : memref<1x512xf32, #tpu.memory_space<vmem>>, vector<1x512xf32>
    %130 = vector.broadcast %129 : vector<1x512xf32> to vector<16x512xf32>
    %131 = arith.addf %128, %130 : vector<16x512xf32>
    %132 = arith.addf %126, %131 : vector<16x512xf32>
    %c0_100 = arith.constant 0 : index
    %c0_101 = arith.constant 0 : index
    %c0_102 = arith.constant 0 : index
    %133 = vector.load %arg23[%c0_100, %c0_101, %c0_102] : memref<1x16x512xf32, #tpu.memory_space<vmem>>, vector<1x16x512xf32>
    %134 = vector.shape_cast %133 : vector<1x16x512xf32> to vector<16x512xf32>
    %135 = vector.shape_cast %132 : vector<16x512xf32> to vector<1x16x512xf32>
    tpu.vector_store %arg23[%c0_100, %c0_101, %c0_102], %135 {strides = array<i32>} : memref<1x16x512xf32, #tpu.memory_space<vmem>>, vector<1x16x512xf32>,
    return
  }
  func.func @transform_0(%arg0: i32) -> (i32, i32, i32) {
    %c0_i32 = arith.constant 0 : i32
    %c0_i32_0 = arith.constant 0 : i32
    %c0_i32_1 = arith.constant 0 : i32
    return %arg0, %c0_i32, %c0_i32_0 : i32, i32, i32
  }
  func.func @transform_1(%arg0: i32) -> (i32, i32, i32) {
    %c0_i32 = arith.constant 0 : i32
    %c0_i32_0 = arith.constant 0 : i32
    %c0_i32_1 = arith.constant 0 : i32
    return %arg0, %c0_i32, %c0_i32_0 : i32, i32, i32
  }
  func.func @transform_2(%arg0: i32) -> (i32, i32, i32) {
    %c0_i32 = arith.constant 0 : i32
    %c0_i32_0 = arith.constant 0 : i32
    %c0_i32_1 = arith.constant 0 : i32
    return %arg0, %c0_i32, %c0_i32_0 : i32, i32, i32
  }
  func.func @transform_3(%arg0: i32) -> (i32, i32, i32) {
    %c0_i32 = arith.constant 0 : i32
    %c0_i32_0 = arith.constant 0 : i32
    %c0_i32_1 = arith.constant 0 : i32
    %c0_i32_2 = arith.constant 0 : i32
    return %c0_i32, %c0_i32_0, %c0_i32_1 : i32, i32, i32
  }
  func.func @transform_4(%arg0: i32) -> (i32, i32, i32) {
    %c0_i32 = arith.constant 0 : i32
    %c0_i32_0 = arith.constant 0 : i32
    %c0_i32_1 = arith.constant 0 : i32
    %c0_i32_2 = arith.constant 0 : i32
    return %c0_i32, %c0_i32_0, %c0_i32_1 : i32, i32, i32
  }
  func.func @transform_5(%arg0: i32) -> (i32, i32) {
    %c0_i32 = arith.constant 0 : i32
    %c0_i32_0 = arith.constant 0 : i32
    %c0_i32_1 = arith.constant 0 : i32
    return %c0_i32, %c0_i32_0 : i32, i32
  }
  func.func @transform_6(%arg0: i32) -> (i32, i32) {
    %c0_i32 = arith.constant 0 : i32
    %c0_i32_0 = arith.constant 0 : i32
    %c0_i32_1 = arith.constant 0 : i32
    return %c0_i32, %c0_i32_0 : i32, i32
  }
  func.func @transform_7(%arg0: i32) -> (i32, i32) {
    %c0_i32 = arith.constant 0 : i32
    %c0_i32_0 = arith.constant 0 : i32
    %c0_i32_1 = arith.constant 0 : i32
    return %c0_i32, %c0_i32_0 : i32, i32
  }
  func.func @transform_8(%arg0: i32) -> (i32, i32, i32) {
    %c0_i32 = arith.constant 0 : i32
    %c0_i32_0 = arith.constant 0 : i32
    %c0_i32_1 = arith.constant 0 : i32
    %c0_i32_2 = arith.constant 0 : i32
    return %c0_i32, %c0_i32_0, %c0_i32_1 : i32, i32, i32
  }
  func.func @transform_9(%arg0: i32) -> (i32, i32) {
    %c0_i32 = arith.constant 0 : i32
    %c0_i32_0 = arith.constant 0 : i32
    %c0_i32_1 = arith.constant 0 : i32
    return %c0_i32, %c0_i32_0 : i32, i32
  }
  func.func @transform_10(%arg0: i32) -> (i32, i32) {
    %c0_i32 = arith.constant 0 : i32
    %c0_i32_0 = arith.constant 0 : i32
    %c0_i32_1 = arith.constant 0 : i32
    return %c0_i32, %c0_i32_0 : i32, i32
  }
  func.func @transform_11(%arg0: i32) -> (i32, i32) {
    %c0_i32 = arith.constant 0 : i32
    %c0_i32_0 = arith.constant 0 : i32
    %c0_i32_1 = arith.constant 0 : i32
    return %c0_i32, %c0_i32_0 : i32, i32
  }
  func.func @transform_12(%arg0: i32) -> (i32, i32) {
    %c0_i32 = arith.constant 0 : i32
    %c0_i32_0 = arith.constant 0 : i32
    %c0_i32_1 = arith.constant 0 : i32
    return %c0_i32, %c0_i32_0 : i32, i32
  }
  func.func @transform_13(%arg0: i32) -> (i32, i32) {
    %c0_i32 = arith.constant 0 : i32
    %c0_i32_0 = arith.constant 0 : i32
    %c0_i32_1 = arith.constant 0 : i32
    return %c0_i32, %c0_i32_0 : i32, i32
  }
  func.func @transform_14(%arg0: i32) -> (i32, i32) {
    %c0_i32 = arith.constant 0 : i32
    %c0_i32_0 = arith.constant 0 : i32
    %c0_i32_1 = arith.constant 0 : i32
    return %c0_i32, %c0_i32_0 : i32, i32
  }
  func.func @transform_15(%arg0: i32) -> (i32, i32) {
    %c0_i32 = arith.constant 0 : i32
    %c0_i32_0 = arith.constant 0 : i32
    %c0_i32_1 = arith.constant 0 : i32
    return %c0_i32, %c0_i32_0 : i32, i32
  }
  func.func @transform_16(%arg0: i32) -> (i32, i32) {
    %c0_i32 = arith.constant 0 : i32
    %c0_i32_0 = arith.constant 0 : i32
    %c0_i32_1 = arith.constant 0 : i32
    return %c0_i32, %c0_i32_0 : i32, i32
  }
  func.func @transform_17(%arg0: i32) -> (i32, i32) {
    %c0_i32 = arith.constant 0 : i32
    %c0_i32_0 = arith.constant 0 : i32
    %c0_i32_1 = arith.constant 0 : i32
    return %c0_i32, %c0_i32_0 : i32, i32
  }
  func.func @transform_18(%arg0: i32) -> (i32, i32) {
    %c0_i32 = arith.constant 0 : i32
    %c0_i32_0 = arith.constant 0 : i32
    %c0_i32_1 = arith.constant 0 : i32
    return %c0_i32, %c0_i32_0 : i32, i32
  }
  func.func @transform_19(%arg0: i32) -> (i32, i32) {
    %c0_i32 = arith.constant 0 : i32
    %c0_i32_0 = arith.constant 0 : i32
    %c0_i32_1 = arith.constant 0 : i32
    return %c0_i32, %c0_i32_0 : i32, i32
  }
  func.func @transform_20(%arg0: i32) -> (i32, i32) {
    %c0_i32 = arith.constant 0 : i32
    %c0_i32_0 = arith.constant 0 : i32
    %c0_i32_1 = arith.constant 0 : i32
    return %c0_i32, %c0_i32_0 : i32, i32
  }
  func.func @transform_21(%arg0: i32) -> (i32, i32) {
    %c0_i32 = arith.constant 0 : i32
    %c0_i32_0 = arith.constant 0 : i32
    %c0_i32_1 = arith.constant 0 : i32
    return %c0_i32, %c0_i32_0 : i32, i32
  }
  func.func @transform_22(%arg0: i32) -> (i32, i32, i32) {
    %c0_i32 = arith.constant 0 : i32
    %c0_i32_0 = arith.constant 0 : i32
    %c0_i32_1 = arith.constant 0 : i32
    return %arg0, %c0_i32, %c0_i32_0 : i32, i32, i32
  }
}

</mosaic_0001>

<bundles_post_ra>
// kernel: residual_block_forward.1
= control target key start
LH: loop header
LB: loop body
LE: loop exit
PB: predicated region body
PF: predicated region fallthrough
CT: control target
= control target key end

     0   :  { %s14816_s0 = inlined_call_operand.vmem [shape: f32[2,16,64], index: 0, kind: input, shape index: {}]   ;;  %s14817_s1 = inlined_call_operand.vmem [shape: f32[2,1,32], index: 1, kind: input, shape index: {}]   ;;  %s14818_s2 = inlined_call_operand.vmem [shape: f32[2,1,32], index: 2, kind: input, shape index: {}]   ;;  %s14819_s3 = inlined_call_operand.vmem [shape: f32[2,16,16], index: 3, kind: input, shape index: {}]   ;;  %s14820_s4 = inlined_call_operand.vmem [shape: f32[3,64,512], index: 4, kind: input, shape index: {}]   ;;  %s14821_s5 = inlined_call_operand.vmem [shape: f32[1,512], index: 5, kind: input, shape index: {}]   ;;  %s14822_s6 = inlined_call_operand.vmem [shape: f32[1,512], index: 6, kind: input, shape index: {}]   ;;  %s14823_s7 = inlined_call_operand.vmem [shape: f32[1,512], index: 7, kind: input, shape index: {}]   ;;  %s14824_s8 = inlined_call_operand.vmem [shape: f32[3,512,512], index: 8, kind: input, shape index: {}]   ;;  %s14825_s9 = inlined_call_operand.vmem [shape: f32[1,512], index: 9, kind: input, shape index: {}]   ;;  %s14826_s10 = inlined_call_operand.vmem [shape: f32[1,512], index: 10, kind: input, shape index: {}]   ;;  %s14827_s11 = inlined_call_operand.vmem [shape: f32[1,512], index: 11, kind: input, shape index: {}]   ;;  %s14828_s12 = inlined_call_operand.vmem [shape: f32[64,512], index: 12, kind: input, shape index: {}]   ;;  %s14829_s13 = inlined_call_operand.vmem [shape: f32[1,512], index: 13, kind: input, shape index: {}]   ;;  %s14830_s14 = inlined_call_operand.vmem [shape: f32[32,32], index: 14, kind: input, shape index: {}]   ;;  %s14831_s15 = inlined_call_operand.vmem [shape: f32[1,32], index: 15, kind: input, shape index: {}]   ;;  %s14832_s16 = inlined_call_operand.vmem [shape: f32[32,32], index: 16, kind: input, shape index: {}]   ;;  %s14833_s17 = inlined_call_operand.vmem [shape: f32[1,32], index: 17, kind: input, shape index: {}]   ;;  %s14834_s18 = inlined_call_operand.vmem [shape: f32[32,32], index: 18, kind: input, shape index: {}]   ;;  %s14835_s19 = inlined_call_operand.vmem [shape: f32[1,32], index: 19, kind: input, shape index: {}]   ;;  %s14836_s20 = inlined_call_operand.vmem [shape: f32[32,512], index: 20, kind: input, shape index: {}]   ;;  %s14837_s21 = inlined_call_operand.vmem [shape: f32[512,512], index: 21, kind: input, shape index: {}]   ;;  %s14838_s22 = inlined_call_operand.vmem [shape: f32[2,16,512], index: 22, kind: output, shape index: {}]  }
   0x1   :  { %15198 = sst [smem:[#allocation219_spill]] %s14816_s0 }
   0x2   :  { %15199 = sst [smem:[#allocation220_spill]] %s14817_s1 }
   0x3   :  { %15200 = sst [smem:[#allocation221_spill]] %s14818_s2 }
   0x4   :  { %15201 = sst [smem:[#allocation222_spill]] %s14819_s3  ;;  %s7482_s3 = smov 0  }
   0x5   :  { %15202 = sst [smem:[#allocation223_spill]] %s14820_s4 }
   0x6   :  { %15203 = sst [smem:[#allocation224_spill]] %s14821_s5 }
   0x7   :  { %15204 = sst [smem:[#allocation225_spill]] %s14822_s6 }
   0x8 LB: > { %s6232_s28 = sadd.s32 4294967295, %s7364_s3   ;;  %p6236_p0 = scmp.ge.s32.totalorder %s7364_s3, 1  ;;  %s7364_s3 = sphi %s7482_s3, %s32_s3  }
   0x9   : > { %p628_p1 = scmp.lt.s32.totalorder %s7364_s3, 3 }
   0xb   : > { %p629_p2 = pnand %p6236_p0, %p628_p1 }
   0xd   : > { %632 = sbr.rel (%p629_p2) target bundleno = 2675 (0xa73), region = 108 }
  0x12   : > { %v773_v0 = vld [vmem:[%s14832_s16 + $0x18] sm:$0xff]  ;;  %v772_v1 = vld [vmem:[%s14832_s16 + $0x10] sm:$0xff]  ;;  %p696_p3 = scmp.lt.s32.totalorder %s6232_s28, 1  ;;  %v771_v2 = vld [vmem:[%s14832_s16 + $0x8] sm:$0xff]  ;;  %s15205_s26 = sld [smem:[#allocation221_spill]]  ;;  %vm745_vm0 = vcmask 261120  }
  0x13   : > { %790 = vmatpush.msra.mxu1 %v773_v0  ;;  %v770_v3 = vld [vmem:[%s14832_s16] sm:$0xff]  ;;  %s15206_s30 = sld [smem:[#allocation220_spill]]  ;;  %v821_v8 = vld [vmem:[%s14834_s18 + $0x18] sm:$0xff]  ;;  %v820_v10 = vld [vmem:[%s14834_s18 + $0x10] sm:$0xff]  ;;  %vm1029_vm9 = vcmask 130048   ;;  %vm1153_vm10 = vcmask 523264  }
  0x14   : > { %s15942_s28 = smov (!%p696_p3, %s6232_s28), 1  ;;  %838 = vmatpush.msra.mxu2 %v821_v8  ;;  %v819_v11 = vld [vmem:[%s14834_s18 + $0x8] sm:$0xff]  ;;  %v774_v12 = vld [vmem:[%s14833_s17] sm:$0x1]  ;;  %v743_v16 = vld [vmem:[%s14830_s14 + $0x18] sm:$0xff]  ;;  %s15207_s5 = sld [smem:[#allocation219_spill]] }
  0x15   : > { %791 = vmatpush.msra.mxu1 %v772_v1  ;;  %v818_v13 = vld [vmem:[%s14834_s18] sm:$0xff]  ;;  %v742_v17 = vld [vmem:[%s14830_s14 + $0x10] sm:$0xff]  ;;  %761 = vmatpush.msra.mxu0 %v743_v16  ;;  %v741_v19 = vld [vmem:[%s14830_s14 + $0x8] sm:$0xff] }
  0x16   : > { %839 = vmatpush.msra.mxu2 %v820_v10  ;;  %v7540_v20 = vld [vmem:[%s14836_s20 + $0x60] sm:$0xff]  ;;  %v7546_v23 = vld [vmem:[%s14836_s20 + $0x70] sm:$0xff]  ;;  %v7551_v24 = vld [vmem:[%s14836_s20 + $0x78] sm:$0xff] }
  0x17   : > { %792 = vmatpush.msra.mxu1 %v771_v2  ;;  %877 = vmatpush.msra.mxu3 %v7540_v20  ;;  %v7556_v25 = vld [vmem:[%s14836_s20 + $0x40] sm:$0xff]  ;;  %v7562_v27 = vld [vmem:[%s14836_s20 + $0x50] sm:$0xff]  ;;  %v857_v31 = vld [vmem:[%s14836_s20 + $0x58] sm:$0xff] }
  0x18   : > { %s706_s2 = scalar_lea.vmem %s15205_s26, %s15942_s28  ;;  %840 = vmatpush.msra.mxu2 %v819_v11  ;;  %762 = vmatpush.msra.mxu0 %v742_v17  ;;  %v740_v28 = vld [vmem:[%s14830_s14] sm:$0xff]  ;;  %v859_v32 = vld [vmem:[%s14836_s20 + $0x68] sm:$0xff]  ;;  %v852_v55 = vld [vmem:[%s14836_s20 + $0x30] sm:$0xff]  ;;  %s15208_s26 = sld [smem:[#allocation223_spill]] }
  0x19   : > { %v769_v4 = vld [vmem:[%s706_s2] sm:$0x1]  ;;  %793 = vmatpush.msra.mxu1 %v770_v3  ;;  %s703_s4 = scalar_lea.vmem %s15206_s30, %s15942_s28  ;;  %878 = vmatpush.msra.mxu3 %v7556_v25  ;;  %v855_v35 = vld [vmem:[%s14836_s20 + $0x48] sm:$0xff]  ;;  %v853_v56 = vld [vmem:[%s14836_s20 + $0x38] sm:$0xff]  ;;  %s6918_s30 = sshll.u32 %s15942_s28, 4 }
  0x1a   : > { %6245 = vmatmul.msk.f32.vlgmr.msra.gmra.mxu1 %vm745_vm0, %v769_v4  ;;  %v719_v5 = vld [vmem:[%s703_s4] sm:$0x1]  ;;  %841 = vmatpush.msra.mxu2 %v818_v13  ;;  %v851_v54 = vld [vmem:[%s14836_s20 + $0x28] sm:$0xff]  ;;  %v848_v59 = vld [vmem:[%s14836_s20 + $0x10] sm:$0xff]  ;;  %s7618_s24 = scalar_lea.vmem %s15207_s5, %s6918_s30  ;;  %s15209_s5 = sld [smem:[#allocation222_spill]] }
  0x1b   : > { %v6243_v6 = vmul.f32 -1.442695, %v719_v5  ;;  %917 = vmatpush.msrb.mxu1 %v7546_v23  ;;  %763 = vmatpush.msra.mxu0 %v741_v19  ;;  %v850_v53 = vld [vmem:[%s14836_s20 + $0x20] sm:$0xff]  ;;  %v847_v58 = vld [vmem:[%s14836_s20 + $0x8] sm:$0xff]  ;;  %v849_v60 = vld [vmem:[%s14836_s20 + $0x18] sm:$0xff]  ;;  %s15218_s2 = sld [smem:[#allocation224_spill]] }
  0x1c   : > { %937 = vmatpush.msrb.mxu2 %v7551_v24  ;;  %879 = vmatpush.msra.mxu3 %v850_v53  ;;  %v846_v57 = vld [vmem:[%s14836_s20] sm:$0xff]  ;;  %v7621_v0 = vld [vmem:[%s7618_s24 + $0x8] sm:$0xff]  ;;  %s15494_s30 = sld [smem:[#allocation225_spill]] }
  0x1d   : > { %6929 = vpow2.f32 %v6243_v6  ;;  %918 = vmatpush.msrb.mxu1 %v7562_v27  ;;  %764 = vmatpush.msra.mxu0 %v740_v28  ;;  %v822_v61 = vld [vmem:[%s14835_s19] sm:$0x1] }
  0x1e   : > { %938 = vmatpush.msrb.mxu2 %v857_v31  ;;  %880 = vmatpush.msra.mxu3 %v846_v57  ;;  %v6288_v1 = vld [vmem:[%s15208_s26 + $0x1e0] sm:$0xff]  ;;  %v6289_v2 = vld [vmem:[%s15208_s26 + $0x1e8] sm:$0xff]  ;;  %v6290_v11 = vld [vmem:[%s15208_s26 + $0x1f0] sm:$0xff] }
  0x1f   : > { %897 = vmatpush.msrb.mxu0 %v859_v32  ;;  %919 = vmatpush.msrb.mxu1 %v852_v55  ;;  %v7632_v3 = vld [vmem:[%s7618_s24] sm:$0xff]  ;;  %v6281_v10 = vld [vmem:[%s15208_s26 + $0x1a8] sm:$0xff]  ;;  %v6287_v16 = vld [vmem:[%s15208_s26 + $0x1d8] sm:$0xff] }
  0x20   : > { %939 = vmatpush.msrb.mxu2 %v853_v56  ;;  %960 = vmatpush.msrb.mxu3 %v7540_v20  ;;  %v744_v4 = vld [vmem:[%s14831_s15] sm:$0x1]  ;;  %v6282_v17 = vld [vmem:[%s15208_s26 + $0x1b0] sm:$0xff]  ;;  %v6275_v28 = vld [vmem:[%s15208_s26 + $0x178] sm:$0xff] }
  0x21   : > { %898 = vmatpush.msrb.mxu0 %v855_v35  ;;  %920 = vmatpush.msrb.mxu1 %v848_v59  ;;  %v6284_v6 = vld [vmem:[%s15208_s26 + $0x1c0] sm:$0xff]  ;;  %v6241_v20 = vld [vmem:[%s15209_s5 + $0x10] sm:$0xff] }
  0x22   : > { %940 = vmatpush.msrb.mxu2 %v849_v60  ;;  %961 = vmatpush.msrb.mxu3 %v7556_v25  ;;  %v6276_v13 = vld [vmem:[%s15208_s26 + $0x180] sm:$0xff] }
  0x23   : > { %v6930_v7 = vpop.eup %6929  ;;  %899 = vmatpush.msrb.mxu0 %v851_v54  ;;  %1000 = vmatpush.msra.mxu1 %v7546_v23  ;;  %v714_v19 = vld [vmem:[%s15209_s5] sm:$0xff]  ;;  %v715_v23 = vld [vmem:[%s15209_s5 + $0x8] sm:$0xff] }
  0x24   : > { %v723_v9 = vadd.f32 1.0, %v6930_v7  ;;  %962 = vmatpush.msrb.mxu3 %v850_v53  ;;  %v6285_v7 = vld [vmem:[%s15208_s26 + $0x1c8] sm:$0xff]  ;;  %v6272_v25 = vld [vmem:[%s15208_s26 + $0x160] sm:$0xff] }
  0x25   : > { %900 = vmatpush.msrb.mxu0 %v847_v58  ;;  %1001 = vmatpush.msra.mxu1 %v7562_v27  ;;  %v6274_v27 = vld [vmem:[%s15208_s26 + $0x170] sm:$0xff]  ;;  %v1104_v53 = vld [vmem:[%s15208_s26 + $0x80] sm:$0xff] }
  0x26   : > { %6931 = vrcp.f32 %v723_v9  ;;  %vm729_vm1 = vweird.f32 %v723_v9  ;;  %v735_v26 = vand.u32 2147483648, %v723_v9  ;;  %v733_v30 = vand.u32 2147483647, %v723_v9  ;;  %963 = vmatpush.msrb.mxu3 %v846_v57  ;;  %v1100_v57 = vld [vmem:[%s15208_s26 + $0x60] sm:$0xff] }
  0x27   : > { %1002 = vmatpush.msra.mxu1 %v852_v55  ;;  %v1106_v55 = vld [vmem:[%s15208_s26 + $0x90] sm:$0xff] }
  0x28   : > { %v736_v34 = vor.u32 1.1754944e-38, %v735_v26  ;;  %vm734_vm4 = vcmp.eq.f32.partialorder %v733_v30, 8.507059e+37  ;;  %v6273_v26 = vld [vmem:[%s15208_s26 + $0x168] sm:$0xff] }
  0x29   : > { %1003 = vmatpush.msra.mxu1 %v848_v59  ;;  %v6269_v30 = vld [vmem:[%s15208_s26 + $0x148] sm:$0xff]  ;;  %v1102_v59 = vld [vmem:[%s15208_s26 + $0x70] sm:$0xff] }
  0x2c   : > { %v6932_v18 = vpop.eup %6931 }
  0x2d   : > { %v725_v22 = vmul.f32 %v6932_v18, %v723_v9  ;;  %vm730_vm2 = vweird.f32 %v6932_v18  ;;  %v6280_v9 = vld [vmem:[%s15208_s26 + $0x1a0] sm:$0xff] }
  0x2e   : > { %vm731_vm3 = vmor %vm729_vm1, %vm730_vm2 }
  0x2f   : > { %v726_v29 = vsub.f32 1.0, %v725_v22  ;;  %v6279_v22 = vld [vmem:[%s15208_s26 + $0x198] sm:$0xff] }
  0x31   : > { %v727_v33 = vmul.f32 %v6932_v18, %v726_v29  ;;  %v6268_v29 = vld [vmem:[%s15208_s26 + $0x140] sm:$0xff] }
  0x33   : > { %v728_v36 = vadd.f32 %v6932_v18, %v727_v33  ;;  %v6264_v33 = vld [vmem:[%s15208_s26 + $0x120] sm:$0xff] }
  0x35   : > { %v732_v38 = vsel %vm731_vm3, %v6932_v18, %v728_v36  ;;  %v6283_v18 = vld [vmem:[%s15208_s26 + $0x1b8] sm:$0xff] }
  0x36   : > { %v737_v40 = vsel %vm734_vm4, %v736_v34, %v732_v38  ;;  %v6265_v34 = vld [vmem:[%s15208_s26 + $0x128] sm:$0xff]  ;;  %v6267_v36 = vld [vmem:[%s15208_s26 + $0x138] sm:$0xff] }
  0x37   : > { %v739_v41 = vmul.f32 %v737_v40, %v719_v5  ;;  %v6261_v38 = vld [vmem:[%s15208_s26 + $0x108] sm:$0xff]  ;;  %v6263_v40 = vld [vmem:[%s15208_s26 + $0x118] sm:$0xff] }
  0x39   : > { %6244 = vmatmul.msk.f32.vlgmr.msra.gmra.mxu0 %vm745_vm0, %v739_v41  ;;  %v1116_v41 = vld [vmem:[%s15208_s26 + $0xe0] sm:$0xff] }
  0x3a   : > { %980 = vmatpush.msra.mxu0 %v859_v32  ;;  %v6271_v32 = vld [vmem:[%s15208_s26 + $0x158] sm:$0xff] }
  0x3c   : > { %981 = vmatpush.msra.mxu0 %v855_v35  ;;  %v6266_v35 = vld [vmem:[%s15208_s26 + $0x130] sm:$0xff] }
  0x3e   : > { %982 = vmatpush.msra.mxu0 %v851_v54  ;;  %v1105_v54 = vld [vmem:[%s15208_s26 + $0x88] sm:$0xff] }
  0x40   : > { %983 = vmatpush.msra.mxu0 %v847_v58  ;;  %v1101_v58 = vld [vmem:[%s15208_s26 + $0x68] sm:$0xff] }
  0x97   : > { %v795_v14 = vpop.f32.mrf.mxu1 }
  0x98   : > { %v796_v15 = vadd.f32 %v795_v14, %v774_v12  ;;  %v6291_v12 = vld [vmem:[%s15208_s26 + $0x1f8] sm:$0xff]  ;;  %v6277_v14 = vld [vmem:[%s15208_s26 + $0x188] sm:$0xff] }
  0x9a   : > { %v6246_v21 = vmul.f32 -1.442695, %v796_v15 }
  0x9c   : > { %6933 = vpow2.f32 %v6246_v21  ;;  %v6278_v21 = vld [vmem:[%s15208_s26 + $0x190] sm:$0xff] }
  0xa2   : > { %v6934_v37 = vpop.eup %6933 }
  0xa3   : > { %v801_v39 = vadd.f32 1.0, %v6934_v37  ;;  %v6260_v37 = vld [vmem:[%s15208_s26 + $0x100] sm:$0xff] }
  0xa5   : > { %6935 = vrcp.f32 %v801_v39  ;;  %v813_v45 = vand.u32 2147483648, %v801_v39  ;;  %v811_v47 = vand.u32 2147483647, %v801_v39  ;;  %vm807_vm6 = vweird.f32 %v801_v39 }
  0xa7   : > { %v814_v49 = vor.u32 1.1754944e-38, %v813_v45  ;;  %vm812_vm8 = vcmp.eq.f32.partialorder %v811_v47, 8.507059e+37  ;;  %v1112_v45 = vld [vmem:[%s15208_s26 + $0xc0] sm:$0xff]  ;;  %v1114_v47 = vld [vmem:[%s15208_s26 + $0xd0] sm:$0xff] }
  0xab   : > { %v6936_v42 = vpop.eup %6935 }
  0xac   : > { %v803_v43 = vmul.f32 %v6936_v42, %v801_v39  ;;  %vm808_vm5 = vweird.f32 %v6936_v42  ;;  %v6262_v39 = vld [vmem:[%s15208_s26 + $0x110] sm:$0xff] }
  0xad   : > { %vm809_vm7 = vmor %vm807_vm6, %vm808_vm5 }
  0xae   : > { %v804_v44 = vsub.f32 1.0, %v803_v43  ;;  %v1118_v43 = vld [vmem:[%s15208_s26 + $0xf0] sm:$0xff] }
  0xb0   : > { %v805_v46 = vmul.f32 %v6936_v42, %v804_v44  ;;  %v1119_v44 = vld [vmem:[%s15208_s26 + $0xf8] sm:$0xff] }
  0xb2   : > { %v806_v48 = vadd.f32 %v6936_v42, %v805_v46  ;;  %v1113_v46 = vld [vmem:[%s15208_s26 + $0xc8] sm:$0xff] }
  0xb4   : > { %v810_v50 = vsel %vm809_vm7, %v6936_v42, %v806_v48  ;;  %v1117_v42 = vld [vmem:[%s15208_s26 + $0xe8] sm:$0xff]  ;;  %v1115_v48 = vld [vmem:[%s15208_s26 + $0xd8] sm:$0xff] }
  0xb5   : > { %v815_v51 = vsel %vm812_vm8, %v814_v49, %v810_v50  ;;  %v1108_v49 = vld [vmem:[%s15208_s26 + $0xa0] sm:$0xff]  ;;  %v1109_v50 = vld [vmem:[%s15208_s26 + $0xa8] sm:$0xff] }
  0xb6   : > { %v817_v52 = vmul.f32 %v815_v51, %v796_v15  ;;  %v766_v5 = vpop.f32.mrf.mxu0  ;;  %v6286_v15 = vld [vmem:[%s15208_s26 + $0x1d0] sm:$0xff] }
  0xb7   : > { %v767_v8 = vadd.f32 %v766_v5, %v744_v4  ;;  %v1110_v51 = vld [vmem:[%s15208_s26 + $0xb0] sm:$0xff]  ;;  %v1095_v4 = vld [vmem:[%s15208_s26 + $0x38] sm:$0xff]  ;;  %v1088_v5 = vld [vmem:[%s15208_s26] sm:$0xff] }
  0xb8   : > { %6247 = vmatmul.msk.f32.vlgmr.msra.gmra.mxu2 %vm745_vm0, %v817_v52  ;;  %v1111_v52 = vld [vmem:[%s15208_s26 + $0xb8] sm:$0xff] }
  0xb9   : > { %1020 = vmatpush.msra.mxu2 %v7551_v24  ;;  %v6242_v24 = vld [vmem:[%s15209_s5 + $0x18] sm:$0xff] }
  0xbb   : > { %1021 = vmatpush.msra.mxu2 %v857_v31  ;;  %v6270_v31 = vld [vmem:[%s15208_s26 + $0x150] sm:$0xff] }
  0xbd   : > { %1022 = vmatpush.msra.mxu2 %v853_v56  ;;  %v1107_v56 = vld [vmem:[%s15208_s26 + $0x98] sm:$0xff] }
  0xbf   : > { %1023 = vmatpush.msra.mxu2 %v849_v60  ;;  %v1103_v60 = vld [vmem:[%s15208_s26 + $0x78] sm:$0xff] }
 0x13b   : > { %v843_v62 = vpop.f32.mrf.mxu2 }
 0x13c   : > { %v844_v63 = vadd.f32 %v843_v62, %v822_v61  ;;  %v1096_v61 = vld [vmem:[%s15208_s26 + $0x40] sm:$0xff]  ;;  %v1097_v62 = vld [vmem:[%s15208_s26 + $0x48] sm:$0xff] }
 0x13e   : > { %6248 = vmatmul.msk.f32.vlgmr.msra.gmra.mxu3 %vm745_vm0, %v844_v63  ;;  %6249 = vmatmul.msk.f32.vlgmr.msrb.gmra.mxu0 %vm745_vm0, %v844_v63 }
 0x13f   : > { %6250 = vmatmul.msk.f32.vlgmr.msrb.gmra.mxu1 %vm745_vm0, %v844_v63  ;;  %6251 = vmatmul.msk.f32.vlgmr.msrb.gmra.mxu2 %vm745_vm0, %v844_v63  ;;  %v1098_v63 = vld [vmem:[%s15208_s26 + $0x50] sm:$0xff] }
 0x140   : > { %1050 = vmatpush.msra.mxu3 %v7621_v0  ;;  %1079 = vmatpush.msrb.mxu0 %v7621_v0 }
 0x141   : > { %1168 = vmatpush.msrb.mxu1 %v6288_v1  ;;  %1191 = vmatpush.msrb.mxu2 %v6289_v2  ;;  %v1099_v1 = vld [vmem:[%s15208_s26 + $0x58] sm:$0xff]  ;;  %v1093_v2 = vld [vmem:[%s15208_s26 + $0x28] sm:$0xff] }
 0x142   : > { %1051 = vmatpush.msra.mxu3 %v7632_v3  ;;  %1080 = vmatpush.msrb.mxu0 %v7632_v3 }
 0x143   : > { %1169 = vmatpush.msrb.mxu1 %v6284_v6  ;;  %1192 = vmatpush.msrb.mxu2 %v6285_v7  ;;  %v1089_v6 = vld [vmem:[%s15208_s26 + $0x8] sm:$0xff]  ;;  %v1090_v7 = vld [vmem:[%s15208_s26 + $0x10] sm:$0xff] }
 0x145   : > { %1170 = vmatpush.msrb.mxu1 %v6280_v9  ;;  %1193 = vmatpush.msrb.mxu2 %v6281_v10  ;;  %v6336_v9 = vld [vmem:[%s15208_s26 + $0x2e0] sm:$0xff]  ;;  %v6337_v10 = vld [vmem:[%s15208_s26 + $0x2e8] sm:$0xff] }
 0x146   : > { %6252 = vmatmul.msk.f32.vlgmr.msrb.gmra.mxu3 %vm745_vm0, %v767_v8  ;;  %6253 = vmatmul.msk.f32.vlgmr.msra.gmra.mxu0 %vm745_vm0, %v767_v8 }
 0x147   : > { %6254 = vmatmul.msk.f32.vlgmr.msra.gmra.mxu1 %vm745_vm0, %v767_v8  ;;  %6255 = vmatmul.msk.f32.vlgmr.msra.gmra.mxu2 %vm745_vm0, %v767_v8  ;;  %v1091_v8 = vld [vmem:[%s15208_s26 + $0x18] sm:$0xff] }
 0x148   : > { %1214 = vmatpush.msrb.mxu3 %v6290_v11  ;;  %1237 = vmatpush.msra.mxu0 %v6291_v12  ;;  %v6338_v11 = vld [vmem:[%s15208_s26 + $0x2f0] sm:$0xff]  ;;  %v6339_v12 = vld [vmem:[%s15208_s26 + $0x2f8] sm:$0xff] }
 0x149   : > { %1171 = vmatpush.msrb.mxu1 %v6276_v13  ;;  %1194 = vmatpush.msrb.mxu2 %v6277_v14  ;;  %v6332_v13 = vld [vmem:[%s15208_s26 + $0x2c0] sm:$0xff]  ;;  %v6333_v14 = vld [vmem:[%s15208_s26 + $0x2c8] sm:$0xff] }
 0x14a   : > { %1215 = vmatpush.msrb.mxu3 %v6286_v15  ;;  %1238 = vmatpush.msra.mxu0 %v6287_v16  ;;  %v6334_v15 = vld [vmem:[%s15208_s26 + $0x2d0] sm:$0xff]  ;;  %v6335_v16 = vld [vmem:[%s15208_s26 + $0x2d8] sm:$0xff] }
 0x14b   : > { %1172 = vmatpush.msrb.mxu1 %v6272_v25  ;;  %1195 = vmatpush.msrb.mxu2 %v6273_v26  ;;  %v6320_v25 = vld [vmem:[%s15208_s26 + $0x260] sm:$0xff]  ;;  %v6321_v26 = vld [vmem:[%s15208_s26 + $0x268] sm:$0xff] }
 0x14c   : > { %1216 = vmatpush.msrb.mxu3 %v6282_v17  ;;  %1239 = vmatpush.msra.mxu0 %v6283_v18  ;;  %v6328_v17 = vld [vmem:[%s15208_s26 + $0x2a0] sm:$0xff]  ;;  %v6329_v18 = vld [vmem:[%s15208_s26 + $0x2a8] sm:$0xff] }
 0x14d   : > { %1173 = vmatpush.msrb.mxu1 %v6268_v29  ;;  %1196 = vmatpush.msrb.mxu2 %v6269_v30  ;;  %v6316_v29 = vld [vmem:[%s15208_s26 + $0x240] sm:$0xff]  ;;  %v6317_v30 = vld [vmem:[%s15208_s26 + $0x248] sm:$0xff] }
 0x14e   : > { %6256 = vmatmul.msk.f32.vlgmr.msra.gmra.mxu3 %vm1029_vm9, %v714_v19  ;;  %6258 = vmatmul.msk.f32.vlgmr.msrb.gmra.mxu0 %vm1029_vm9, %v6241_v20  ;;  %v6330_v19 = vld [vmem:[%s15208_s26 + $0x2b0] sm:$0xff]  ;;  %v6331_v20 = vld [vmem:[%s15208_s26 + $0x2b8] sm:$0xff] }
 0x14f   : > { %1217 = vmatpush.msrb.mxu3 %v6278_v21  ;;  %1240 = vmatpush.msra.mxu0 %v6279_v22  ;;  %v6324_v21 = vld [vmem:[%s15208_s26 + $0x280] sm:$0xff]  ;;  %v6325_v22 = vld [vmem:[%s15208_s26 + $0x288] sm:$0xff] }
 0x150   : > { %1174 = vmatpush.msrb.mxu1 %v6264_v33  ;;  %1197 = vmatpush.msrb.mxu2 %v6265_v34  ;;  %v6312_v34 = vld [vmem:[%s15208_s26 + $0x220] sm:$0xff] }
 0x151   : > { %1218 = vmatpush.msrb.mxu3 %v6274_v27  ;;  %1241 = vmatpush.msra.mxu0 %v6275_v28  ;;  %v6322_v27 = vld [vmem:[%s15208_s26 + $0x270] sm:$0xff]  ;;  %v6323_v28 = vld [vmem:[%s15208_s26 + $0x278] sm:$0xff] }
 0x152   : > { %1175 = vmatpush.msrb.mxu1 %v6260_v37  ;;  %1198 = vmatpush.msrb.mxu2 %v6261_v38  ;;  %v6315_v37 = vld [vmem:[%s15208_s26 + $0x238] sm:$0xff]  ;;  %v6308_v38 = vld [vmem:[%s15208_s26 + $0x200] sm:$0xff] }
 0x153   : > { %1219 = vmatpush.msrb.mxu3 %v6270_v31  ;;  %1242 = vmatpush.msra.mxu0 %v6271_v32  ;;  %v6318_v31 = vld [vmem:[%s15208_s26 + $0x250] sm:$0xff]  ;;  %v6319_v32 = vld [vmem:[%s15208_s26 + $0x258] sm:$0xff] }
 0x154   : > { %6292 = vmatmul.msk.f32.vlgmr.msrb.gmra.mxu1 %vm1153_vm10, %v7632_v3  ;;  %6294 = vmatmul.msk.f32.vlgmr.msrb.gmra.mxu2 %vm1153_vm10, %v7632_v3 }
 0x155   : > { %1220 = vmatpush.msrb.mxu3 %v6266_v35  ;;  %1243 = vmatpush.msra.mxu0 %v6267_v36  ;;  %v6313_v35 = vld [vmem:[%s15208_s26 + $0x228] sm:$0xff]  ;;  %v6314_v36 = vld [vmem:[%s15208_s26 + $0x230] sm:$0xff] }
 0x156   : > { %6257 = vmatmul.msk.f32.gmra.mxu3 %vm1029_vm9, %v715_v23  ;;  %6259 = vmatmul.msk.f32.gmra.mxu0 %vm1029_vm9, %v6242_v24  ;;  %v6326_v23 = vld [vmem:[%s15208_s26 + $0x290] sm:$0xff]  ;;  %v6327_v24 = vld [vmem:[%s15208_s26 + $0x298] sm:$0xff] }
 0x157   : > { %1221 = vmatpush.msrb.mxu3 %v6262_v39  ;;  %1244 = vmatpush.msra.mxu0 %v6263_v40  ;;  %v6309_v39 = vld [vmem:[%s15208_s26 + $0x208] sm:$0xff]  ;;  %v6310_v40 = vld [vmem:[%s15208_s26 + $0x210] sm:$0xff] }
 0x158   : > { %1266 = vmatpush.msra.mxu1 %v1116_v41  ;;  %1289 = vmatpush.msra.mxu2 %v1117_v42  ;;  %v6311_v41 = vld [vmem:[%s15208_s26 + $0x218] sm:$0xff] }
 0x159   : > { %1312 = vmatpush.msra.mxu3 %v1118_v43  ;;  %1335 = vmatpush.msrb.mxu0 %v1119_v44 }
 0x15a   : > { %1267 = vmatpush.msra.mxu1 %v1112_v45  ;;  %1290 = vmatpush.msra.mxu2 %v1113_v46 }
 0x15b   : > { %1313 = vmatpush.msra.mxu3 %v1114_v47  ;;  %1336 = vmatpush.msrb.mxu0 %v1115_v48 }
 0x15c   : > { %1268 = vmatpush.msra.mxu1 %v1108_v49  ;;  %1291 = vmatpush.msra.mxu2 %v1109_v50 }
 0x15d   : > { %1314 = vmatpush.msra.mxu3 %v1110_v51  ;;  %1337 = vmatpush.msrb.mxu0 %v1111_v52 }
 0x15e   : > { %6296 = vmatmul.msk.f32.vlgmr.msrb.gmra.mxu3 %vm1153_vm10, %v7632_v3  ;;  %6298 = vmatmul.msk.f32.vlgmr.msra.gmra.mxu0 %vm1153_vm10, %v7632_v3  ;;  %v1094_v3 = vld [vmem:[%s15208_s26 + $0x30] sm:$0xff] }
 0x15f   : > { %1269 = vmatpush.msra.mxu1 %v1104_v53  ;;  %1292 = vmatpush.msra.mxu2 %v1105_v54 }
 0x160   : > { %1315 = vmatpush.msra.mxu3 %v1106_v55  ;;  %1338 = vmatpush.msrb.mxu0 %v1107_v56 }
 0x161   : > { %6293 = vmatmul.msk.f32.gmra.mxu1 %vm1153_vm10, %v7621_v0  ;;  %6295 = vmatmul.msk.f32.gmra.mxu2 %vm1153_vm10, %v7621_v0 }
 0x162   : > { %1270 = vmatpush.msra.mxu1 %v1100_v57  ;;  %1293 = vmatpush.msra.mxu2 %v1101_v58 }
 0x163   : > { %1316 = vmatpush.msra.mxu3 %v1102_v59  ;;  %1339 = vmatpush.msrb.mxu0 %v1103_v60 }
 0x164   : > { %1271 = vmatpush.msra.mxu1 %v1096_v61  ;;  %1294 = vmatpush.msra.mxu2 %v1097_v62 }
 0x165   : > { %1317 = vmatpush.msra.mxu3 %v1098_v63  ;;  %1340 = vmatpush.msrb.mxu0 %v1099_v1 }
 0x166   : > { %6297 = vmatmul.msk.f32.gmra.mxu3 %vm1153_vm10, %v7621_v0  ;;  %6299 = vmatmul.msk.f32.gmra.mxu0 %vm1153_vm10, %v7621_v0  ;;  %v1092_v0 = vld [vmem:[%s15208_s26 + $0x20] sm:$0xff] }
 0x167   : > { %1272 = vmatpush.msra.mxu1 %v1092_v0  ;;  %1295 = vmatpush.msra.mxu2 %v1093_v2 }
 0x168   : > { %1318 = vmatpush.msra.mxu3 %v1094_v3  ;;  %1341 = vmatpush.msrb.mxu0 %v1095_v4 }
 0x169   : > { %1273 = vmatpush.msra.mxu1 %v1088_v5  ;;  %1296 = vmatpush.msra.mxu2 %v1089_v6 }
 0x16a   : > { %1319 = vmatpush.msra.mxu3 %v1090_v7  ;;  %1342 = vmatpush.msrb.mxu0 %v1091_v8  ;;  %v1028_v7 = vld [vmem:[%s15218_s2] sm:$0xf]  ;;  %s6919_s2 = sshll.u32 %s15942_s28, 6 }
 0x16b   : > { %1397 = vmatpush.msrb.mxu1 %v6336_v9  ;;  %1420 = vmatpush.msrb.mxu2 %v6337_v10  ;;  %s14767_s29 = scalar_lea.vmem %s14838_s22, %s6919_s2 }
 0x16c   : > { %1443 = vmatpush.msrb.mxu3 %v6338_v11  ;;  %1466 = vmatpush.msra.mxu0 %v6339_v12 }
 0x16d   : > { %1398 = vmatpush.msrb.mxu1 %v6332_v13  ;;  %1421 = vmatpush.msrb.mxu2 %v6333_v14 }
 0x16e   : > { %1444 = vmatpush.msrb.mxu3 %v6334_v15  ;;  %1467 = vmatpush.msra.mxu0 %v6335_v16  ;;  %v1490_v16 = vperm.slane %v1028_v7, 0 }
 0x16f   : > { %1399 = vmatpush.msrb.mxu1 %v6328_v17  ;;  %1422 = vmatpush.msrb.mxu2 %v6329_v18 }
 0x170   : > { %1445 = vmatpush.msrb.mxu3 %v6330_v19  ;;  %1468 = vmatpush.msra.mxu0 %v6331_v20  ;;  %v1493_v20 = vperm.slane %v1028_v7, 3 }
 0x171   : > { %1400 = vmatpush.msrb.mxu1 %v6324_v21  ;;  %1423 = vmatpush.msrb.mxu2 %v6325_v22 }
 0x172   : > { %1446 = vmatpush.msrb.mxu3 %v6326_v23  ;;  %1469 = vmatpush.msra.mxu0 %v6327_v24 }
 0x173   : > { %1401 = vmatpush.msrb.mxu1 %v6320_v25  ;;  %1424 = vmatpush.msrb.mxu2 %v6321_v26 }
 0x174   : > { %1447 = vmatpush.msrb.mxu3 %v6322_v27  ;;  %1470 = vmatpush.msra.mxu0 %v6323_v28 }
 0x175   : > { %1402 = vmatpush.msrb.mxu1 %v6316_v29  ;;  %1425 = vmatpush.msrb.mxu2 %v6317_v30 }
 0x176   : > { %1448 = vmatpush.msrb.mxu3 %v6318_v31  ;;  %1471 = vmatpush.msra.mxu0 %v6319_v32  ;;  %v1651_v31 = vld [vmem:[%s14837_s21 + $0x1e0] sm:$0xff] }
 0x177   : > { %1403 = vmatpush.msrb.mxu1 %v6312_v34  ;;  %1426 = vmatpush.msrb.mxu2 %v6313_v35  ;;  %v1491_v34 = vperm.slane %v1028_v7, 1 }
 0x178   : > { %1449 = vmatpush.msrb.mxu3 %v6314_v36  ;;  %1472 = vmatpush.msra.mxu0 %v6315_v37  ;;  %v1843_v37 = vld [vmem:[%s14837_s21 + $0x7e0] sm:$0xff] }
 0x179   : > { %1404 = vmatpush.msrb.mxu1 %v6308_v38  ;;  %1427 = vmatpush.msrb.mxu2 %v6309_v39  ;;  %v1492_v39 = vperm.slane %v1028_v7, 2  ;;  %v1819_v7 = vld [vmem:[%s14837_s21 + $0x720] sm:$0xff] }
 0x17a   : > { %1450 = vmatpush.msrb.mxu3 %v6310_v40  ;;  %1473 = vmatpush.msra.mxu0 %v6311_v41  ;;  %v14841_v41 = vmov 1.0  }
 0x1bb   : > { %v7965_v43 = vpop.f32.mrf.mxu0 }
 0x1bc   : > { %15212 = vst [vmem:[#allocation4_spill] sm:$0xff] %v7965_v43  ;;  %v7985_v49 = vpop.f32.mrf.mxu1  ;;  %v8556_v43 = vld [vmem:[%s14837_s21 + $0x248] sm:$0xff] }
 0x1bd   : > { %15214 = vst [vmem:[#allocation6_spill] sm:$0xff] %v7985_v49  ;;  %v8544_v49 = vld [vmem:[%s14837_s21 + $0x268] sm:$0xff] }
 0x1c1   : > { %v7937_v33 = vpop.f32.mrf.mxu3 }
 0x1c2   : > { %15210 = vst [vmem:[#allocation2_spill] sm:$0xff] %v7937_v33  ;;  %v7987_v50 = vpop.f32.mrf.mxu2  ;;  %v8568_v33 = vld [vmem:[%s14837_s21 + $0x228] sm:$0xff] }
 0x1c3   : > { %v7971_v45 = vpop.f32.mrf.mxu0  ;;  %15215 = vst [vmem:[#allocation7_spill] sm:$0xff] %v7987_v50  ;;  %v8532_v50 = vld [vmem:[%s14837_s21 + $0x288] sm:$0xff] }
 0x1c4   : > { %15213 = vst [vmem:[#allocation5_spill] sm:$0xff] %v7971_v45  ;;  %v7989_v51 = vpop.f32.mrf.mxu1  ;;  %v8549_v45 = vld [vmem:[%s14837_s21 + $0x468] sm:$0xff] }
 0x1c5   : > { %15216 = vst [vmem:[#allocation8_spill] sm:$0xff] %v7989_v51  ;;  %v8537_v51 = vld [vmem:[%s14837_s21 + $0x488] sm:$0xff] }
 0x1c6   : > { %15231 = vst [vmem:[#allocation22_spill] sm:$0xff] %v8537_v51 }
 0x1c7   : > { %15232 = vst [vmem:[#allocation23_spill] sm:$0xff] %v8549_v45 }
 0x1c8   : > { %15234 = vst [vmem:[#allocation25_spill] sm:$0xff] %v8568_v33 }
 0x1c9   : > { %v7963_v42 = vpop.f32.mrf.mxu3 }
 0x1ca   : > { %15211 = vst [vmem:[#allocation3_spill] sm:$0xff] %v7963_v42  ;;  %v7991_v52 = vpop.f32.mrf.mxu2  ;;  %v8561_v42 = vld [vmem:[%s14837_s21 + $0x448] sm:$0xff] }
 0x1cb   : > { %v1082_v47 = vpop.f32.mrf.mxu0  ;;  %15217 = vst [vmem:[#allocation9_spill] sm:$0xff] %v7991_v52  ;;  %v8525_v52 = vld [vmem:[%s14837_s21 + $0x4a8] sm:$0xff] }
 0x1cc   : > { %15230 = vst [vmem:[#allocation21_spill] sm:$0xff] %v8525_v52 }
 0x1cd   : > { %15233 = vst [vmem:[#allocation24_spill] sm:$0xff] %v8561_v42 }
 0x1d1   : > { %v1053_v44 = vpop.f32.mrf.mxu3  ;;  %v1177_v53 = vpop.f32.mrf.mxu1 }
 0x1d2   : > { %6300 = vmatmul.msk.f32.vlgmr.msra.gmra.mxu1 %vm1153_vm10, %v1053_v44  ;;  %6302 = vmatmul.msk.f32.vlgmr.msra.gmra.mxu2 %vm1153_vm10, %v1053_v44 }
 0x1d3   : > { %6304 = vmatmul.msk.f32.vlgmr.msra.gmra.mxu3 %vm1153_vm10, %v1053_v44  ;;  %6306 = vmatmul.msk.f32.vlgmr.msrb.gmra.mxu0 %vm1153_vm10, %v1053_v44  ;;  %v1085_v48 = vpop.f32.mrf.mxu0  ;;  %v1647_v44 = vld [vmem:[%s14837_s21 + $0x1c0] sm:$0xff] }
 0x1d7   : > { %v1200_v55 = vpop.f32.mrf.mxu2 }
 0x1d9   : > { %v1056_v46 = vpop.f32.mrf.mxu3 }
 0x1da   : > { %6301 = vmatmul.msk.f32.gmra.mxu1 %vm1153_vm10, %v1056_v46  ;;  %6303 = vmatmul.msk.f32.gmra.mxu2 %vm1153_vm10, %v1056_v46 }
 0x1db   : > { %6305 = vmatmul.msk.f32.gmra.mxu3 %vm1153_vm10, %v1056_v46  ;;  %6307 = vmatmul.msk.f32.gmra.mxu0 %vm1153_vm10, %v1056_v46  ;;  %v1246_v54 = vpop.f32.mrf.mxu0 }
 0x1de   : > { %v1180_v57 = vpop.f32.mrf.mxu1 }
 0x1e1   : > { %v1223_v56 = vpop.f32.mrf.mxu3 }
 0x1e2   : > { %6340 = vmatmul.msk.f32.vlgmr.msrb.gmra.mxu1 %vm1153_vm10, %v1082_v47  ;;  %6342 = vmatmul.msk.f32.vlgmr.msrb.gmra.mxu2 %vm1153_vm10, %v1082_v47 }
 0x1e3   : > { %6344 = vmatmul.msk.f32.vlgmr.msrb.gmra.mxu3 %vm1153_vm10, %v1082_v47  ;;  %6346 = vmatmul.msk.f32.vlgmr.msra.gmra.mxu0 %vm1153_vm10, %v1082_v47  ;;  %v1249_v58 = vpop.f32.mrf.mxu0  ;;  %v1839_v47 = vld [vmem:[%s14837_s21 + $0x7c0] sm:$0xff] }
 0x1e4   : > { %v1203_v59 = vpop.f32.mrf.mxu2 }
 0x1e9   : > { %v1226_v60 = vpop.f32.mrf.mxu3 }
 0x1ea   : > { %6341 = vmatmul.msk.f32.gmra.mxu1 %vm1153_vm10, %v1085_v48  ;;  %6343 = vmatmul.msk.f32.gmra.mxu2 %vm1153_vm10, %v1085_v48 }
 0x1eb   : > { %6345 = vmatmul.msk.f32.gmra.mxu3 %vm1153_vm10, %v1085_v48  ;;  %6347 = vmatmul.msk.f32.gmra.mxu0 %vm1153_vm10, %v1085_v48 }
 0x24f   : > { %v1275_v61 = vpop.f32.mrf.mxu1 }
 0x250   : > { %v1344_v62 = vpop.f32.mrf.mxu0  ;;  %v1276_v9 = vadd.f32 %v1275_v61, %v1177_v53  ;;  %v1643_v53 = vld [vmem:[%s14837_s21 + $0x1a0] sm:$0xff] }
 0x251   : > { %v1345_v12 = vadd.f32 %v1344_v62, %v1246_v54  ;;  %v1635_v61 = vld [vmem:[%s14837_s21 + $0x160] sm:$0xff] }
 0x252   : > { %v1711_v62 = vld [vmem:[%s14837_s21 + $0x3c0] sm:$0xff] }
 0x255   : > { %v1298_v63 = vpop.f32.mrf.mxu2 }
 0x256   : > { %v1321_v1 = vpop.f32.mrf.mxu3  ;;  %v1299_v24 = vadd.f32 %v1298_v63, %v1200_v55  ;;  %v1827_v63 = vld [vmem:[%s14837_s21 + $0x760] sm:$0xff] }
 0x257   : > { %v1278_v0 = vpop.f32.mrf.mxu1  ;;  %v1322_v27 = vadd.f32 %v1321_v1, %v1223_v56  ;;  %v1835_v56 = vld [vmem:[%s14837_s21 + $0x7a0] sm:$0xff] }
 0x258   : > { %v1347_v2 = vpop.f32.mrf.mxu0  ;;  %v1279_v10 = vadd.f32 %v1278_v0, %v1180_v57  ;;  %v1639_v57 = vld [vmem:[%s14837_s21 + $0x180] sm:$0xff] }
 0x259   : > { %v1348_v13 = vadd.f32 %v1347_v2, %v1249_v58  ;;  %v1715_v58 = vld [vmem:[%s14837_s21 + $0x3e0] sm:$0xff] }
 0x25a   : > { %v1775_v1 = vld [vmem:[%s14837_s21 + $0x5c0] sm:$0xff] }
 0x25b   : > { %v1631_v0 = vld [vmem:[%s14837_s21 + $0x140] sm:$0xff] }
 0x25c   : > { %v1707_v2 = vld [vmem:[%s14837_s21 + $0x3a0] sm:$0xff] }
 0x25d   : > { %v1301_v3 = vpop.f32.mrf.mxu2 }
 0x25e   : > { %v1324_v4 = vpop.f32.mrf.mxu3  ;;  %v1302_v25 = vadd.f32 %v1301_v3, %v1203_v59  ;;  %v1831_v59 = vld [vmem:[%s14837_s21 + $0x780] sm:$0xff] }
 0x25f   : > { %v1406_v5 = vpop.f32.mrf.mxu1  ;;  %v1325_v28 = vadd.f32 %v1324_v4, %v1226_v60  ;;  %v1779_v60 = vld [vmem:[%s14837_s21 + $0x5e0] sm:$0xff] }
 0x260   : > { %v1475_v6 = vpop.f32.mrf.mxu0  ;;  %v1481_v15 = vadd.f32 %v1406_v5, %v1276_v9  ;;  %v1823_v3 = vld [vmem:[%s14837_s21 + $0x740] sm:$0xff] }
 0x261   : > { %v1484_v19 = vadd.f32 %v1475_v6, %v1345_v12  ;;  %v1771_v4 = vld [vmem:[%s14837_s21 + $0x5a0] sm:$0xff] }
 0x262   : > { %v8000_v26 = vadd.f32 %v1490_v16, %v1481_v15  ;;  %v1627_v5 = vld [vmem:[%s14837_s21 + $0x120] sm:$0xff] }
 0x263   : > { %v8003_v29 = vadd.f32 %v1493_v20, %v1484_v19  ;;  %v1703_v6 = vld [vmem:[%s14837_s21 + $0x380] sm:$0xff] }
 0x264   : > { %v1623_v9 = vld [vmem:[%s14837_s21 + $0x100] sm:$0xff] }
 0x265   : > { %v1429_v8 = vpop.f32.mrf.mxu2  ;;  %v1763_v12 = vld [vmem:[%s14837_s21 + $0x560] sm:$0xff] }
 0x266   : > { %v1452_v11 = vpop.f32.mrf.mxu3  ;;  %v1482_v32 = vadd.f32 %v1429_v8, %v1299_v24  ;;  %v1767_v8 = vld [vmem:[%s14837_s21 + $0x580] sm:$0xff] }
 0x267   : > { %v1409_v14 = vpop.f32.mrf.mxu1  ;;  %v1483_v38 = vadd.f32 %v1452_v11, %v1322_v27  ;;  %v1815_v11 = vld [vmem:[%s14837_s21 + $0x700] sm:$0xff] }
 0x268   : > { %v1485_v17 = vadd.f32 %v1409_v14, %v1279_v10  ;;  %v1478_v18 = vpop.f32.mrf.mxu0  ;;  %v8031_v54 = vadd.f32 %v1491_v34, %v1482_v32  ;;  %v1699_v10 = vld [vmem:[%s14837_s21 + $0x360] sm:$0xff] }
 0x269   : > { %v1488_v21 = vadd.f32 %v1478_v18, %v1348_v13  ;;  %v8034_v55 = vadd.f32 %v1492_v39, %v1483_v38  ;;  %v1619_v13 = vld [vmem:[%s14837_s21 + $0xe0] sm:$0xff] }
 0x26a   : > { %v7996_v22 = vadd.f32 %v1490_v16, %v1485_v17  ;;  %v1695_v14 = vld [vmem:[%s14837_s21 + $0x340] sm:$0xff] }
 0x26b   : > { %v7998_v23 = vadd.f32 %v1493_v20, %v1488_v21  ;;  %v1811_v15 = vld [vmem:[%s14837_s21 + $0x6e0] sm:$0xff] }
 0x26c   : > { %1525 = vmatpush.msra.mxu1 %v7996_v22  ;;  %v1759_v16 = vld [vmem:[%s14837_s21 + $0x540] sm:$0xff] }
 0x26d   : > { %1585 = vmatpush.msrb.mxu0 %v7998_v23  ;;  %v1432_v30 = vpop.f32.mrf.mxu2  ;;  %v1615_v17 = vld [vmem:[%s14837_s21 + $0xc0] sm:$0xff] }
 0x26e   : > { %v1486_v35 = vadd.f32 %v1432_v30, %v1302_v25  ;;  %v1455_v36 = vpop.f32.mrf.mxu3  ;;  %1526 = vmatpush.msra.mxu1 %v8000_v26  ;;  %v1691_v18 = vld [vmem:[%s14837_s21 + $0x320] sm:$0xff] }
 0x26f   : > { %v1487_v40 = vadd.f32 %v1455_v36, %v1325_v28  ;;  %1586 = vmatpush.msrb.mxu0 %v8003_v29  ;;  %6348 = vmatmul.msk.f32.vlgmr.msra.gmra.mxu1 %vm1029_vm9, %v14841_v41  ;;  %v1807_v19 = vld [vmem:[%s14837_s21 + $0x6c0] sm:$0xff] }
 0x270   : > { %v8019_v46 = vadd.f32 %v1491_v34, %v1486_v35  ;;  %6351 = vmatmul.msk.f32.vlgmr.msrb.gmra.mxu0 %vm1029_vm9, %v14841_v41  ;;  %1847 = vmatpush.msrb.mxu1 %v1651_v31  ;;  %v1755_v20 = vld [vmem:[%s14837_s21 + $0x520] sm:$0xff] }
 0x271   : > { %v8026_v48 = vadd.f32 %v1492_v39, %v1487_v40  ;;  %1907 = vmatpush.msra.mxu0 %v1843_v37  ;;  %v1611_v21 = vld [vmem:[%s14837_s21 + $0xa0] sm:$0xff] }
 0x272   : > { %1545 = vmatpush.msra.mxu2 %v8019_v46  ;;  %1848 = vmatpush.msrb.mxu1 %v1647_v44  ;;  %v1687_v24 = vld [vmem:[%s14837_s21 + $0x300] sm:$0xff] }
 0x273   : > { %1565 = vmatpush.msra.mxu3 %v8026_v48  ;;  %1908 = vmatpush.msra.mxu0 %v1839_v47  ;;  %v1803_v25 = vld [vmem:[%s14837_s21 + $0x6a0] sm:$0xff] }
 0x274   : > { %1546 = vmatpush.msra.mxu2 %v8031_v54  ;;  %1849 = vmatpush.msrb.mxu1 %v1643_v53  ;;  %v1751_v27 = vld [vmem:[%s14837_s21 + $0x500] sm:$0xff] }
 0x275   : > { %1566 = vmatpush.msra.mxu3 %v8034_v55  ;;  %6349 = vmatmul.msk.f32.vlgmr.msra.gmra.mxu2 %vm1029_vm9, %v14841_v41  ;;  %v1607_v28 = vld [vmem:[%s14837_s21 + $0x80] sm:$0xff] }
 0x276   : > { %6350 = vmatmul.msk.f32.vlgmr.msra.gmra.mxu3 %vm1029_vm9, %v14841_v41  ;;  %1909 = vmatpush.msra.mxu0 %v1835_v56  ;;  %v1683_v30 = vld [vmem:[%s14837_s21 + $0x2e0] sm:$0xff]  ;;  %v8520_v41 = vld [vmem:[%s14837_s21 + $0x2a8] sm:$0xff] }
 0x277   : > { %1850 = vmatpush.msrb.mxu1 %v1639_v57  ;;  %1867 = vmatpush.msrb.mxu2 %v1715_v58  ;;  %v1799_v31 = vld [vmem:[%s14837_s21 + $0x680] sm:$0xff] }
 0x278   : > { %1910 = vmatpush.msra.mxu0 %v1831_v59  ;;  %1887 = vmatpush.msrb.mxu3 %v1779_v60  ;;  %v1747_v32 = vld [vmem:[%s14837_s21 + $0x4e0] sm:$0xff] }
 0x279   : > { %1851 = vmatpush.msrb.mxu1 %v1635_v61  ;;  %1868 = vmatpush.msrb.mxu2 %v1711_v62  ;;  %v8157_v34 = vld [vmem:[%s14837_s21 + $0x60] sm:$0xff]  ;;  %v8220_v61 = vld [vmem:[%s14837_s21 + $0x1e8] sm:$0xff] }
 0x27a   : > { %1911 = vmatpush.msra.mxu0 %v1827_v63  ;;  %1888 = vmatpush.msrb.mxu3 %v1775_v1  ;;  %v1679_v35 = vld [vmem:[%s14837_s21 + $0x2c0] sm:$0xff]  ;;  %v1844_v62 = vld [vmem:[%s14837_s21 + $0x7e8] sm:$0xff] }
 0x27b   : > { %1852 = vmatpush.msrb.mxu1 %v1631_v0  ;;  %1869 = vmatpush.msrb.mxu2 %v1707_v2  ;;  %v1795_v36 = vld [vmem:[%s14837_s21 + $0x660] sm:$0xff]  ;;  %v8233_v1 = vld [vmem:[%s14837_s21 + $0x1c8] sm:$0xff] }
 0x27c   : > { %1912 = vmatpush.msra.mxu0 %v1823_v3  ;;  %1889 = vmatpush.msrb.mxu3 %v1771_v4  ;;  %v1743_v37 = vld [vmem:[%s14837_s21 + $0x4c0] sm:$0xff]  ;;  %v1840_v2 = vld [vmem:[%s14837_s21 + $0x7c8] sm:$0xff] }
 0x27d   : > { %1853 = vmatpush.msrb.mxu1 %v1627_v5  ;;  %1870 = vmatpush.msrb.mxu2 %v1703_v6  ;;  %v8171_v38 = vld [vmem:[%s14837_s21 + $0x40] sm:$0xff]  ;;  %v8251_v4 = vld [vmem:[%s14837_s21 + $0x1a8] sm:$0xff] }
 0x27e   : > { %1913 = vmatpush.msra.mxu0 %v1819_v7  ;;  %1890 = vmatpush.msrb.mxu3 %v1767_v8  ;;  %v8176_v39 = vld [vmem:[%s14837_s21 + $0x2a0] sm:$0xff]  ;;  %v1836_v6 = vld [vmem:[%s14837_s21 + $0x7a8] sm:$0xff] }
 0x27f   : > { %1854 = vmatpush.msrb.mxu1 %v1623_v9  ;;  %1871 = vmatpush.msrb.mxu2 %v1699_v10  ;;  %v1791_v40 = vld [vmem:[%s14837_s21 + $0x640] sm:$0xff]  ;;  %v8269_v8 = vld [vmem:[%s14837_s21 + $0x188] sm:$0xff] }
 0x280   : > { %1914 = vmatpush.msra.mxu0 %v1815_v11  ;;  %1891 = vmatpush.msrb.mxu3 %v1763_v12  ;;  %v1739_v44 = vld [vmem:[%s14837_s21 + $0x4a0] sm:$0xff]  ;;  %v1832_v10 = vld [vmem:[%s14837_s21 + $0x788] sm:$0xff] }
 0x281   : > { %1855 = vmatpush.msrb.mxu1 %v1619_v13  ;;  %1872 = vmatpush.msrb.mxu2 %v1695_v14  ;;  %v8188_v47 = vld [vmem:[%s14837_s21 + $0x20] sm:$0xff]  ;;  %v8287_v12 = vld [vmem:[%s14837_s21 + $0x168] sm:$0xff] }
 0x282   : > { %1915 = vmatpush.msra.mxu0 %v1811_v15  ;;  %1892 = vmatpush.msrb.mxu3 %v1759_v16  ;;  %v8193_v53 = vld [vmem:[%s14837_s21 + $0x280] sm:$0xff]  ;;  %v8292_v13 = vld [vmem:[%s14837_s21 + $0x3e8] sm:$0xff] }
 0x283   : > { %1856 = vmatpush.msrb.mxu1 %v1615_v17  ;;  %1873 = vmatpush.msrb.mxu2 %v1691_v18  ;;  %v1787_v56 = vld [vmem:[%s14837_s21 + $0x620] sm:$0xff]  ;;  %v1828_v14 = vld [vmem:[%s14837_s21 + $0x768] sm:$0xff] }
 0x284   : > { %1916 = vmatpush.msra.mxu0 %v1807_v19  ;;  %1893 = vmatpush.msrb.mxu3 %v1755_v20  ;;  %v1735_v57 = vld [vmem:[%s14837_s21 + $0x480] sm:$0xff]  ;;  %v1780_v15 = vld [vmem:[%s14837_s21 + $0x5e8] sm:$0xff] }
 0x285   : > { %1857 = vmatpush.msrb.mxu1 %v1611_v21  ;;  %1874 = vmatpush.msrb.mxu2 %v1687_v24  ;;  %v8206_v58 = vld [vmem:[%s14837_s21] sm:$0xff]  ;;  %v8305_v16 = vld [vmem:[%s14837_s21 + $0x148] sm:$0xff] }
 0x286   : > { %1917 = vmatpush.msra.mxu0 %v1803_v25  ;;  %1894 = vmatpush.msrb.mxu3 %v1751_v27  ;;  %v8211_v59 = vld [vmem:[%s14837_s21 + $0x260] sm:$0xff]  ;;  %v8310_v17 = vld [vmem:[%s14837_s21 + $0x3c8] sm:$0xff] }
 0x287   : > { %1858 = vmatpush.msrb.mxu1 %v1607_v28  ;;  %1875 = vmatpush.msrb.mxu2 %v1683_v30  ;;  %v1783_v60 = vld [vmem:[%s14837_s21 + $0x600] sm:$0xff]  ;;  %v1824_v18 = vld [vmem:[%s14837_s21 + $0x748] sm:$0xff] }
 0x288   : > { %1918 = vmatpush.msra.mxu0 %v1799_v31  ;;  %1895 = vmatpush.msrb.mxu3 %v1747_v32  ;;  %v1731_v63 = vld [vmem:[%s14837_s21 + $0x460] sm:$0xff]  ;;  %v1776_v19 = vld [vmem:[%s14837_s21 + $0x5c8] sm:$0xff] }
 0x289   : > { %1859 = vmatpush.msrb.mxu1 %v8157_v34  ;;  %1876 = vmatpush.msrb.mxu2 %v1679_v35  ;;  %v8239_v0 = vld [vmem:[%s14837_s21 + $0x240] sm:$0xff]  ;;  %v8323_v20 = vld [vmem:[%s14837_s21 + $0x128] sm:$0xff] }
 0x28a   : > { %1919 = vmatpush.msra.mxu0 %v1795_v36  ;;  %1896 = vmatpush.msrb.mxu3 %v1743_v37  ;;  %v1727_v3 = vld [vmem:[%s14837_s21 + $0x440] sm:$0xff]  ;;  %v8328_v21 = vld [vmem:[%s14837_s21 + $0x3a8] sm:$0xff] }
 0x28b   : > { %1860 = vmatpush.msrb.mxu1 %v8171_v38  ;;  %1877 = vmatpush.msrb.mxu2 %v8176_v39  ;;  %v8256_v5 = vld [vmem:[%s14837_s21 + $0x220] sm:$0xff]  ;;  %v1820_v24 = vld [vmem:[%s14837_s21 + $0x728] sm:$0xff] }
 0x28c   : > { %1920 = vmatpush.msra.mxu0 %v1791_v40  ;;  %1897 = vmatpush.msrb.mxu3 %v1739_v44  ;;  %v1723_v7 = vld [vmem:[%s14837_s21 + $0x420] sm:$0xff]  ;;  %v1772_v25 = vld [vmem:[%s14837_s21 + $0x5a8] sm:$0xff] }
 0x28d   : > { %1861 = vmatpush.msrb.mxu1 %v8188_v47  ;;  %1878 = vmatpush.msrb.mxu2 %v8193_v53  ;;  %v8274_v9 = vld [vmem:[%s14837_s21 + $0x200] sm:$0xff]  ;;  %v8341_v27 = vld [vmem:[%s14837_s21 + $0x108] sm:$0xff] }
 0x28e   : > { %1921 = vmatpush.msra.mxu0 %v1787_v56  ;;  %1898 = vmatpush.msrb.mxu3 %v1735_v57  ;;  %v1719_v11 = vld [vmem:[%s14837_s21 + $0x400] sm:$0xff]  ;;  %v8346_v28 = vld [vmem:[%s14837_s21 + $0x388] sm:$0xff] }
 0x28f   : > { %1862 = vmatpush.msrb.mxu1 %v8206_v58  ;;  %1879 = vmatpush.msrb.mxu2 %v8211_v59  ;;  %v1816_v30 = vld [vmem:[%s14837_s21 + $0x708] sm:$0xff] }
 0x290   : > { %1922 = vmatpush.msra.mxu0 %v1783_v60  ;;  %1899 = vmatpush.msrb.mxu3 %v1731_v63  ;;  %v8356_v31 = vld [vmem:[%s14837_s21 + $0x588] sm:$0xff] }
 0x291   : > { %1927 = vmatpush.msra.mxu1 %v8220_v61  ;;  %1880 = vmatpush.msrb.mxu2 %v8239_v0  ;;  %15219 = vst [vmem:[#allocation10_spill] sm:$0xff] %v8356_v31  ;;  %v8361_v32 = vld [vmem:[%s14837_s21 + $0xe8] sm:$0xff] }
 0x292   : > { %1987 = vmatpush.msrb.mxu0 %v1844_v62  ;;  %1900 = vmatpush.msrb.mxu3 %v1727_v3  ;;  %v8366_v35 = vld [vmem:[%s14837_s21 + $0x368] sm:$0xff] }
 0x293   : > { %1928 = vmatpush.msra.mxu1 %v8233_v1  ;;  %1881 = vmatpush.msrb.mxu2 %v8256_v5  ;;  %v1812_v36 = vld [vmem:[%s14837_s21 + $0x6e8] sm:$0xff] }
 0x294   : > { %1988 = vmatpush.msrb.mxu0 %v1840_v2  ;;  %1901 = vmatpush.msrb.mxu3 %v1723_v7  ;;  %v8376_v37 = vld [vmem:[%s14837_s21 + $0x568] sm:$0xff] }
 0x295   : > { %1929 = vmatpush.msra.mxu1 %v8251_v4  ;;  %1882 = vmatpush.msrb.mxu2 %v8274_v9  ;;  %15220 = vst [vmem:[#allocation11_spill] sm:$0xff] %v8376_v37  ;;  %v8381_v40 = vld [vmem:[%s14837_s21 + $0xc8] sm:$0xff] }
 0x296   : > { %1989 = vmatpush.msrb.mxu0 %v1836_v6  ;;  %1902 = vmatpush.msrb.mxu3 %v1719_v11  ;;  %v8387_v44 = vld [vmem:[%s14837_s21 + $0x348] sm:$0xff] }
 0x297   : > { %1930 = vmatpush.msra.mxu1 %v8269_v8  ;;  %1947 = vmatpush.msra.mxu2 %v8292_v13  ;;  %v1808_v56 = vld [vmem:[%s14837_s21 + $0x6c8] sm:$0xff] }
 0x298   : > { %1990 = vmatpush.msrb.mxu0 %v1832_v10  ;;  %1967 = vmatpush.msra.mxu3 %v1780_v15  ;;  %v8397_v57 = vld [vmem:[%s14837_s21 + $0x548] sm:$0xff] }
 0x299   : > { %1931 = vmatpush.msra.mxu1 %v8287_v12  ;;  %1948 = vmatpush.msra.mxu2 %v8310_v17  ;;  %15221 = vst [vmem:[#allocation12_spill] sm:$0xff] %v8397_v57  ;;  %v8402_v60 = vld [vmem:[%s14837_s21 + $0xa8] sm:$0xff] }
 0x29a   : > { %1991 = vmatpush.msrb.mxu0 %v1828_v14  ;;  %1968 = vmatpush.msra.mxu3 %v1776_v19  ;;  %v8408_v62 = vld [vmem:[%s14837_s21 + $0x328] sm:$0xff] }
 0x29b   : > { %1932 = vmatpush.msra.mxu1 %v8305_v16  ;;  %1949 = vmatpush.msra.mxu2 %v8328_v21  ;;  %v1804_v63 = vld [vmem:[%s14837_s21 + $0x6a8] sm:$0xff] }
 0x29c   : > { %1992 = vmatpush.msrb.mxu0 %v1824_v18  ;;  %1969 = vmatpush.msra.mxu3 %v1772_v25  ;;  %v8418_v2 = vld [vmem:[%s14837_s21 + $0x528] sm:$0xff] }
 0x29d   : > { %1933 = vmatpush.msra.mxu1 %v8323_v20  ;;  %1950 = vmatpush.msra.mxu2 %v8346_v28  ;;  %15222 = vst [vmem:[#allocation13_spill] sm:$0xff] %v8418_v2  ;;  %v8423_v3 = vld [vmem:[%s14837_s21 + $0x88] sm:$0xff] }
 0x29e   : > { %1993 = vmatpush.msrb.mxu0 %v1820_v24  ;;  %1970 = vmatpush.msra.mxu3 %v8356_v31  ;;  %v8429_v6 = vld [vmem:[%s14837_s21 + $0x308] sm:$0xff] }
 0x29f   : > { %1934 = vmatpush.msra.mxu1 %v8341_v27  ;;  %1951 = vmatpush.msra.mxu2 %v8366_v35  ;;  %v1800_v7 = vld [vmem:[%s14837_s21 + $0x688] sm:$0xff] }
 0x2a0   : > { %1994 = vmatpush.msrb.mxu0 %v1816_v30  ;;  %1971 = vmatpush.msra.mxu3 %v8376_v37  ;;  %v8439_v10 = vld [vmem:[%s14837_s21 + $0x508] sm:$0xff]  ;;  %v8705_v37 = vld [vmem:[%s14837_s21 + $0x3b0] sm:$0xff] }
 0x2a1   : > { %1935 = vmatpush.msra.mxu1 %v8361_v32  ;;  %1952 = vmatpush.msra.mxu2 %v8387_v44  ;;  %15223 = vst [vmem:[#allocation14_spill] sm:$0xff] %v8439_v10  ;;  %v8444_v11 = vld [vmem:[%s14837_s21 + $0x68] sm:$0xff] }
 0x2a2   : > { %1995 = vmatpush.msrb.mxu0 %v1812_v36  ;;  %1972 = vmatpush.msra.mxu3 %v8397_v57  ;;  %v8450_v14 = vld [vmem:[%s14837_s21 + $0x2e8] sm:$0xff]  ;;  %v1817_v57 = vld [vmem:[%s14837_s21 + $0x710] sm:$0xff]  ;;  %15251 = vst [vmem:[#allocation42_spill] sm:$0xff] %v8705_v37 }
 0x2a3   : > { %1936 = vmatpush.msra.mxu1 %v8381_v40  ;;  %1953 = vmatpush.msra.mxu2 %v8408_v62  ;;  %v8456_v15 = vld [vmem:[%s14837_s21 + $0x668] sm:$0xff] }
 0x2a4   : > { %1996 = vmatpush.msrb.mxu0 %v1808_v56  ;;  %1973 = vmatpush.msra.mxu3 %v8418_v2  ;;  %15224 = vst [vmem:[#allocation15_spill] sm:$0xff] %v8456_v15  ;;  %v8462_v18 = vld [vmem:[%s14837_s21 + $0x4e8] sm:$0xff]  ;;  %v8689_v2 = vld [vmem:[%s14837_s21 + $0x5d0] sm:$0xff] }
 0x2a5   : > { %1937 = vmatpush.msra.mxu1 %v8402_v60  ;;  %1954 = vmatpush.msra.mxu2 %v8429_v6  ;;  %15225 = vst [vmem:[#allocation16_spill] sm:$0xff] %v8462_v18  ;;  %v8467_v19 = vld [vmem:[%s14837_s21 + $0x48] sm:$0xff] }
 0x2a6   : > { %1997 = vmatpush.msrb.mxu0 %v1804_v63  ;;  %1974 = vmatpush.msra.mxu3 %v8439_v10  ;;  %v8474_v24 = vld [vmem:[%s14837_s21 + $0x648] sm:$0xff]  ;;  %v8677_v10 = vld [vmem:[%s14837_s21 + $0x110] sm:$0xff]  ;;  %15249 = vst [vmem:[#allocation40_spill] sm:$0xff] %v8689_v2 }
 0x2a7   : > { %1938 = vmatpush.msra.mxu1 %v8423_v3  ;;  %15226 = vst [vmem:[#allocation17_spill] sm:$0xff] %v8474_v24  ;;  %1955 = vmatpush.msra.mxu2 %v8450_v14  ;;  %v8481_v25 = vld [vmem:[%s14837_s21 + $0x28] sm:$0xff] }
 0x2a8   : > { %1998 = vmatpush.msrb.mxu0 %v1800_v7  ;;  %1975 = vmatpush.msra.mxu3 %v8462_v18  ;;  %v8488_v30 = vld [vmem:[%s14837_s21 + $0x628] sm:$0xff]  ;;  %v8666_v18 = vld [vmem:[%s14837_s21 + $0x5f0] sm:$0xff]  ;;  %15247 = vst [vmem:[#allocation38_spill] sm:$0xff] %v8677_v10 }
 0x2a9   : > { %1939 = vmatpush.msra.mxu1 %v8444_v11  ;;  %15227 = vst [vmem:[#allocation18_spill] sm:$0xff] %v8488_v30  ;;  %v8496_v36 = vld [vmem:[%s14837_s21 + $0x8] sm:$0xff] }
 0x2aa   : > { %1999 = vmatpush.msrb.mxu0 %v8456_v15  ;;  %v8501_v56 = vld [vmem:[%s14837_s21 + $0x2c8] sm:$0xff]  ;;  %v8592_v15 = vld [vmem:[%s14837_s21 + $0x1f0] sm:$0xff]  ;;  %15246 = vst [vmem:[#allocation37_spill] sm:$0xff] %v8666_v18 }
 0x2ab   : > { %1940 = vmatpush.msra.mxu1 %v8467_v19  ;;  %v8506_v63 = vld [vmem:[%s14837_s21 + $0x4c8] sm:$0xff]  ;;  %1956 = vmatpush.msra.mxu2 %v8501_v56  ;;  %15238 = vst [vmem:[#allocation29_spill] sm:$0xff] %v8592_v15 }
 0x2ac   : > { %2000 = vmatpush.msrb.mxu0 %v8474_v24  ;;  %15228 = vst [vmem:[#allocation19_spill] sm:$0xff] %v8506_v63  ;;  %v8513_v7 = vld [vmem:[%s14837_s21 + $0x608] sm:$0xff]  ;;  %1976 = vmatpush.msra.mxu3 %v8506_v63  ;;  %v1837_v63 = vld [vmem:[%s14837_s21 + $0x7b0] sm:$0xff] }
 0x2ad   : > { %1941 = vmatpush.msra.mxu1 %v8481_v25  ;;  %15229 = vst [vmem:[#allocation20_spill] sm:$0xff] %v8513_v7  ;;  %1957 = vmatpush.msra.mxu2 %v8520_v41  ;;  %v8585_v24 = vld [vmem:[%s14837_s21 + $0x408] sm:$0xff] }
 0x2ae   : > { %2001 = vmatpush.msrb.mxu0 %v8488_v30  ;;  %1977 = vmatpush.msra.mxu3 %v8525_v52  ;;  %v8580_v30 = vld [vmem:[%s14837_s21 + $0x208] sm:$0xff]  ;;  %15237 = vst [vmem:[#allocation28_spill] sm:$0xff] %v8585_v24  ;;  %v8615_v52 = vld [vmem:[%s14837_s21 + $0x1b0] sm:$0xff] }
 0x2af   : > { %1942 = vmatpush.msra.mxu1 %v8496_v36  ;;  %1958 = vmatpush.msra.mxu2 %v8532_v50  ;;  %15236 = vst [vmem:[#allocation27_spill] sm:$0xff] %v8580_v30 }
 0x2b0   : > { %2002 = vmatpush.msrb.mxu0 %v8513_v7  ;;  %1978 = vmatpush.msra.mxu3 %v8537_v51  ;;  %v8573_v7 = vld [vmem:[%s14837_s21 + $0x428] sm:$0xff]  ;;  %v8605_v51 = vld [vmem:[%s14837_s21 + $0x1d0] sm:$0xff]  ;;  %15240 = vst [vmem:[#allocation31_spill] sm:$0xff] %v8615_v52 }
 0x2b1   : > { %1959 = vmatpush.msra.mxu2 %v8544_v49  ;;  %15235 = vst [vmem:[#allocation26_spill] sm:$0xff] %v8573_v7 }
 0x2b2   : > { %1979 = vmatpush.msra.mxu3 %v8549_v45  ;;  %15239 = vst [vmem:[#allocation30_spill] sm:$0xff] %v8605_v51 }
 0x2b3   : > { %1960 = vmatpush.msra.mxu2 %v8556_v43 }
 0x2b4   : > { %1980 = vmatpush.msra.mxu3 %v8561_v42  ;;  %v1845_v42 = vld [vmem:[%s14837_s21 + $0x7f0] sm:$0xff] }
 0x2b5   : > { %1961 = vmatpush.msra.mxu2 %v8568_v33 }
 0x2b6   : > { %1981 = vmatpush.msra.mxu3 %v8573_v7 }
 0x2b7   : > { %1962 = vmatpush.msra.mxu2 %v8580_v30 }
 0x2b8   : > { %1982 = vmatpush.msra.mxu3 %v8585_v24  ;;  %v1841_v24 = vld [vmem:[%s14837_s21 + $0x7d0] sm:$0xff] }
 0x2ec   : > { %v8594_v7 = vpop.f32.mrf.mxu1 }
 0x2ed   : > { %v8599_v45 = vpop.f32.mrf.mxu0  ;;  %1863 = vmatmul.f32.vlgmr.msrb.gmra.mxu1 %v8594_v7 }
 0x2ee   : > { %1923 = vmatmul.f32.vlgmr.msra.gmra.mxu0 %v8599_v45  ;;  %2007 = vmatpush.msrb.mxu1 %v8592_v15  ;;  %v8624_v15 = vld [vmem:[%s14837_s21 + $0x190] sm:$0xff] }
 0x2ef   : > { %2067 = vmatpush.msra.mxu0 %v1845_v42  ;;  %15241 = vst [vmem:[#allocation32_spill] sm:$0xff] %v8624_v15  ;;  %v1833_v42 = vld [vmem:[%s14837_s21 + $0x790] sm:$0xff] }
 0x2f0   : > { %2008 = vmatpush.msrb.mxu1 %v8605_v51  ;;  %v8633_v51 = vld [vmem:[%s14837_s21 + $0x170] sm:$0xff] }
 0x2f1   : > { %2068 = vmatpush.msra.mxu0 %v1841_v24  ;;  %15242 = vst [vmem:[#allocation33_spill] sm:$0xff] %v8633_v51  ;;  %v1829_v24 = vld [vmem:[%s14837_s21 + $0x770] sm:$0xff] }
 0x2f2   : > { %2009 = vmatpush.msrb.mxu1 %v8615_v52  ;;  %v8642_v52 = vld [vmem:[%s14837_s21 + $0x150] sm:$0xff] }
 0x2f3   : > { %2069 = vmatpush.msra.mxu0 %v1837_v63  ;;  %15243 = vst [vmem:[#allocation34_spill] sm:$0xff] %v8642_v52  ;;  %v1825_v63 = vld [vmem:[%s14837_s21 + $0x750] sm:$0xff] }
 0x2f4   : > { %2010 = vmatpush.msrb.mxu1 %v8624_v15 }
 0x2f5   : > { %2070 = vmatpush.msra.mxu0 %v1833_v42  ;;  %1943 = vmatmul.f32.vlgmr.msra.gmra.mxu1 %v8594_v7  ;;  %v8653_v42 = vld [vmem:[%s14837_s21 + $0x130] sm:$0xff] }
 0x2f6   : > { %2011 = vmatpush.msrb.mxu1 %v8633_v51  ;;  %2003 = vmatmul.f32.vlgmr.msrb.gmra.mxu0 %v8599_v45  ;;  %15244 = vst [vmem:[#allocation35_spill] sm:$0xff] %v8653_v42  ;;  %v8661_v51 = vld [vmem:[%s14837_s21 + $0x3f0] sm:$0xff] }
 0x2f7   : > { %2071 = vmatpush.msra.mxu0 %v1829_v24  ;;  %15245 = vst [vmem:[#allocation36_spill] sm:$0xff] %v8661_v51 }
 0x2f8   : > { %2012 = vmatpush.msrb.mxu1 %v8642_v52  ;;  %v8656_v15 = vpop.f32.mrf.mxu2  ;;  %v1821_v52 = vld [vmem:[%s14837_s21 + $0x730] sm:$0xff] }
 0x2f9   : > { %2072 = vmatpush.msra.mxu0 %v1825_v63  ;;  %v8668_v24 = vpop.f32.mrf.mxu3  ;;  %1883 = vmatmul.f32.vlgmr.msrb.gmra.mxu2 %v8656_v15  ;;  %v8684_v63 = vld [vmem:[%s14837_s21 + $0x3d0] sm:$0xff] }
 0x2fa   : > { %1903 = vmatmul.f32.vlgmr.msrb.gmra.mxu3 %v8668_v24  ;;  %2013 = vmatpush.msrb.mxu1 %v8653_v42  ;;  %15248 = vst [vmem:[#allocation39_spill] sm:$0xff] %v8684_v63  ;;  %v8699_v42 = vld [vmem:[%s14837_s21 + $0xf0] sm:$0xff] }
 0x2fb   : > { %2027 = vmatpush.msrb.mxu2 %v8661_v51  ;;  %2047 = vmatpush.msrb.mxu3 %v8666_v18  ;;  %15250 = vst [vmem:[#allocation41_spill] sm:$0xff] %v8699_v42  ;;  %v8710_v18 = vld [vmem:[%s14837_s21 + $0x5b0] sm:$0xff] }
 0x2fc   : > { %2073 = vmatpush.msra.mxu0 %v1821_v52  ;;  %2014 = vmatpush.msrb.mxu1 %v8677_v10  ;;  %15252 = vst [vmem:[#allocation43_spill] sm:$0xff] %v8710_v18  ;;  %v1813_v52 = vld [vmem:[%s14837_s21 + $0x6f0] sm:$0xff] }
 0x2fd   : > { %2028 = vmatpush.msrb.mxu2 %v8684_v63  ;;  %2048 = vmatpush.msrb.mxu3 %v8689_v2  ;;  %v8720_v51 = vld [vmem:[%s14837_s21 + $0xd0] sm:$0xff] }
 0x2fe   : > { %15253 = vst [vmem:[#allocation44_spill] sm:$0xff] %v8720_v51  ;;  %2074 = vmatpush.msra.mxu0 %v1817_v57  ;;  %2015 = vmatpush.msrb.mxu1 %v8699_v42  ;;  %v8726_v10 = vld [vmem:[%s14837_s21 + $0x390] sm:$0xff] }
 0x2ff   : > { %15254 = vst [vmem:[#allocation45_spill] sm:$0xff] %v8726_v10  ;;  %v8731_v2 = vld [vmem:[%s14837_s21 + $0x590] sm:$0xff]  ;;  %2029 = vmatpush.msrb.mxu2 %v8705_v37  ;;  %2049 = vmatpush.msrb.mxu3 %v8710_v18 }
 0x300   : > { %15255 = vst [vmem:[#allocation46_spill] sm:$0xff] %v8731_v2  ;;  %v1809_v57 = vld [vmem:[%s14837_s21 + $0x6d0] sm:$0xff]  ;;  %2075 = vmatpush.msra.mxu0 %v1813_v52  ;;  %2016 = vmatpush.msrb.mxu1 %v8720_v51 }
 0x301   : > { %v8742_v63 = vld [vmem:[%s14837_s21 + $0xb0] sm:$0xff]  ;;  %2030 = vmatpush.msrb.mxu2 %v8726_v10  ;;  %2050 = vmatpush.msrb.mxu3 %v8731_v2 }
 0x302   : > { %15256 = vst [vmem:[#allocation47_spill] sm:$0xff] %v8742_v63  ;;  %v8749_v18 = vld [vmem:[%s14837_s21 + $0x370] sm:$0xff]  ;;  %2076 = vmatpush.msra.mxu0 %v1809_v57  ;;  %1963 = vmatmul.f32.vlgmr.msra.gmra.mxu2 %v8656_v15 }
 0x303   : > { %15257 = vst [vmem:[#allocation48_spill] sm:$0xff] %v8749_v18  ;;  %v8754_v52 = vld [vmem:[%s14837_s21 + $0x570] sm:$0xff]  ;;  %1983 = vmatmul.f32.vlgmr.msra.gmra.mxu3 %v8668_v24  ;;  %2017 = vmatpush.msrb.mxu1 %v8742_v63 }
 0x304   : > { %15258 = vst [vmem:[#allocation49_spill] sm:$0xff] %v8754_v52  ;;  %v8760_v37 = vld [vmem:[%s14837_s21 + $0x6b0] sm:$0xff]  ;;  %2031 = vmatpush.msrb.mxu2 %v8749_v18  ;;  %2051 = vmatpush.msrb.mxu3 %v8754_v52 }
 0x305   : > { %15259 = vst [vmem:[#allocation50_spill] sm:$0xff] %v8760_v37  ;;  %v8765_v2 = vld [vmem:[%s14837_s21 + $0x90] sm:$0xff]  ;;  %2077 = vmatpush.msra.mxu0 %v8760_v37 }
 0x306   : > { %15260 = vst [vmem:[#allocation51_spill] sm:$0xff] %v8765_v2  ;;  %v8772_v57 = vld [vmem:[%s14837_s21 + $0x350] sm:$0xff]  ;;  %2018 = vmatpush.msrb.mxu1 %v8765_v2 }
 0x307   : > { %15261 = vst [vmem:[#allocation52_spill] sm:$0xff] %v8772_v57  ;;  %v8777_v10 = vld [vmem:[%s14837_s21 + $0x550] sm:$0xff]  ;;  %2032 = vmatpush.msrb.mxu2 %v8772_v57 }
 0x308   : > { %15262 = vst [vmem:[#allocation53_spill] sm:$0xff] %v8777_v10  ;;  %v8784_v51 = vld [vmem:[%s14837_s21 + $0x690] sm:$0xff]  ;;  %2052 = vmatpush.msrb.mxu3 %v8777_v10 }
 0x309   : > { %15263 = vst [vmem:[#allocation54_spill] sm:$0xff] %v8784_v51  ;;  %v8789_v63 = vld [vmem:[%s14837_s21 + $0x70] sm:$0xff]  ;;  %2078 = vmatpush.msra.mxu0 %v8784_v51 }
 0x30a   : > { %15264 = vst [vmem:[#allocation55_spill] sm:$0xff] %v8789_v63  ;;  %v8796_v18 = vld [vmem:[%s14837_s21 + $0x330] sm:$0xff]  ;;  %2019 = vmatpush.msrb.mxu1 %v8789_v63 }
 0x30b   : > { %15265 = vst [vmem:[#allocation56_spill] sm:$0xff] %v8796_v18  ;;  %v8801_v52 = vld [vmem:[%s14837_s21 + $0x530] sm:$0xff]  ;;  %2033 = vmatpush.msrb.mxu2 %v8796_v18 }
 0x30c   : > { %15266 = vst [vmem:[#allocation57_spill] sm:$0xff] %v8801_v52  ;;  %v8808_v37 = vld [vmem:[%s14837_s21 + $0x670] sm:$0xff]  ;;  %2053 = vmatpush.msrb.mxu3 %v8801_v52 }
 0x30d   : > { %15267 = vst [vmem:[#allocation58_spill] sm:$0xff] %v8808_v37  ;;  %v8813_v2 = vld [vmem:[%s14837_s21 + $0x50] sm:$0xff]  ;;  %2079 = vmatpush.msra.mxu0 %v8808_v37 }
 0x30e   : > { %15268 = vst [vmem:[#allocation59_spill] sm:$0xff] %v8813_v2  ;;  %v8820_v57 = vld [vmem:[%s14837_s21 + $0x310] sm:$0xff]  ;;  %2020 = vmatpush.msrb.mxu1 %v8813_v2 }
 0x30f   : > { %15269 = vst [vmem:[#allocation60_spill] sm:$0xff] %v8820_v57  ;;  %v8825_v10 = vld [vmem:[%s14837_s21 + $0x510] sm:$0xff]  ;;  %2034 = vmatpush.msrb.mxu2 %v8820_v57 }
 0x310   : > { %15270 = vst [vmem:[#allocation61_spill] sm:$0xff] %v8825_v10  ;;  %v8832_v51 = vld [vmem:[%s14837_s21 + $0x650] sm:$0xff]  ;;  %2054 = vmatpush.msrb.mxu3 %v8825_v10 }
 0x311   : > { %15271 = vst [vmem:[#allocation62_spill] sm:$0xff] %v8832_v51  ;;  %v8837_v63 = vld [vmem:[%s14837_s21 + $0x30] sm:$0xff]  ;;  %2080 = vmatpush.msra.mxu0 %v8832_v51 }
 0x312   : > { %15272 = vst [vmem:[#allocation63_spill] sm:$0xff] %v8837_v63  ;;  %v8844_v18 = vld [vmem:[%s14837_s21 + $0x2f0] sm:$0xff]  ;;  %2021 = vmatpush.msrb.mxu1 %v8837_v63  ;;  %v8887_v63 = vld [vmem:[%s14837_s21 + $0x1f8] sm:$0xff] }
 0x313   : > { %15273 = vst [vmem:[#allocation64_spill] sm:$0xff] %v8844_v18  ;;  %v8849_v52 = vld [vmem:[%s14837_s21 + $0x4f0] sm:$0xff]  ;;  %2035 = vmatpush.msrb.mxu2 %v8844_v18 }
 0x314   : > { %15274 = vst [vmem:[#allocation65_spill] sm:$0xff] %v8849_v52  ;;  %v8856_v37 = vld [vmem:[%s14837_s21 + $0x630] sm:$0xff]  ;;  %2055 = vmatpush.msrb.mxu3 %v8849_v52  ;;  %v8894_v52 = vld [vmem:[%s14837_s21 + $0x7f8] sm:$0xff] }
 0x315   : > { %15275 = vst [vmem:[#allocation66_spill] sm:$0xff] %v8856_v37  ;;  %v8861_v2 = vld [vmem:[%s14837_s21 + $0x10] sm:$0xff]  ;;  %2081 = vmatpush.msra.mxu0 %v8856_v37 }
 0x316   : > { %15276 = vst [vmem:[#allocation67_spill] sm:$0xff] %v8861_v2  ;;  %v8868_v57 = vld [vmem:[%s14837_s21 + $0x2d0] sm:$0xff]  ;;  %2022 = vmatpush.msrb.mxu1 %v8861_v2 }
 0x317   : > { %15277 = vst [vmem:[#allocation68_spill] sm:$0xff] %v8868_v57  ;;  %v8873_v10 = vld [vmem:[%s14837_s21 + $0x4d0] sm:$0xff]  ;;  %2036 = vmatpush.msrb.mxu2 %v8868_v57  ;;  %2023 = vmatmul.f32.vlgmr.msrb.gmra.mxu1 %v8594_v7 }
 0x318   : > { %15278 = vst [vmem:[#allocation69_spill] sm:$0xff] %v8873_v10  ;;  %v8880_v51 = vld [vmem:[%s14837_s21 + $0x610] sm:$0xff]  ;;  %2056 = vmatpush.msrb.mxu3 %v8873_v10  ;;  %v8911_v10 = vld [vmem:[%s14837_s21 + $0x1d8] sm:$0xff]  ;;  %2087 = vmatpush.msra.mxu1 %v8887_v63 }
 0x319   : > { %15279 = vst [vmem:[#allocation70_spill] sm:$0xff] %v8880_v51  ;;  %v8899_v37 = vld [vmem:[%s14837_s21 + $0x2b0] sm:$0xff]  ;;  %2082 = vmatpush.msra.mxu0 %v8880_v51  ;;  %v8918_v51 = vld [vmem:[%s14837_s21 + $0x7d8] sm:$0xff] }
 0x31a   : > { %15280 = vst [vmem:[#allocation71_spill] sm:$0xff] %v8887_v63  ;;  %v8906_v57 = vld [vmem:[%s14837_s21 + $0x4b0] sm:$0xff]  ;;  %2083 = vmatmul.f32.vlgmr.msra.gmra.mxu0 %v8599_v45  ;;  %2037 = vmatpush.msrb.mxu2 %v8899_v37  ;;  %v8935_v63 = vld [vmem:[%s14837_s21 + $0x1b8] sm:$0xff] }
 0x31b   : > { %15281 = vst [vmem:[#allocation72_spill] sm:$0xff] %v8894_v52  ;;  %v8923_v18 = vld [vmem:[%s14837_s21 + $0x290] sm:$0xff]  ;;  %2147 = vmatpush.msrb.mxu0 %v8894_v52  ;;  %2057 = vmatpush.msrb.mxu3 %v8906_v57  ;;  %v8942_v52 = vld [vmem:[%s14837_s21 + $0x7b8] sm:$0xff] }
 0x31c   : > { %15282 = vst [vmem:[#allocation73_spill] sm:$0xff] %v8899_v37  ;;  %v8930_v2 = vld [vmem:[%s14837_s21 + $0x490] sm:$0xff]  ;;  %2088 = vmatpush.msra.mxu1 %v8911_v10  ;;  %2038 = vmatpush.msrb.mxu2 %v8923_v18 }
 0x31d   : > { %15283 = vst [vmem:[#allocation74_spill] sm:$0xff] %v8906_v57  ;;  %v8947_v37 = vld [vmem:[%s14837_s21 + $0x270] sm:$0xff]  ;;  %2148 = vmatpush.msrb.mxu0 %v8918_v51  ;;  %2058 = vmatpush.msrb.mxu3 %v8930_v2 }
 0x31e   : > { %15284 = vst [vmem:[#allocation75_spill] sm:$0xff] %v8911_v10  ;;  %v8954_v57 = vld [vmem:[%s14837_s21 + $0x470] sm:$0xff]  ;;  %v8959_v10 = vld [vmem:[%s14837_s21 + $0x198] sm:$0xff]  ;;  %2089 = vmatpush.msra.mxu1 %v8935_v63  ;;  %2039 = vmatpush.msrb.mxu2 %v8947_v37 }
 0x31f   : > { %15285 = vst [vmem:[#allocation76_spill] sm:$0xff] %v8918_v51  ;;  %v8966_v51 = vld [vmem:[%s14837_s21 + $0x798] sm:$0xff]  ;;  %2149 = vmatpush.msrb.mxu0 %v8942_v52  ;;  %2059 = vmatpush.msrb.mxu3 %v8954_v57 }
 0x320   : > { %15286 = vst [vmem:[#allocation77_spill] sm:$0xff] %v8923_v18  ;;  %v8971_v18 = vld [vmem:[%s14837_s21 + $0x250] sm:$0xff]  ;;  %2090 = vmatpush.msra.mxu1 %v8959_v10 }
 0x321   : > { %15287 = vst [vmem:[#allocation78_spill] sm:$0xff] %v8930_v2  ;;  %v8978_v2 = vld [vmem:[%s14837_s21 + $0x450] sm:$0xff]  ;;  %2150 = vmatpush.msrb.mxu0 %v8966_v51  ;;  %2040 = vmatpush.msrb.mxu2 %v8971_v18 }
 0x322   : > { %15288 = vst [vmem:[#allocation79_spill] sm:$0xff] %v8935_v63  ;;  %v8983_v63 = vld [vmem:[%s14837_s21 + $0x178] sm:$0xff]  ;;  %2060 = vmatpush.msrb.mxu3 %v8978_v2 }
 0x323   : > { %15289 = vst [vmem:[#allocation80_spill] sm:$0xff] %v8942_v52  ;;  %v8990_v52 = vld [vmem:[%s14837_s21 + $0x778] sm:$0xff]  ;;  %2091 = vmatpush.msra.mxu1 %v8983_v63 }
 0x324   : > { %15290 = vst [vmem:[#allocation81_spill] sm:$0xff] %v8947_v37  ;;  %v8995_v37 = vld [vmem:[%s14837_s21 + $0x230] sm:$0xff]  ;;  %2151 = vmatpush.msrb.mxu0 %v8990_v52 }
 0x325   : > { %15291 = vst [vmem:[#allocation82_spill] sm:$0xff] %v8954_v57  ;;  %v9002_v57 = vld [vmem:[%s14837_s21 + $0x430] sm:$0xff]  ;;  %2041 = vmatpush.msrb.mxu2 %v8995_v37 }
 0x326   : > { %15292 = vst [vmem:[#allocation83_spill] sm:$0xff] %v8959_v10  ;;  %v9007_v10 = vld [vmem:[%s14837_s21 + $0x158] sm:$0xff]  ;;  %2061 = vmatpush.msrb.mxu3 %v9002_v57 }
 0x327   : > { %15293 = vst [vmem:[#allocation84_spill] sm:$0xff] %v8966_v51  ;;  %v9014_v51 = vld [vmem:[%s14837_s21 + $0x758] sm:$0xff]  ;;  %2092 = vmatpush.msra.mxu1 %v9007_v10 }
 0x328   : > { %15294 = vst [vmem:[#allocation85_spill] sm:$0xff] %v8971_v18  ;;  %v9019_v18 = vld [vmem:[%s14837_s21 + $0x210] sm:$0xff]  ;;  %2152 = vmatpush.msrb.mxu0 %v9014_v51 }
 0x329   : > { %15295 = vst [vmem:[#allocation86_spill] sm:$0xff] %v8978_v2  ;;  %v9026_v2 = vld [vmem:[%s14837_s21 + $0x410] sm:$0xff]  ;;  %2042 = vmatpush.msrb.mxu2 %v9019_v18 }
 0x32a   : > { %15296 = vst [vmem:[#allocation87_spill] sm:$0xff] %v8983_v63  ;;  %v9033_v63 = vld [vmem:[%s14837_s21 + $0x138] sm:$0xff]  ;;  %2062 = vmatpush.msrb.mxu3 %v9026_v2  ;;  %2043 = vmatmul.f32.vlgmr.msrb.gmra.mxu2 %v8656_v15 }
 0x32b   : > { %15297 = vst [vmem:[#allocation88_spill] sm:$0xff] %v8990_v52  ;;  %v9040_v52 = vld [vmem:[%s14837_s21 + $0x3f8] sm:$0xff]  ;;  %2063 = vmatmul.f32.vlgmr.msrb.gmra.mxu3 %v8668_v24  ;;  %2093 = vmatpush.msra.mxu1 %v9033_v63 }
 0x32c   : > { %15298 = vst [vmem:[#allocation89_spill] sm:$0xff] %v8995_v37  ;;  %v9069_v37 = vld [vmem:[%s14837_s21 + $0x5d8] sm:$0xff]  ;;  %2107 = vmatpush.msra.mxu2 %v9040_v52 }
 0x32d   : > { %15299 = vst [vmem:[#allocation90_spill] sm:$0xff] %v9002_v57  ;;  %v9045_v57 = vld [vmem:[%s14837_s21 + $0x5f8] sm:$0xff] }
 0x32e   : > { %15300 = vst [vmem:[#allocation91_spill] sm:$0xff] %v9007_v10  ;;  %2127 = vmatpush.msra.mxu3 %v9045_v57  ;;  %v9076_v10 = vld [vmem:[%s14837_s21 + $0x718] sm:$0xff] }
 0x32f   : > { %15301 = vst [vmem:[#allocation92_spill] sm:$0xff] %v9014_v51  ;;  %v9052_v51 = vld [vmem:[%s14837_s21 + $0x738] sm:$0xff] }
 0x330   : > { %15302 = vst [vmem:[#allocation93_spill] sm:$0xff] %v9019_v18  ;;  %v9057_v18 = vld [vmem:[%s14837_s21 + $0x118] sm:$0xff]  ;;  %2153 = vmatpush.msrb.mxu0 %v9052_v51  ;;  %2128 = vmatpush.msra.mxu3 %v9069_v37 }
 0x331   : > { %15303 = vst [vmem:[#allocation94_spill] sm:$0xff] %v9026_v2  ;;  %v9064_v2 = vld [vmem:[%s14837_s21 + $0x3d8] sm:$0xff]  ;;  %2094 = vmatpush.msra.mxu1 %v9057_v18 }
 0x332   : > { %15304 = vst [vmem:[#allocation95_spill] sm:$0xff] %v9033_v63  ;;  %v9081_v63 = vld [vmem:[%s14837_s21 + $0xf8] sm:$0xff]  ;;  %2108 = vmatpush.msra.mxu2 %v9064_v2  ;;  %2154 = vmatpush.msrb.mxu0 %v9076_v10 }
 0x333   : > { %15305 = vst [vmem:[#allocation96_spill] sm:$0xff] %v9040_v52  ;;  %v9088_v52 = vld [vmem:[%s14837_s21 + $0x3b8] sm:$0xff]  ;;  %2095 = vmatpush.msra.mxu1 %v9081_v63 }
 0x334   : > { %15306 = vst [vmem:[#allocation97_spill] sm:$0xff] %v9045_v57  ;;  %v9093_v57 = vld [vmem:[%s14837_s21 + $0x5b8] sm:$0xff]  ;;  %2109 = vmatpush.msra.mxu2 %v9088_v52 }
 0x335   : > { %15307 = vst [vmem:[#allocation98_spill] sm:$0xff] %v9052_v51  ;;  %v9100_v51 = vld [vmem:[%s14837_s21 + $0x6f8] sm:$0xff]  ;;  %2129 = vmatpush.msra.mxu3 %v9093_v57 }
 0x336   : > { %15308 = vst [vmem:[#allocation99_spill] sm:$0xff] %v9057_v18  ;;  %v9105_v18 = vld [vmem:[%s14837_s21 + $0xd8] sm:$0xff]  ;;  %2155 = vmatpush.msrb.mxu0 %v9100_v51 }
 0x337   : > { %15309 = vst [vmem:[#allocation100_spill] sm:$0xff] %v9064_v2  ;;  %v9112_v2 = vld [vmem:[%s14837_s21 + $0x398] sm:$0xff]  ;;  %2096 = vmatpush.msra.mxu1 %v9105_v18 }
 0x338   : > { %15310 = vst [vmem:[#allocation101_spill] sm:$0xff] %v9069_v37  ;;  %v9117_v37 = vld [vmem:[%s14837_s21 + $0x598] sm:$0xff]  ;;  %2110 = vmatpush.msra.mxu2 %v9112_v2 }
 0x339   : > { %15311 = vst [vmem:[#allocation102_spill] sm:$0xff] %v9076_v10  ;;  %v9124_v10 = vld [vmem:[%s14837_s21 + $0x6d8] sm:$0xff]  ;;  %2130 = vmatpush.msra.mxu3 %v9117_v37 }
 0x33a   : > { %15312 = vst [vmem:[#allocation103_spill] sm:$0xff] %v9081_v63  ;;  %v9129_v63 = vld [vmem:[%s14837_s21 + $0xb8] sm:$0xff]  ;;  %2156 = vmatpush.msrb.mxu0 %v9124_v10 }
 0x33b   : > { %15313 = vst [vmem:[#allocation104_spill] sm:$0xff] %v9088_v52  ;;  %v9136_v52 = vld [vmem:[%s14837_s21 + $0x378] sm:$0xff]  ;;  %2097 = vmatpush.msra.mxu1 %v9129_v63 }
 0x33c   : > { %15314 = vst [vmem:[#allocation105_spill] sm:$0xff] %v9093_v57  ;;  %v9141_v57 = vld [vmem:[%s14837_s21 + $0x578] sm:$0xff]  ;;  %2111 = vmatpush.msra.mxu2 %v9136_v52 }
 0x33d   : > { %15315 = vst [vmem:[#allocation106_spill] sm:$0xff] %v9100_v51  ;;  %v9148_v51 = vld [vmem:[%s14837_s21 + $0x6b8] sm:$0xff]  ;;  %2131 = vmatpush.msra.mxu3 %v9141_v57 }
 0x33e   : > { %15316 = vst [vmem:[#allocation107_spill] sm:$0xff] %v9105_v18  ;;  %v9153_v18 = vld [vmem:[%s14837_s21 + $0x98] sm:$0xff]  ;;  %2157 = vmatpush.msrb.mxu0 %v9148_v51 }
 0x33f   : > { %15317 = vst [vmem:[#allocation108_spill] sm:$0xff] %v9112_v2  ;;  %v9160_v2 = vld [vmem:[%s14837_s21 + $0x358] sm:$0xff]  ;;  %2098 = vmatpush.msra.mxu1 %v9153_v18 }
 0x340   : > { %15318 = vst [vmem:[#allocation109_spill] sm:$0xff] %v9117_v37  ;;  %v9165_v37 = vld [vmem:[%s14837_s21 + $0x558] sm:$0xff]  ;;  %2112 = vmatpush.msra.mxu2 %v9160_v2 }
 0x341   : > { %15319 = vst [vmem:[#allocation110_spill] sm:$0xff] %v9124_v10  ;;  %v9172_v10 = vld [vmem:[%s14837_s21 + $0x698] sm:$0xff]  ;;  %2132 = vmatpush.msra.mxu3 %v9165_v37 }
 0x342   : > { %15320 = vst [vmem:[#allocation111_spill] sm:$0xff] %v9129_v63  ;;  %v9177_v63 = vld [vmem:[%s14837_s21 + $0x78] sm:$0xff]  ;;  %2158 = vmatpush.msrb.mxu0 %v9172_v10 }
 0x343   : > { %15321 = vst [vmem:[#allocation112_spill] sm:$0xff] %v9136_v52  ;;  %v9184_v52 = vld [vmem:[%s14837_s21 + $0x338] sm:$0xff]  ;;  %2099 = vmatpush.msra.mxu1 %v9177_v63 }
 0x344   : > { %15322 = vst [vmem:[#allocation113_spill] sm:$0xff] %v9141_v57  ;;  %v9189_v57 = vld [vmem:[%s14837_s21 + $0x538] sm:$0xff]  ;;  %2113 = vmatpush.msra.mxu2 %v9184_v52 }
 0x345   : > { %15323 = vst [vmem:[#allocation114_spill] sm:$0xff] %v9148_v51  ;;  %v9196_v51 = vld [vmem:[%s14837_s21 + $0x678] sm:$0xff]  ;;  %2133 = vmatpush.msra.mxu3 %v9189_v57 }
 0x346   : > { %15324 = vst [vmem:[#allocation115_spill] sm:$0xff] %v9153_v18  ;;  %v9201_v18 = vld [vmem:[%s14837_s21 + $0x58] sm:$0xff]  ;;  %2159 = vmatpush.msrb.mxu0 %v9196_v51 }
 0x347   : > { %15325 = vst [vmem:[#allocation116_spill] sm:$0xff] %v9160_v2  ;;  %v9208_v2 = vld [vmem:[%s14837_s21 + $0x318] sm:$0xff]  ;;  %2100 = vmatpush.msra.mxu1 %v9201_v18 }
 0x348   : > { %15326 = vst [vmem:[#allocation117_spill] sm:$0xff] %v9165_v37  ;;  %v9213_v37 = vld [vmem:[%s14837_s21 + $0x518] sm:$0xff]  ;;  %2114 = vmatpush.msra.mxu2 %v9208_v2 }
 0x349   : > { %15327 = vst [vmem:[#allocation118_spill] sm:$0xff] %v9172_v10  ;;  %v9220_v10 = vld [vmem:[%s14837_s21 + $0x658] sm:$0xff]  ;;  %2134 = vmatpush.msra.mxu3 %v9213_v37 }
 0x34a   : > { %15328 = vst [vmem:[#allocation119_spill] sm:$0xff] %v9177_v63  ;;  %v9225_v63 = vld [vmem:[%s14837_s21 + $0x38] sm:$0xff]  ;;  %2160 = vmatpush.msrb.mxu0 %v9220_v10 }
 0x34b   : > { %15329 = vst [vmem:[#allocation120_spill] sm:$0xff] %v9184_v52  ;;  %v9232_v52 = vld [vmem:[%s14837_s21 + $0x2f8] sm:$0xff]  ;;  %2101 = vmatpush.msra.mxu1 %v9225_v63 }
 0x34c   : > { %15330 = vst [vmem:[#allocation121_spill] sm:$0xff] %v9189_v57  ;;  %v9237_v57 = vld [vmem:[%s14837_s21 + $0x4f8] sm:$0xff]  ;;  %2115 = vmatpush.msra.mxu2 %v9232_v52 }
 0x34d   : > { %15331 = vst [vmem:[#allocation122_spill] sm:$0xff] %v9196_v51  ;;  %v9244_v51 = vld [vmem:[%s14837_s21 + $0x638] sm:$0xff]  ;;  %2135 = vmatpush.msra.mxu3 %v9237_v57 }
 0x34e   : > { %15332 = vst [vmem:[#allocation123_spill] sm:$0xff] %v9201_v18  ;;  %v9249_v18 = vld [vmem:[%s14837_s21 + $0x18] sm:$0xff]  ;;  %2161 = vmatpush.msrb.mxu0 %v9244_v51 }
 0x34f   : > { %15333 = vst [vmem:[#allocation124_spill] sm:$0xff] %v9208_v2  ;;  %v9256_v2 = vld [vmem:[%s14837_s21 + $0x2d8] sm:$0xff]  ;;  %2102 = vmatpush.msra.mxu1 %v9249_v18 }
 0x350   : > { %15334 = vst [vmem:[#allocation125_spill] sm:$0xff] %v9213_v37  ;;  %v9261_v37 = vld [vmem:[%s14837_s21 + $0x4d8] sm:$0xff]  ;;  %2116 = vmatpush.msra.mxu2 %v9256_v2  ;;  %2103 = vmatmul.f32.vlgmr.msra.gmra.mxu1 %v8594_v7 }
 0x351   : > { %15335 = vst [vmem:[#allocation126_spill] sm:$0xff] %v9220_v10  ;;  %v9268_v10 = vld [vmem:[%s14837_s21 + $0x618] sm:$0xff]  ;;  %2136 = vmatpush.msra.mxu3 %v9261_v37 }
 0x352   : > { %15336 = vst [vmem:[#allocation127_spill] sm:$0xff] %v9225_v63  ;;  %v9275_v63 = vld [vmem:[%s14837_s21 + $0x2b8] sm:$0xff]  ;;  %2162 = vmatpush.msrb.mxu0 %v9268_v10 }
 0x353   : > { %15337 = vst [vmem:[#allocation128_spill] sm:$0xff] %v9232_v52  ;;  %2163 = vmatmul.f32.vlgmr.msrb.gmra.mxu0 %v8599_v45  ;;  %2117 = vmatpush.msra.mxu2 %v9275_v63  ;;  %v9302_v7 = vld [vmem:[%s14837_s21 + $0x278] sm:$0xff] }
 0x354   : > { %15338 = vst [vmem:[#allocation129_spill] sm:$0xff] %v9237_v57  ;;  %v9282_v57 = vld [vmem:[%s14837_s21 + $0x4b8] sm:$0xff] }
 0x355   : > { %15339 = vst [vmem:[#allocation130_spill] sm:$0xff] %v9244_v51  ;;  %v9289_v51 = vld [vmem:[%s14837_s21 + $0x298] sm:$0xff]  ;;  %2137 = vmatpush.msra.mxu3 %v9282_v57 }
 0x356   : > { %15340 = vst [vmem:[#allocation131_spill] sm:$0xff] %v9249_v18  ;;  %2118 = vmatpush.msra.mxu2 %v9289_v51  ;;  %v9308_v45 = vld [vmem:[%s14837_s21 + $0x478] sm:$0xff] }
 0x357   : > { %15341 = vst [vmem:[#allocation132_spill] sm:$0xff] %v9256_v2 }
 0x358   : > { %15342 = vst [vmem:[#allocation133_spill] sm:$0xff] %v9261_v37  ;;  %v9296_v37 = vld [vmem:[%s14837_s21 + $0x498] sm:$0xff]  ;;  %2119 = vmatpush.msra.mxu2 %v9302_v7 }
 0x359   : > { %15343 = vst [vmem:[#allocation134_spill] sm:$0xff] %v9268_v10  ;;  %2138 = vmatpush.msra.mxu3 %v9296_v37  ;;  %v9314_v10 = vld [vmem:[%s14837_s21 + $0x258] sm:$0xff] }
 0x35a   : > { %15344 = vst [vmem:[#allocation135_spill] sm:$0xff] %v9275_v63  ;;  %2120 = vmatpush.msra.mxu2 %v9314_v10 }
 0x35b   : > { %15345 = vst [vmem:[#allocation136_spill] sm:$0xff] %v9282_v57  ;;  %v9320_v57 = vld [vmem:[%s14837_s21 + $0x458] sm:$0xff]  ;;  %2139 = vmatpush.msra.mxu3 %v9308_v45 }
 0x35c   : > { %15346 = vst [vmem:[#allocation137_spill] sm:$0xff] %v9289_v51  ;;  %v9326_v51 = vld [vmem:[%s14837_s21 + $0x238] sm:$0xff] }
 0x35d   : > { %15347 = vst [vmem:[#allocation138_spill] sm:$0xff] %v9296_v37  ;;  %v9332_v37 = vld [vmem:[%s14837_s21 + $0x438] sm:$0xff]  ;;  %2140 = vmatpush.msra.mxu3 %v9320_v57  ;;  %2121 = vmatpush.msra.mxu2 %v9326_v51 }
 0x35e   : > { %15348 = vst [vmem:[#allocation139_spill] sm:$0xff] %v9302_v7  ;;  %v9338_v7 = vld [vmem:[%s14837_s21 + $0x218] sm:$0xff] }
 0x35f   : > { %15349 = vst [vmem:[#allocation140_spill] sm:$0xff] %v9308_v45  ;;  %v9344_v45 = vld [vmem:[%s14837_s21 + $0x418] sm:$0xff]  ;;  %2141 = vmatpush.msra.mxu3 %v9332_v37  ;;  %2122 = vmatpush.msra.mxu2 %v9338_v7 }
 0x360   : > { %15350 = vst [vmem:[#allocation141_spill] sm:$0xff] %v9314_v10  ;;  %2123 = vmatmul.f32.vlgmr.msra.gmra.mxu2 %v8656_v15 }
 0x361   : > { %15351 = vst [vmem:[#allocation142_spill] sm:$0xff] %v9320_v57  ;;  %2142 = vmatpush.msra.mxu3 %v9344_v45 }
 0x362   : > { %15352 = vst [vmem:[#allocation143_spill] sm:$0xff] %v9326_v51  ;;  %2143 = vmatmul.f32.vlgmr.msra.gmra.mxu3 %v8668_v24 }
 0x363   : > { %15353 = vst [vmem:[#allocation144_spill] sm:$0xff] %v9332_v37 }
 0x364   : > { %15354 = vst [vmem:[#allocation145_spill] sm:$0xff] %v9338_v7 }
 0x365   : > { %15355 = vst [vmem:[#allocation146_spill] sm:$0xff] %v9344_v45 }
 0x36a   : > { %v1864_v57 = vpop.f32.mrf.mxu1 }
 0x36b   : > { %v1924_v51 = vpop.f32.mrf.mxu0 }
 0x372   : > { %v1944_v37 = vpop.f32.mrf.mxu1 }
 0x37c   : > { %v1884_v10 = vpop.f32.mrf.mxu2 }
 0x37d   : > { %v1885_v63 = vadd.f32 %v1884_v10, %v1864_v57  ;;  %v1904_v2 = vpop.f32.mrf.mxu3  ;;  %v2004_v10 = vpop.f32.mrf.mxu0  ;;  %v7022_v57 = vld [vmem:[%s14837_s21 + $0x3e0] sm:$0xff] }
 0x37f   : > { %v1905_v52 = vadd.f32 %v1904_v2, %v1885_v63  ;;  %v7019_v63 = vld [vmem:[%s14837_s21 + $0x1a0] sm:$0xff] }
 0x381   : > { %v1925_v18 = vadd.f32 %v1924_v51, %v1905_v52  ;;  %v7021_v52 = vld [vmem:[%s14837_s21 + $0x160] sm:$0xff] }
 0x383   : > { %v2167_v42 = vperm.slane %v1925_v18, 0  ;;  %v15356_v18 = vmov 1.0  }
 0x385   : > { %v9352_v30 = vsub.f32 %v7996_v22, %v2167_v42  ;;  %v1964_v31 = vpop.f32.mrf.mxu2  ;;  %v9355_v7 = vsub.f32 %v8000_v26, %v2167_v42  ;;  %v7017_v26 = vld [vmem:[%s14837_s21 + $0x1e0] sm:$0xff] }
 0x386   : > { %v1965_v45 = vadd.f32 %v1964_v31, %v1944_v37  ;;  %v1984_v15 = vpop.f32.mrf.mxu3 }
 0x387   : > { %v2183_v24 = vmul.f32 %v9352_v30, %v9352_v30  ;;  %v2179_v51 = vmul.f32 %v9355_v7, %v9355_v7 }
 0x388   : > { %v1985_v33 = vadd.f32 %v1984_v15, %v1965_v45  ;;  %v7023_v45 = vld [vmem:[%s14837_s21 + $0x140] sm:$0xff] }
 0x389   : > { %2201 = vmatpush.msrb.mxu1 %v2183_v24  ;;  %v7024_v15 = vld [vmem:[%s14837_s21 + $0x3c0] sm:$0xff] }
 0x38a   : > { %v2005_v2 = vadd.f32 %v2004_v10, %v1985_v33  ;;  %v7018_v33 = vld [vmem:[%s14837_s21 + $0x1c0] sm:$0xff] }
 0x38b   : > { %2202 = vmatpush.msrb.mxu1 %v2179_v51  ;;  %v7025_v24 = vld [vmem:[%s14837_s21 + $0x120] sm:$0xff] }
 0x38c   : > { %v2168_v22 = vperm.slane %v2005_v2, 0  ;;  %6352 = vmatmul.msk.f32.vlgmr.msrb.gmra.mxu1 %vm1029_vm9, %v15356_v18  ;;  %v7026_v10 = vld [vmem:[%s14837_s21 + $0x3a0] sm:$0xff] }
 0x38d   : > { %2267 = vmatpush.msra.mxu1 %v7017_v26  ;;  %v7027_v51 = vld [vmem:[%s14837_s21 + $0x100] sm:$0xff] }
 0x38e   : > { %v9367_v31 = vsub.f32 %v8019_v46, %v2168_v22  ;;  %v9370_v37 = vsub.f32 %v8031_v54, %v2168_v22  ;;  %v7020_v54 = vld [vmem:[%s14837_s21 + $0x180] sm:$0xff] }
 0x38f   : > { %2268 = vmatpush.msra.mxu1 %v7018_v33  ;;  %v7028_v2 = vld [vmem:[%s14837_s21 + $0x380] sm:$0xff] }
 0x390   : > { %v2184_v42 = vmul.f32 %v9367_v31, %v9367_v31  ;;  %v2180_v46 = vmul.f32 %v9370_v37, %v9370_v37  ;;  %v7029_v22 = vld [vmem:[%s14837_s21 + $0xe0] sm:$0xff] }
 0x391   : > { %2269 = vmatpush.msra.mxu1 %v7019_v63  ;;  %v7030_v26 = vld [vmem:[%s14837_s21 + $0x360] sm:$0xff] }
 0x392   : > { %2221 = vmatpush.msrb.mxu2 %v2184_v42  ;;  %v7031_v63 = vld [vmem:[%s14837_s21 + $0xc0] sm:$0xff] }
 0x393   : > { %2270 = vmatpush.msra.mxu1 %v7020_v54  ;;  %v7032_v54 = vld [vmem:[%s14837_s21 + $0x340] sm:$0xff] }
 0x394   : > { %2222 = vmatpush.msrb.mxu2 %v2180_v46  ;;  %v2024_v33 = vpop.f32.mrf.mxu1 }
 0x395   : > { %6353 = vmatmul.msk.f32.vlgmr.msrb.gmra.mxu2 %vm1029_vm9, %v15356_v18  ;;  %2271 = vmatpush.msra.mxu1 %v7021_v52 }
 0x396   : > { %2287 = vmatpush.msra.mxu2 %v7022_v57  ;;  %v7033_v57 = vld [vmem:[%s14837_s21 + $0xa0] sm:$0xff] }
 0x397   : > { %2272 = vmatpush.msra.mxu1 %v7023_v45 }
 0x398   : > { %2288 = vmatpush.msra.mxu2 %v7024_v15  ;;  %v7034_v15 = vld [vmem:[%s14837_s21 + $0x320] sm:$0xff] }
 0x399   : > { %2273 = vmatpush.msra.mxu1 %v7025_v24  ;;  %v2084_v24 = vpop.f32.mrf.mxu0 }
 0x39a   : > { %2289 = vmatpush.msra.mxu2 %v7026_v10  ;;  %v7035_v10 = vld [vmem:[%s14837_s21 + $0x80] sm:$0xff] }
 0x39b   : > { %2274 = vmatpush.msra.mxu1 %v7027_v51 }
 0x39c   : > { %2290 = vmatpush.msra.mxu2 %v7028_v2  ;;  %v7036_v2 = vld [vmem:[%s14837_s21 + $0x300] sm:$0xff] }
 0x39d   : > { %2275 = vmatpush.msra.mxu1 %v7029_v22 }
 0x39e   : > { %2291 = vmatpush.msra.mxu2 %v7030_v26  ;;  %v7037_v26 = vld [vmem:[%s14837_s21 + $0x2e0] sm:$0xff] }
 0x39f   : > { %2276 = vmatpush.msra.mxu1 %v7031_v63  ;;  %v7038_v63 = vld [vmem:[%s14837_s21 + $0x2c0] sm:$0xff] }
 0x3a0   : > { %2292 = vmatpush.msra.mxu2 %v7032_v54  ;;  %v7064_v54 = vld [vmem:[%s14837_s21 + $0x720] sm:$0xff] }
 0x3a1   : > { %2277 = vmatpush.msra.mxu1 %v7033_v57  ;;  %v7065_v57 = vld [vmem:[%s14837_s21 + $0x700] sm:$0xff] }
 0x3a2   : > { %2293 = vmatpush.msra.mxu2 %v7034_v15  ;;  %v7066_v15 = vld [vmem:[%s14837_s21 + $0x6e0] sm:$0xff] }
 0x3a3   : > { %2278 = vmatpush.msra.mxu1 %v7035_v10  ;;  %v7067_v10 = vld [vmem:[%s14837_s21 + $0x6c0] sm:$0xff] }
 0x3a4   : > { %2294 = vmatpush.msra.mxu2 %v7036_v2  ;;  %v7068_v2 = vld [vmem:[%s14837_s21 + $0x6a0] sm:$0xff] }
 0x3a5   : > { %2279 = vmatpush.msra.mxu1 %v8157_v34 }
 0x3a6   : > { %2295 = vmatpush.msra.mxu2 %v7037_v26  ;;  %v7069_v26 = vld [vmem:[%s14837_s21 + $0x680] sm:$0xff] }
 0x3a7   : > { %2280 = vmatpush.msra.mxu1 %v8171_v38  ;;  %v7040_v38 = vld [vmem:[%s14837_s21 + $0x5c0] sm:$0xff] }
 0x3a8   : > { %2296 = vmatpush.msra.mxu2 %v7038_v63  ;;  %v15368_v63 = vld [vmem:[#allocation23_spill] sm:$0xff] }
 0x3a9   : > { %2281 = vmatpush.msra.mxu1 %v8188_v47  ;;  %v7042_v47 = vld [vmem:[%s14837_s21 + $0x580] sm:$0xff] }
 0x3aa   : > { %2297 = vmatpush.msra.mxu2 %v8176_v39  ;;  %v7041_v39 = vld [vmem:[%s14837_s21 + $0x5a0] sm:$0xff] }
 0x3ab   : > { %2282 = vmatpush.msra.mxu1 %v8206_v58  ;;  %v7044_v58 = vld [vmem:[%s14837_s21 + $0x540] sm:$0xff] }
 0x3ac   : > { %2298 = vmatpush.msra.mxu2 %v8193_v53  ;;  %v7043_v53 = vld [vmem:[%s14837_s21 + $0x560] sm:$0xff] }
 0x3ad   : > { %v2044_v42 = vpop.f32.mrf.mxu2  ;;  %2347 = vmatpush.msrb.mxu1 %v8220_v61  ;;  %v7046_v61 = vld [vmem:[%s14837_s21 + $0x500] sm:$0xff] }
 0x3ae   : > { %v2045_v46 = vadd.f32 %v2044_v42, %v2024_v33  ;;  %v2064_v52 = vpop.f32.mrf.mxu3  ;;  %2299 = vmatpush.msra.mxu2 %v8211_v59  ;;  %v7045_v59 = vld [vmem:[%s14837_s21 + $0x520] sm:$0xff] }
 0x3af   : > { %2348 = vmatpush.msrb.mxu1 %v8233_v1 }
 0x3b0   : > { %v2065_v45 = vadd.f32 %v2064_v52, %v2045_v46  ;;  %2300 = vmatpush.msra.mxu2 %v8239_v0  ;;  %v15362_v46 = vld [vmem:[#allocation13_spill] sm:$0xff]  ;;  %v15363_v52 = vld [vmem:[#allocation14_spill] sm:$0xff] }
 0x3b1   : > { %2349 = vmatpush.msrb.mxu1 %v8251_v4  ;;  %v7047_v4 = vld [vmem:[%s14837_s21 + $0x4e0] sm:$0xff] }
 0x3b2   : > { %v2085_v51 = vadd.f32 %v2084_v24, %v2065_v45  ;;  %2301 = vmatpush.msra.mxu2 %v8256_v5  ;;  %v15364_v45 = vld [vmem:[#allocation16_spill] sm:$0xff]  ;;  %v15365_v24 = vld [vmem:[#allocation19_spill] sm:$0xff] }
 0x3b3   : > { %2350 = vmatpush.msrb.mxu1 %v8269_v8 }
 0x3b4   : > { %v2169_v22 = vperm.slane %v2085_v51, 0  ;;  %2302 = vmatpush.msra.mxu2 %v8274_v9  ;;  %v7048_v9 = vld [vmem:[%s14837_s21 + $0x4c0] sm:$0xff]  ;;  %v15366_v51 = vld [vmem:[#allocation21_spill] sm:$0xff] }
 0x3b5   : > { %2351 = vmatpush.msrb.mxu1 %v8287_v12 }
 0x3b6   : > { %v9441_v33 = vsub.f32 %v8026_v48, %v2169_v22  ;;  %v9444_v42 = vsub.f32 %v8034_v55, %v2169_v22  ;;  %v7039_v55 = vld [vmem:[%s14837_s21 + $0x5e0] sm:$0xff]  ;;  %2367 = vmatpush.msrb.mxu2 %v8292_v13 }
 0x3b7   : > { %2352 = vmatpush.msrb.mxu1 %v8305_v16  ;;  %v7049_v16 = vld [vmem:[%s14837_s21 + $0x4a0] sm:$0xff] }
 0x3b8   : > { %v2185_v34 = vmul.f32 %v9441_v33, %v9441_v33  ;;  %v2181_v48 = vmul.f32 %v9444_v42, %v9444_v42  ;;  %2368 = vmatpush.msrb.mxu2 %v8310_v17  ;;  %v15367_v22 = vld [vmem:[#allocation22_spill] sm:$0xff] }
 0x3b9   : > { %2353 = vmatpush.msrb.mxu1 %v8323_v20  ;;  %v7050_v20 = vld [vmem:[%s14837_s21 + $0x480] sm:$0xff] }
 0x3ba   : > { %2241 = vmatpush.msrb.mxu3 %v2185_v34  ;;  %2369 = vmatpush.msrb.mxu2 %v8328_v21  ;;  %v7070_v34 = vld [vmem:[%s14837_s21 + $0x660] sm:$0xff] }
 0x3bb   : > { %2354 = vmatpush.msrb.mxu1 %v8341_v27  ;;  %v7051_v27 = vld [vmem:[%s14837_s21 + $0x460] sm:$0xff] }
 0x3bc   : > { %2242 = vmatpush.msrb.mxu3 %v2181_v48  ;;  %2370 = vmatpush.msrb.mxu2 %v8346_v28  ;;  %v15369_v48 = vld [vmem:[#allocation24_spill] sm:$0xff] }
 0x3bd   : > { %6354 = vmatmul.msk.f32.vlgmr.msrb.gmra.mxu3 %vm1029_vm9, %v15356_v18  ;;  %2355 = vmatpush.msrb.mxu1 %v8361_v32 }
 0x3be   : > { %2307 = vmatpush.msra.mxu3 %v7039_v55  ;;  %2371 = vmatpush.msrb.mxu2 %v8366_v35  ;;  %v7052_v35 = vld [vmem:[%s14837_s21 + $0x440] sm:$0xff] }
 0x3bf   : > { %2356 = vmatpush.msrb.mxu1 %v8381_v40  ;;  %v7071_v55 = vld [vmem:[%s14837_s21 + $0x640] sm:$0xff] }
 0x3c0   : > { %2308 = vmatpush.msra.mxu3 %v7040_v38  ;;  %2372 = vmatpush.msrb.mxu2 %v8387_v44  ;;  %v7054_v44 = vld [vmem:[%s14837_s21 + $0x400] sm:$0xff] }
 0x3c1   : > { %2357 = vmatpush.msrb.mxu1 %v8402_v60  ;;  %v7057_v60 = vld [vmem:[%s14837_s21 + $0x5c8] sm:$0xff]  ;;  %v15370_v38 = vld [vmem:[#allocation26_spill] sm:$0xff] }
 0x3c2   : > { %2309 = vmatpush.msra.mxu3 %v7041_v39  ;;  %2373 = vmatpush.msrb.mxu2 %v8408_v62  ;;  %v7058_v62 = vld [vmem:[%s14837_s21 + $0x7c0] sm:$0xff] }
 0x3c3   : > { %2358 = vmatpush.msrb.mxu1 %v8423_v3  ;;  %v15357_v3 = vld [vmem:[#allocation25_spill] sm:$0xff]  ;;  %v7072_v39 = vld [vmem:[%s14837_s21 + $0x620] sm:$0xff] }
 0x3c4   : > { %2310 = vmatpush.msra.mxu3 %v7042_v47  ;;  %2374 = vmatpush.msrb.mxu2 %v8429_v6  ;;  %v7060_v6 = vld [vmem:[%s14837_s21 + $0x7a0] sm:$0xff]  ;;  %v15371_v47 = vld [vmem:[#allocation28_spill] sm:$0xff] }
 0x3c5   : > { %2359 = vmatpush.msrb.mxu1 %v8444_v11  ;;  %v15358_v11 = vld [vmem:[#allocation10_spill] sm:$0xff] }
 0x3c6   : > { %2311 = vmatpush.msra.mxu3 %v7043_v53  ;;  %2375 = vmatpush.msrb.mxu2 %v8450_v14  ;;  %v7061_v14 = vld [vmem:[%s14837_s21 + $0x780] sm:$0xff] }
 0x3c7   : > { %2360 = vmatpush.msrb.mxu1 %v8467_v19  ;;  %v15360_v19 = vld [vmem:[#allocation11_spill] sm:$0xff]  ;;  %v7073_v53 = vld [vmem:[%s14837_s21 + $0x600] sm:$0xff] }
 0x3c8   : > { %2312 = vmatpush.msra.mxu3 %v7044_v58  ;;  %2376 = vmatpush.msrb.mxu2 %v8501_v56  ;;  %v7063_v56 = vld [vmem:[%s14837_s21 + $0x740] sm:$0xff]  ;;  %v7074_v58 = vld [vmem:[%s14837_s21 + $0x7e8] sm:$0xff] }
 0x3c9   : > { %2361 = vmatpush.msrb.mxu1 %v8481_v25  ;;  %v7062_v25 = vld [vmem:[%s14837_s21 + $0x760] sm:$0xff] }
 0x3ca   : > { %2313 = vmatpush.msra.mxu3 %v7045_v59  ;;  %2377 = vmatpush.msrb.mxu2 %v8520_v41  ;;  %v7055_v41 = vld [vmem:[%s14837_s21 + $0x5e8] sm:$0xff] }
 0x3cb   : > { %2362 = vmatpush.msrb.mxu1 %v8496_v36  ;;  %v15361_v36 = vld [vmem:[#allocation12_spill] sm:$0xff]  ;;  %v7075_v59 = vld [vmem:[%s14837_s21 + $0x7c8] sm:$0xff] }
 0x3cc   : > { %2314 = vmatpush.msra.mxu3 %v7046_v61  ;;  %2378 = vmatpush.msrb.mxu2 %v8532_v50  ;;  %v7056_v50 = vld [vmem:[%s14837_s21 + $0x7e0] sm:$0xff]  ;;  %v7076_v61 = vld [vmem:[%s14837_s21 + $0x7a8] sm:$0xff] }
 0x3cd   : > { %v2104_v1 = vpop.f32.mrf.mxu1 }
 0x3ce   : > { %2315 = vmatpush.msra.mxu3 %v7047_v4  ;;  %2379 = vmatpush.msrb.mxu2 %v8544_v49  ;;  %v7059_v49 = vld [vmem:[%s14837_s21 + $0x5a8] sm:$0xff] }
 0x3cf   : > { %v7079_v4 = vld [vmem:[%s14837_s21 + $0x748] sm:$0xff] }
 0x3d0   : > { %2316 = vmatpush.msra.mxu3 %v7048_v9  ;;  %v2164_v13 = vpop.f32.mrf.mxu0  ;;  %2380 = vmatpush.msrb.mxu2 %v8556_v43  ;;  %v15359_v43 = vld [vmem:[#allocation27_spill] sm:$0xff] }
 0x3d1   : > { %v7082_v9 = vld [vmem:[%s14837_s21 + $0x6e8] sm:$0xff] }
 0x3d2   : > { %2317 = vmatpush.msra.mxu3 %v7049_v16  ;;  %2381 = vmatpush.msrb.mxu2 %v15357_v3  ;;  %v7085_v16 = vld [vmem:[%s14837_s21 + $0x688] sm:$0xff]  ;;  %v15384_v3 = vld [vmem:[#allocation36_spill] sm:$0xff] }
 0x3d4   : > { %2318 = vmatpush.msra.mxu3 %v7050_v20  ;;  %2382 = vmatpush.msrb.mxu2 %v15359_v43  ;;  %v15387_v43 = vld [vmem:[#allocation44_spill] sm:$0xff] }
 0x3d6   : > { %2319 = vmatpush.msra.mxu3 %v7051_v27  ;;  %v15374_v27 = vld [vmem:[#allocation29_spill] sm:$0xff] }
 0x3d8   : > { %2320 = vmatpush.msra.mxu3 %v7052_v35  ;;  %v15375_v35 = vld [vmem:[#allocation18_spill] sm:$0xff] }
 0x3e3   : > { %v2124_v0 = vpop.f32.mrf.mxu2 }
 0x3e4   : > { %v2125_v5 = vadd.f32 %v2124_v0, %v2104_v1  ;;  %v7077_v1 = vld [vmem:[%s14837_s21 + $0x788] sm:$0xff] }
 0x3e5   : > { %v2144_v8 = vpop.f32.mrf.mxu3  ;;  %v7078_v0 = vld [vmem:[%s14837_s21 + $0x768] sm:$0xff] }
 0x3e6   : > { %v2145_v12 = vadd.f32 %v2144_v8, %v2125_v5  ;;  %v7080_v5 = vld [vmem:[%s14837_s21 + $0x728] sm:$0xff] }
 0x3e7   : > { %v7081_v8 = vld [vmem:[%s14837_s21 + $0x708] sm:$0xff] }
 0x3e8   : > { %v2165_v17 = vadd.f32 %v2164_v13, %v2145_v12  ;;  %v7083_v12 = vld [vmem:[%s14837_s21 + $0x6c8] sm:$0xff] }
 0x3e9   : > { %v7084_v13 = vld [vmem:[%s14837_s21 + $0x6a8] sm:$0xff] }
 0x3ea   : > { %v2170_v21 = vperm.slane %v2165_v17, 0  ;;  %v15372_v17 = vld [vmem:[#allocation15_spill] sm:$0xff] }
 0x3ec   : > { %v9527_v28 = vsub.f32 %v7998_v23, %v2170_v21  ;;  %v9530_v32 = vsub.f32 %v8003_v29, %v2170_v21  ;;  %v7053_v23 = vld [vmem:[%s14837_s21 + $0x420] sm:$0xff]  ;;  %v15373_v21 = vld [vmem:[#allocation17_spill] sm:$0xff] }
 0x3ed   : > { %2321 = vmatpush.msra.mxu3 %v7053_v23  ;;  %v15377_v23 = vld [vmem:[#allocation20_spill] sm:$0xff] }
 0x3ee   : > { %v2186_v40 = vmul.f32 %v9527_v28, %v9527_v28  ;;  %v2182_v29 = vmul.f32 %v9530_v32, %v9530_v32 }
 0x3ef   : > { %2322 = vmatpush.msra.mxu3 %v7054_v44  ;;  %v15379_v44 = vld [vmem:[#allocation32_spill] sm:$0xff] }
 0x3f0   : > { %2261 = vmatpush.msra.mxu0 %v2186_v40  ;;  %v15376_v40 = vld [vmem:[#allocation30_spill] sm:$0xff] }
 0x3f1   : > { %2387 = vmatpush.msrb.mxu3 %v7055_v41  ;;  %v15380_v41 = vld [vmem:[#allocation33_spill] sm:$0xff] }
 0x3f2   : > { %2262 = vmatpush.msra.mxu0 %v2182_v29  ;;  %v15378_v29 = vld [vmem:[#allocation31_spill] sm:$0xff] }
 0x3f3   : > { %6355 = vmatmul.msk.f32.vlgmr.msra.gmra.mxu0 %vm1029_vm9, %v15356_v18  ;;  %2388 = vmatpush.msrb.mxu3 %v7057_v60  ;;  %v15382_v60 = vld [vmem:[#allocation35_spill] sm:$0xff] }
 0x3f4   : > { %2327 = vmatpush.msrb.mxu0 %v7056_v50  ;;  %v15381_v50 = vld [vmem:[#allocation34_spill] sm:$0xff] }
 0x3f5   : > { %2389 = vmatpush.msrb.mxu3 %v7059_v49  ;;  %v15383_v49 = vld [vmem:[#allocation38_spill] sm:$0xff] }
 0x3f6   : > { %2328 = vmatpush.msrb.mxu0 %v7058_v62 }
 0x3f7   : > { %2390 = vmatpush.msrb.mxu3 %v15358_v11  ;;  %v15386_v11 = vld [vmem:[#allocation39_spill] sm:$0xff] }
 0x3f8   : > { %2329 = vmatpush.msrb.mxu0 %v7060_v6  ;;  %v15385_v6 = vld [vmem:[#allocation41_spill] sm:$0xff] }
 0x3f9   : > { %2391 = vmatpush.msrb.mxu3 %v15360_v19  ;;  %v15389_v19 = vld [vmem:[#allocation47_spill] sm:$0xff] }
 0x3fa   : > { %2330 = vmatpush.msrb.mxu0 %v7061_v14  ;;  %v15388_v14 = vld [vmem:[#allocation42_spill] sm:$0xff] }
 0x3fb   : > { %2392 = vmatpush.msrb.mxu3 %v15361_v36  ;;  %v15391_v36 = vld [vmem:[#allocation51_spill] sm:$0xff] }
 0x3fc   : > { %2331 = vmatpush.msrb.mxu0 %v7062_v25  ;;  %v15390_v25 = vld [vmem:[#allocation45_spill] sm:$0xff] }
 0x3fd   : > { %2393 = vmatpush.msrb.mxu3 %v15362_v46  ;;  %v15393_v46 = vld [vmem:[#allocation55_spill] sm:$0xff] }
 0x3fe   : > { %2332 = vmatpush.msrb.mxu0 %v7063_v56  ;;  %v15392_v56 = vld [vmem:[#allocation48_spill] sm:$0xff] }
 0x3ff   : > { %2394 = vmatpush.msrb.mxu3 %v15363_v52  ;;  %v15395_v52 = vld [vmem:[#allocation59_spill] sm:$0xff] }
 0x400   : > { %2333 = vmatpush.msrb.mxu0 %v7064_v54  ;;  %v15394_v54 = vld [vmem:[#allocation52_spill] sm:$0xff] }
 0x401   : > { %2395 = vmatpush.msrb.mxu3 %v15364_v45  ;;  %v15397_v45 = vld [vmem:[#allocation63_spill] sm:$0xff] }
 0x402   : > { %2334 = vmatpush.msrb.mxu0 %v7065_v57  ;;  %v15396_v57 = vld [vmem:[#allocation56_spill] sm:$0xff] }
 0x403   : > { %2396 = vmatpush.msrb.mxu3 %v15365_v24  ;;  %v15399_v24 = vld [vmem:[#allocation67_spill] sm:$0xff] }
 0x404   : > { %2335 = vmatpush.msrb.mxu0 %v7066_v15  ;;  %v15398_v15 = vld [vmem:[#allocation60_spill] sm:$0xff] }
 0x405   : > { %2397 = vmatpush.msrb.mxu3 %v15366_v51  ;;  %v15401_v51 = vld [vmem:[#allocation71_spill] sm:$0xff] }
 0x406   : > { %2336 = vmatpush.msrb.mxu0 %v7067_v10  ;;  %v15400_v10 = vld [vmem:[#allocation64_spill] sm:$0xff] }
 0x407   : > { %2398 = vmatpush.msrb.mxu3 %v15367_v22  ;;  %v15403_v22 = vld [vmem:[#allocation75_spill] sm:$0xff] }
 0x408   : > { %2337 = vmatpush.msrb.mxu0 %v7068_v2  ;;  %v15402_v2 = vld [vmem:[#allocation68_spill] sm:$0xff] }
 0x409   : > { %2399 = vmatpush.msrb.mxu3 %v15368_v63  ;;  %v9662_v20 = vpop.f32.mrf.mxu1  ;;  %v15405_v63 = vld [vmem:[#allocation79_spill] sm:$0xff] }
 0x40a   : > { %2338 = vmatpush.msrb.mxu0 %v7069_v26  ;;  %2283 = vmatmul.f32.vlgmr.msra.gmra.mxu1 %v9662_v20  ;;  %v15404_v26 = vld [vmem:[#allocation73_spill] sm:$0xff] }
 0x40b   : > { %2400 = vmatpush.msrb.mxu3 %v15369_v48  ;;  %2427 = vmatpush.msra.mxu1 %v15374_v27  ;;  %v15407_v48 = vld [vmem:[#allocation83_spill] sm:$0xff]  ;;  %v15426_v27 = vld [vmem:[#allocation53_spill] sm:$0xff] }
 0x40c   : > { %2339 = vmatpush.msrb.mxu0 %v7070_v34  ;;  %v15406_v34 = vld [vmem:[#allocation77_spill] sm:$0xff] }
 0x40d   : > { %2401 = vmatpush.msrb.mxu3 %v15370_v38  ;;  %2428 = vmatpush.msra.mxu1 %v15376_v40  ;;  %v15408_v38 = vld [vmem:[#allocation81_spill] sm:$0xff]  ;;  %v15428_v40 = vld [vmem:[#allocation108_spill] sm:$0xff] }
 0x40e   : > { %2340 = vmatpush.msrb.mxu0 %v7071_v55 }
 0x40f   : > { %2402 = vmatpush.msrb.mxu3 %v15371_v47  ;;  %2429 = vmatpush.msra.mxu1 %v15378_v29  ;;  %v15410_v47 = vld [vmem:[#allocation37_spill] sm:$0xff]  ;;  %v15430_v29 = vld [vmem:[#allocation115_spill] sm:$0xff] }
 0x410   : > { %2341 = vmatpush.msrb.mxu0 %v7072_v39  ;;  %v15409_v39 = vld [vmem:[#allocation87_spill] sm:$0xff] }
 0x411   : > { %2430 = vmatpush.msra.mxu1 %v15379_v44  ;;  %v15431_v44 = vld [vmem:[#allocation112_spill] sm:$0xff] }
 0x412   : > { %2342 = vmatpush.msrb.mxu0 %v7073_v53  ;;  %2363 = vmatmul.f32.vlgmr.msrb.gmra.mxu1 %v9662_v20  ;;  %v15411_v53 = vld [vmem:[#allocation85_spill] sm:$0xff] }
 0x413   : > { %2431 = vmatpush.msra.mxu1 %v15380_v41  ;;  %v15432_v41 = vld [vmem:[#allocation61_spill] sm:$0xff] }
 0x414   : > { %2407 = vmatpush.msra.mxu0 %v7074_v58  ;;  %v15412_v58 = vld [vmem:[#allocation91_spill] sm:$0xff] }
 0x415   : > { %2432 = vmatpush.msra.mxu1 %v15381_v50  ;;  %v15433_v50 = vld [vmem:[#allocation119_spill] sm:$0xff] }
 0x416   : > { %2408 = vmatpush.msra.mxu0 %v7075_v59  ;;  %v15413_v59 = vld [vmem:[#allocation40_spill] sm:$0xff] }
 0x417   : > { %2433 = vmatpush.msra.mxu1 %v15382_v60  ;;  %v15434_v60 = vld [vmem:[#allocation65_spill] sm:$0xff] }
 0x418   : > { %2409 = vmatpush.msra.mxu0 %v7076_v61  ;;  %v9676_v62 = vpop.f32.mrf.mxu2  ;;  %v15414_v61 = vld [vmem:[#allocation89_spill] sm:$0xff] }
 0x419   : > { %2303 = vmatmul.f32.vlgmr.msra.gmra.mxu2 %v9676_v62  ;;  %2434 = vmatpush.msra.mxu1 %v15383_v49  ;;  %v15435_v49 = vld [vmem:[#allocation116_spill] sm:$0xff] }
 0x41a   : > { %2410 = vmatpush.msra.mxu0 %v7077_v1  ;;  %2447 = vmatpush.msra.mxu2 %v15384_v3  ;;  %v15415_v1 = vld [vmem:[#allocation95_spill] sm:$0xff] }
 0x41b   : > { %2435 = vmatpush.msra.mxu1 %v15385_v6  ;;  %v15436_v3 = vld [vmem:[#allocation123_spill] sm:$0xff]  ;;  %v15437_v6 = vld [vmem:[#allocation69_spill] sm:$0xff] }
 0x41c   : > { %2411 = vmatpush.msra.mxu0 %v7078_v0  ;;  %2448 = vmatpush.msra.mxu2 %v15386_v11  ;;  %v15416_v0 = vld [vmem:[#allocation43_spill] sm:$0xff]  ;;  %v15438_v11 = vld [vmem:[#allocation120_spill] sm:$0xff] }
 0x41d   : > { %2436 = vmatpush.msra.mxu1 %v15387_v43  ;;  %v15439_v43 = vld [vmem:[#allocation127_spill] sm:$0xff] }
 0x41e   : > { %2412 = vmatpush.msra.mxu0 %v7079_v4  ;;  %2449 = vmatpush.msra.mxu2 %v15388_v14  ;;  %v15417_v4 = vld [vmem:[#allocation93_spill] sm:$0xff]  ;;  %v15440_v14 = vld [vmem:[#allocation74_spill] sm:$0xff] }
 0x41f   : > { %2437 = vmatpush.msra.mxu1 %v15389_v19  ;;  %v15441_v19 = vld [vmem:[#allocation124_spill] sm:$0xff] }
 0x420   : > { %2413 = vmatpush.msra.mxu0 %v7080_v5  ;;  %2450 = vmatpush.msra.mxu2 %v15390_v25  ;;  %v15418_v5 = vld [vmem:[#allocation99_spill] sm:$0xff] }
 0x421   : > { %2438 = vmatpush.msra.mxu1 %v15391_v36  ;;  %2383 = vmatmul.f32.vlgmr.msrb.gmra.mxu2 %v9676_v62  ;;  %v15442_v25 = vld [vmem:[#allocation131_spill] sm:$0xff]  ;;  %v15443_v36 = vld [vmem:[#allocation78_spill] sm:$0xff] }
 0x422   : > { %2414 = vmatpush.msra.mxu0 %v7081_v8  ;;  %2451 = vmatpush.msra.mxu2 %v15392_v56  ;;  %v15419_v8 = vld [vmem:[#allocation96_spill] sm:$0xff] }
 0x423   : > { %2439 = vmatpush.msra.mxu1 %v15393_v46  ;;  %v15444_v56 = vld [vmem:[#allocation128_spill] sm:$0xff]  ;;  %v15445_v46 = vld [vmem:[#allocation82_spill] sm:$0xff] }
 0x424   : > { %2415 = vmatpush.msra.mxu0 %v7082_v9  ;;  %2452 = vmatpush.msra.mxu2 %v15394_v54  ;;  %v15420_v9 = vld [vmem:[#allocation46_spill] sm:$0xff]  ;;  %v15446_v54 = vld [vmem:[#allocation132_spill] sm:$0xff] }
 0x425   : > { %2440 = vmatpush.msra.mxu1 %v15395_v52 }
 0x426   : > { %2416 = vmatpush.msra.mxu0 %v7083_v12  ;;  %2453 = vmatpush.msra.mxu2 %v15396_v57  ;;  %v15421_v12 = vld [vmem:[#allocation103_spill] sm:$0xff]  ;;  %v15447_v57 = vld [vmem:[#allocation86_spill] sm:$0xff] }
 0x427   : > { %2441 = vmatpush.msra.mxu1 %v15397_v45  ;;  %v7086_v45 = vld [vmem:[%s14837_s21 + $0x7f0] sm:$0xff] }
 0x428   : > { %2417 = vmatpush.msra.mxu0 %v7084_v13  ;;  %2454 = vmatpush.msra.mxu2 %v15398_v15  ;;  %v15422_v13 = vld [vmem:[#allocation100_spill] sm:$0xff]  ;;  %v15448_v15 = vld [vmem:[#allocation135_spill] sm:$0xff] }
 0x429   : > { %2442 = vmatpush.msra.mxu1 %v15399_v24  ;;  %v15449_v24 = vld [vmem:[#allocation90_spill] sm:$0xff] }
 0x42a   : > { %2418 = vmatpush.msra.mxu0 %v7085_v16  ;;  %2455 = vmatpush.msra.mxu2 %v15400_v10  ;;  %v15423_v16 = vld [vmem:[#allocation49_spill] sm:$0xff] }
 0x42b   : > { %2507 = vmatpush.msrb.mxu1 %v15401_v51  ;;  %v15450_v10 = vld [vmem:[#allocation137_spill] sm:$0xff]  ;;  %v15451_v51 = vld [vmem:[#allocation94_spill] sm:$0xff] }
 0x42c   : > { %2419 = vmatpush.msra.mxu0 %v15372_v17  ;;  %2443 = vmatmul.f32.vlgmr.msra.gmra.mxu1 %v9662_v20  ;;  %v15424_v17 = vld [vmem:[#allocation107_spill] sm:$0xff] }
 0x42d   : > { %2456 = vmatpush.msra.mxu2 %v15402_v2  ;;  %2508 = vmatpush.msrb.mxu1 %v15403_v22  ;;  %v7088_v2 = vld [vmem:[%s14837_s21 + $0x7b0] sm:$0xff]  ;;  %v15452_v22 = vld [vmem:[#allocation97_spill] sm:$0xff] }
 0x42e   : > { %2420 = vmatpush.msra.mxu0 %v15373_v21  ;;  %v15425_v21 = vld [vmem:[#allocation104_spill] sm:$0xff] }
 0x42f   : > { %2457 = vmatpush.msra.mxu2 %v15404_v26  ;;  %2509 = vmatpush.msrb.mxu1 %v15405_v63  ;;  %v15453_v26 = vld [vmem:[#allocation139_spill] sm:$0xff]  ;;  %v7089_v63 = vld [vmem:[%s14837_s21 + $0x790] sm:$0xff] }
 0x430   : > { %2421 = vmatpush.msra.mxu0 %v15375_v35  ;;  %v15427_v35 = vld [vmem:[#allocation111_spill] sm:$0xff] }
 0x431   : > { %2458 = vmatpush.msra.mxu2 %v15406_v34  ;;  %2510 = vmatpush.msrb.mxu1 %v15407_v48  ;;  %v15454_v34 = vld [vmem:[#allocation101_spill] sm:$0xff]  ;;  %v7090_v48 = vld [vmem:[%s14837_s21 + $0x770] sm:$0xff] }
 0x432   : > { %2422 = vmatpush.msra.mxu0 %v15377_v23  ;;  %v15429_v23 = vld [vmem:[#allocation57_spill] sm:$0xff] }
 0x433   : > { %2459 = vmatpush.msra.mxu2 %v15408_v38  ;;  %2511 = vmatpush.msrb.mxu1 %v15409_v39  ;;  %v15455_v38 = vld [vmem:[#allocation141_spill] sm:$0xff] }
 0x434   : > { %v15456_v39 = vld [vmem:[#allocation105_spill] sm:$0xff] }
 0x435   : > { %2460 = vmatpush.msra.mxu2 %v15411_v53  ;;  %2512 = vmatpush.msrb.mxu1 %v15412_v58  ;;  %v15457_v53 = vld [vmem:[#allocation143_spill] sm:$0xff]  ;;  %v15458_v58 = vld [vmem:[#allocation109_spill] sm:$0xff] }
 0x437   : > { %2461 = vmatpush.msra.mxu2 %v15414_v61  ;;  %2513 = vmatpush.msrb.mxu1 %v15415_v1  ;;  %v15459_v61 = vld [vmem:[#allocation145_spill] sm:$0xff] }
 0x438   : > { %v15460_v1 = vld [vmem:[#allocation113_spill] sm:$0xff] }
 0x439   : > { %2462 = vmatpush.msra.mxu2 %v15417_v4  ;;  %2514 = vmatpush.msrb.mxu1 %v15418_v5  ;;  %v15461_v4 = vld [vmem:[#allocation117_spill] sm:$0xff]  ;;  %v7094_v5 = vld [vmem:[%s14837_s21 + $0x6f0] sm:$0xff] }
 0x43a   : > { %2463 = vmatmul.f32.vlgmr.msra.gmra.mxu2 %v9676_v62 }
 0x43b   : > { %2527 = vmatpush.msrb.mxu2 %v15419_v8  ;;  %2515 = vmatpush.msrb.mxu1 %v15421_v12  ;;  %v15462_v8 = vld [vmem:[#allocation121_spill] sm:$0xff]  ;;  %v15464_v12 = vld [vmem:[#allocation50_spill] sm:$0xff] }
 0x43d   : > { %2528 = vmatpush.msrb.mxu2 %v15422_v13  ;;  %2516 = vmatpush.msrb.mxu1 %v15424_v17  ;;  %v15465_v13 = vld [vmem:[#allocation129_spill] sm:$0xff] }
 0x43e   : > { %v15467_v17 = vld [vmem:[#allocation133_spill] sm:$0xff] }
 0x43f   : > { %2529 = vmatpush.msrb.mxu2 %v15425_v21  ;;  %2517 = vmatpush.msrb.mxu1 %v15427_v35  ;;  %v15468_v21 = vld [vmem:[#allocation58_spill] sm:$0xff] }
 0x440   : > { %v9706_v55 = vpop.f32.mrf.mxu3  ;;  %v15470_v35 = vld [vmem:[#allocation62_spill] sm:$0xff] }
 0x441   : > { %2323 = vmatmul.f32.vlgmr.msra.gmra.mxu3 %v9706_v55  ;;  %2530 = vmatpush.msrb.mxu2 %v15428_v40  ;;  %v15471_v40 = vld [vmem:[#allocation138_spill] sm:$0xff] }
 0x442   : > { %2467 = vmatpush.msra.mxu3 %v15410_v47  ;;  %2518 = vmatpush.msrb.mxu1 %v15430_v29  ;;  %v7091_v47 = vld [vmem:[%s14837_s21 + $0x750] sm:$0xff] }
 0x443   : > { %2531 = vmatpush.msrb.mxu2 %v15431_v44  ;;  %v15473_v29 = vld [vmem:[#allocation140_spill] sm:$0xff]  ;;  %v15474_v44 = vld [vmem:[#allocation70_spill] sm:$0xff] }
 0x444   : > { %2468 = vmatpush.msra.mxu3 %v15413_v59  ;;  %2519 = vmatpush.msrb.mxu1 %v15433_v50  ;;  %v7092_v59 = vld [vmem:[%s14837_s21 + $0x730] sm:$0xff] }
 0x445   : > { %2532 = vmatpush.msrb.mxu2 %v15435_v49  ;;  %v15476_v50 = vld [vmem:[#allocation72_spill] sm:$0xff] }
 0x446   : > { %2469 = vmatpush.msra.mxu3 %v15416_v0  ;;  %2520 = vmatpush.msrb.mxu1 %v15436_v3  ;;  %v7093_v0 = vld [vmem:[%s14837_s21 + $0x710] sm:$0xff]  ;;  %v15479_v3 = vld [vmem:[#allocation146_spill] sm:$0xff] }
 0x447   : > { %2533 = vmatpush.msrb.mxu2 %v15438_v11  ;;  %v15478_v49 = vld [vmem:[#allocation76_spill] sm:$0xff] }
 0x448   : > { %2470 = vmatpush.msra.mxu3 %v15420_v9  ;;  %2521 = vmatpush.msrb.mxu1 %v15439_v43  ;;  %v15463_v9 = vld [vmem:[#allocation125_spill] sm:$0xff]  ;;  %v15481_v11 = vld [vmem:[#allocation84_spill] sm:$0xff] }
 0x449   : > { %2403 = vmatmul.f32.vlgmr.msrb.gmra.mxu3 %v9706_v55  ;;  %2534 = vmatpush.msrb.mxu2 %v15441_v19  ;;  %v15482_v43 = vld [vmem:[#allocation88_spill] sm:$0xff]  ;;  %v15484_v19 = vld [vmem:[#allocation98_spill] sm:$0xff] }
 0x44a   : > { %2471 = vmatpush.msra.mxu3 %v15423_v16  ;;  %2522 = vmatpush.msrb.mxu1 %v15442_v25  ;;  %v15466_v16 = vld [vmem:[#allocation54_spill] sm:$0xff] }
 0x44b   : > { %2535 = vmatpush.msrb.mxu2 %v15444_v56  ;;  %2523 = vmatmul.f32.vlgmr.msrb.gmra.mxu1 %v9662_v20  ;;  %v7087_v20 = vld [vmem:[%s14837_s21 + $0x7d0] sm:$0xff]  ;;  %v15485_v25 = vld [vmem:[#allocation102_spill] sm:$0xff] }
 0x44c   : > { %2472 = vmatpush.msra.mxu3 %v15426_v27  ;;  %v15469_v27 = vld [vmem:[#allocation136_spill] sm:$0xff]  ;;  %v15487_v56 = vld [vmem:[#allocation110_spill] sm:$0xff] }
 0x44d   : > { %2536 = vmatpush.msrb.mxu2 %v15446_v54  ;;  %v15489_v54 = vld [vmem:[#allocation118_spill] sm:$0xff] }
 0x44e   : > { %2473 = vmatpush.msra.mxu3 %v15429_v23  ;;  %v15472_v23 = vld [vmem:[#allocation66_spill] sm:$0xff] }
 0x44f   : > { %2537 = vmatpush.msrb.mxu2 %v15448_v15  ;;  %v15493_v15 = vld [vmem:[#allocation134_spill] sm:$0xff] }
 0x450   : > { %2474 = vmatpush.msra.mxu3 %v15432_v41  ;;  %v15475_v41 = vld [vmem:[#allocation142_spill] sm:$0xff] }
 0x451   : > { %2538 = vmatpush.msrb.mxu2 %v15450_v10 }
 0x452   : > { %2475 = vmatpush.msra.mxu3 %v15434_v60  ;;  %v15477_v60 = vld [vmem:[#allocation144_spill] sm:$0xff] }
 0x453   : > { %2539 = vmatpush.msrb.mxu2 %v15453_v26 }
 0x454   : > { %2476 = vmatpush.msra.mxu3 %v15437_v6  ;;  %v15480_v6 = vld [vmem:[#allocation80_spill] sm:$0xff] }
 0x455   : > { %2540 = vmatpush.msrb.mxu2 %v15455_v38 }
 0x456   : > { %2477 = vmatpush.msra.mxu3 %v15440_v14  ;;  %v15483_v14 = vld [vmem:[#allocation92_spill] sm:$0xff] }
 0x457   : > { %2541 = vmatpush.msrb.mxu2 %v15457_v53 }
 0x458   : > { %2478 = vmatpush.msra.mxu3 %v15443_v36  ;;  %v15486_v36 = vld [vmem:[#allocation106_spill] sm:$0xff] }
 0x459   : > { %2542 = vmatpush.msrb.mxu2 %v15459_v61 }
 0x45a   : > { %2479 = vmatpush.msra.mxu3 %v15445_v46  ;;  %2543 = vmatmul.f32.vlgmr.msrb.gmra.mxu2 %v9676_v62  ;;  %v7095_v62 = vld [vmem:[%s14837_s21 + $0x6d0] sm:$0xff]  ;;  %v15488_v46 = vld [vmem:[#allocation114_spill] sm:$0xff] }
 0x45c   : > { %2480 = vmatpush.msra.mxu3 %v15447_v57  ;;  %v15490_v57 = vld [vmem:[#allocation122_spill] sm:$0xff] }
 0x45e   : > { %2481 = vmatpush.msra.mxu3 %v15449_v24 }
 0x460   : > { %2482 = vmatpush.msra.mxu3 %v15451_v51 }
 0x461   : > { %2483 = vmatmul.f32.vlgmr.msra.gmra.mxu3 %v9706_v55 }
 0x462   : > { %2547 = vmatpush.msrb.mxu3 %v15452_v22 }
 0x464   : > { %2548 = vmatpush.msrb.mxu3 %v15454_v34 }
 0x466   : > { %2549 = vmatpush.msrb.mxu3 %v15456_v39 }
 0x468   : > { %2550 = vmatpush.msrb.mxu3 %v15458_v58 }
 0x46a   : > { %2551 = vmatpush.msrb.mxu3 %v15460_v1 }
 0x46c   : > { %2552 = vmatpush.msrb.mxu3 %v15461_v4 }
 0x46e   : > { %2553 = vmatpush.msrb.mxu3 %v15462_v8  ;;  %v9840_v8 = vld [vmem:[%s15494_s30] sm:$0xf] }
 0x470   : > { %v9751_v52 = vpop.f32.mrf.mxu0  ;;  %2554 = vmatpush.msrb.mxu3 %v15463_v9 }
 0x471   : > { %2343 = vmatmul.f32.vlgmr.msrb.gmra.mxu0 %v9751_v52 }
 0x472   : > { %2487 = vmatpush.msrb.mxu0 %v7086_v45  ;;  %2555 = vmatpush.msrb.mxu3 %v15465_v13  ;;  %v15492_v45 = vld [vmem:[#allocation130_spill] sm:$0xff] }
 0x474   : > { %2488 = vmatpush.msrb.mxu0 %v7087_v20  ;;  %2556 = vmatpush.msrb.mxu3 %v15467_v17 }
 0x476   : > { %2489 = vmatpush.msrb.mxu0 %v7088_v2  ;;  %2557 = vmatpush.msrb.mxu3 %v15469_v27 }
 0x478   : > { %2490 = vmatpush.msrb.mxu0 %v7089_v63  ;;  %2558 = vmatpush.msrb.mxu3 %v15471_v40 }
 0x479   : > { %2423 = vmatmul.f32.vlgmr.msra.gmra.mxu0 %v9751_v52 }
 0x47a   : > { %2491 = vmatpush.msrb.mxu0 %v7090_v48  ;;  %2559 = vmatpush.msrb.mxu3 %v15473_v29 }
 0x47c   : > { %2492 = vmatpush.msrb.mxu0 %v7091_v47  ;;  %2560 = vmatpush.msrb.mxu3 %v15475_v41 }
 0x47e   : > { %2493 = vmatpush.msrb.mxu0 %v7092_v59  ;;  %2561 = vmatpush.msrb.mxu3 %v15477_v60 }
 0x480   : > { %2494 = vmatpush.msrb.mxu0 %v7093_v0  ;;  %2562 = vmatpush.msrb.mxu3 %v15479_v3 }
 0x481   : > { %2563 = vmatmul.f32.vlgmr.msrb.gmra.mxu3 %v9706_v55  ;;  %v15491_v55 = vld [vmem:[#allocation126_spill] sm:$0xff] }
 0x482   : > { %2495 = vmatpush.msrb.mxu0 %v7094_v5 }
 0x484   : > { %2496 = vmatpush.msrb.mxu0 %v7095_v62 }
 0x486   : > { %2497 = vmatpush.msrb.mxu0 %v15464_v12  ;;  %v9845_v12 = vld [vmem:[%s14823_s7] sm:$0xf] }
 0x487   : > { %v2284_v24 = vpop.f32.mrf.mxu1  ;;  %v2657_v29 = vperm.slane %v9845_v12, 0 }
 0x488   : > { %2498 = vmatpush.msrb.mxu0 %v15466_v16  ;;  %v2285_v20 = vadd.f32 1e-05, %v2284_v24 }
 0x48a   : > { %2499 = vmatpush.msrb.mxu0 %v15468_v21  ;;  %v2640_v21 = vperm.slane %v9840_v8, 0 }
 0x48c   : > { %2500 = vmatpush.msrb.mxu0 %v15470_v35 }
 0x48e   : > { %2501 = vmatpush.msrb.mxu0 %v15472_v23 }
 0x48f   : > { %v2364_v26 = vpop.f32.mrf.mxu1 }
 0x490   : > { %2502 = vmatpush.msrb.mxu0 %v15474_v44  ;;  %v2365_v63 = vadd.f32 1e-05, %v2364_v26 }
 0x491   : > { %2503 = vmatmul.f32.vlgmr.msrb.gmra.mxu0 %v9751_v52 }
 0x492   : > { %2567 = vmatpush.msra.mxu0 %v15476_v50 }
 0x494   : > { %2568 = vmatpush.msra.mxu0 %v15478_v49 }
 0x496   : > { %2569 = vmatpush.msra.mxu0 %v15480_v6 }
 0x498   : > { %2570 = vmatpush.msra.mxu0 %v15481_v11 }
 0x49a   : > { %2571 = vmatpush.msra.mxu0 %v15482_v43 }
 0x49c   : > { %2572 = vmatpush.msra.mxu0 %v15483_v14  ;;  %v2304_v10 = vpop.f32.mrf.mxu2 }
 0x49d   : > { %v2305_v51 = vadd.f32 %v2304_v10, %v2285_v20 }
 0x49e   : > { %2573 = vmatpush.msra.mxu0 %v15484_v19 }
 0x4a0   : > { %2574 = vmatpush.msra.mxu0 %v15485_v25 }
 0x4a2   : > { %2575 = vmatpush.msra.mxu0 %v15486_v36  ;;  %v2641_v36 = vperm.slane %v9840_v8, 1 }
 0x4a4   : > { %2576 = vmatpush.msra.mxu0 %v15487_v56  ;;  %v2384_v38 = vpop.f32.mrf.mxu2  ;;  %v2658_v56 = vperm.slane %v9845_v12, 1 }
 0x4a5   : > { %v2385_v39 = vadd.f32 %v2384_v38, %v2365_v63 }
 0x4a6   : > { %2577 = vmatpush.msra.mxu0 %v15488_v46 }
 0x4a8   : > { %2578 = vmatpush.msra.mxu0 %v15489_v54 }
 0x4a9   : > { %v2444_v35 = vpop.f32.mrf.mxu1 }
 0x4aa   : > { %2579 = vmatpush.msra.mxu0 %v15490_v57  ;;  %v2445_v44 = vadd.f32 1e-05, %v2444_v35 }
 0x4ac   : > { %2580 = vmatpush.msra.mxu0 %v15491_v55 }
 0x4ae   : > { %2581 = vmatpush.msra.mxu0 %v15492_v45 }
 0x4b0   : > { %2582 = vmatpush.msra.mxu0 %v15493_v15 }
 0x4b1   : > { %2583 = vmatmul.f32.vlgmr.msra.gmra.mxu0 %v9751_v52 }
 0x4bd   : > { %v2464_v50 = vpop.f32.mrf.mxu2 }
 0x4be   : > { %v2465_v43 = vadd.f32 %v2464_v50, %v2445_v44 }
 0x4c4   : > { %v2324_v2 = vpop.f32.mrf.mxu3 }
 0x4c5   : > { %v2325_v22 = vadd.f32 %v2324_v2, %v2305_v51 }
 0x4cc   : > { %v2404_v47 = vpop.f32.mrf.mxu3 }
 0x4cd   : > { %v2405_v53 = vadd.f32 %v2404_v47, %v2385_v39 }
 0x4dd   : > { %v2544_v38 = vpop.f32.mrf.mxu2 }
 0x4ee   : > { %v2344_v34 = vpop.f32.mrf.mxu0 }
 0x4ef   : > { %v2345_v48 = vadd.f32 %v2344_v34, %v2325_v22  ;;  %v2524_v34 = vpop.f32.mrf.mxu1 }
 0x4f1   : > { %6937 = vrsqrt.f32 %v2345_v48  ;;  %vm2593_vm12 = vweird.f32 %v2345_v48 }
 0x4f6   : > { %v2424_v58 = vpop.f32.mrf.mxu0 }
 0x4f7   : > { %v6938_v59 = vpop.eup %6937  ;;  %v2425_v61 = vadd.f32 %v2424_v58, %v2405_v53  ;;  %v2525_v53 = vadd.f32 1e-05, %v2524_v34 }
 0x4f8   : > { %v2588_v1 = vmul.f32 %v6938_v59, %v2345_v48  ;;  %vm2594_vm11 = vweird.f32 %v6938_v59 }
 0x4f9   : > { %6939 = vrsqrt.f32 %v2425_v61  ;;  %vm2595_vm13 = vmor %vm2593_vm12, %vm2594_vm11  ;;  %vm2603_vm15 = vweird.f32 %v2425_v61 }
 0x4fa   : > { %v2589_v52 = vmul.f32 %v6938_v59, %v2588_v1 }
 0x4fc   : > { %v2590_v0 = vmul.f32 0.5, %v2589_v52  ;;  %v15495_v52 = vld [vmem:[#allocation2_spill] sm:$0xff] }
 0x4fe   : > { %v2591_v4 = vsub.f32 1.5, %v2590_v0  ;;  %v2833_v0 = vperm.slane %v15495_v52, 0 }
 0x4ff   : > { %v6940_v5 = vpop.eup %6939 }
 0x500   : > { %v2592_v62 = vmul.f32 %v6938_v59, %v2591_v4  ;;  %v2598_v9 = vmul.f32 %v6940_v5, %v2425_v61  ;;  %vm2604_vm14 = vweird.f32 %v6940_v5  ;;  %v15496_v4 = vld [vmem:[#allocation3_spill] sm:$0xff] }
 0x501   : > { %vm2605_vm0 = vmor %vm2603_vm15, %vm2604_vm14 }
 0x502   : > { %v2596_v13 = vsel %vm2595_vm13, %v6938_v59, %v2592_v62  ;;  %v2599_v16 = vmul.f32 %v6940_v5, %v2598_v9  ;;  %v2545_v9 = vadd.f32 %v2544_v38, %v2525_v53 }
 0x503   : > { %v2627_v17 = vperm.slane %v2596_v13, 0 }
 0x504   : > { %v2600_v27 = vmul.f32 0.5, %v2599_v16 }
 0x505   : > { %v2631_v40 = vmul.f32 %v2627_v17, %v9355_v7  ;;  %v2635_v23 = vmul.f32 %v2627_v17, %v9352_v30  ;;  %v2484_v7 = vpop.f32.mrf.mxu3 }
 0x506   : > { %v2601_v41 = vsub.f32 1.5, %v2600_v27  ;;  %v2485_v57 = vadd.f32 %v2484_v7, %v2465_v43 }
 0x507   : > { %v2648_v60 = vmul.f32 %v2640_v21, %v2631_v40  ;;  %v2652_v49 = vmul.f32 %v2640_v21, %v2635_v23  ;;  %v2642_v21 = vperm.slane %v9840_v8, 2 }
 0x508   : > { %v2602_v3 = vmul.f32 %v6940_v5, %v2601_v41 }
 0x509   : > { %v9851_v6 = vadd.f32 %v2657_v29, %v2648_v60  ;;  %v9853_v11 = vadd.f32 %v2657_v29, %v2652_v49  ;;  %v2659_v60 = vperm.slane %v9845_v12, 2 }
 0x50a   : > { %v2606_v14 = vsel %vm2605_vm0, %v6940_v5, %v2602_v3  ;;  %v2845_v5 = vperm.slane %v15496_v4, 0  ;;  %v6440_v4 = vld [vmem:[%s14824_s8 + $0x9e0] sm:$0xff] }
 0x50b   : > { %v6356_v30 = vmul.f32 -1.442695, %v9851_v6  ;;  %v6360_v19 = vmul.f32 -1.442695, %v9853_v11  ;;  %v2628_v25 = vperm.slane %v2606_v14, 0 }
 0x50d   : > { %6941 = vpow2.f32 %v6356_v30  ;;  %v2632_v46 = vmul.f32 %v2628_v25, %v9370_v37  ;;  %v2636_v54 = vmul.f32 %v2628_v25, %v9367_v31  ;;  %v2564_v7 = vpop.f32.mrf.mxu3 }
 0x50e   : > { %6943 = vpow2.f32 %v6360_v19  ;;  %v2504_v55 = vpop.f32.mrf.mxu0 }
 0x50f   : > { %v2649_v45 = vmul.f32 %v2641_v36, %v2632_v46  ;;  %v2653_v15 = vmul.f32 %v2641_v36, %v2636_v54  ;;  %v2505_v24 = vadd.f32 %v2504_v55, %v2485_v57 }
 0x511   : > { %v9861_v20 = vadd.f32 %v2658_v56, %v2649_v45  ;;  %v9863_v10 = vadd.f32 %v2658_v56, %v2653_v15  ;;  %6945 = vrsqrt.f32 %v2505_v24  ;;  %vm2613_vm5 = vweird.f32 %v2505_v24 }
 0x513   : > { %v6942_v51 = vpop.eup %6941  ;;  %v6357_v2 = vmul.f32 -1.442695, %v9861_v20  ;;  %v6361_v37 = vmul.f32 -1.442695, %v9863_v10 }
 0x514   : > { %v6944_v22 = vpop.eup %6943  ;;  %v2697_v26 = vadd.f32 1.0, %v6942_v51 }
 0x515   : > { %v2701_v63 = vadd.f32 1.0, %v6944_v22  ;;  %6947 = vpow2.f32 %v6357_v2 }
 0x516   : > { %6949 = vrcp.f32 %v2697_v26  ;;  %v2714_v16 = vand.u32 2147483647, %v2697_v26  ;;  %v2716_v35 = vand.u32 2147483648, %v2697_v26  ;;  %vm2710_vm3 = vweird.f32 %v2697_v26 }
 0x517   : > { %v6946_v31 = vpop.eup %6945  ;;  %6951 = vrcp.f32 %v2701_v63  ;;  %v2774_v40 = vand.u32 2147483647, %v2701_v63  ;;  %v2776_v44 = vand.u32 2147483648, %v2701_v63  ;;  %vm2770_vm7 = vweird.f32 %v2701_v63 }
 0x518   : > { %6953 = vpow2.f32 %v6361_v37  ;;  %v2608_v48 = vmul.f32 %v6946_v31, %v2505_v24  ;;  %vm2614_vm1 = vweird.f32 %v6946_v31  ;;  %vm9877_vm6 = vcmp.eq.f32.partialorder %v2714_v16, 8.507059e+37 }
 0x519   : > { %vm2615_vm8 = vmor %vm2613_vm5, %vm2614_vm1  ;;  %v2717_v19 = vor.u32 1.1754944e-38, %v2716_v35  ;;  %vm2775_vm12 = vcmp.eq.f32.partialorder %v2774_v40, 8.507059e+37  ;;  %v2777_v36 = vor.u32 1.1754944e-38, %v2776_v44  ;;  %v2565_v24 = vadd.f32 %v2564_v7, %v2545_v9 }
 0x51a   : > { %v2609_v39 = vmul.f32 %v6946_v31, %v2608_v48 }
 0x51b   : > { %v6948_v47 = vpop.eup %6947 }
 0x51c   : > { %v6950_v58 = vpop.eup %6949  ;;  %v9867_v59 = vadd.f32 1.0, %v6948_v47  ;;  %v2610_v61 = vmul.f32 0.5, %v2609_v39 }
 0x51d   : > { %v6952_v1 = vpop.eup %6951  ;;  %v2706_v62 = vmul.f32 %v6950_v58, %v2697_v26  ;;  %vm2711_vm2 = vweird.f32 %v6950_v58 }
 0x51e   : > { %v6954_v13 = vpop.eup %6953  ;;  %v2766_v17 = vmul.f32 %v6952_v1, %v2701_v63  ;;  %6955 = vrcp.f32 %v9867_v59  ;;  %v2611_v41 = vsub.f32 1.5, %v2610_v61  ;;  %vm2771_vm4 = vweird.f32 %v6952_v1  ;;  %vm2712_vm11 = vmor %vm2710_vm3, %vm2711_vm2 }
 0x51f   : > { %v2707_v27 = vsub.f32 1.0, %v2706_v62  ;;  %v9873_v23 = vadd.f32 1.0, %v6954_v13  ;;  %vm2772_vm13 = vmor %vm2770_vm7, %vm2771_vm4  ;;  %v2731_v54 = vand.u32 2147483648, %v9867_v59  ;;  %vm2725_vm14 = vweird.f32 %v9867_v59 }
 0x520   : > { %v2767_v29 = vsub.f32 1.0, %v2766_v17  ;;  %v2612_v14 = vmul.f32 %v6946_v31, %v2611_v41  ;;  %v2729_v63 = vand.u32 2147483647, %v9867_v59 }
 0x521   : > { %v2708_v50 = vmul.f32 %v6950_v58, %v2707_v27  ;;  %6957 = vrcp.f32 %v9873_v23  ;;  %v2732_v38 = vor.u32 1.1754944e-38, %v2731_v54  ;;  %vm2785_vm3 = vweird.f32 %v9873_v23 }
 0x522   : > { %v2768_v49 = vmul.f32 %v6952_v1, %v2767_v29  ;;  %v2616_v57 = vsel %vm2615_vm8, %v6946_v31, %v2612_v14  ;;  %vm2730_vm2 = vcmp.eq.f32.partialorder %v2729_v63, 8.507059e+37  ;;  %v6432_v14 = vld [vmem:[%s14824_s8 + $0x9a0] sm:$0xff] }
 0x523   : > { %v2709_v3 = vadd.f32 %v6950_v58, %v2708_v50  ;;  %v2629_v15 = vperm.slane %v2616_v57, 0  ;;  %v6424_v57 = vld [vmem:[%s14824_s8 + $0x960] sm:$0xff] }
 0x524   : > { %v6956_v30 = vpop.eup %6955  ;;  %v2769_v25 = vadd.f32 %v6952_v1, %v2768_v49  ;;  %v15500_v49 = vld [vmem:[#allocation5_spill] sm:$0xff]  ;;  %v6496_v63 = vld [vmem:[%s14824_s8 + $0xba0] sm:$0xff] }
 0x525   : > { %v2713_v56 = vsel %vm2712_vm11, %v6950_v58, %v2709_v3  ;;  %v2721_v46 = vmul.f32 %v6956_v30, %v9867_v59  ;;  %v2633_v31 = vmul.f32 %v2629_v15, %v9444_v42  ;;  %vm2726_vm15 = vweird.f32 %v6956_v30 }
 0x526   : > { %v2718_v55 = vsel %vm9877_vm6, %v2717_v19, %v2713_v56  ;;  %v2773_v45 = vsel %vm2772_vm13, %v6952_v1, %v2769_v25  ;;  %v2637_v39 = vmul.f32 %v2629_v15, %v9441_v33  ;;  %v2789_v1 = vand.u32 2147483647, %v9873_v23  ;;  %vm2727_vm0 = vmor %vm2725_vm14, %vm2726_vm15  ;;  %v6504_v15 = vld [vmem:[%s14824_s8 + $0xbe0] sm:$0xff] }
 0x527   : > { %v6958_v51 = vpop.eup %6957  ;;  %v2778_v2 = vsel %vm2775_vm12, %v2777_v36, %v2773_v45  ;;  %v2825_v22 = vmul.f32 %v2718_v55, %v9851_v6  ;;  %v2722_v26 = vsub.f32 1.0, %v2721_v46  ;;  %v2650_v53 = vmul.f32 %v2642_v21, %v2633_v31  ;;  %v6428_v36 = vld [vmem:[%s14824_s8 + $0x980] sm:$0xff]  ;;  %v9965_v45 = vld [vmem:[%s15209_s5 + $0x8] sm:$0xff] }
 0x528   : > { %v2829_v37 = vmul.f32 %v2778_v2, %v9853_v11  ;;  %v2781_v34 = vmul.f32 %v6958_v51, %v9873_v23  ;;  %v2791_v11 = vand.u32 2147483648, %v9873_v23  ;;  %v2654_v52 = vmul.f32 %v2642_v21, %v2637_v39  ;;  %v6500_v2 = vld [vmem:[%s14824_s8 + $0xbc0] sm:$0xff] }
 0x529   : > { %v2723_v48 = vmul.f32 %v6956_v30, %v2722_v26  ;;  %v2837_v6 = vmul.f32 %v2833_v0, %v2825_v22  ;;  %vm2786_vm1 = vweird.f32 %v6958_v51  ;;  %v9897_v42 = vadd.f32 %v2659_v60, %v2650_v53  ;;  %v6416_v22 = vld [vmem:[%s14824_s8 + $0x920] sm:$0xff] }
 0x52a   : > { %v2782_v47 = vsub.f32 1.0, %v2781_v34  ;;  %v2841_v58 = vmul.f32 %v2833_v0, %v2829_v37  ;;  %v9904_v0 = vadd.f32 %v2659_v60, %v2654_v52  ;;  %vm2787_vm4 = vmor %vm2785_vm3, %vm2786_vm1  ;;  %v2792_v27 = vor.u32 1.1754944e-38, %v2791_v11  ;;  %v6436_v60 = vld [vmem:[%s14824_s8 + $0x9c0] sm:$0xff]  ;;  %v10007_v52 = vld [vmem:[%s15209_s5 + $0x10] sm:$0xff] }
 0x52b   : > { %v2724_v61 = vadd.f32 %v6956_v30, %v2723_v48  ;;  %v6358_v17 = vmul.f32 -1.442695, %v9897_v42  ;;  %v9910_v21 = vadd.f32 %v2845_v5, %v2837_v6  ;;  %vm2790_vm5 = vcmp.eq.f32.partialorder %v2789_v1, 8.507059e+37  ;;  %v6412_v34 = vld [vmem:[%s14824_s8 + $0x900] sm:$0xff] }
 0x52c   : > { %v2783_v62 = vmul.f32 %v6958_v51, %v2782_v47  ;;  %v9901_v33 = vadd.f32 %v2845_v5, %v2841_v58  ;;  %v6362_v35 = vmul.f32 -1.442695, %v9904_v0  ;;  %v15499_v5 = vld [vmem:[#allocation4_spill] sm:$0xff]  ;;  %v2846_v3 = vperm.slane %v15500_v49, 0  ;;  %v6492_v47 = vld [vmem:[%s14824_s8 + $0xb80] sm:$0xff] }
 0x52d   : > { %v2728_v9 = vsel %vm2727_vm0, %v6956_v30, %v2724_v61  ;;  %6959 = vpow2.f32 %v6358_v17  ;;  %v2834_v41 = vperm.slane %v15499_v5, 0  ;;  %v6408_v53 = vld [vmem:[%s14824_s8 + $0x8e0] sm:$0xff]  ;;  %v2643_v17 = vperm.slane %v9840_v8, 3 }
 0x52e   : > { %v2733_v13 = vsel %vm2730_vm2, %v2732_v38, %v2728_v9  ;;  %v2784_v16 = vadd.f32 %v6958_v51, %v2783_v62  ;;  %v2584_v59 = vpop.f32.mrf.mxu0  ;;  %2872 = vmatpush.msra.mxu1 %v9901_v33  ;;  %6961 = vpow2.f32 %v6362_v35  ;;  %v6488_v62 = vld [vmem:[%s14824_s8 + $0xb60] sm:$0xff] }
 0x52f   : > { %v9913_v40 = vadd.f32 %v2584_v59, %v2565_v24  ;;  %v2826_v29 = vmul.f32 %v2733_v13, %v9861_v20  ;;  %v9927_v20 = vld [vmem:[%s15209_s5] sm:$0xff] }
 0x530   : > { %v2788_v23 = vsel %vm2787_vm4, %v6958_v51, %v2784_v16  ;;  %2873 = vmatpush.msra.mxu1 %v9910_v21  ;;  %v6420_v24 = vld [vmem:[%s14824_s8 + $0x940] sm:$0xff] }
 0x531   : > { %v2793_v44 = vsel %vm2790_vm5, %v2792_v27, %v2788_v23  ;;  %6963 = vrsqrt.f32 %v9913_v40  ;;  %6364 = vmatmul.msk.f32.vlgmr.msra.gmra.mxu1 %vm1029_vm9, %v9927_v20  ;;  %v2838_v43 = vmul.f32 %v2834_v41, %v2826_v29  ;;  %vm2623_vm7 = vweird.f32 %v9913_v40  ;;  %v6404_v9 = vld [vmem:[%s14824_s8 + $0x8c0] sm:$0xff] }
 0x532   : > { %2964 = vmatpush.msrb.mxu1 %v9901_v33  ;;  %v2830_v50 = vmul.f32 %v2793_v44, %v9863_v10  ;;  %v6400_v23 = vld [vmem:[%s14824_s8 + $0x8a0] sm:$0xff]  ;;  %v2660_v44 = vperm.slane %v9845_v12, 3 }
 0x533   : > { %v6960_v7 = vpop.eup %6959  ;;  %v9951_v54 = vadd.f32 %v2846_v3, %v2838_v43 }
 0x534   : > { %2965 = vmatpush.msrb.mxu1 %v9910_v21  ;;  %v2842_v10 = vmul.f32 %v2834_v41, %v2830_v50  ;;  %v6962_v19 = vpop.eup %6961  ;;  %v9941_v25 = vadd.f32 1.0, %v6960_v7  ;;  %v6480_v41 = vld [vmem:[%s14824_s8 + $0xb20] sm:$0xff] }
 0x535   : > { %v9948_v46 = vadd.f32 1.0, %v6962_v19 }
 0x536   : > { %3555 = vmatpush.msra.mxu1 %v6440_v4  ;;  %v9939_v30 = vadd.f32 %v2846_v3, %v2842_v10  ;;  %6965 = vrcp.f32 %v9941_v25  ;;  %v2744_v6 = vand.u32 2147483647, %v9941_v25  ;;  %v2746_v61 = vand.u32 2147483648, %v9941_v25  ;;  %v6396_v3 = vld [vmem:[%s14824_s8 + $0x880] sm:$0xff] }
 0x537   : > { %v9946_v56 = vpop.eup %6963  ;;  %6967 = vrcp.f32 %v9948_v46  ;;  %v2806_v16 = vand.u32 2147483648, %v9948_v46  ;;  %v2804_v27 = vand.u32 2147483647, %v9948_v46  ;;  %vm2740_vm13 = vweird.f32 %v9941_v25 }
 0x538   : > { %3556 = vmatpush.msra.mxu1 %v6436_v60  ;;  %2895 = vmatpush.msra.mxu2 %v9939_v30  ;;  %v2618_v55 = vmul.f32 %v9946_v56, %v9913_v40  ;;  %vm2624_vm6 = vweird.f32 %v9946_v56  ;;  %v6484_v40 = vld [vmem:[%s14824_s8 + $0xb40] sm:$0xff]  ;;  %vm2745_vm15 = vcmp.eq.f32.partialorder %v2744_v6, 8.507059e+37  ;;  %v2747_v4 = vor.u32 1.1754944e-38, %v2746_v61 }
 0x539   : > { %6365 = vmatmul.msk.f32.gmra.mxu1 %vm1029_vm9, %v9965_v45  ;;  %vm2625_vm11 = vmor %vm2623_vm7, %vm2624_vm6  ;;  %vm2800_vm0 = vweird.f32 %v9948_v46  ;;  %v2807_v60 = vor.u32 1.1754944e-38, %v2806_v16  ;;  %vm2805_vm2 = vcmp.eq.f32.partialorder %v2804_v27, 8.507059e+37  ;;  %v6456_v6 = vld [vmem:[%s14824_s8 + $0xa60] sm:$0xff] }
 0x53a   : > { %3557 = vmatpush.msra.mxu1 %v6432_v14  ;;  %2896 = vmatpush.msra.mxu2 %v9951_v54  ;;  %v2619_v51 = vmul.f32 %v9946_v56, %v2618_v55  ;;  %v6476_v14 = vld [vmem:[%s14824_s8 + $0xb00] sm:$0xff] }
 0x53b   : > { %6366 = vmatmul.msk.f32.vlgmr.msra.gmra.mxu2 %vm1029_vm9, %v9927_v20  ;;  %v6448_v27 = vld [vmem:[%s14824_s8 + $0xa20] sm:$0xff] }
 0x53c   : > { %3558 = vmatpush.msra.mxu1 %v6428_v36  ;;  %2987 = vmatpush.msrb.mxu2 %v9939_v30  ;;  %v6966_v26 = vpop.eup %6965  ;;  %v2620_v37 = vmul.f32 0.5, %v2619_v51  ;;  %v15501_v36 = vld [vmem:[#allocation6_spill] sm:$0xff] }
 0x53d   : > { %v6968_v31 = vpop.eup %6967  ;;  %v2736_v48 = vmul.f32 %v6966_v26, %v9941_v25  ;;  %vm2741_vm8 = vweird.f32 %v6966_v26 }
 0x53e   : > { %3559 = vmatpush.msra.mxu1 %v6424_v57  ;;  %2988 = vmatpush.msrb.mxu2 %v9951_v54  ;;  %v2796_v38 = vmul.f32 %v6968_v31, %v9948_v46  ;;  %v2621_v39 = vsub.f32 1.5, %v2620_v37  ;;  %vm2801_vm12 = vweird.f32 %v6968_v31  ;;  %vm2742_vm14 = vmor %vm2740_vm13, %vm2741_vm8  ;;  %v6472_v57 = vld [vmem:[%s14824_s8 + $0xae0] sm:$0xff] }
 0x53f   : > { %v2737_v58 = vsub.f32 1.0, %v2736_v48  ;;  %vm2802_vm1 = vmor %vm2800_vm0, %vm2801_vm12  ;;  %v6464_v48 = vld [vmem:[%s14824_s8 + $0xaa0] sm:$0xff] }
 0x540   : > { %3578 = vmatpush.msra.mxu2 %v6504_v15  ;;  %3560 = vmatpush.msra.mxu1 %v6420_v24  ;;  %v2797_v1 = vsub.f32 1.0, %v2796_v38  ;;  %v2622_v11 = vmul.f32 %v9946_v56, %v2621_v39  ;;  %v15502_v24 = vld [vmem:[#allocation8_spill] sm:$0xff]  ;;  %v6380_v38 = vld [vmem:[%s14824_s8 + $0x800] sm:$0xff] }
 0x541   : > { %6372 = vmatmul.msk.f32.vlgmr.msrb.gmra.mxu1 %vm1029_vm9, %v10007_v52  ;;  %v2738_v13 = vmul.f32 %v6966_v26, %v2737_v58  ;;  %v2847_v51 = vperm.slane %v15502_v24, 0  ;;  %v6441_v58 = vld [vmem:[%s14824_s8 + $0x9e8] sm:$0xff]  ;;  %v6536_v24 = vld [vmem:[%s14824_s8 + $0xce0] sm:$0xff] }
 0x542   : > { %3579 = vmatpush.msra.mxu2 %v6500_v2  ;;  %3561 = vmatpush.msra.mxu1 %v6416_v22  ;;  %v2798_v59 = vmul.f32 %v6968_v31, %v2797_v1  ;;  %v2626_v35 = vsel %vm2625_vm11, %v9946_v56, %v2622_v11  ;;  %v2835_v56 = vperm.slane %v15501_v36, 0  ;;  %v6468_v22 = vld [vmem:[%s14824_s8 + $0xac0] sm:$0xff]  ;;  %v6437_v11 = vld [vmem:[%s14824_s8 + $0x9c8] sm:$0xff] }
 0x543   : > { %6367 = vmatmul.msk.f32.gmra.mxu2 %vm1029_vm9, %v9965_v45  ;;  %v2739_v8 = vadd.f32 %v6966_v26, %v2738_v13  ;;  %v2630_v29 = vperm.slane %v2626_v35, 0  ;;  %v6564_v1 = vld [vmem:[%s14824_s8 + $0xdc0] sm:$0xff] }
 0x544   : > { %3580 = vmatpush.msra.mxu2 %v6496_v63  ;;  %3562 = vmatpush.msra.mxu1 %v6412_v34  ;;  %v2799_v5 = vadd.f32 %v6968_v31, %v2798_v59  ;;  %v6384_v34 = vld [vmem:[%s14824_s8 + $0x820] sm:$0xff]  ;;  %v6433_v59 = vld [vmem:[%s14824_s8 + $0x9a8] sm:$0xff] }
 0x545   : > { %v2743_v50 = vsel %vm2742_vm14, %v6966_v26, %v2739_v8  ;;  %v2634_v49 = vmul.f32 %v2630_v29, %v9530_v32  ;;  %v2638_v12 = vmul.f32 %v2630_v29, %v9527_v28  ;;  %v6392_v28 = vld [vmem:[%s14824_s8 + $0x860] sm:$0xff]  ;;  %v6425_v29 = vld [vmem:[%s14824_s8 + $0x968] sm:$0xff] }
 0x546   : > { %3581 = vmatpush.msra.mxu2 %v6492_v47  ;;  %3563 = vmatpush.msra.mxu1 %v6408_v53  ;;  %v2748_v10 = vsel %vm2745_vm15, %v2747_v4, %v2743_v50  ;;  %v2803_v43 = vsel %vm2802_vm1, %v6968_v31, %v2799_v5  ;;  %v6460_v47 = vld [vmem:[%s14824_s8 + $0xa80] sm:$0xff] }
 0x547   : > { %v2808_v7 = vsel %vm2805_vm2, %v2807_v60, %v2803_v43  ;;  %v2827_v19 = vmul.f32 %v2748_v10, %v9897_v42  ;;  %v2651_v25 = vmul.f32 %v2643_v17, %v2634_v49  ;;  %v2655_v32 = vmul.f32 %v2643_v17, %v2638_v12  ;;  %v10063_v42 = vld [vmem:[%s15209_s5 + $0x18] sm:$0xff]  ;;  %v6568_v53 = vld [vmem:[%s14824_s8 + $0xde0] sm:$0xff]  ;;  %v6501_v49 = vld [vmem:[%s14824_s8 + $0xbc8] sm:$0xff] }
 0x548   : > { %3582 = vmatpush.msra.mxu2 %v6488_v62  ;;  %3564 = vmatpush.msra.mxu1 %v6404_v9  ;;  %v2831_v46 = vmul.f32 %v2808_v7, %v9904_v0  ;;  %v6388_v0 = vld [vmem:[%s14824_s8 + $0x840] sm:$0xff]  ;;  %v6417_v10 = vld [vmem:[%s14824_s8 + $0x928] sm:$0xff] }
 0x549   : > { %v10056_v55 = vadd.f32 %v2660_v44, %v2651_v25  ;;  %v10058_v15 = vadd.f32 %v2660_v44, %v2655_v32  ;;  %6373 = vmatmul.msk.f32.gmra.mxu1 %vm1029_vm9, %v10063_v42  ;;  %v2839_v26 = vmul.f32 %v2835_v56, %v2827_v19  ;;  %v6452_v13 = vld [vmem:[%s14824_s8 + $0xa40] sm:$0xff]  ;;  %v6505_v44 = vld [vmem:[%s14824_s8 + $0xbe8] sm:$0xff] }
 0x54a   : > { %3583 = vmatpush.msra.mxu2 %v6484_v40  ;;  %3565 = vmatpush.msra.mxu1 %v6400_v23  ;;  %v2843_v2 = vmul.f32 %v2835_v56, %v2831_v46  ;;  %v6560_v17 = vld [vmem:[%s14824_s8 + $0xda0] sm:$0xff]  ;;  %v6429_v40 = vld [vmem:[%s14824_s8 + $0x988] sm:$0xff] }
 0x54b   : > { %6374 = vmatmul.msk.f32.vlgmr.msrb.gmra.mxu2 %vm1029_vm9, %v10007_v52  ;;  %v6359_v37 = vmul.f32 -1.442695, %v10056_v55  ;;  %v6363_v63 = vmul.f32 -1.442695, %v10058_v15  ;;  %v10090_v39 = vadd.f32 %v2847_v51, %v2839_v26  ;;  %v6556_v35 = vld [vmem:[%s14824_s8 + $0xd80] sm:$0xff]  ;;  %v6413_v32 = vld [vmem:[%s14824_s8 + $0x908] sm:$0xff] }
 0x54c   : > { %3584 = vmatpush.msra.mxu2 %v6480_v41  ;;  %3566 = vmatpush.msra.mxu1 %v6396_v3  ;;  %v10081_v31 = vadd.f32 %v2847_v51, %v2843_v2  ;;  %v6444_v23 = vld [vmem:[%s14824_s8 + $0xa00] sm:$0xff]  ;;  %v6421_v41 = vld [vmem:[%s14824_s8 + $0x948] sm:$0xff] }
 0x54d   : > { %6969 = vpow2.f32 %v6359_v37  ;;  %v6552_v8 = vld [vmem:[%s14824_s8 + $0xd60] sm:$0xff]  ;;  %v6493_v46 = vld [vmem:[%s14824_s8 + $0xb88] sm:$0xff] }
 0x54e   : > { %3585 = vmatpush.msra.mxu2 %v6476_v14  ;;  %3567 = vmatpush.msra.mxu1 %v6392_v28  ;;  %6971 = vpow2.f32 %v6363_v63  ;;  %v6548_v5 = vld [vmem:[%s14824_s8 + $0xd40] sm:$0xff]  ;;  %v6497_v14 = vld [vmem:[%s14824_s8 + $0xba8] sm:$0xff] }
 0x54f   : > { %2918 = vmatpush.msra.mxu3 %v10081_v31  ;;  %v6544_v3 = vld [vmem:[%s14824_s8 + $0xd20] sm:$0xff]  ;;  %v6409_v2 = vld [vmem:[%s14824_s8 + $0x8e8] sm:$0xff] }
 0x550   : > { %3586 = vmatpush.msra.mxu2 %v6472_v57  ;;  %3568 = vmatpush.msra.mxu1 %v6388_v0  ;;  %v6540_v25 = vld [vmem:[%s14824_s8 + $0xd00] sm:$0xff]  ;;  %v6445_v26 = vld [vmem:[%s14824_s8 + $0xa08] sm:$0xff] }
 0x551   : > { %2919 = vmatpush.msra.mxu3 %v10090_v39 }
 0x552   : > { %3587 = vmatpush.msra.mxu2 %v6468_v22  ;;  %3569 = vmatpush.msra.mxu1 %v6384_v34  ;;  %v6489_v22 = vld [vmem:[%s14824_s8 + $0xb68] sm:$0xff]  ;;  %v6532_v34 = vld [vmem:[%s14824_s8 + $0xcc0] sm:$0xff] }
 0x553   : > { %3010 = vmatpush.msrb.mxu3 %v10081_v31  ;;  %6375 = vmatmul.msk.f32.gmra.mxu2 %vm1029_vm9, %v10063_v42  ;;  %v6970_v61 = vpop.eup %6969 }
 0x554   : > { %3588 = vmatpush.msra.mxu2 %v6464_v48  ;;  %3570 = vmatpush.msra.mxu1 %v6380_v38  ;;  %v6972_v62 = vpop.eup %6971  ;;  %v10118_v9 = vadd.f32 1.0, %v6970_v61  ;;  %v6528_v61 = vld [vmem:[%s14824_s8 + $0xca0] sm:$0xff] }
 0x555   : > { %6368 = vmatmul.msk.f32.vlgmr.msra.gmra.mxu3 %vm1029_vm9, %v9927_v20  ;;  %3571 = vmatmul.f32.vlgmr.msra.gmra.mxu1 %v9910_v21  ;;  %v10123_v16 = vadd.f32 1.0, %v6972_v62  ;;  %v6401_v62 = vld [vmem:[%s14824_s8 + $0x8a8] sm:$0xff] }
 0x556   : > { %3589 = vmatpush.msra.mxu2 %v6460_v47  ;;  %3011 = vmatpush.msrb.mxu3 %v10090_v39  ;;  %6973 = vrcp.f32 %v10118_v9  ;;  %v2761_v7 = vand.u32 2147483648, %v10118_v9  ;;  %v2759_v36 = vand.u32 2147483647, %v10118_v9  ;;  %vm2755_vm5 = vweird.f32 %v10118_v9  ;;  %v6405_v47 = vld [vmem:[%s14824_s8 + $0x8c8] sm:$0xff] }
 0x557   : > { %3647 = vmatpush.msrb.mxu1 %v6441_v58  ;;  %6975 = vrcp.f32 %v10123_v16  ;;  %v2821_v56 = vand.u32 2147483648, %v10123_v16  ;;  %v2819_v0 = vand.u32 2147483647, %v10123_v16  ;;  %vm2815_vm7 = vweird.f32 %v10123_v16 }
 0x558   : > { %3601 = vmatpush.msra.mxu3 %v6568_v53  ;;  %3590 = vmatpush.msra.mxu2 %v6456_v6  ;;  %v2762_v37 = vor.u32 1.1754944e-38, %v2761_v7  ;;  %vm2760_vm8 = vcmp.eq.f32.partialorder %v2759_v36, 8.507059e+37  ;;  %v6485_v53 = vld [vmem:[%s14824_s8 + $0xb48] sm:$0xff]  ;;  %v6632_v7 = vld [vmem:[%s14824_s8 + $0xfe0] sm:$0xff]  ;;  %v6438_v36 = vld [vmem:[%s14824_s8 + $0x9d0] sm:$0xff] }
 0x559   : > { %3648 = vmatpush.msrb.mxu1 %v6437_v11  ;;  %v2822_v38 = vor.u32 1.1754944e-38, %v2821_v56  ;;  %vm2820_vm12 = vcmp.eq.f32.partialorder %v2819_v0, 8.507059e+37  ;;  %v6453_v56 = vld [vmem:[%s14824_s8 + $0xa48] sm:$0xff]  ;;  %v6434_v0 = vld [vmem:[%s14824_s8 + $0x9b0] sm:$0xff] }
 0x55a   : > { %3602 = vmatpush.msra.mxu3 %v6564_v1  ;;  %3591 = vmatpush.msra.mxu2 %v6452_v13  ;;  %v15505_v13 = vld [vmem:[#allocation7_spill] sm:$0xff] }
 0x55b   : > { %3649 = vmatpush.msrb.mxu1 %v6433_v59  ;;  %v6524_v59 = vld [vmem:[%s14824_s8 + $0xc80] sm:$0xff] }
 0x55c   : > { %3603 = vmatpush.msra.mxu3 %v6560_v17  ;;  %3592 = vmatpush.msra.mxu2 %v6448_v27  ;;  %v6974_v4 = vpop.eup %6973  ;;  %v6477_v27 = vld [vmem:[%s14824_s8 + $0xb08] sm:$0xff] }
 0x55d   : > { %3650 = vmatpush.msrb.mxu1 %v6429_v40  ;;  %6369 = vmatmul.msk.f32.gmra.mxu3 %vm1029_vm9, %v9965_v45  ;;  %v6976_v50 = vpop.eup %6975  ;;  %v2751_v60 = vmul.f32 %v6974_v4, %v10118_v9  ;;  %vm2756_vm3 = vweird.f32 %v6974_v4  ;;  %v6481_v9 = vld [vmem:[%s14824_s8 + $0xb28] sm:$0xff] }
 0x55e   : > { %3604 = vmatpush.msra.mxu3 %v6556_v35  ;;  %3593 = vmatpush.msra.mxu2 %v6444_v23  ;;  %v2811_v12 = vmul.f32 %v6976_v50, %v10123_v16  ;;  %vm2816_vm4 = vweird.f32 %v6976_v50  ;;  %vm10202_vm6 = vmor %vm2755_vm5, %vm2756_vm3  ;;  %v2836_v16 = vperm.slane %v15505_v13, 0  ;;  %v15506_v35 = vld [vmem:[#allocation9_spill] sm:$0xff]  ;;  %v6520_v23 = vld [vmem:[%s14824_s8 + $0xc60] sm:$0xff] }
 0x55f   : > { %3574 = vmatmul.f32.gmra.mxu1 %v9901_v33  ;;  %3594 = vmatmul.f32.vlgmr.msra.gmra.mxu2 %v9951_v54  ;;  %v2752_v43 = vsub.f32 1.0, %v2751_v60  ;;  %vm2817_vm11 = vmor %vm2815_vm7, %vm2816_vm4  ;;  %v2848_v40 = vperm.slane %v15506_v35, 0  ;;  %v6494_v13 = vld [vmem:[%s14824_s8 + $0xb90] sm:$0xff]  ;;  %v6533_v35 = vld [vmem:[%s14824_s8 + $0xcc8] sm:$0xff] }
 0x560   : > { %3605 = vmatpush.msra.mxu3 %v6552_v8  ;;  %3651 = vmatpush.msrb.mxu1 %v6425_v29  ;;  %v2812_v19 = vsub.f32 1.0, %v2811_v12  ;;  %v6393_v8 = vld [vmem:[%s14824_s8 + $0x868] sm:$0xff] }
 0x561   : > { %3670 = vmatpush.msrb.mxu2 %v6505_v44  ;;  %v2753_v28 = vmul.f32 %v6974_v4, %v2752_v43  ;;  %v6473_v44 = vld [vmem:[%s14824_s8 + $0xae8] sm:$0xff] }
 0x562   : > { %3606 = vmatpush.msra.mxu3 %v6548_v5  ;;  %3652 = vmatpush.msrb.mxu1 %v6421_v41  ;;  %v2813_v57 = vmul.f32 %v6976_v50, %v2812_v19  ;;  %v6516_v5 = vld [vmem:[%s14824_s8 + $0xc40] sm:$0xff]  ;;  %v6389_v41 = vld [vmem:[%s14824_s8 + $0x848] sm:$0xff] }
 0x563   : > { %3671 = vmatpush.msrb.mxu2 %v6501_v49  ;;  %v2754_v51 = vadd.f32 %v6974_v4, %v2753_v28  ;;  %v6512_v49 = vld [vmem:[%s14824_s8 + $0xc20] sm:$0xff]  ;;  %v6385_v12 = vld [vmem:[%s14824_s8 + $0x828] sm:$0xff] }
 0x564   : > { %3607 = vmatpush.msra.mxu3 %v6544_v3  ;;  %3653 = vmatpush.msrb.mxu1 %v6417_v10  ;;  %v2814_v63 = vadd.f32 %v6976_v50, %v2813_v57  ;;  %v6465_v3 = vld [vmem:[%s14824_s8 + $0xaa8] sm:$0xff]  ;;  %v6508_v10 = vld [vmem:[%s14824_s8 + $0xc00] sm:$0xff] }
 0x565   : > { %3672 = vmatpush.msrb.mxu2 %v6497_v14  ;;  %6376 = vmatmul.msk.f32.vlgmr.msrb.gmra.mxu3 %vm1029_vm9, %v10007_v52  ;;  %v2758_v48 = vsel %vm10202_vm6, %v6974_v4, %v2754_v51  ;;  %v6381_v43 = vld [vmem:[%s14824_s8 + $0x808] sm:$0xff]  ;;  %v6620_v51 = vld [vmem:[%s14824_s8 + $0xf80] sm:$0xff] }
 0x566   : > { %3608 = vmatpush.msra.mxu3 %v6540_v25  ;;  %3654 = vmatpush.msrb.mxu1 %v6413_v32  ;;  %v2763_v58 = vsel %vm2760_vm8, %v2762_v37, %v2758_v48  ;;  %v2818_v6 = vsel %vm2817_vm11, %v6976_v50, %v2814_v63  ;;  %v6469_v50 = vld [vmem:[%s14824_s8 + $0xac8] sm:$0xff]  ;;  %v6442_v25 = vld [vmem:[%s14824_s8 + $0x9f0] sm:$0xff]  ;;  %v6628_v32 = vld [vmem:[%s14824_s8 + $0xfc0] sm:$0xff] }
 0x567   : > { %3673 = vmatpush.msrb.mxu2 %v6493_v46  ;;  %v2823_v1 = vsel %vm2820_vm12, %v2822_v38, %v2818_v6  ;;  %v2828_v11 = vmul.f32 %v2763_v58, %v10056_v55  ;;  %v6397_v55 = vld [vmem:[%s14824_s8 + $0x888] sm:$0xff]  ;;  %v6624_v46 = vld [vmem:[%s14824_s8 + $0xfa0] sm:$0xff]  ;;  %v6506_v48 = vld [vmem:[%s14824_s8 + $0xbf0] sm:$0xff] }
 0x568   : > { %3597 = vmatmul.f32.gmra.mxu2 %v9939_v30  ;;  %3609 = vmatpush.msra.mxu3 %v6536_v24  ;;  %v2832_v17 = vmul.f32 %v2823_v1, %v10058_v15  ;;  %v6461_v14 = vld [vmem:[%s14824_s8 + $0xa88] sm:$0xff]  ;;  %v6616_v37 = vld [vmem:[%s14824_s8 + $0xf60] sm:$0xff]  ;;  %v6498_v1 = vld [vmem:[%s14824_s8 + $0xbb0] sm:$0xff] }
 0x569   : > { %3655 = vmatpush.msrb.mxu1 %v6409_v2  ;;  %3674 = vmatpush.msrb.mxu2 %v6489_v22  ;;  %v2840_v29 = vmul.f32 %v2836_v16, %v2828_v11  ;;  %v6569_v19 = vld [vmem:[%s14824_s8 + $0xde8] sm:$0xff]  ;;  %v6430_v22 = vld [vmem:[%s14824_s8 + $0x990] sm:$0xff]  ;;  %v6608_v58 = vld [vmem:[%s14824_s8 + $0xf20] sm:$0xff] }
 0x56a   : > { %3610 = vmatpush.msra.mxu3 %v6532_v34  ;;  %v2844_v15 = vmul.f32 %v2836_v16, %v2832_v17  ;;  %v6565_v28 = vld [vmem:[%s14824_s8 + $0xdc8] sm:$0xff]  ;;  %v6426_v34 = vld [vmem:[%s14824_s8 + $0x970] sm:$0xff]  ;;  %v6604_v11 = vld [vmem:[%s14824_s8 + $0xf00] sm:$0xff] }
 0x56b   : > { %3656 = vmatpush.msrb.mxu1 %v6405_v47  ;;  %3675 = vmatpush.msrb.mxu2 %v6485_v53  ;;  %v10267_v60 = vadd.f32 %v2848_v40, %v2840_v29  ;;  %v6561_v57 = vld [vmem:[%s14824_s8 + $0xda8] sm:$0xff]  ;;  %v6422_v47 = vld [vmem:[%s14824_s8 + $0x950] sm:$0xff]  ;;  %v6600_v16 = vld [vmem:[%s14824_s8 + $0xee0] sm:$0xff] }
 0x56c   : > { %3611 = vmatpush.msra.mxu3 %v6528_v61  ;;  %v10253_v4 = vadd.f32 %v2848_v40, %v2844_v15  ;;  %v6449_v24 = vld [vmem:[%s14824_s8 + $0xa28] sm:$0xff]  ;;  %v6502_v53 = vld [vmem:[%s14824_s8 + $0xbd0] sm:$0xff]  ;;  %v6592_v15 = vld [vmem:[%s14824_s8 + $0xea0] sm:$0xff] }
 0x56d   : > { %3657 = vmatpush.msrb.mxu1 %v6401_v62  ;;  %3676 = vmatpush.msrb.mxu2 %v6481_v9  ;;  %v6557_v2 = vld [vmem:[%s14824_s8 + $0xd88] sm:$0xff]  ;;  %v6418_v61 = vld [vmem:[%s14824_s8 + $0x930] sm:$0xff] }
 0x56e   : > { %3612 = vmatpush.msra.mxu3 %v6524_v59  ;;  %2941 = vmatpush.msrb.mxu0 %v10253_v4  ;;  %v6553_v63 = vld [vmem:[%s14824_s8 + $0xd68] sm:$0xff]  ;;  %v6414_v9 = vld [vmem:[%s14824_s8 + $0x910] sm:$0xff] }
 0x56f   : > { %3658 = vmatpush.msrb.mxu1 %v6397_v55  ;;  %3677 = vmatpush.msrb.mxu2 %v6477_v27  ;;  %v6549_v38 = vld [vmem:[%s14824_s8 + $0xd48] sm:$0xff]  ;;  %v6410_v59 = vld [vmem:[%s14824_s8 + $0x8f0] sm:$0xff]  ;;  %v6596_v27 = vld [vmem:[%s14824_s8 + $0xec0] sm:$0xff] }
 0x570   : > { %6377 = vmatmul.msk.f32.gmra.mxu3 %vm1029_vm9, %v10063_v42  ;;  %2942 = vmatpush.msrb.mxu0 %v10267_v60  ;;  %v6545_v6 = vld [vmem:[%s14824_s8 + $0xd28] sm:$0xff]  ;;  %v6490_v55 = vld [vmem:[%s14824_s8 + $0xb70] sm:$0xff] }
 0x571   : > { %3613 = vmatpush.msra.mxu3 %v6520_v23  ;;  %3659 = vmatpush.msrb.mxu1 %v6393_v8  ;;  %v6541_v62 = vld [vmem:[%s14824_s8 + $0xd08] sm:$0xff]  ;;  %v6406_v40 = vld [vmem:[%s14824_s8 + $0x8d0] sm:$0xff] }
 0x572   : > { %3678 = vmatpush.msrb.mxu2 %v6473_v44  ;;  %3033 = vmatpush.msra.mxu0 %v10253_v4  ;;  %v6537_v17 = vld [vmem:[%s14824_s8 + $0xce8] sm:$0xff]  ;;  %v6402_v8 = vld [vmem:[%s14824_s8 + $0x8b0] sm:$0xff]  ;;  %v6588_v44 = vld [vmem:[%s14824_s8 + $0xe80] sm:$0xff] }
 0x573   : > { %3614 = vmatpush.msra.mxu3 %v6516_v5  ;;  %3660 = vmatpush.msrb.mxu1 %v6389_v41  ;;  %v6529_v23 = vld [vmem:[%s14824_s8 + $0xca8] sm:$0xff]  ;;  %v6482_v29 = vld [vmem:[%s14824_s8 + $0xb30] sm:$0xff] }
 0x574   : > { %3679 = vmatpush.msrb.mxu2 %v6469_v50  ;;  %6370 = vmatmul.msk.f32.vlgmr.msrb.gmra.mxu0 %vm1029_vm9, %v9927_v20  ;;  %v6457_v20 = vld [vmem:[%s14824_s8 + $0xa68] sm:$0xff]  ;;  %v6398_v41 = vld [vmem:[%s14824_s8 + $0x890] sm:$0xff] }
 0x575   : > { %3615 = vmatpush.msra.mxu3 %v6512_v49  ;;  %3661 = vmatpush.msrb.mxu1 %v6385_v12  ;;  %v6525_v5 = vld [vmem:[%s14824_s8 + $0xc88] sm:$0xff]  ;;  %v6478_v50 = vld [vmem:[%s14824_s8 + $0xb10] sm:$0xff]  ;;  %v6584_v49 = vld [vmem:[%s14824_s8 + $0xe60] sm:$0xff] }
 0x576   : > { %3680 = vmatpush.msrb.mxu2 %v6465_v3  ;;  %3034 = vmatpush.msra.mxu0 %v10267_v60  ;;  %v6521_v12 = vld [vmem:[%s14824_s8 + $0xc68] sm:$0xff]  ;;  %v6394_v3 = vld [vmem:[%s14824_s8 + $0x870] sm:$0xff] }
 0x577   : > { %3616 = vmatpush.msra.mxu3 %v6508_v10  ;;  %3662 = vmatpush.msrb.mxu1 %v6381_v43  ;;  %v6474_v10 = vld [vmem:[%s14824_s8 + $0xaf0] sm:$0xff]  ;;  %v6580_v43 = vld [vmem:[%s14824_s8 + $0xe40] sm:$0xff] }
 0x578   : > { %3681 = vmatpush.msrb.mxu2 %v6461_v14  ;;  %3617 = vmatmul.f32.vlgmr.msra.gmra.mxu3 %v10090_v39  ;;  %v6517_v14 = vld [vmem:[%s14824_s8 + $0xc48] sm:$0xff] }
 0x579   : > { %3624 = vmatpush.msrb.mxu0 %v6632_v7  ;;  %3663 = vmatmul.f32.vlgmr.msrb.gmra.mxu1 %v9910_v21  ;;  %v6390_v7 = vld [vmem:[%s14824_s8 + $0x850] sm:$0xff] }
 0x57a   : > { %3693 = vmatpush.msrb.mxu3 %v6569_v19  ;;  %3739 = vmatpush.msra.mxu1 %v6442_v25  ;;  %v6470_v19 = vld [vmem:[%s14824_s8 + $0xad0] sm:$0xff]  ;;  %v6513_v25 = vld [vmem:[%s14824_s8 + $0xc28] sm:$0xff] }
 0x57b   : > { %3682 = vmatpush.msrb.mxu2 %v6457_v20  ;;  %3625 = vmatpush.msrb.mxu0 %v6628_v32  ;;  %v6386_v20 = vld [vmem:[%s14824_s8 + $0x830] sm:$0xff] }
 0x57c   : > { %3694 = vmatpush.msrb.mxu3 %v6565_v28  ;;  %3740 = vmatpush.msra.mxu1 %v6438_v36  ;;  %v6466_v32 = vld [vmem:[%s14824_s8 + $0xab0] sm:$0xff]  ;;  %v6572_v28 = vld [vmem:[%s14824_s8 + $0xe00] sm:$0xff]  ;;  %v6509_v36 = vld [vmem:[%s14824_s8 + $0xc08] sm:$0xff] }
 0x57d   : > { %3683 = vmatpush.msrb.mxu2 %v6453_v56  ;;  %3626 = vmatpush.msrb.mxu0 %v6624_v46  ;;  %v6382_v56 = vld [vmem:[%s14824_s8 + $0x810] sm:$0xff] }
 0x57e   : > { %3695 = vmatpush.msrb.mxu3 %v6561_v57  ;;  %3741 = vmatpush.msra.mxu1 %v6434_v0  ;;  %v6462_v46 = vld [vmem:[%s14824_s8 + $0xa90] sm:$0xff]  ;;  %v6633_v57 = vld [vmem:[%s14824_s8 + $0xfe8] sm:$0xff] }
 0x57f   : > { %3684 = vmatpush.msrb.mxu2 %v6449_v24  ;;  %3627 = vmatpush.msrb.mxu0 %v6620_v51  ;;  %v6570_v0 = vld [vmem:[%s14824_s8 + $0xdf0] sm:$0xff]  ;;  %v6443_v24 = vld [vmem:[%s14824_s8 + $0x9f8] sm:$0xff] }
 0x580   : > { %3696 = vmatpush.msrb.mxu3 %v6557_v2  ;;  %3742 = vmatpush.msra.mxu1 %v6430_v22  ;;  %v6458_v51 = vld [vmem:[%s14824_s8 + $0xa70] sm:$0xff]  ;;  %v6629_v2 = vld [vmem:[%s14824_s8 + $0xfc8] sm:$0xff] }
 0x581   : > { %6371 = vmatmul.msk.f32.gmra.mxu0 %vm1029_vm9, %v9965_v45  ;;  %3685 = vmatpush.msrb.mxu2 %v6445_v26  ;;  %v6612_v45 = vld [vmem:[%s14824_s8 + $0xf40] sm:$0xff]  ;;  %v6566_v22 = vld [vmem:[%s14824_s8 + $0xdd0] sm:$0xff]  ;;  %v6439_v26 = vld [vmem:[%s14824_s8 + $0x9d8] sm:$0xff] }
 0x582   : > { %3620 = vmatmul.f32.gmra.mxu3 %v10081_v31  ;;  %3628 = vmatpush.msrb.mxu0 %v6616_v37  ;;  %v6454_v37 = vld [vmem:[%s14824_s8 + $0xa50] sm:$0xff] }
 0x583   : > { %3666 = vmatmul.f32.gmra.mxu1 %v9901_v33  ;;  %3686 = vmatmul.f32.vlgmr.msrb.gmra.mxu2 %v9951_v54 }
 0x584   : > { %3697 = vmatpush.msrb.mxu3 %v6553_v63  ;;  %3743 = vmatpush.msra.mxu1 %v6426_v34  ;;  %v6625_v63 = vld [vmem:[%s14824_s8 + $0xfa8] sm:$0xff]  ;;  %v6562_v34 = vld [vmem:[%s14824_s8 + $0xdb0] sm:$0xff] }
 0x585   : > { %3762 = vmatpush.msra.mxu2 %v6506_v48  ;;  %3629 = vmatpush.msrb.mxu0 %v6612_v45  ;;  %v6435_v48 = vld [vmem:[%s14824_s8 + $0x9b8] sm:$0xff]  ;;  %v6450_v45 = vld [vmem:[%s14824_s8 + $0xa30] sm:$0xff] }
 0x586   : > { %3698 = vmatpush.msrb.mxu3 %v6549_v38  ;;  %3744 = vmatpush.msra.mxu1 %v6422_v47  ;;  %v6621_v38 = vld [vmem:[%s14824_s8 + $0xf88] sm:$0xff]  ;;  %v6558_v47 = vld [vmem:[%s14824_s8 + $0xd90] sm:$0xff] }
 0x587   : > { %3763 = vmatpush.msra.mxu2 %v6502_v53  ;;  %3630 = vmatpush.msrb.mxu0 %v6608_v58  ;;  %v6431_v53 = vld [vmem:[%s14824_s8 + $0x998] sm:$0xff]  ;;  %v6446_v58 = vld [vmem:[%s14824_s8 + $0xa10] sm:$0xff] }
 0x588   : > { %3699 = vmatpush.msrb.mxu3 %v6545_v6  ;;  %3745 = vmatpush.msra.mxu1 %v6418_v61  ;;  %v6617_v6 = vld [vmem:[%s14824_s8 + $0xf68] sm:$0xff]  ;;  %v6554_v61 = vld [vmem:[%s14824_s8 + $0xd70] sm:$0xff] }
 0x589   : > { %3764 = vmatpush.msra.mxu2 %v6498_v1  ;;  %3631 = vmatpush.msrb.mxu0 %v6604_v11  ;;  %v6427_v1 = vld [vmem:[%s14824_s8 + $0x978] sm:$0xff] }
 0x58a   : > { %3700 = vmatpush.msrb.mxu3 %v6541_v62  ;;  %3746 = vmatpush.msra.mxu1 %v6414_v9  ;;  %v6507_v11 = vld [vmem:[%s14824_s8 + $0xbf8] sm:$0xff]  ;;  %v6613_v62 = vld [vmem:[%s14824_s8 + $0xf48] sm:$0xff]  ;;  %v6550_v9 = vld [vmem:[%s14824_s8 + $0xd50] sm:$0xff] }
 0x58b   : > { %3765 = vmatpush.msra.mxu2 %v6494_v13  ;;  %6378 = vmatmul.msk.f32.vlgmr.msra.gmra.mxu0 %vm1029_vm9, %v10007_v52  ;;  %v6486_v52 = vld [vmem:[%s14824_s8 + $0xb50] sm:$0xff]  ;;  %v6423_v13 = vld [vmem:[%s14824_s8 + $0x958] sm:$0xff] }
 0x58c   : > { %3632 = vmatpush.msrb.mxu0 %v6600_v16  ;;  %3689 = vmatmul.f32.gmra.mxu2 %v9939_v30  ;;  %v6503_v16 = vld [vmem:[%s14824_s8 + $0xbd8] sm:$0xff] }
 0x58d   : > { %3701 = vmatpush.msrb.mxu3 %v6537_v17  ;;  %3747 = vmatpush.msra.mxu1 %v6410_v59  ;;  %v6609_v17 = vld [vmem:[%s14824_s8 + $0xf28] sm:$0xff]  ;;  %v6546_v59 = vld [vmem:[%s14824_s8 + $0xd30] sm:$0xff] }
 0x58e   : > { %3766 = vmatpush.msra.mxu2 %v6490_v55  ;;  %3633 = vmatpush.msrb.mxu0 %v6596_v27  ;;  %v6419_v55 = vld [vmem:[%s14824_s8 + $0x938] sm:$0xff] }
 0x58f   : > { %3702 = vmatpush.msrb.mxu3 %v6533_v35  ;;  %3748 = vmatpush.msra.mxu1 %v6406_v40  ;;  %v6499_v27 = vld [vmem:[%s14824_s8 + $0xbb8] sm:$0xff]  ;;  %v6605_v35 = vld [vmem:[%s14824_s8 + $0xf08] sm:$0xff]  ;;  %v6542_v40 = vld [vmem:[%s14824_s8 + $0xd10] sm:$0xff] }
 0x590   : > { %3767 = vmatpush.msra.mxu2 %v6486_v52  ;;  %3634 = vmatpush.msrb.mxu0 %v6592_v15  ;;  %v6415_v52 = vld [vmem:[%s14824_s8 + $0x918] sm:$0xff] }
 0x591   : > { %3703 = vmatpush.msrb.mxu3 %v6529_v23  ;;  %3749 = vmatpush.msra.mxu1 %v6402_v8  ;;  %v6495_v15 = vld [vmem:[%s14824_s8 + $0xb98] sm:$0xff]  ;;  %v6601_v23 = vld [vmem:[%s14824_s8 + $0xee8] sm:$0xff]  ;;  %v6538_v8 = vld [vmem:[%s14824_s8 + $0xcf0] sm:$0xff] }
 0x592   : > { %3768 = vmatpush.msra.mxu2 %v6482_v29  ;;  %3635 = vmatpush.msrb.mxu0 %v6588_v44  ;;  %v6411_v29 = vld [vmem:[%s14824_s8 + $0x8f8] sm:$0xff] }
 0x593   : > { %3704 = vmatpush.msrb.mxu3 %v6525_v5  ;;  %3750 = vmatpush.msra.mxu1 %v6398_v41  ;;  %v6491_v44 = vld [vmem:[%s14824_s8 + $0xb78] sm:$0xff]  ;;  %v6597_v5 = vld [vmem:[%s14824_s8 + $0xec8] sm:$0xff]  ;;  %v6534_v41 = vld [vmem:[%s14824_s8 + $0xcd0] sm:$0xff] }
 0x594   : > { %3769 = vmatpush.msra.mxu2 %v6478_v50  ;;  %6379 = vmatmul.msk.f32.gmra.mxu0 %vm1029_vm9, %v10063_v42  ;;  %v6576_v42 = vld [vmem:[%s14824_s8 + $0xe20] sm:$0xff]  ;;  %v6407_v50 = vld [vmem:[%s14824_s8 + $0x8d8] sm:$0xff] }
 0x595   : > { %3636 = vmatpush.msrb.mxu0 %v6584_v49  ;;  %3705 = vmatpush.msrb.mxu3 %v6521_v12  ;;  %v6487_v49 = vld [vmem:[%s14824_s8 + $0xb58] sm:$0xff]  ;;  %v6593_v12 = vld [vmem:[%s14824_s8 + $0xea8] sm:$0xff] }
 0x596   : > { %3751 = vmatpush.msra.mxu1 %v6394_v3  ;;  %3770 = vmatpush.msra.mxu2 %v6474_v10  ;;  %v6530_v3 = vld [vmem:[%s14824_s8 + $0xcb0] sm:$0xff]  ;;  %v6403_v10 = vld [vmem:[%s14824_s8 + $0x8b8] sm:$0xff] }
 0x597   : > { %3637 = vmatpush.msrb.mxu0 %v6580_v43  ;;  %3706 = vmatpush.msrb.mxu3 %v6517_v14  ;;  %v6483_v43 = vld [vmem:[%s14824_s8 + $0xb38] sm:$0xff]  ;;  %v6589_v14 = vld [vmem:[%s14824_s8 + $0xe88] sm:$0xff] }
 0x598   : > { %3752 = vmatpush.msra.mxu1 %v6390_v7  ;;  %3771 = vmatpush.msra.mxu2 %v6470_v19  ;;  %v6526_v7 = vld [vmem:[%s14824_s8 + $0xc90] sm:$0xff]  ;;  %v6399_v19 = vld [vmem:[%s14824_s8 + $0x898] sm:$0xff] }
 0x599   : > { %3638 = vmatpush.msrb.mxu0 %v6576_v42  ;;  %3707 = vmatpush.msrb.mxu3 %v6513_v25  ;;  %v6479_v42 = vld [vmem:[%s14824_s8 + $0xb18] sm:$0xff]  ;;  %v6585_v25 = vld [vmem:[%s14824_s8 + $0xe68] sm:$0xff] }
 0x59a   : > { %3753 = vmatpush.msra.mxu1 %v6386_v20  ;;  %3772 = vmatpush.msra.mxu2 %v6466_v32  ;;  %v6522_v20 = vld [vmem:[%s14824_s8 + $0xc70] sm:$0xff]  ;;  %v6395_v32 = vld [vmem:[%s14824_s8 + $0x878] sm:$0xff] }
 0x59b   : > { %3639 = vmatpush.msrb.mxu0 %v6572_v28  ;;  %3708 = vmatpush.msrb.mxu3 %v6509_v36  ;;  %v6475_v28 = vld [vmem:[%s14824_s8 + $0xaf8] sm:$0xff]  ;;  %v6581_v36 = vld [vmem:[%s14824_s8 + $0xe48] sm:$0xff] }
 0x59c   : > { %3754 = vmatpush.msra.mxu1 %v6382_v56  ;;  %3773 = vmatpush.msra.mxu2 %v6462_v46  ;;  %v6518_v56 = vld [vmem:[%s14824_s8 + $0xc50] sm:$0xff]  ;;  %v6391_v46 = vld [vmem:[%s14824_s8 + $0x858] sm:$0xff] }
 0x59d   : > { %3640 = vmatmul.f32.vlgmr.msrb.gmra.mxu0 %v10267_v60  ;;  %3709 = vmatmul.f32.vlgmr.msrb.gmra.mxu3 %v10090_v39 }
 0x59e   : > { %3716 = vmatpush.msra.mxu0 %v6633_v57  ;;  %3755 = vmatmul.f32.vlgmr.msra.gmra.mxu1 %v9910_v21  ;;  %v6471_v57 = vld [vmem:[%s14824_s8 + $0xad8] sm:$0xff] }
 0x59f   : > { %3785 = vmatpush.msra.mxu3 %v6570_v0  ;;  %3831 = vmatpush.msrb.mxu1 %v6443_v24  ;;  %v6577_v0 = vld [vmem:[%s14824_s8 + $0xe28] sm:$0xff]  ;;  %v6514_v24 = vld [vmem:[%s14824_s8 + $0xc30] sm:$0xff] }
 0x5a0   : > { %3774 = vmatpush.msra.mxu2 %v6458_v51  ;;  %3717 = vmatpush.msra.mxu0 %v6629_v2  ;;  %v6387_v51 = vld [vmem:[%s14824_s8 + $0x838] sm:$0xff] }
 0x5a1   : > { %3786 = vmatpush.msra.mxu3 %v6566_v22  ;;  %3832 = vmatpush.msrb.mxu1 %v6439_v26  ;;  %v6467_v2 = vld [vmem:[%s14824_s8 + $0xab8] sm:$0xff]  ;;  %v6573_v22 = vld [vmem:[%s14824_s8 + $0xe08] sm:$0xff]  ;;  %v6510_v26 = vld [vmem:[%s14824_s8 + $0xc10] sm:$0xff] }
 0x5a2   : > { %3775 = vmatpush.msra.mxu2 %v6454_v37  ;;  %3718 = vmatpush.msra.mxu0 %v6625_v63  ;;  %v6383_v37 = vld [vmem:[%s14824_s8 + $0x818] sm:$0xff] }
 0x5a3   : > { %3787 = vmatpush.msra.mxu3 %v6562_v34  ;;  %3833 = vmatpush.msrb.mxu1 %v6435_v48  ;;  %v6463_v63 = vld [vmem:[%s14824_s8 + $0xa98] sm:$0xff]  ;;  %v6634_v34 = vld [vmem:[%s14824_s8 + $0xff0] sm:$0xff] }
 0x5a4   : > { %3776 = vmatpush.msra.mxu2 %v6450_v45  ;;  %3719 = vmatpush.msra.mxu0 %v6621_v38  ;;  %v6571_v48 = vld [vmem:[%s14824_s8 + $0xdf8] sm:$0xff]  ;;  %v3102_v45 = vld [vmem:[%s14824_s8 + $0x1e0] sm:$0xff] }
 0x5a5   : > { %3788 = vmatpush.msra.mxu3 %v6558_v47  ;;  %3834 = vmatpush.msrb.mxu1 %v6431_v53  ;;  %v6459_v38 = vld [vmem:[%s14824_s8 + $0xa78] sm:$0xff]  ;;  %v6630_v47 = vld [vmem:[%s14824_s8 + $0xfd0] sm:$0xff] }
 0x5a6   : > { %3777 = vmatpush.msra.mxu2 %v6446_v58  ;;  %3643 = vmatmul.f32.gmra.mxu0 %v10253_v4  ;;  %v6567_v53 = vld [vmem:[%s14824_s8 + $0xdd8] sm:$0xff]  ;;  %v3098_v58 = vld [vmem:[%s14824_s8 + $0x1c0] sm:$0xff] }
 0x5a7   : > { %3712 = vmatmul.f32.gmra.mxu3 %v10081_v31  ;;  %3720 = vmatpush.msra.mxu0 %v6617_v6  ;;  %v6455_v6 = vld [vmem:[%s14824_s8 + $0xa58] sm:$0xff] }
 0x5a8   : > { %3758 = vmatmul.f32.gmra.mxu1 %v9901_v33  ;;  %3778 = vmatmul.f32.vlgmr.msra.gmra.mxu2 %v9951_v54 }
 0x5a9   : > { %3789 = vmatpush.msra.mxu3 %v6554_v61  ;;  %3835 = vmatpush.msrb.mxu1 %v6427_v1  ;;  %v6626_v61 = vld [vmem:[%s14824_s8 + $0xfb0] sm:$0xff]  ;;  %v3094_v1 = vld [vmem:[%s14824_s8 + $0x1a0] sm:$0xff] }
 0x5aa   : > { %3854 = vmatpush.msrb.mxu2 %v6507_v11  ;;  %3721 = vmatpush.msra.mxu0 %v6613_v62  ;;  %v6451_v11 = vld [vmem:[%s14824_s8 + $0xa38] sm:$0xff]  ;;  %v6622_v62 = vld [vmem:[%s14824_s8 + $0xf90] sm:$0xff] }
 0x5ab   : > { %3790 = vmatpush.msra.mxu3 %v6550_v9  ;;  %3836 = vmatpush.msrb.mxu1 %v6423_v13  ;;  %v6559_v9 = vld [vmem:[%s14824_s8 + $0xd98] sm:$0xff]  ;;  %v3090_v13 = vld [vmem:[%s14824_s8 + $0x180] sm:$0xff] }
 0x5ac   : > { %3855 = vmatpush.msrb.mxu2 %v6503_v16  ;;  %3722 = vmatpush.msra.mxu0 %v6609_v17  ;;  %v6447_v16 = vld [vmem:[%s14824_s8 + $0xa18] sm:$0xff]  ;;  %v6618_v17 = vld [vmem:[%s14824_s8 + $0xf70] sm:$0xff] }
 0x5ad   : > { %3791 = vmatpush.msra.mxu3 %v6546_v59  ;;  %3837 = vmatpush.msrb.mxu1 %v6419_v55  ;;  %v6555_v59 = vld [vmem:[%s14824_s8 + $0xd78] sm:$0xff]  ;;  %v3086_v55 = vld [vmem:[%s14824_s8 + $0x160] sm:$0xff] }
 0x5ae   : > { %3856 = vmatpush.msrb.mxu2 %v6499_v27  ;;  %3723 = vmatpush.msra.mxu0 %v6605_v35  ;;  %v3166_v27 = vld [vmem:[%s14824_s8 + $0x3e0] sm:$0xff]  ;;  %v6614_v35 = vld [vmem:[%s14824_s8 + $0xf50] sm:$0xff] }
 0x5af   : > { %3792 = vmatpush.msra.mxu3 %v6542_v40  ;;  %3838 = vmatpush.msrb.mxu1 %v6415_v52  ;;  %v6551_v40 = vld [vmem:[%s14824_s8 + $0xd58] sm:$0xff]  ;;  %v3082_v52 = vld [vmem:[%s14824_s8 + $0x140] sm:$0xff] }
 0x5b0   : > { %3857 = vmatpush.msrb.mxu2 %v6495_v15  ;;  %3724 = vmatpush.msra.mxu0 %v6601_v23  ;;  %v3162_v15 = vld [vmem:[%s14824_s8 + $0x3c0] sm:$0xff] }
 0x5b1   : > { %3781 = vmatmul.f32.gmra.mxu2 %v9939_v30  ;;  %3793 = vmatpush.msra.mxu3 %v6538_v8  ;;  %v3078_v23 = vld [vmem:[%s14824_s8 + $0x120] sm:$0xff] }
 0x5b2   : > { %3839 = vmatpush.msrb.mxu1 %v6411_v29  ;;  %3858 = vmatpush.msrb.mxu2 %v6491_v44  ;;  %v3158_v8 = vld [vmem:[%s14824_s8 + $0x3a0] sm:$0xff]  ;;  %v6606_v29 = vld [vmem:[%s14824_s8 + $0xf10] sm:$0xff]  ;;  %v6543_v44 = vld [vmem:[%s14824_s8 + $0xd18] sm:$0xff] }
 0x5b3   : > { %3725 = vmatpush.msra.mxu0 %v6597_v5  ;;  %3794 = vmatpush.msra.mxu3 %v6534_v41  ;;  %v3074_v5 = vld [vmem:[%s14824_s8 + $0x100] sm:$0xff] }
 0x5b4   : > { %3840 = vmatpush.msrb.mxu1 %v6407_v50  ;;  %3859 = vmatpush.msrb.mxu2 %v6487_v49  ;;  %v3154_v41 = vld [vmem:[%s14824_s8 + $0x380] sm:$0xff]  ;;  %v6602_v50 = vld [vmem:[%s14824_s8 + $0xef0] sm:$0xff]  ;;  %v6539_v49 = vld [vmem:[%s14824_s8 + $0xcf8] sm:$0xff] }
 0x5b5   : > { %3726 = vmatpush.msra.mxu0 %v6593_v12  ;;  %3795 = vmatpush.msra.mxu3 %v6530_v3  ;;  %v3070_v12 = vld [vmem:[%s14824_s8 + $0xe0] sm:$0xff] }
 0x5b6   : > { %3841 = vmatpush.msrb.mxu1 %v6403_v10  ;;  %3860 = vmatpush.msrb.mxu2 %v6483_v43  ;;  %v3150_v3 = vld [vmem:[%s14824_s8 + $0x360] sm:$0xff]  ;;  %v6598_v10 = vld [vmem:[%s14824_s8 + $0xed0] sm:$0xff]  ;;  %v6535_v43 = vld [vmem:[%s14824_s8 + $0xcd8] sm:$0xff] }
 0x5b7   : > { %3727 = vmatpush.msra.mxu0 %v6589_v14  ;;  %3796 = vmatpush.msra.mxu3 %v6526_v7  ;;  %v3066_v14 = vld [vmem:[%s14824_s8 + $0xc0] sm:$0xff] }
 0x5b8   : > { %3842 = vmatpush.msrb.mxu1 %v6399_v19  ;;  %3861 = vmatpush.msrb.mxu2 %v6479_v42  ;;  %v3146_v7 = vld [vmem:[%s14824_s8 + $0x340] sm:$0xff]  ;;  %v6594_v19 = vld [vmem:[%s14824_s8 + $0xeb0] sm:$0xff]  ;;  %v6531_v42 = vld [vmem:[%s14824_s8 + $0xcb8] sm:$0xff] }
 0x5b9   : > { %3728 = vmatpush.msra.mxu0 %v6585_v25  ;;  %3797 = vmatpush.msra.mxu3 %v6522_v20  ;;  %v3142_v25 = vld [vmem:[%s14824_s8 + $0x320] sm:$0xff]  ;;  %v6590_v20 = vld [vmem:[%s14824_s8 + $0xe90] sm:$0xff] }
 0x5ba   : > { %3843 = vmatpush.msrb.mxu1 %v6395_v32  ;;  %3862 = vmatpush.msrb.mxu2 %v6475_v28  ;;  %v6527_v32 = vld [vmem:[%s14824_s8 + $0xc98] sm:$0xff]  ;;  %v3058_v28 = vld [vmem:[%s14824_s8 + $0x80] sm:$0xff] }
 0x5bb   : > { %3729 = vmatpush.msra.mxu0 %v6581_v36  ;;  %3798 = vmatpush.msra.mxu3 %v6518_v56  ;;  %v3138_v36 = vld [vmem:[%s14824_s8 + $0x300] sm:$0xff]  ;;  %v6586_v56 = vld [vmem:[%s14824_s8 + $0xe70] sm:$0xff] }
 0x5bc   : > { %3844 = vmatpush.msrb.mxu1 %v6391_v46  ;;  %3863 = vmatpush.msrb.mxu2 %v6471_v57  ;;  %v6523_v46 = vld [vmem:[%s14824_s8 + $0xc78] sm:$0xff]  ;;  %v3054_v57 = vld [vmem:[%s14824_s8 + $0x60] sm:$0xff] }
 0x5bd   : > { %3730 = vmatpush.msra.mxu0 %v6577_v0  ;;  %3799 = vmatpush.msra.mxu3 %v6514_v24  ;;  %v3134_v0 = vld [vmem:[%s14824_s8 + $0x2e0] sm:$0xff]  ;;  %v6582_v24 = vld [vmem:[%s14824_s8 + $0xe50] sm:$0xff] }
 0x5be   : > { %3845 = vmatpush.msrb.mxu1 %v6387_v51  ;;  %3864 = vmatpush.msrb.mxu2 %v6467_v2  ;;  %v6519_v51 = vld [vmem:[%s14824_s8 + $0xc58] sm:$0xff]  ;;  %v3050_v2 = vld [vmem:[%s14824_s8 + $0x40] sm:$0xff] }
 0x5bf   : > { %3731 = vmatpush.msra.mxu0 %v6573_v22  ;;  %3800 = vmatpush.msra.mxu3 %v6510_v26  ;;  %v3130_v22 = vld [vmem:[%s14824_s8 + $0x2c0] sm:$0xff]  ;;  %v6578_v26 = vld [vmem:[%s14824_s8 + $0xe30] sm:$0xff] }
 0x5c0   : > { %3846 = vmatpush.msrb.mxu1 %v6383_v37  ;;  %3865 = vmatpush.msrb.mxu2 %v6463_v63  ;;  %v6515_v37 = vld [vmem:[%s14824_s8 + $0xc38] sm:$0xff]  ;;  %v3046_v63 = vld [vmem:[%s14824_s8 + $0x20] sm:$0xff] }
 0x5c1   : > { %3732 = vmatmul.f32.vlgmr.msra.gmra.mxu0 %v10267_v60  ;;  %3801 = vmatmul.f32.vlgmr.msra.gmra.mxu3 %v10090_v39 }
 0x5c2   : > { %3808 = vmatpush.msrb.mxu0 %v6634_v34  ;;  %3847 = vmatmul.f32.vlgmr.msrb.gmra.mxu1 %v9910_v21  ;;  %v6563_v21 = vld [vmem:[%s14824_s8 + $0xdb8] sm:$0xff]  ;;  %v3126_v34 = vld [vmem:[%s14824_s8 + $0x2a0] sm:$0xff] }
 0x5c3   : > { %3877 = vmatpush.msrb.mxu3 %v6571_v48  ;;  %3923 = vmatpush.msra.mxu1 %v3102_v45  ;;  %v6574_v48 = vld [vmem:[%s14824_s8 + $0xe10] sm:$0xff]  ;;  %v6511_v45 = vld [vmem:[%s14824_s8 + $0xc18] sm:$0xff] }
 0x5c4   : > { %3866 = vmatpush.msrb.mxu2 %v6459_v38  ;;  %3809 = vmatpush.msrb.mxu0 %v6630_v47  ;;  %v3042_v38 = vld [vmem:[%s14824_s8] sm:$0xff] }
 0x5c5   : > { %3878 = vmatpush.msrb.mxu3 %v6567_v53  ;;  %3924 = vmatpush.msra.mxu1 %v3098_v58  ;;  %v3122_v47 = vld [vmem:[%s14824_s8 + $0x280] sm:$0xff]  ;;  %v6635_v53 = vld [vmem:[%s14824_s8 + $0xff8] sm:$0xff] }
 0x5c6   : > { %3867 = vmatpush.msrb.mxu2 %v6455_v6  ;;  %3810 = vmatpush.msrb.mxu0 %v6626_v61  ;;  %v3230_v58 = vld [vmem:[%s14824_s8 + $0x5e0] sm:$0xff]  ;;  %v3103_v6 = vld [vmem:[%s14824_s8 + $0x1e8] sm:$0xff]  ;;  %v10905_v61 = vpop.f32.mrf.mxu1 }
 0x5c7   : > { %3879 = vmatpush.msrb.mxu3 %v6563_v21  ;;  %3925 = vmatpush.msra.mxu1 %v3094_v1  ;;  %v3118_v21 = vld [vmem:[%s14824_s8 + $0x260] sm:$0xff]  ;;  %v6631_v1 = vld [vmem:[%s14824_s8 + $0xfd8] sm:$0xff] }
 0x5c8   : > { %3868 = vmatpush.msrb.mxu2 %v6451_v11  ;;  %3811 = vmatpush.msrb.mxu0 %v6622_v62  ;;  %v3226_v11 = vld [vmem:[%s14824_s8 + $0x5c0] sm:$0xff]  ;;  %v3099_v62 = vld [vmem:[%s14824_s8 + $0x1c8] sm:$0xff] }
 0x5c9   : > { %3880 = vmatpush.msrb.mxu3 %v6559_v9  ;;  %3926 = vmatpush.msra.mxu1 %v3090_v13  ;;  %v6627_v9 = vld [vmem:[%s14824_s8 + $0xfb8] sm:$0xff]  ;;  %v3222_v13 = vld [vmem:[%s14824_s8 + $0x5a0] sm:$0xff] }
 0x5ca   : > { %3869 = vmatpush.msrb.mxu2 %v6447_v16  ;;  %3735 = vmatmul.f32.gmra.mxu0 %v10253_v4  ;;  %v3095_v16 = vld [vmem:[%s14824_s8 + $0x1a8] sm:$0xff] }
 0x5cb   : > { %3804 = vmatmul.f32.gmra.mxu3 %v10081_v31  ;;  %3812 = vmatpush.msrb.mxu0 %v6618_v17  ;;  %v3110_v17 = vld [vmem:[%s14824_s8 + $0x220] sm:$0xff] }
 0x5cc   : > { %3850 = vmatmul.f32.gmra.mxu1 %v9901_v33  ;;  %3870 = vmatmul.f32.vlgmr.msrb.gmra.mxu2 %v9951_v54  ;;  %v6610_v33 = vld [vmem:[%s14824_s8 + $0xf30] sm:$0xff]  ;;  %v6547_v54 = vld [vmem:[%s14824_s8 + $0xd38] sm:$0xff] }
 0x5cd   : > { %3881 = vmatpush.msrb.mxu3 %v6555_v59  ;;  %3927 = vmatpush.msra.mxu1 %v3086_v55  ;;  %v6623_v59 = vld [vmem:[%s14824_s8 + $0xf98] sm:$0xff]  ;;  %v3218_v55 = vld [vmem:[%s14824_s8 + $0x580] sm:$0xff] }
 0x5ce   : > { %3946 = vmatpush.msra.mxu2 %v3166_v27  ;;  %3813 = vmatpush.msrb.mxu0 %v6614_v35  ;;  %v3091_v27 = vld [vmem:[%s14824_s8 + $0x188] sm:$0xff]  ;;  %v3106_v35 = vld [vmem:[%s14824_s8 + $0x200] sm:$0xff] }
 0x5cf   : > { %3882 = vmatpush.msrb.mxu3 %v6551_v40  ;;  %3928 = vmatpush.msra.mxu1 %v3082_v52  ;;  %v6619_v40 = vld [vmem:[%s14824_s8 + $0xf78] sm:$0xff]  ;;  %v10952_v52 = vpop.f32.mrf.mxu2 }
 0x5d0   : > { %3947 = vmatpush.msra.mxu2 %v3162_v15  ;;  %3814 = vmatpush.msrb.mxu0 %v6610_v33  ;;  %v3214_v15 = vld [vmem:[%s14824_s8 + $0x560] sm:$0xff]  ;;  %v3087_v33 = vld [vmem:[%s14824_s8 + $0x168] sm:$0xff] }
 0x5d1   : > { %3883 = vmatpush.msrb.mxu3 %v6547_v54  ;;  %3929 = vmatpush.msra.mxu1 %v3078_v23  ;;  %v10961_v54 = vpop.f32.mrf.mxu1  ;;  %v3167_v23 = vld [vmem:[%s14824_s8 + $0x3e8] sm:$0xff] }
 0x5d2   : > { %3948 = vmatpush.msra.mxu2 %v3158_v8  ;;  %3815 = vmatpush.msrb.mxu0 %v6606_v29  ;;  %v6615_v8 = vld [vmem:[%s14824_s8 + $0xf58] sm:$0xff]  ;;  %v3210_v29 = vld [vmem:[%s14824_s8 + $0x540] sm:$0xff] }
 0x5d3   : > { %3884 = vmatpush.msrb.mxu3 %v6543_v44  ;;  %3930 = vmatpush.msra.mxu1 %v3074_v5  ;;  %v3163_v44 = vld [vmem:[%s14824_s8 + $0x3c8] sm:$0xff]  ;;  %v6611_v5 = vld [vmem:[%s14824_s8 + $0xf38] sm:$0xff] }
 0x5d4   : > { %3949 = vmatpush.msra.mxu2 %v3154_v41  ;;  %3816 = vmatpush.msrb.mxu0 %v6602_v50  ;;  %v3206_v41 = vld [vmem:[%s14824_s8 + $0x520] sm:$0xff]  ;;  %v3079_v50 = vld [vmem:[%s14824_s8 + $0x128] sm:$0xff] }
 0x5d5   : > { %3873 = vmatmul.f32.gmra.mxu2 %v9939_v30  ;;  %3885 = vmatpush.msrb.mxu3 %v6539_v49  ;;  %v3062_v30 = vld [vmem:[%s14824_s8 + $0xa0] sm:$0xff]  ;;  %v3159_v49 = vld [vmem:[%s14824_s8 + $0x3a8] sm:$0xff] }
 0x5d6   : > { %3931 = vmatpush.msra.mxu1 %v3070_v12  ;;  %3950 = vmatpush.msra.mxu2 %v3150_v3  ;;  %v6607_v12 = vld [vmem:[%s14824_s8 + $0xf18] sm:$0xff]  ;;  %v3202_v3 = vld [vmem:[%s14824_s8 + $0x500] sm:$0xff] }
 0x5d7   : > { %3817 = vmatpush.msrb.mxu0 %v6598_v10  ;;  %3886 = vmatpush.msrb.mxu3 %v6535_v43  ;;  %v3075_v10 = vld [vmem:[%s14824_s8 + $0x108] sm:$0xff] }
 0x5d8   : > { %3932 = vmatpush.msra.mxu1 %v3066_v14  ;;  %3951 = vmatpush.msra.mxu2 %v3146_v7  ;;  %v3155_v43 = vld [vmem:[%s14824_s8 + $0x388] sm:$0xff]  ;;  %v6603_v14 = vld [vmem:[%s14824_s8 + $0xef8] sm:$0xff]  ;;  %v3198_v7 = vld [vmem:[%s14824_s8 + $0x4e0] sm:$0xff] }
 0x5d9   : > { %3818 = vmatpush.msrb.mxu0 %v6594_v19  ;;  %3887 = vmatpush.msrb.mxu3 %v6531_v42  ;;  %v3071_v19 = vld [vmem:[%s14824_s8 + $0xe8] sm:$0xff] }
 0x5da   : > { %3933 = vmatpush.msra.mxu1 %v3062_v30  ;;  %3952 = vmatpush.msra.mxu2 %v3142_v25  ;;  %v3151_v42 = vld [vmem:[%s14824_s8 + $0x368] sm:$0xff]  ;;  %v11017_v30 = vpop.f32.mrf.mxu2  ;;  %v6599_v25 = vld [vmem:[%s14824_s8 + $0xed8] sm:$0xff] }
 0x5db   : > { %3819 = vmatpush.msrb.mxu0 %v6590_v20  ;;  %3888 = vmatpush.msrb.mxu3 %v6527_v32  ;;  %v3194_v20 = vld [vmem:[%s14824_s8 + $0x4c0] sm:$0xff]  ;;  %v3067_v32 = vld [vmem:[%s14824_s8 + $0xc8] sm:$0xff] }
 0x5dc   : > { %3934 = vmatpush.msra.mxu1 %v3058_v28  ;;  %3953 = vmatpush.msra.mxu2 %v3138_v36  ;;  %v3147_v28 = vld [vmem:[%s14824_s8 + $0x348] sm:$0xff]  ;;  %v6595_v36 = vld [vmem:[%s14824_s8 + $0xeb8] sm:$0xff] }
 0x5dd   : > { %3820 = vmatpush.msrb.mxu0 %v6586_v56  ;;  %3889 = vmatpush.msrb.mxu3 %v6523_v46  ;;  %v3190_v56 = vld [vmem:[%s14824_s8 + $0x4a0] sm:$0xff]  ;;  %v3063_v46 = vld [vmem:[%s14824_s8 + $0xa8] sm:$0xff] }
 0x5de   : > { %3935 = vmatpush.msra.mxu1 %v3054_v57  ;;  %3954 = vmatpush.msra.mxu2 %v3134_v0  ;;  %v3143_v57 = vld [vmem:[%s14824_s8 + $0x328] sm:$0xff]  ;;  %v6591_v0 = vld [vmem:[%s14824_s8 + $0xe98] sm:$0xff] }
 0x5df   : > { %3821 = vmatpush.msrb.mxu0 %v6582_v24  ;;  %3890 = vmatpush.msrb.mxu3 %v6519_v51  ;;  %v3186_v24 = vld [vmem:[%s14824_s8 + $0x480] sm:$0xff]  ;;  %v3059_v51 = vld [vmem:[%s14824_s8 + $0x88] sm:$0xff] }
 0x5e0   : > { %3936 = vmatpush.msra.mxu1 %v3050_v2  ;;  %3955 = vmatpush.msra.mxu2 %v3130_v22  ;;  %v3139_v2 = vld [vmem:[%s14824_s8 + $0x308] sm:$0xff]  ;;  %v6587_v22 = vld [vmem:[%s14824_s8 + $0xe78] sm:$0xff] }
 0x5e1   : > { %3822 = vmatpush.msrb.mxu0 %v6578_v26  ;;  %3891 = vmatpush.msrb.mxu3 %v6515_v37  ;;  %v3182_v26 = vld [vmem:[%s14824_s8 + $0x460] sm:$0xff]  ;;  %v3055_v37 = vld [vmem:[%s14824_s8 + $0x68] sm:$0xff] }
 0x5e2   : > { %3937 = vmatpush.msra.mxu1 %v3046_v63  ;;  %3956 = vmatpush.msra.mxu2 %v3126_v34  ;;  %v3135_v63 = vld [vmem:[%s14824_s8 + $0x2e8] sm:$0xff]  ;;  %v6583_v34 = vld [vmem:[%s14824_s8 + $0xe58] sm:$0xff] }
 0x5e3   : > { %3823 = vmatpush.msrb.mxu0 %v6574_v48  ;;  %3892 = vmatpush.msrb.mxu3 %v6511_v45  ;;  %v3178_v48 = vld [vmem:[%s14824_s8 + $0x440] sm:$0xff]  ;;  %v3051_v45 = vld [vmem:[%s14824_s8 + $0x48] sm:$0xff] }
 0x5e4   : > { %3938 = vmatpush.msra.mxu1 %v3042_v38  ;;  %3957 = vmatpush.msra.mxu2 %v3122_v47  ;;  %v3131_v38 = vld [vmem:[%s14824_s8 + $0x2c8] sm:$0xff]  ;;  %v6579_v47 = vld [vmem:[%s14824_s8 + $0xe38] sm:$0xff] }
 0x5e5   : > { %3824 = vmatmul.f32.vlgmr.msrb.gmra.mxu0 %v10267_v60  ;;  %3893 = vmatmul.f32.vlgmr.msrb.gmra.mxu3 %v10090_v39  ;;  %v3114_v39 = vld [vmem:[%s14824_s8 + $0x240] sm:$0xff] }
 0x5e6   : > { %3900 = vmatpush.msra.mxu0 %v6635_v53  ;;  %3939 = vmatmul.f32.vlgmr.msra.gmra.mxu1 %v10905_v61  ;;  %v3174_v53 = vld [vmem:[%s14824_s8 + $0x420] sm:$0xff] }
 0x5e7   : > { %3969 = vmatpush.msra.mxu3 %v3230_v58  ;;  %4015 = vmatpush.msrb.mxu1 %v3103_v6  ;;  %v3047_v58 = vld [vmem:[%s14824_s8 + $0x28] sm:$0xff] }
 0x5e8   : > { %3958 = vmatpush.msra.mxu2 %v3118_v21  ;;  %3901 = vmatpush.msra.mxu0 %v6631_v1  ;;  %v3127_v6 = vld [vmem:[%s14824_s8 + $0x2a8] sm:$0xff]  ;;  %v6575_v21 = vld [vmem:[%s14824_s8 + $0xe18] sm:$0xff]  ;;  %v3170_v1 = vld [vmem:[%s14824_s8 + $0x400] sm:$0xff] }
 0x5e9   : > { %3970 = vmatpush.msra.mxu3 %v3226_v11  ;;  %4016 = vmatpush.msrb.mxu1 %v3099_v62  ;;  %v3043_v11 = vld [vmem:[%s14824_s8 + $0x8] sm:$0xff] }
 0x5ea   : > { %3959 = vmatpush.msra.mxu2 %v3114_v39  ;;  %3902 = vmatpush.msra.mxu0 %v6627_v9  ;;  %v3123_v62 = vld [vmem:[%s14824_s8 + $0x288] sm:$0xff]  ;;  %v3294_v39 = vld [vmem:[%s14824_s8 + $0x7e0] sm:$0xff]  ;;  %v11107_v9 = vpop.f32.mrf.mxu3 }
 0x5eb   : > { %3971 = vmatpush.msra.mxu3 %v3222_v13  ;;  %4017 = vmatpush.msrb.mxu1 %v3095_v16  ;;  %v3231_v13 = vld [vmem:[%s14824_s8 + $0x5e8] sm:$0xff]  ;;  %v3104_v16 = vld [vmem:[%s14824_s8 + $0x1f0] sm:$0xff] }
 0x5ec   : > { %3960 = vmatpush.msra.mxu2 %v3110_v17  ;;  %3903 = vmatpush.msra.mxu0 %v6623_v59  ;;  %v3119_v17 = vld [vmem:[%s14824_s8 + $0x268] sm:$0xff]  ;;  %v3290_v59 = vld [vmem:[%s14824_s8 + $0x7c0] sm:$0xff] }
 0x5ed   : > { %3972 = vmatpush.msra.mxu3 %v3218_v55  ;;  %4018 = vmatpush.msrb.mxu1 %v3091_v27  ;;  %v3227_v55 = vld [vmem:[%s14824_s8 + $0x5c8] sm:$0xff] }
 0x5ee   : > { %3961 = vmatpush.msra.mxu2 %v3106_v35  ;;  %3827 = vmatmul.f32.gmra.mxu0 %v10253_v4  ;;  %v3115_v27 = vld [vmem:[%s14824_s8 + $0x248] sm:$0xff]  ;;  %v3286_v35 = vld [vmem:[%s14824_s8 + $0x7a0] sm:$0xff] }
 0x5ef   : > { %3896 = vmatmul.f32.gmra.mxu3 %v10081_v31  ;;  %3904 = vmatpush.msra.mxu0 %v6619_v40  ;;  %v3083_v31 = vld [vmem:[%s14824_s8 + $0x148] sm:$0xff] }
 0x5f0   : > { %3942 = vmatmul.f32.gmra.mxu1 %v10961_v54  ;;  %3962 = vmatmul.f32.vlgmr.msra.gmra.mxu2 %v10952_v52  ;;  %v3223_v40 = vld [vmem:[%s14824_s8 + $0x5a8] sm:$0xff] }
 0x5f1   : > { %3973 = vmatpush.msra.mxu3 %v3214_v15  ;;  %4019 = vmatpush.msrb.mxu1 %v3087_v33  ;;  %v3096_v15 = vld [vmem:[%s14824_s8 + $0x1b0] sm:$0xff]  ;;  %v3111_v33 = vld [vmem:[%s14824_s8 + $0x228] sm:$0xff] }
 0x5f2   : > { %4038 = vmatpush.msrb.mxu2 %v3167_v23  ;;  %3905 = vmatpush.msra.mxu0 %v6615_v8  ;;  %v3282_v23 = vld [vmem:[%s14824_s8 + $0x780] sm:$0xff]  ;;  %v3219_v8 = vld [vmem:[%s14824_s8 + $0x588] sm:$0xff] }
 0x5f3   : > { %3974 = vmatpush.msra.mxu3 %v3210_v29  ;;  %4020 = vmatpush.msrb.mxu1 %v3083_v31  ;;  %v3092_v29 = vld [vmem:[%s14824_s8 + $0x190] sm:$0xff]  ;;  %v3107_v31 = vld [vmem:[%s14824_s8 + $0x208] sm:$0xff] }
 0x5f4   : > { %4039 = vmatpush.msrb.mxu2 %v3163_v44  ;;  %3906 = vmatpush.msra.mxu0 %v6611_v5  ;;  %v3278_v44 = vld [vmem:[%s14824_s8 + $0x760] sm:$0xff]  ;;  %v11160_v5 = vpop.f32.mrf.mxu3 }
 0x5f5   : > { %3975 = vmatpush.msra.mxu3 %v3206_v41  ;;  %4021 = vmatpush.msrb.mxu1 %v3079_v50  ;;  %v3215_v41 = vld [vmem:[%s14824_s8 + $0x568] sm:$0xff]  ;;  %v3088_v50 = vld [vmem:[%s14824_s8 + $0x170] sm:$0xff] }
 0x5f6   : > { %4040 = vmatpush.msrb.mxu2 %v3159_v49  ;;  %3907 = vmatpush.msra.mxu0 %v6607_v12  ;;  %v3168_v49 = vld [vmem:[%s14824_s8 + $0x3f0] sm:$0xff]  ;;  %v3274_v12 = vld [vmem:[%s14824_s8 + $0x740] sm:$0xff] }
 0x5f7   : > { %3976 = vmatpush.msra.mxu3 %v3202_v3  ;;  %4022 = vmatpush.msrb.mxu1 %v3075_v10  ;;  %v3084_v3 = vld [vmem:[%s14824_s8 + $0x150] sm:$0xff] }
 0x5f8   : > { %4041 = vmatpush.msrb.mxu2 %v3155_v43  ;;  %3908 = vmatpush.msra.mxu0 %v6603_v14  ;;  %v3164_v10 = vld [vmem:[%s14824_s8 + $0x3d0] sm:$0xff]  ;;  %v3270_v43 = vld [vmem:[%s14824_s8 + $0x720] sm:$0xff]  ;;  %v3207_v14 = vld [vmem:[%s14824_s8 + $0x528] sm:$0xff] }
 0x5f9   : > { %3965 = vmatmul.f32.gmra.mxu2 %v11017_v30  ;;  %3977 = vmatpush.msra.mxu3 %v3198_v7  ;;  %v3080_v7 = vld [vmem:[%s14824_s8 + $0x130] sm:$0xff] }
 0x5fa   : > { %4023 = vmatpush.msrb.mxu1 %v3071_v19  ;;  %4042 = vmatpush.msrb.mxu2 %v3151_v42  ;;  %v3160_v19 = vld [vmem:[%s14824_s8 + $0x3b0] sm:$0xff]  ;;  %v3266_v42 = vld [vmem:[%s14824_s8 + $0x700] sm:$0xff] }
 0x5fb   : > { %3909 = vmatpush.msra.mxu0 %v6599_v25  ;;  %3978 = vmatpush.msra.mxu3 %v3194_v20  ;;  %v3203_v25 = vld [vmem:[%s14824_s8 + $0x508] sm:$0xff]  ;;  %v3076_v20 = vld [vmem:[%s14824_s8 + $0x110] sm:$0xff] }
 0x5fc   : > { %4024 = vmatpush.msrb.mxu1 %v3067_v32  ;;  %4043 = vmatpush.msrb.mxu2 %v3147_v28  ;;  %v3156_v32 = vld [vmem:[%s14824_s8 + $0x390] sm:$0xff]  ;;  %v3262_v28 = vld [vmem:[%s14824_s8 + $0x6e0] sm:$0xff] }
 0x5fd   : > { %3910 = vmatpush.msra.mxu0 %v6595_v36  ;;  %3979 = vmatpush.msra.mxu3 %v3190_v56  ;;  %v3199_v36 = vld [vmem:[%s14824_s8 + $0x4e8] sm:$0xff]  ;;  %v3072_v56 = vld [vmem:[%s14824_s8 + $0xf0] sm:$0xff] }
 0x5fe   : > { %4025 = vmatpush.msrb.mxu1 %v3063_v46  ;;  %4044 = vmatpush.msrb.mxu2 %v3143_v57  ;;  %v3152_v46 = vld [vmem:[%s14824_s8 + $0x370] sm:$0xff]  ;;  %v3258_v57 = vld [vmem:[%s14824_s8 + $0x6c0] sm:$0xff] }
 0x5ff   : > { %3911 = vmatpush.msra.mxu0 %v6591_v0  ;;  %3980 = vmatpush.msra.mxu3 %v3186_v24  ;;  %v3195_v0 = vld [vmem:[%s14824_s8 + $0x4c8] sm:$0xff]  ;;  %v3068_v24 = vld [vmem:[%s14824_s8 + $0xd0] sm:$0xff] }
 0x600   : > { %4026 = vmatpush.msrb.mxu1 %v3059_v51  ;;  %4045 = vmatpush.msrb.mxu2 %v3139_v2  ;;  %v3148_v51 = vld [vmem:[%s14824_s8 + $0x350] sm:$0xff]  ;;  %v3254_v2 = vld [vmem:[%s14824_s8 + $0x6a0] sm:$0xff] }
 0x601   : > { %3912 = vmatpush.msra.mxu0 %v6587_v22  ;;  %3981 = vmatpush.msra.mxu3 %v3182_v26  ;;  %v3191_v22 = vld [vmem:[%s14824_s8 + $0x4a8] sm:$0xff]  ;;  %v3064_v26 = vld [vmem:[%s14824_s8 + $0xb0] sm:$0xff] }
 0x602   : > { %4027 = vmatpush.msrb.mxu1 %v3055_v37  ;;  %4046 = vmatpush.msrb.mxu2 %v3135_v63  ;;  %v3144_v37 = vld [vmem:[%s14824_s8 + $0x330] sm:$0xff]  ;;  %v3250_v63 = vld [vmem:[%s14824_s8 + $0x680] sm:$0xff] }
 0x603   : > { %3913 = vmatpush.msra.mxu0 %v6583_v34  ;;  %3982 = vmatpush.msra.mxu3 %v3178_v48  ;;  %v3187_v34 = vld [vmem:[%s14824_s8 + $0x488] sm:$0xff]  ;;  %v3060_v48 = vld [vmem:[%s14824_s8 + $0x90] sm:$0xff] }
 0x604   : > { %4028 = vmatpush.msrb.mxu1 %v3051_v45  ;;  %4047 = vmatpush.msrb.mxu2 %v3131_v38  ;;  %v3140_v45 = vld [vmem:[%s14824_s8 + $0x310] sm:$0xff]  ;;  %v3246_v38 = vld [vmem:[%s14824_s8 + $0x660] sm:$0xff] }
 0x605   : > { %3914 = vmatpush.msra.mxu0 %v6579_v47  ;;  %3983 = vmatpush.msra.mxu3 %v3174_v53  ;;  %v3183_v47 = vld [vmem:[%s14824_s8 + $0x468] sm:$0xff]  ;;  %v3056_v53 = vld [vmem:[%s14824_s8 + $0x70] sm:$0xff] }
 0x606   : > { %4029 = vmatpush.msrb.mxu1 %v3047_v58  ;;  %4048 = vmatpush.msrb.mxu2 %v3127_v6  ;;  %v3136_v58 = vld [vmem:[%s14824_s8 + $0x2f0] sm:$0xff]  ;;  %v3242_v6 = vld [vmem:[%s14824_s8 + $0x640] sm:$0xff] }
 0x607   : > { %3915 = vmatpush.msra.mxu0 %v6575_v21  ;;  %3984 = vmatpush.msra.mxu3 %v3170_v1  ;;  %v3179_v21 = vld [vmem:[%s14824_s8 + $0x448] sm:$0xff]  ;;  %v3052_v1 = vld [vmem:[%s14824_s8 + $0x50] sm:$0xff] }
 0x608   : > { %4030 = vmatpush.msrb.mxu1 %v3043_v11  ;;  %4049 = vmatpush.msrb.mxu2 %v3123_v62  ;;  %v3132_v11 = vld [vmem:[%s14824_s8 + $0x2d0] sm:$0xff]  ;;  %v3238_v62 = vld [vmem:[%s14824_s8 + $0x620] sm:$0xff] }
 0x609   : > { %3916 = vmatmul.f32.vlgmr.msra.gmra.mxu0 %v10267_v60  ;;  %3985 = vmatmul.f32.vlgmr.msra.gmra.mxu3 %v11107_v9  ;;  %v3100_v60 = vld [vmem:[%s14824_s8 + $0x1d0] sm:$0xff] }
 0x60a   : > { %3992 = vmatpush.msrb.mxu0 %v3294_v39  ;;  %4031 = vmatmul.f32.vlgmr.msrb.gmra.mxu1 %v10905_v61  ;;  %v3175_v39 = vld [vmem:[%s14824_s8 + $0x428] sm:$0xff] }
 0x60b   : > { %4061 = vmatpush.msrb.mxu3 %v3231_v13  ;;  %4107 = vmatpush.msra.mxu1 %v3104_v16  ;;  %v3048_v13 = vld [vmem:[%s14824_s8 + $0x30] sm:$0xff] }
 0x60c   : > { %4050 = vmatpush.msrb.mxu2 %v3119_v17  ;;  %3993 = vmatpush.msrb.mxu0 %v3290_v59  ;;  %v3128_v16 = vld [vmem:[%s14824_s8 + $0x2b0] sm:$0xff]  ;;  %v3234_v17 = vld [vmem:[%s14824_s8 + $0x600] sm:$0xff]  ;;  %v3171_v59 = vld [vmem:[%s14824_s8 + $0x408] sm:$0xff] }
 0x60d   : > { %4062 = vmatpush.msrb.mxu3 %v3227_v55  ;;  %4108 = vmatpush.msra.mxu1 %v3100_v60  ;;  %v3044_v55 = vld [vmem:[%s14824_s8 + $0x10] sm:$0xff] }
 0x60e   : > { %4051 = vmatpush.msrb.mxu2 %v3115_v27  ;;  %3994 = vmatpush.msrb.mxu0 %v3286_v35  ;;  %v3124_v60 = vld [vmem:[%s14824_s8 + $0x290] sm:$0xff]  ;;  %v11308_v27 = vpop.f32.mrf.mxu0  ;;  %v3295_v35 = vld [vmem:[%s14824_s8 + $0x7e8] sm:$0xff] }
 0x60f   : > { %4063 = vmatpush.msrb.mxu3 %v3223_v40  ;;  %4109 = vmatpush.msra.mxu1 %v3096_v15  ;;  %v3232_v40 = vld [vmem:[%s14824_s8 + $0x5f0] sm:$0xff]  ;;  %v3105_v15 = vld [vmem:[%s14824_s8 + $0x1f8] sm:$0xff] }
 0x610   : > { %4052 = vmatpush.msrb.mxu2 %v3111_v33  ;;  %3995 = vmatpush.msrb.mxu0 %v3282_v23  ;;  %v3120_v33 = vld [vmem:[%s14824_s8 + $0x270] sm:$0xff]  ;;  %v3291_v23 = vld [vmem:[%s14824_s8 + $0x7c8] sm:$0xff] }
 0x611   : > { %4064 = vmatpush.msrb.mxu3 %v3219_v8  ;;  %4110 = vmatpush.msra.mxu1 %v3092_v29  ;;  %v3228_v8 = vld [vmem:[%s14824_s8 + $0x5d0] sm:$0xff]  ;;  %v3101_v29 = vld [vmem:[%s14824_s8 + $0x1d8] sm:$0xff] }
 0x612   : > { %4053 = vmatpush.msrb.mxu2 %v3107_v31  ;;  %3919 = vmatmul.f32.gmra.mxu0 %v10253_v4  ;;  %v3211_v4 = vld [vmem:[%s14824_s8 + $0x548] sm:$0xff]  ;;  %v3116_v31 = vld [vmem:[%s14824_s8 + $0x250] sm:$0xff] }
 0x613   : > { %3988 = vmatmul.f32.gmra.mxu3 %v11160_v5  ;;  %3996 = vmatpush.msrb.mxu0 %v3278_v44  ;;  %v3287_v44 = vld [vmem:[%s14824_s8 + $0x7a8] sm:$0xff] }
 0x614   : > { %4034 = vmatmul.f32.gmra.mxu1 %v10961_v54  ;;  %4054 = vmatmul.f32.vlgmr.msrb.gmra.mxu2 %v10952_v52 }
 0x615   : > { %4065 = vmatpush.msrb.mxu3 %v3215_v41  ;;  %4111 = vmatpush.msra.mxu1 %v3088_v50  ;;  %v3224_v41 = vld [vmem:[%s14824_s8 + $0x5b0] sm:$0xff]  ;;  %v3097_v50 = vld [vmem:[%s14824_s8 + $0x1b8] sm:$0xff] }
 0x616   : > { %4130 = vmatpush.msra.mxu2 %v3168_v49  ;;  %3997 = vmatpush.msrb.mxu0 %v3274_v12  ;;  %v3112_v49 = vld [vmem:[%s14824_s8 + $0x230] sm:$0xff]  ;;  %v3283_v12 = vld [vmem:[%s14824_s8 + $0x788] sm:$0xff] }
 0x617   : > { %4066 = vmatpush.msrb.mxu3 %v3211_v4  ;;  %4112 = vmatpush.msra.mxu1 %v3084_v3  ;;  %v3220_v4 = vld [vmem:[%s14824_s8 + $0x590] sm:$0xff]  ;;  %v3093_v3 = vld [vmem:[%s14824_s8 + $0x198] sm:$0xff] }
 0x618   : > { %4131 = vmatpush.msra.mxu2 %v3164_v10  ;;  %3998 = vmatpush.msrb.mxu0 %v3270_v43  ;;  %v3108_v10 = vld [vmem:[%s14824_s8 + $0x210] sm:$0xff]  ;;  %v3279_v43 = vld [vmem:[%s14824_s8 + $0x768] sm:$0xff] }
 0x619   : > { %4067 = vmatpush.msrb.mxu3 %v3207_v14  ;;  %4113 = vmatpush.msra.mxu1 %v3080_v7  ;;  %v11364_v14 = vpop.f32.mrf.mxu0  ;;  %v11366_v7 = vpop.f32.mrf.mxu1 }
 0x61a   : > { %4132 = vmatpush.msra.mxu2 %v3160_v19  ;;  %3999 = vmatpush.msrb.mxu0 %v3266_v42  ;;  %v3216_v19 = vld [vmem:[%s14824_s8 + $0x570] sm:$0xff]  ;;  %v3089_v42 = vld [vmem:[%s14824_s8 + $0x178] sm:$0xff] }
 0x61b   : > { %4068 = vmatpush.msrb.mxu3 %v3203_v25  ;;  %4114 = vmatpush.msra.mxu1 %v3076_v20  ;;  %v3169_v25 = vld [vmem:[%s14824_s8 + $0x3f8] sm:$0xff]  ;;  %v3275_v20 = vld [vmem:[%s14824_s8 + $0x748] sm:$0xff] }
 0x61c   : > { %4133 = vmatpush.msra.mxu2 %v3156_v32  ;;  %4000 = vmatpush.msrb.mxu0 %v3262_v28  ;;  %v3212_v32 = vld [vmem:[%s14824_s8 + $0x550] sm:$0xff]  ;;  %v3085_v28 = vld [vmem:[%s14824_s8 + $0x158] sm:$0xff] }
 0x61d   : > { %4057 = vmatmul.f32.gmra.mxu2 %v11017_v30  ;;  %4069 = vmatpush.msrb.mxu3 %v3199_v36  ;;  %v3165_v36 = vld [vmem:[%s14824_s8 + $0x3d8] sm:$0xff] }
 0x61e   : > { %4115 = vmatpush.msra.mxu1 %v3072_v56  ;;  %4134 = vmatpush.msra.mxu2 %v3152_v46  ;;  %v3271_v56 = vld [vmem:[%s14824_s8 + $0x728] sm:$0xff]  ;;  %v3208_v46 = vld [vmem:[%s14824_s8 + $0x530] sm:$0xff] }
 0x61f   : > { %4001 = vmatpush.msrb.mxu0 %v3258_v57  ;;  %4070 = vmatpush.msrb.mxu3 %v3195_v0  ;;  %v3081_v57 = vld [vmem:[%s14824_s8 + $0x138] sm:$0xff]  ;;  %v11402_v0 = vpop.f32.mrf.mxu2 }
 0x620   : > { %4116 = vmatpush.msra.mxu1 %v3068_v24  ;;  %4135 = vmatpush.msra.mxu2 %v3148_v51  ;;  %v3161_v24 = vld [vmem:[%s14824_s8 + $0x3b8] sm:$0xff]  ;;  %v3267_v51 = vld [vmem:[%s14824_s8 + $0x708] sm:$0xff] }
 0x621   : > { %4002 = vmatpush.msrb.mxu0 %v3254_v2  ;;  %4071 = vmatpush.msrb.mxu3 %v3191_v22  ;;  %v3204_v2 = vld [vmem:[%s14824_s8 + $0x510] sm:$0xff]  ;;  %v3077_v22 = vld [vmem:[%s14824_s8 + $0x118] sm:$0xff] }
 0x622   : > { %4117 = vmatpush.msra.mxu1 %v3064_v26  ;;  %4136 = vmatpush.msra.mxu2 %v3144_v37  ;;  %v3157_v26 = vld [vmem:[%s14824_s8 + $0x398] sm:$0xff]  ;;  %v3263_v37 = vld [vmem:[%s14824_s8 + $0x6e8] sm:$0xff] }
 0x623   : > { %4003 = vmatpush.msrb.mxu0 %v3250_v63  ;;  %4072 = vmatpush.msrb.mxu3 %v3187_v34  ;;  %v3200_v63 = vld [vmem:[%s14824_s8 + $0x4f0] sm:$0xff]  ;;  %v3073_v34 = vld [vmem:[%s14824_s8 + $0xf8] sm:$0xff] }
 0x624   : > { %4118 = vmatpush.msra.mxu1 %v3060_v48  ;;  %4137 = vmatpush.msra.mxu2 %v3140_v45  ;;  %v3153_v48 = vld [vmem:[%s14824_s8 + $0x378] sm:$0xff]  ;;  %v11431_v45 = vpop.f32.mrf.mxu1 }
 0x625   : > { %4004 = vmatpush.msrb.mxu0 %v3246_v38  ;;  %4073 = vmatpush.msrb.mxu3 %v3183_v47  ;;  %v3259_v38 = vld [vmem:[%s14824_s8 + $0x6c8] sm:$0xff]  ;;  %v3196_v47 = vld [vmem:[%s14824_s8 + $0x4d0] sm:$0xff] }
 0x626   : > { %4119 = vmatpush.msra.mxu1 %v3056_v53  ;;  %4138 = vmatpush.msra.mxu2 %v3136_v58  ;;  %v3069_v53 = vld [vmem:[%s14824_s8 + $0xd8] sm:$0xff] }
 0x627   : > { %4005 = vmatpush.msrb.mxu0 %v3242_v6  ;;  %4074 = vmatpush.msrb.mxu3 %v3179_v21  ;;  %v3149_v58 = vld [vmem:[%s14824_s8 + $0x358] sm:$0xff]  ;;  %v3255_v6 = vld [vmem:[%s14824_s8 + $0x6a8] sm:$0xff]  ;;  %v3192_v21 = vld [vmem:[%s14824_s8 + $0x4b0] sm:$0xff] }
 0x628   : > { %4120 = vmatpush.msra.mxu1 %v3052_v1  ;;  %4139 = vmatpush.msra.mxu2 %v3132_v11  ;;  %v3065_v1 = vld [vmem:[%s14824_s8 + $0xb8] sm:$0xff] }
 0x629   : > { %4006 = vmatpush.msrb.mxu0 %v3238_v62  ;;  %4075 = vmatpush.msrb.mxu3 %v3175_v39  ;;  %v3145_v11 = vld [vmem:[%s14824_s8 + $0x338] sm:$0xff]  ;;  %v3251_v62 = vld [vmem:[%s14824_s8 + $0x688] sm:$0xff]  ;;  %v3188_v39 = vld [vmem:[%s14824_s8 + $0x490] sm:$0xff] }
 0x62a   : > { %4121 = vmatpush.msra.mxu1 %v3048_v13  ;;  %4140 = vmatpush.msra.mxu2 %v3128_v16  ;;  %v11464_v13 = vpop.f32.mrf.mxu2  ;;  %v3061_v16 = vld [vmem:[%s14824_s8 + $0x98] sm:$0xff] }
 0x62b   : > { %4007 = vmatpush.msrb.mxu0 %v3234_v17  ;;  %4076 = vmatpush.msrb.mxu3 %v3171_v59  ;;  %v3141_v17 = vld [vmem:[%s14824_s8 + $0x318] sm:$0xff]  ;;  %v3247_v59 = vld [vmem:[%s14824_s8 + $0x668] sm:$0xff] }
 0x62c   : > { %4122 = vmatpush.msra.mxu1 %v3044_v55  ;;  %4141 = vmatpush.msra.mxu2 %v3124_v60  ;;  %v3184_v55 = vld [vmem:[%s14824_s8 + $0x470] sm:$0xff]  ;;  %v3057_v60 = vld [vmem:[%s14824_s8 + $0x78] sm:$0xff] }
 0x62d   : > { %4008 = vmatmul.f32.vlgmr.msrb.gmra.mxu0 %v11308_v27  ;;  %4077 = vmatmul.f32.vlgmr.msrb.gmra.mxu3 %v11107_v9 }
 0x62e   : > { %4084 = vmatpush.msra.mxu0 %v3295_v35  ;;  %4123 = vmatmul.f32.vlgmr.msra.gmra.mxu1 %v10905_v61  ;;  %v3137_v35 = vld [vmem:[%s14824_s8 + $0x2f8] sm:$0xff] }
 0x62f   : > { %4153 = vmatpush.msra.mxu3 %v3232_v40  ;;  %4199 = vmatpush.msrb.mxu1 %v3105_v15  ;;  %v3243_v40 = vld [vmem:[%s14824_s8 + $0x648] sm:$0xff]  ;;  %v3180_v15 = vld [vmem:[%s14824_s8 + $0x450] sm:$0xff] }
 0x630   : > { %4142 = vmatpush.msra.mxu2 %v3120_v33  ;;  %4085 = vmatpush.msra.mxu0 %v3291_v23  ;;  %v3053_v33 = vld [vmem:[%s14824_s8 + $0x58] sm:$0xff] }
 0x631   : > { %4154 = vmatpush.msra.mxu3 %v3228_v8  ;;  %4200 = vmatpush.msrb.mxu1 %v3101_v29  ;;  %v3133_v23 = vld [vmem:[%s14824_s8 + $0x2d8] sm:$0xff]  ;;  %v11496_v8 = vpop.f32.mrf.mxu1  ;;  %v3239_v29 = vld [vmem:[%s14824_s8 + $0x628] sm:$0xff] }
 0x632   : > { %4143 = vmatpush.msra.mxu2 %v3116_v31  ;;  %4086 = vmatpush.msra.mxu0 %v3287_v44  ;;  %v3176_v31 = vld [vmem:[%s14824_s8 + $0x430] sm:$0xff]  ;;  %v3049_v44 = vld [vmem:[%s14824_s8 + $0x38] sm:$0xff] }
 0x633   : > { %4155 = vmatpush.msra.mxu3 %v3224_v41  ;;  %4201 = vmatpush.msrb.mxu1 %v3097_v50  ;;  %v3129_v41 = vld [vmem:[%s14824_s8 + $0x2b8] sm:$0xff]  ;;  %v3235_v50 = vld [vmem:[%s14824_s8 + $0x608] sm:$0xff] }
 0x634   : > { %4144 = vmatpush.msra.mxu2 %v3112_v49  ;;  %4087 = vmatpush.msra.mxu0 %v3283_v12  ;;  %v3172_v49 = vld [vmem:[%s14824_s8 + $0x410] sm:$0xff]  ;;  %v3045_v12 = vld [vmem:[%s14824_s8 + $0x18] sm:$0xff] }
 0x635   : > { %4156 = vmatpush.msra.mxu3 %v3220_v4  ;;  %4202 = vmatpush.msrb.mxu1 %v3093_v3  ;;  %v3125_v4 = vld [vmem:[%s14824_s8 + $0x298] sm:$0xff]  ;;  %v11522_v3 = vpop.f32.mrf.mxu2 }
 0x636   : > { %4145 = vmatpush.msra.mxu2 %v3108_v10  ;;  %4011 = vmatmul.f32.gmra.mxu0 %v11364_v14  ;;  %v3296_v10 = vld [vmem:[%s14824_s8 + $0x7f0] sm:$0xff] }
 0x637   : > { %4080 = vmatmul.f32.gmra.mxu3 %v11160_v5  ;;  %4088 = vmatpush.msra.mxu0 %v3279_v43  ;;  %v3233_v43 = vld [vmem:[%s14824_s8 + $0x5f8] sm:$0xff] }
 0x638   : > { %4126 = vmatmul.f32.gmra.mxu1 %v10961_v54  ;;  %4146 = vmatmul.f32.vlgmr.msra.gmra.mxu2 %v10952_v52 }
 0x639   : > { %4157 = vmatpush.msra.mxu3 %v3216_v19  ;;  %4203 = vmatpush.msrb.mxu1 %v3089_v42  ;;  %v6696_v19 = vld [vmem:[%s14824_s8 + $0x11e0] sm:$0xff]  ;;  %v3121_v42 = vld [vmem:[%s14824_s8 + $0x278] sm:$0xff] }
 0x63a   : > { %4222 = vmatpush.msrb.mxu2 %v3169_v25  ;;  %4089 = vmatpush.msra.mxu0 %v3275_v20  ;;  %v3292_v25 = vld [vmem:[%s14824_s8 + $0x7d0] sm:$0xff]  ;;  %v3229_v20 = vld [vmem:[%s14824_s8 + $0x5d8] sm:$0xff] }
 0x63b   : > { %4158 = vmatpush.msra.mxu3 %v3212_v32  ;;  %4204 = vmatpush.msrb.mxu1 %v3085_v28  ;;  %v6692_v32 = vld [vmem:[%s14824_s8 + $0x11c0] sm:$0xff]  ;;  %v3117_v28 = vld [vmem:[%s14824_s8 + $0x258] sm:$0xff] }
 0x63c   : > { %4223 = vmatpush.msrb.mxu2 %v3165_v36  ;;  %4090 = vmatpush.msra.mxu0 %v3271_v56  ;;  %v3288_v36 = vld [vmem:[%s14824_s8 + $0x7b0] sm:$0xff]  ;;  %v11554_v56 = vpop.f32.mrf.mxu1 }
 0x63d   : > { %4159 = vmatpush.msra.mxu3 %v3208_v46  ;;  %4205 = vmatpush.msrb.mxu1 %v3081_v57  ;;  %v3225_v46 = vld [vmem:[%s14824_s8 + $0x5b8] sm:$0xff]  ;;  %v6688_v57 = vld [vmem:[%s14824_s8 + $0x11a0] sm:$0xff] }
 0x63e   : > { %4224 = vmatpush.msrb.mxu2 %v3161_v24  ;;  %4091 = vmatpush.msra.mxu0 %v3267_v51  ;;  %v3113_v24 = vld [vmem:[%s14824_s8 + $0x238] sm:$0xff]  ;;  %v3284_v51 = vld [vmem:[%s14824_s8 + $0x790] sm:$0xff] }
 0x63f   : > { %4160 = vmatpush.msra.mxu3 %v3204_v2  ;;  %4206 = vmatpush.msrb.mxu1 %v3077_v22  ;;  %v3221_v2 = vld [vmem:[%s14824_s8 + $0x598] sm:$0xff]  ;;  %v6684_v22 = vld [vmem:[%s14824_s8 + $0x1180] sm:$0xff] }
 0x640   : > { %4225 = vmatpush.msrb.mxu2 %v3157_v26  ;;  %4092 = vmatpush.msra.mxu0 %v3263_v37  ;;  %v3109_v26 = vld [vmem:[%s14824_s8 + $0x218] sm:$0xff]  ;;  %v3280_v37 = vld [vmem:[%s14824_s8 + $0x770] sm:$0xff] }
 0x641   : > { %4149 = vmatmul.f32.gmra.mxu2 %v11017_v30  ;;  %4161 = vmatpush.msra.mxu3 %v3200_v63  ;;  %v11582_v63 = vpop.f32.mrf.mxu2 }
 0x642   : > { %4207 = vmatpush.msrb.mxu1 %v3073_v34  ;;  %4226 = vmatpush.msrb.mxu2 %v3153_v48  ;;  %v3217_v34 = vld [vmem:[%s14824_s8 + $0x578] sm:$0xff]  ;;  %v6680_v48 = vld [vmem:[%s14824_s8 + $0x1160] sm:$0xff] }
 0x643   : > { %4093 = vmatpush.msra.mxu0 %v3259_v38  ;;  %4162 = vmatpush.msra.mxu3 %v3196_v47  ;;  %v6760_v38 = vld [vmem:[%s14824_s8 + $0x13e0] sm:$0xff]  ;;  %v3276_v47 = vld [vmem:[%s14824_s8 + $0x750] sm:$0xff] }
 0x644   : > { %4208 = vmatpush.msrb.mxu1 %v3069_v53  ;;  %4227 = vmatpush.msrb.mxu2 %v3149_v58  ;;  %v11598_v53 = vpop.f32.mrf.mxu1  ;;  %v3213_v58 = vld [vmem:[%s14824_s8 + $0x558] sm:$0xff] }
 0x645   : > { %4094 = vmatpush.msra.mxu0 %v3255_v6  ;;  %4163 = vmatpush.msra.mxu3 %v3192_v21  ;;  %v6676_v6 = vld [vmem:[%s14824_s8 + $0x1140] sm:$0xff] }
 0x646   : > { %4209 = vmatpush.msrb.mxu1 %v3065_v1  ;;  %4228 = vmatpush.msrb.mxu2 %v3145_v11  ;;  %v6756_v21 = vld [vmem:[%s14824_s8 + $0x13c0] sm:$0xff] }
 0x647   : > { %4095 = vmatpush.msra.mxu0 %v3251_v62  ;;  %4164 = vmatpush.msra.mxu3 %v3188_v39  ;;  %v6672_v11 = vld [vmem:[%s14824_s8 + $0x1120] sm:$0xff]  ;;  %v3268_v39 = vld [vmem:[%s14824_s8 + $0x710] sm:$0xff] }
 0x648   : > { %4210 = vmatpush.msrb.mxu1 %v3061_v16  ;;  %4229 = vmatpush.msrb.mxu2 %v3141_v17  ;;  %v6752_v62 = vld [vmem:[%s14824_s8 + $0x13a0] sm:$0xff]  ;;  %v3205_v16 = vld [vmem:[%s14824_s8 + $0x518] sm:$0xff] }
 0x649   : > { %4096 = vmatpush.msra.mxu0 %v3247_v59  ;;  %4165 = vmatpush.msra.mxu3 %v3184_v55  ;;  %v6668_v17 = vld [vmem:[%s14824_s8 + $0x1100] sm:$0xff]  ;;  %v11634_v59 = vpop.f32.mrf.mxu2 }
 0x64a   : > { %4211 = vmatpush.msrb.mxu1 %v3057_v60  ;;  %4230 = vmatpush.msrb.mxu2 %v3137_v35  ;;  %v6748_v55 = vld [vmem:[%s14824_s8 + $0x1380] sm:$0xff]  ;;  %v3264_v60 = vld [vmem:[%s14824_s8 + $0x6f0] sm:$0xff]  ;;  %v3201_v35 = vld [vmem:[%s14824_s8 + $0x4f8] sm:$0xff] }
 0x64b   : > { %4097 = vmatpush.msra.mxu0 %v3243_v40  ;;  %4166 = vmatpush.msra.mxu3 %v3180_v15  ;;  %v6664_v40 = vld [vmem:[%s14824_s8 + $0x10e0] sm:$0xff] }
 0x64c   : > { %4212 = vmatpush.msrb.mxu1 %v3053_v33  ;;  %4231 = vmatpush.msrb.mxu2 %v3133_v23  ;;  %v6744_v15 = vld [vmem:[%s14824_s8 + $0x1360] sm:$0xff]  ;;  %v3260_v33 = vld [vmem:[%s14824_s8 + $0x6d0] sm:$0xff]  ;;  %v3197_v23 = vld [vmem:[%s14824_s8 + $0x4d8] sm:$0xff] }
 0x64d   : > { %4098 = vmatpush.msra.mxu0 %v3239_v29  ;;  %4167 = vmatpush.msra.mxu3 %v3176_v31  ;;  %v6660_v29 = vld [vmem:[%s14824_s8 + $0x10c0] sm:$0xff] }
 0x64e   : > { %4213 = vmatpush.msrb.mxu1 %v3049_v44  ;;  %4232 = vmatpush.msrb.mxu2 %v3129_v41  ;;  %v6740_v31 = vld [vmem:[%s14824_s8 + $0x1340] sm:$0xff]  ;;  %v11664_v44 = vpop.f32.mrf.mxu1  ;;  %v3256_v41 = vld [vmem:[%s14824_s8 + $0x6b0] sm:$0xff] }
 0x64f   : > { %4099 = vmatpush.msra.mxu0 %v3235_v50  ;;  %4168 = vmatpush.msra.mxu3 %v3172_v49  ;;  %v6656_v50 = vld [vmem:[%s14824_s8 + $0x10a0] sm:$0xff] }
 0x650   : > { %4214 = vmatpush.msrb.mxu1 %v3045_v12  ;;  %4233 = vmatpush.msrb.mxu2 %v3125_v4  ;;  %v6736_v49 = vld [vmem:[%s14824_s8 + $0x1320] sm:$0xff]  ;;  %v3252_v4 = vld [vmem:[%s14824_s8 + $0x690] sm:$0xff] }
 0x651   : > { %4100 = vmatmul.f32.vlgmr.msra.gmra.mxu0 %v11308_v27  ;;  %4169 = vmatmul.f32.vlgmr.msra.gmra.mxu3 %v11107_v9 }
 0x652   : > { %4176 = vmatpush.msrb.mxu0 %v3296_v10  ;;  %4215 = vmatmul.f32.vlgmr.msrb.gmra.mxu1 %v10905_v61  ;;  %v11556_v61 = vpop.f32.mrf.mxu3  ;;  %v3189_v10 = vld [vmem:[%s14824_s8 + $0x498] sm:$0xff] }
 0x653   : > { %4245 = vmatpush.msrb.mxu3 %v3233_v43  ;;  %4548 = vmatpush.msra.mxu1 %v6696_v19  ;;  %v6652_v43 = vld [vmem:[%s14824_s8 + $0x1080] sm:$0xff] }
 0x654   : > { %4234 = vmatpush.msrb.mxu2 %v3121_v42  ;;  %4177 = vmatpush.msrb.mxu0 %v3292_v25  ;;  %v6732_v19 = vld [vmem:[%s14824_s8 + $0x1300] sm:$0xff]  ;;  %v3248_v42 = vld [vmem:[%s14824_s8 + $0x670] sm:$0xff]  ;;  %v3185_v25 = vld [vmem:[%s14824_s8 + $0x478] sm:$0xff] }
 0x655   : > { %4246 = vmatpush.msrb.mxu3 %v3229_v20  ;;  %4549 = vmatpush.msra.mxu1 %v6692_v32  ;;  %v11698_v20 = vpop.f32.mrf.mxu2  ;;  %v6648_v32 = vld [vmem:[%s14824_s8 + $0x1060] sm:$0xff] }
 0x656   : > { %4235 = vmatpush.msrb.mxu2 %v3117_v28  ;;  %4178 = vmatpush.msrb.mxu0 %v3288_v36  ;;  %v6728_v28 = vld [vmem:[%s14824_s8 + $0x12e0] sm:$0xff]  ;;  %v3244_v36 = vld [vmem:[%s14824_s8 + $0x650] sm:$0xff] }
 0x657   : > { %4247 = vmatpush.msrb.mxu3 %v3225_v46  ;;  %4550 = vmatpush.msra.mxu1 %v6688_v57  ;;  %v3181_v46 = vld [vmem:[%s14824_s8 + $0x458] sm:$0xff]  ;;  %v6644_v57 = vld [vmem:[%s14824_s8 + $0x1040] sm:$0xff] }
 0x658   : > { %4236 = vmatpush.msrb.mxu2 %v3113_v24  ;;  %4179 = vmatpush.msrb.mxu0 %v3284_v51  ;;  %v6724_v24 = vld [vmem:[%s14824_s8 + $0x12c0] sm:$0xff]  ;;  %v11718_v51 = vpop.f32.mrf.mxu1 }
 0x659   : > { %4248 = vmatpush.msrb.mxu3 %v3221_v2  ;;  %4551 = vmatpush.msra.mxu1 %v6684_v22  ;;  %v3240_v2 = vld [vmem:[%s14824_s8 + $0x630] sm:$0xff]  ;;  %v3177_v22 = vld [vmem:[%s14824_s8 + $0x438] sm:$0xff] }
 0x65a   : > { %4237 = vmatpush.msrb.mxu2 %v3109_v26  ;;  %4103 = vmatmul.f32.gmra.mxu0 %v11364_v14  ;;  %v11614_v1 = vpop.f32.mrf.mxu3  ;;  %v6640_v26 = vld [vmem:[%s14824_s8 + $0x1020] sm:$0xff] }
 0x65b   : > { %4172 = vmatmul.f32.gmra.mxu3 %v11160_v5  ;;  %4180 = vmatpush.msrb.mxu0 %v3280_v37  ;;  %v6720_v37 = vld [vmem:[%s14824_s8 + $0x12a0] sm:$0xff] }
 0x65c   : > { %4218 = vmatmul.f32.gmra.mxu1 %v10961_v54  ;;  %4238 = vmatmul.f32.vlgmr.msrb.gmra.mxu2 %v10952_v52  ;;  %v3272_v54 = vld [vmem:[%s14824_s8 + $0x730] sm:$0xff]  ;;  %v3209_v52 = vld [vmem:[%s14824_s8 + $0x538] sm:$0xff] }
 0x65d   : > { %4249 = vmatpush.msrb.mxu3 %v3217_v34  ;;  %4552 = vmatpush.msra.mxu1 %v6680_v48  ;;  %v3236_v34 = vld [vmem:[%s14824_s8 + $0x610] sm:$0xff]  ;;  %v3173_v48 = vld [vmem:[%s14824_s8 + $0x418] sm:$0xff] }
 0x65e   : > { %4571 = vmatpush.msra.mxu2 %v6760_v38  ;;  %4181 = vmatpush.msrb.mxu0 %v3276_v47  ;;  %v6636_v38 = vld [vmem:[%s14824_s8 + $0x1000] sm:$0xff] }
 0x65f   : > { %4250 = vmatpush.msrb.mxu3 %v3213_v58  ;;  %4553 = vmatpush.msra.mxu1 %v6676_v6  ;;  %v6716_v47 = vld [vmem:[%s14824_s8 + $0x1280] sm:$0xff]  ;;  %v11746_v6 = vpop.f32.mrf.mxu0 }
 0x660   : > { %4572 = vmatpush.msra.mxu2 %v6756_v21  ;;  %4182 = vmatpush.msrb.mxu0 %v3272_v54  ;;  %v11748_v21 = vpop.f32.mrf.mxu2  ;;  %v3297_v54 = vld [vmem:[%s14824_s8 + $0x7f8] sm:$0xff] }
 0x661   : > { %4251 = vmatpush.msrb.mxu3 %v3209_v52  ;;  %4554 = vmatpush.msra.mxu1 %v6672_v11  ;;  %v6824_v52 = vld [vmem:[%s14824_s8 + $0x15e0] sm:$0xff]  ;;  %v6697_v11 = vld [vmem:[%s14824_s8 + $0x11e8] sm:$0xff] }
 0x662   : > { %4573 = vmatpush.msra.mxu2 %v6752_v62  ;;  %4183 = vmatpush.msrb.mxu0 %v3268_v39  ;;  %v11678_v12 = vpop.f32.mrf.mxu3  ;;  %v6712_v62 = vld [vmem:[%s14824_s8 + $0x1260] sm:$0xff]  ;;  %v3293_v39 = vld [vmem:[%s14824_s8 + $0x7d8] sm:$0xff] }
 0x663   : > { %4252 = vmatpush.msrb.mxu3 %v3205_v16  ;;  %4555 = vmatpush.msra.mxu1 %v6668_v17  ;;  %v6820_v16 = vld [vmem:[%s14824_s8 + $0x15c0] sm:$0xff]  ;;  %v6693_v17 = vld [vmem:[%s14824_s8 + $0x11c8] sm:$0xff] }
 0x664   : > { %4574 = vmatpush.msra.mxu2 %v6748_v55  ;;  %4184 = vmatpush.msrb.mxu0 %v3264_v60  ;;  %v3289_v55 = vld [vmem:[%s14824_s8 + $0x7b8] sm:$0xff]  ;;  %v11780_v60 = vpop.f32.mrf.mxu1 }
 0x665   : > { %4241 = vmatmul.f32.gmra.mxu2 %v11017_v30  ;;  %4253 = vmatpush.msrb.mxu3 %v3201_v35  ;;  %v3193_v30 = vld [vmem:[%s14824_s8 + $0x4b8] sm:$0xff]  ;;  %v6816_v35 = vld [vmem:[%s14824_s8 + $0x15a0] sm:$0xff] }
 0x666   : > { %4556 = vmatpush.msra.mxu1 %v6664_v40  ;;  %4575 = vmatpush.msra.mxu2 %v6744_v15  ;;  %v6689_v40 = vld [vmem:[%s14824_s8 + $0x11a8] sm:$0xff]  ;;  %v6704_v15 = vld [vmem:[%s14824_s8 + $0x1220] sm:$0xff] }
 0x667   : > { %4185 = vmatpush.msrb.mxu0 %v3260_v33  ;;  %4254 = vmatpush.msrb.mxu3 %v3197_v23  ;;  %v3285_v33 = vld [vmem:[%s14824_s8 + $0x798] sm:$0xff] }
 0x668   : > { %4557 = vmatpush.msra.mxu1 %v6660_v29  ;;  %4576 = vmatpush.msra.mxu2 %v6740_v31  ;;  %v6812_v29 = vld [vmem:[%s14824_s8 + $0x1580] sm:$0xff]  ;;  %v6685_v31 = vld [vmem:[%s14824_s8 + $0x1188] sm:$0xff] }
 0x669   : > { %4186 = vmatpush.msrb.mxu0 %v3256_v41  ;;  %4255 = vmatpush.msrb.mxu3 %v3193_v30  ;;  %v6700_v41 = vld [vmem:[%s14824_s8 + $0x1200] sm:$0xff]  ;;  %v11805_v30 = vpop.f32.mrf.mxu0 }
 0x66a   : > { %4558 = vmatpush.msra.mxu1 %v6656_v50  ;;  %4577 = vmatpush.msra.mxu2 %v6736_v49  ;;  %v11744_v58 = vpop.f32.mrf.mxu3  ;;  %v3281_v50 = vld [vmem:[%s14824_s8 + $0x778] sm:$0xff]  ;;  %v11810_v49 = vpop.f32.mrf.mxu2 }
 0x66b   : > { %4187 = vmatpush.msrb.mxu0 %v3252_v4  ;;  %4256 = vmatpush.msrb.mxu3 %v3189_v10  ;;  %v6808_v4 = vld [vmem:[%s14824_s8 + $0x1560] sm:$0xff]  ;;  %v6681_v10 = vld [vmem:[%s14824_s8 + $0x1168] sm:$0xff] }
 0x66c   : > { %4559 = vmatpush.msra.mxu1 %v6652_v43  ;;  %4578 = vmatpush.msra.mxu2 %v6732_v19  ;;  %v6761_v43 = vld [vmem:[%s14824_s8 + $0x13e8] sm:$0xff]  ;;  %v3277_v19 = vld [vmem:[%s14824_s8 + $0x758] sm:$0xff] }
 0x66d   : > { %4188 = vmatpush.msrb.mxu0 %v3248_v42  ;;  %4257 = vmatpush.msrb.mxu3 %v3185_v25  ;;  %v11826_v42 = vpop.f32.mrf.mxu1  ;;  %v6804_v25 = vld [vmem:[%s14824_s8 + $0x1540] sm:$0xff] }
 0x66e   : > { %4560 = vmatpush.msra.mxu1 %v6648_v32  ;;  %4579 = vmatpush.msra.mxu2 %v6728_v28  ;;  %v6757_v32 = vld [vmem:[%s14824_s8 + $0x13c8] sm:$0xff]  ;;  %v3273_v28 = vld [vmem:[%s14824_s8 + $0x738] sm:$0xff] }
 0x66f   : > { %4189 = vmatpush.msrb.mxu0 %v3244_v36  ;;  %4258 = vmatpush.msrb.mxu3 %v3181_v46  ;;  %v6800_v36 = vld [vmem:[%s14824_s8 + $0x1520] sm:$0xff]  ;;  %v6673_v46 = vld [vmem:[%s14824_s8 + $0x1128] sm:$0xff] }
 0x670   : > { %4561 = vmatpush.msra.mxu1 %v6644_v57  ;;  %4580 = vmatpush.msra.mxu2 %v6724_v24  ;;  %v6753_v57 = vld [vmem:[%s14824_s8 + $0x13a8] sm:$0xff]  ;;  %v3269_v24 = vld [vmem:[%s14824_s8 + $0x718] sm:$0xff] }
 0x671   : > { %4190 = vmatpush.msrb.mxu0 %v3240_v2  ;;  %4259 = vmatpush.msrb.mxu3 %v3177_v22  ;;  %v6796_v22 = vld [vmem:[%s14824_s8 + $0x1500] sm:$0xff] }
 0x672   : > { %4562 = vmatpush.msra.mxu1 %v6640_v26  ;;  %4581 = vmatpush.msra.mxu2 %v6720_v37  ;;  %v11794_v23 = vpop.f32.mrf.mxu3  ;;  %v6669_v26 = vld [vmem:[%s14824_s8 + $0x1108] sm:$0xff]  ;;  %v11862_v37 = vpop.f32.mrf.mxu2 }
 0x673   : > { %4191 = vmatpush.msrb.mxu0 %v3236_v34  ;;  %4260 = vmatpush.msrb.mxu3 %v3173_v48  ;;  %v6749_v34 = vld [vmem:[%s14824_s8 + $0x1388] sm:$0xff]  ;;  %v3265_v48 = vld [vmem:[%s14824_s8 + $0x6f8] sm:$0xff] }
 0x674   : > { %4563 = vmatpush.msra.mxu1 %v6636_v38  ;;  %4582 = vmatpush.msra.mxu2 %v6716_v47  ;;  %v11870_v38 = vpop.f32.mrf.mxu0  ;;  %v6792_v47 = vld [vmem:[%s14824_s8 + $0x14e0] sm:$0xff] }
 0x675   : > { %4192 = vmatmul.f32.vlgmr.msrb.gmra.mxu0 %v11308_v27  ;;  %4261 = vmatmul.f32.vlgmr.msrb.gmra.mxu3 %v11107_v9  ;;  %v6708_v9 = vld [vmem:[%s14824_s8 + $0x1240] sm:$0xff] }
 0x676   : > { %4268 = vmatpush.msra.mxu0 %v3297_v54  ;;  %4564 = vmatmul.f32.vlgmr.msra.gmra.mxu1 %v11366_v7  ;;  %v6665_v54 = vld [vmem:[%s14824_s8 + $0x10e8] sm:$0xff] }
 0x677   : > { %4594 = vmatpush.msra.mxu3 %v6824_v52  ;;  %4640 = vmatpush.msrb.mxu1 %v6697_v11  ;;  %v6745_v52 = vld [vmem:[%s14824_s8 + $0x1368] sm:$0xff]  ;;  %v3261_v11 = vld [vmem:[%s14824_s8 + $0x6d8] sm:$0xff] }
 0x678   : > { %4583 = vmatpush.msra.mxu2 %v6712_v62  ;;  %4269 = vmatpush.msra.mxu0 %v3293_v39  ;;  %v6788_v62 = vld [vmem:[%s14824_s8 + $0x14c0] sm:$0xff]  ;;  %v6661_v39 = vld [vmem:[%s14824_s8 + $0x10c8] sm:$0xff] }
 0x679   : > { %4595 = vmatpush.msra.mxu3 %v6820_v16  ;;  %4641 = vmatpush.msrb.mxu1 %v6693_v17  ;;  %v6741_v16 = vld [vmem:[%s14824_s8 + $0x1348] sm:$0xff]  ;;  %v11894_v17 = vpop.f32.mrf.mxu1 }
 0x67a   : > { %4584 = vmatpush.msra.mxu2 %v6708_v9  ;;  %4270 = vmatpush.msra.mxu0 %v3289_v55  ;;  %v11854_v2 = vpop.f32.mrf.mxu3  ;;  %v3257_v9 = vld [vmem:[%s14824_s8 + $0x6b8] sm:$0xff]  ;;  %v6784_v55 = vld [vmem:[%s14824_s8 + $0x14a0] sm:$0xff] }
 0x67b   : > { %4596 = vmatpush.msra.mxu3 %v6816_v35  ;;  %4642 = vmatpush.msrb.mxu1 %v6689_v40  ;;  %v6657_v35 = vld [vmem:[%s14824_s8 + $0x10a8] sm:$0xff] }
 0x67c   : > { %4585 = vmatpush.msra.mxu2 %v6704_v15  ;;  %4271 = vmatpush.msra.mxu0 %v3285_v33  ;;  %v6737_v40 = vld [vmem:[%s14824_s8 + $0x1328] sm:$0xff]  ;;  %v3253_v33 = vld [vmem:[%s14824_s8 + $0x698] sm:$0xff] }
 0x67d   : > { %4597 = vmatpush.msra.mxu3 %v6812_v29  ;;  %4643 = vmatpush.msrb.mxu1 %v6685_v31  ;;  %v6780_v29 = vld [vmem:[%s14824_s8 + $0x1480] sm:$0xff]  ;;  %v6653_v31 = vld [vmem:[%s14824_s8 + $0x1088] sm:$0xff] }
 0x67e   : > { %4586 = vmatpush.msra.mxu2 %v6700_v41  ;;  %4195 = vmatmul.f32.gmra.mxu0 %v11364_v14  ;;  %v6733_v41 = vld [vmem:[%s14824_s8 + $0x1308] sm:$0xff] }
 0x67f   : > { %4264 = vmatmul.f32.gmra.mxu3 %v11160_v5  ;;  %4272 = vmatpush.msra.mxu0 %v3281_v50  ;;  %v6677_v5 = vld [vmem:[%s14824_s8 + $0x1148] sm:$0xff]  ;;  %v3249_v50 = vld [vmem:[%s14824_s8 + $0x678] sm:$0xff] }
 0x680   : > { %4567 = vmatmul.f32.gmra.mxu1 %v11431_v45  ;;  %4587 = vmatmul.f32.vlgmr.msra.gmra.mxu2 %v11402_v0 }
 0x681   : > { %4598 = vmatpush.msra.mxu3 %v6808_v4  ;;  %4644 = vmatpush.msrb.mxu1 %v6681_v10  ;;  %v6776_v4 = vld [vmem:[%s14824_s8 + $0x1460] sm:$0xff]  ;;  %v11928_v10 = vpop.f32.mrf.mxu2 }
 0x682   : > { %4663 = vmatpush.msrb.mxu2 %v6761_v43  ;;  %4273 = vmatpush.msra.mxu0 %v3277_v19  ;;  %v11908_v15 = vpop.f32.mrf.mxu3  ;;  %v6649_v43 = vld [vmem:[%s14824_s8 + $0x1068] sm:$0xff] }
 0x683   : > { %4599 = vmatpush.msra.mxu3 %v6804_v25  ;;  %4645 = vmatpush.msrb.mxu1 %v6677_v5  ;;  %v6729_v19 = vld [vmem:[%s14824_s8 + $0x12e8] sm:$0xff]  ;;  %v11936_v25 = vpop.f32.mrf.mxu0  ;;  %v3245_v5 = vld [vmem:[%s14824_s8 + $0x658] sm:$0xff] }
 0x684   : > { %4664 = vmatpush.msrb.mxu2 %v6757_v32  ;;  %4274 = vmatpush.msra.mxu0 %v3273_v28  ;;  %v6772_v32 = vld [vmem:[%s14824_s8 + $0x1440] sm:$0xff]  ;;  %v6645_v28 = vld [vmem:[%s14824_s8 + $0x1048] sm:$0xff] }
 0x685   : > { %4600 = vmatpush.msra.mxu3 %v6800_v36  ;;  %4646 = vmatpush.msrb.mxu1 %v6673_v46  ;;  %v6725_v36 = vld [vmem:[%s14824_s8 + $0x12c8] sm:$0xff]  ;;  %v11950_v46 = vpop.f32.mrf.mxu1 }
 0x686   : > { %4665 = vmatpush.msrb.mxu2 %v6753_v57  ;;  %4275 = vmatpush.msra.mxu0 %v3269_v24  ;;  %v3241_v57 = vld [vmem:[%s14824_s8 + $0x638] sm:$0xff]  ;;  %v6768_v24 = vld [vmem:[%s14824_s8 + $0x1420] sm:$0xff] }
 0x687   : > { %4601 = vmatpush.msra.mxu3 %v6796_v22  ;;  %4647 = vmatpush.msrb.mxu1 %v6669_v26  ;;  %v6641_v22 = vld [vmem:[%s14824_s8 + $0x1028] sm:$0xff] }
 0x688   : > { %4666 = vmatpush.msrb.mxu2 %v6749_v34  ;;  %4276 = vmatpush.msra.mxu0 %v3265_v48  ;;  %v6721_v26 = vld [vmem:[%s14824_s8 + $0x12a8] sm:$0xff]  ;;  %v3237_v34 = vld [vmem:[%s14824_s8 + $0x618] sm:$0xff]  ;;  %v6764_v48 = vld [vmem:[%s14824_s8 + $0x1400] sm:$0xff] }
 0x689   : > { %4590 = vmatmul.f32.gmra.mxu2 %v11464_v13  ;;  %4602 = vmatpush.msra.mxu3 %v6792_v47  ;;  %v6637_v47 = vld [vmem:[%s14824_s8 + $0x1008] sm:$0xff] }
 0x68a   : > { %4648 = vmatpush.msrb.mxu1 %v6665_v54  ;;  %4667 = vmatpush.msrb.mxu2 %v6745_v52  ;;  %v6717_v54 = vld [vmem:[%s14824_s8 + $0x1288] sm:$0xff]  ;;  %v11976_v52 = vpop.f32.mrf.mxu3 }
 0x68b   : > { %4277 = vmatpush.msra.mxu0 %v3261_v11  ;;  %4603 = vmatpush.msra.mxu3 %v6788_v62  ;;  %v11978_v11 = vpop.f32.mrf.mxu2  ;;  %v6888_v62 = vld [vmem:[%s14824_s8 + $0x17e0] sm:$0xff] }
 0x68c   : > { %4649 = vmatpush.msrb.mxu1 %v6661_v39  ;;  %4668 = vmatpush.msrb.mxu2 %v6741_v16  ;;  %v11983_v39 = vpop.f32.mrf.mxu0  ;;  %v6825_v16 = vld [vmem:[%s14824_s8 + $0x15e8] sm:$0xff] }
 0x68d   : > { %4278 = vmatpush.msra.mxu0 %v3257_v9  ;;  %4604 = vmatpush.msra.mxu3 %v6784_v55  ;;  %v6698_v9 = vld [vmem:[%s14824_s8 + $0x11f0] sm:$0xff]  ;;  %v6713_v55 = vld [vmem:[%s14824_s8 + $0x1268] sm:$0xff] }
 0x68e   : > { %4650 = vmatpush.msrb.mxu1 %v6657_v35  ;;  %4669 = vmatpush.msrb.mxu2 %v6737_v40  ;;  %v6884_v35 = vld [vmem:[%s14824_s8 + $0x17c0] sm:$0xff]  ;;  %v6821_v40 = vld [vmem:[%s14824_s8 + $0x15c8] sm:$0xff] }
 0x68f   : > { %4279 = vmatpush.msra.mxu0 %v3253_v33  ;;  %4605 = vmatpush.msra.mxu3 %v6780_v29  ;;  %v6709_v33 = vld [vmem:[%s14824_s8 + $0x1248] sm:$0xff]  ;;  %v6880_v29 = vld [vmem:[%s14824_s8 + $0x17a0] sm:$0xff] }
 0x690   : > { %4651 = vmatpush.msrb.mxu1 %v6653_v31  ;;  %4670 = vmatpush.msrb.mxu2 %v6733_v41  ;;  %v12012_v31 = vpop.f32.mrf.mxu1  ;;  %v6817_v41 = vld [vmem:[%s14824_s8 + $0x15a8] sm:$0xff] }
 0x691   : > { %4280 = vmatpush.msra.mxu0 %v3249_v50  ;;  %4606 = vmatpush.msra.mxu3 %v6776_v4  ;;  %v6690_v50 = vld [vmem:[%s14824_s8 + $0x11b0] sm:$0xff]  ;;  %v6705_v4 = vld [vmem:[%s14824_s8 + $0x1228] sm:$0xff] }
 0x692   : > { %4652 = vmatpush.msrb.mxu1 %v6649_v43  ;;  %4671 = vmatpush.msrb.mxu2 %v6729_v19  ;;  %v6876_v43 = vld [vmem:[%s14824_s8 + $0x1780] sm:$0xff]  ;;  %v12026_v19 = vpop.f32.mrf.mxu3 }
 0x693   : > { %4281 = vmatpush.msra.mxu0 %v3245_v5  ;;  %4607 = vmatpush.msra.mxu3 %v6772_v32  ;;  %v6813_v5 = vld [vmem:[%s14824_s8 + $0x1588] sm:$0xff]  ;;  %v6686_v32 = vld [vmem:[%s14824_s8 + $0x1190] sm:$0xff] }
 0x694   : > { %4653 = vmatpush.msrb.mxu1 %v6645_v28  ;;  %4672 = vmatpush.msrb.mxu2 %v6725_v36  ;;  %v6701_v28 = vld [vmem:[%s14824_s8 + $0x1208] sm:$0xff]  ;;  %v6872_v36 = vld [vmem:[%s14824_s8 + $0x1760] sm:$0xff] }
 0x695   : > { %4282 = vmatpush.msra.mxu0 %v3241_v57  ;;  %4608 = vmatpush.msra.mxu3 %v6768_v24  ;;  %v12040_v57 = vpop.f32.mrf.mxu2  ;;  %v12042_v24 = vpop.f32.mrf.mxu0 }
 0x696   : > { %4654 = vmatpush.msrb.mxu1 %v6641_v22  ;;  %4673 = vmatpush.msrb.mxu2 %v6721_v26  ;;  %v6809_v22 = vld [vmem:[%s14824_s8 + $0x1568] sm:$0xff]  ;;  %v6682_v26 = vld [vmem:[%s14824_s8 + $0x1170] sm:$0xff] }
 0x697   : > { %4283 = vmatpush.msra.mxu0 %v3237_v34  ;;  %4609 = vmatpush.msra.mxu3 %v6764_v48  ;;  %v6762_v34 = vld [vmem:[%s14824_s8 + $0x13f0] sm:$0xff]  ;;  %v6868_v48 = vld [vmem:[%s14824_s8 + $0x1740] sm:$0xff] }
 0x698   : > { %4655 = vmatpush.msrb.mxu1 %v6637_v47  ;;  %4674 = vmatpush.msrb.mxu2 %v6717_v54  ;;  %v6805_v47 = vld [vmem:[%s14824_s8 + $0x1548] sm:$0xff]  ;;  %v6678_v54 = vld [vmem:[%s14824_s8 + $0x1150] sm:$0xff] }
 0x699   : > { %4284 = vmatmul.f32.vlgmr.msra.gmra.mxu0 %v11308_v27  ;;  %4610 = vmatmul.f32.vlgmr.msra.gmra.mxu3 %v11556_v61  ;;  %v6694_v27 = vld [vmem:[%s14824_s8 + $0x11d0] sm:$0xff] }
 0x69a   : > { %4617 = vmatpush.msrb.mxu0 %v6888_v62  ;;  %4656 = vmatmul.f32.vlgmr.msrb.gmra.mxu1 %v11366_v7  ;;  %v6758_v62 = vld [vmem:[%s14824_s8 + $0x13d0] sm:$0xff] }
 0x69b   : > { %4686 = vmatpush.msrb.mxu3 %v6825_v16  ;;  %4732 = vmatpush.msra.mxu1 %v6698_v9  ;;  %v6864_v16 = vld [vmem:[%s14824_s8 + $0x1720] sm:$0xff]  ;;  %v6801_v9 = vld [vmem:[%s14824_s8 + $0x1528] sm:$0xff] }
 0x69c   : > { %4675 = vmatpush.msrb.mxu2 %v6713_v55  ;;  %4618 = vmatpush.msrb.mxu0 %v6884_v35  ;;  %v6674_v55 = vld [vmem:[%s14824_s8 + $0x1130] sm:$0xff] }
 0x69d   : > { %4687 = vmatpush.msrb.mxu3 %v6821_v40  ;;  %4733 = vmatpush.msra.mxu1 %v6694_v27  ;;  %v6754_v35 = vld [vmem:[%s14824_s8 + $0x13b0] sm:$0xff]  ;;  %v6860_v40 = vld [vmem:[%s14824_s8 + $0x1700] sm:$0xff]  ;;  %v12086_v27 = vpop.f32.mrf.mxu3 }
 0x69e   : > { %4676 = vmatpush.msrb.mxu2 %v6709_v33  ;;  %4619 = vmatpush.msrb.mxu0 %v6880_v29  ;;  %v6797_v33 = vld [vmem:[%s14824_s8 + $0x1508] sm:$0xff]  ;;  %v6670_v29 = vld [vmem:[%s14824_s8 + $0x1110] sm:$0xff] }
 0x69f   : > { %4688 = vmatpush.msrb.mxu3 %v6817_v41  ;;  %4734 = vmatpush.msra.mxu1 %v6690_v50  ;;  %v6750_v41 = vld [vmem:[%s14824_s8 + $0x1390] sm:$0xff]  ;;  %v12097_v50 = vpop.f32.mrf.mxu2 }
 0x6a0   : > { %4677 = vmatpush.msrb.mxu2 %v6705_v4  ;;  %4620 = vmatpush.msrb.mxu0 %v6876_v43  ;;  %v6856_v4 = vld [vmem:[%s14824_s8 + $0x16e0] sm:$0xff]  ;;  %v12102_v43 = vpop.f32.mrf.mxu0 }
 0x6a1   : > { %4689 = vmatpush.msrb.mxu3 %v6813_v5  ;;  %4735 = vmatpush.msra.mxu1 %v6686_v32  ;;  %v6793_v5 = vld [vmem:[%s14824_s8 + $0x14e8] sm:$0xff]  ;;  %v6666_v32 = vld [vmem:[%s14824_s8 + $0x10f0] sm:$0xff] }
 0x6a2   : > { %4678 = vmatpush.msrb.mxu2 %v6701_v28  ;;  %4287 = vmatmul.f32.gmra.mxu0 %v11364_v14  ;;  %v12058_v14 = vpop.f32.mrf.mxu1  ;;  %v6746_v28 = vld [vmem:[%s14824_s8 + $0x1370] sm:$0xff] }
 0x6a3   : > { %4613 = vmatmul.f32.gmra.mxu3 %v11614_v1  ;;  %4621 = vmatpush.msrb.mxu0 %v6872_v36  ;;  %v6852_v36 = vld [vmem:[%s14824_s8 + $0x16c0] sm:$0xff] }
 0x6a4   : > { %4659 = vmatmul.f32.gmra.mxu1 %v11431_v45  ;;  %4679 = vmatmul.f32.vlgmr.msrb.gmra.mxu2 %v11402_v0 }
 0x6a5   : > { %4690 = vmatpush.msrb.mxu3 %v6809_v22  ;;  %4736 = vmatpush.msra.mxu1 %v6682_v26  ;;  %v6789_v22 = vld [vmem:[%s14824_s8 + $0x14c8] sm:$0xff]  ;;  %v6662_v26 = vld [vmem:[%s14824_s8 + $0x10d0] sm:$0xff] }
 0x6a6   : > { %4755 = vmatpush.msra.mxu2 %v6762_v34  ;;  %4622 = vmatpush.msrb.mxu0 %v6868_v48  ;;  %v6742_v34 = vld [vmem:[%s14824_s8 + $0x1350] sm:$0xff] }
 0x6a7   : > { %4691 = vmatpush.msrb.mxu3 %v6805_v47  ;;  %4737 = vmatpush.msra.mxu1 %v6678_v54  ;;  %v6848_v47 = vld [vmem:[%s14824_s8 + $0x16a0] sm:$0xff]  ;;  %v6785_v54 = vld [vmem:[%s14824_s8 + $0x14a8] sm:$0xff] }
 0x6a8   : > { %4756 = vmatpush.msra.mxu2 %v6758_v62  ;;  %4623 = vmatpush.msrb.mxu0 %v6864_v16  ;;  %v6658_v62 = vld [vmem:[%s14824_s8 + $0x10b0] sm:$0xff] }
 0x6a9   : > { %4692 = vmatpush.msrb.mxu3 %v6801_v9  ;;  %4738 = vmatpush.msra.mxu1 %v6674_v55  ;;  %v6738_v16 = vld [vmem:[%s14824_s8 + $0x1330] sm:$0xff]  ;;  %v12140_v9 = vpop.f32.mrf.mxu3  ;;  %v6844_v55 = vld [vmem:[%s14824_s8 + $0x1680] sm:$0xff] }
 0x6aa   : > { %4757 = vmatpush.msra.mxu2 %v6754_v35  ;;  %4624 = vmatpush.msrb.mxu0 %v6860_v40  ;;  %v12126_v48 = vpop.f32.mrf.mxu1  ;;  %v6781_v35 = vld [vmem:[%s14824_s8 + $0x1488] sm:$0xff]  ;;  %v6654_v40 = vld [vmem:[%s14824_s8 + $0x1090] sm:$0xff] }
 0x6ab   : > { %4693 = vmatpush.msrb.mxu3 %v6797_v33  ;;  %4739 = vmatpush.msra.mxu1 %v6670_v29  ;;  %v6734_v33 = vld [vmem:[%s14824_s8 + $0x1310] sm:$0xff]  ;;  %v6840_v29 = vld [vmem:[%s14824_s8 + $0x1660] sm:$0xff] }
 0x6ac   : > { %4758 = vmatpush.msra.mxu2 %v6750_v41  ;;  %4625 = vmatpush.msrb.mxu0 %v6856_v4  ;;  %v6777_v41 = vld [vmem:[%s14824_s8 + $0x1468] sm:$0xff]  ;;  %v12160_v4 = vpop.f32.mrf.mxu2 }
 0x6ad   : > { %4682 = vmatmul.f32.gmra.mxu2 %v11464_v13  ;;  %4694 = vmatpush.msrb.mxu3 %v6793_v5  ;;  %v6650_v5 = vld [vmem:[%s14824_s8 + $0x1070] sm:$0xff] }
 0x6ae   : > { %4740 = vmatpush.msra.mxu1 %v6666_v32  ;;  %4759 = vmatpush.msra.mxu2 %v6746_v28  ;;  %v6730_v32 = vld [vmem:[%s14824_s8 + $0x12f0] sm:$0xff]  ;;  %v3780_v28 = vadd.f32 %v11748_v21, %v11718_v51 }
 0x6af   : > { %4626 = vmatpush.msrb.mxu0 %v6852_v36  ;;  %4695 = vmatpush.msrb.mxu3 %v6789_v22  ;;  %v3828_v36 = vpop.f32.mrf.mxu0  ;;  %v6836_v22 = vld [vmem:[%s14824_s8 + $0x1640] sm:$0xff]  ;;  %v6726_v51 = vld [vmem:[%s14824_s8 + $0x12d0] sm:$0xff] }
 0x6b0   : > { %4741 = vmatpush.msra.mxu1 %v6662_v26  ;;  %4760 = vmatpush.msra.mxu2 %v6742_v34  ;;  %v6773_v26 = vld [vmem:[%s14824_s8 + $0x1448] sm:$0xff]  ;;  %v6646_v34 = vld [vmem:[%s14824_s8 + $0x1050] sm:$0xff]  ;;  %v3803_v21 = vadd.f32 %v11908_v15, %v3780_v28 }
 0x6b1   : > { %4627 = vmatpush.msrb.mxu0 %v6848_v47  ;;  %4696 = vmatpush.msrb.mxu3 %v6785_v54  ;;  %v6832_v47 = vld [vmem:[%s14824_s8 + $0x1620] sm:$0xff]  ;;  %v6769_v54 = vld [vmem:[%s14824_s8 + $0x1428] sm:$0xff]  ;;  %v6722_v15 = vld [vmem:[%s14824_s8 + $0x12b0] sm:$0xff] }
 0x6b2   : > { %4742 = vmatpush.msra.mxu1 %v6658_v62  ;;  %4761 = vmatpush.msra.mxu2 %v6738_v16  ;;  %v4124_v62 = vpop.f32.mrf.mxu1  ;;  %v6642_v16 = vld [vmem:[%s14824_s8 + $0x1030] sm:$0xff] }
 0x6b3   : > { %4628 = vmatpush.msrb.mxu0 %v6844_v55  ;;  %4697 = vmatpush.msrb.mxu3 %v6781_v35  ;;  %v3826_v55 = vadd.f32 %v12102_v43, %v3803_v21  ;;  %v6828_v35 = vld [vmem:[%s14824_s8 + $0x1600] sm:$0xff]  ;;  %v6718_v43 = vld [vmem:[%s14824_s8 + $0x1290] sm:$0xff] }
 0x6b4   : > { %4743 = vmatpush.msra.mxu1 %v6654_v40  ;;  %4762 = vmatpush.msra.mxu2 %v6734_v33  ;;  %v6765_v40 = vld [vmem:[%s14824_s8 + $0x1408] sm:$0xff]  ;;  %v6638_v33 = vld [vmem:[%s14824_s8 + $0x1010] sm:$0xff] }
 0x6b5   : > { %4629 = vmatpush.msrb.mxu0 %v6840_v29  ;;  %4698 = vmatpush.msrb.mxu3 %v6777_v41  ;;  %v12208_v29 = vpop.f32.mrf.mxu3  ;;  %v4125_v41 = vadd.f32 %v4124_v62, %v3826_v55  ;;  %v6714_v21 = vld [vmem:[%s14824_s8 + $0x1270] sm:$0xff] }
 0x6b6   : > { %4744 = vmatpush.msra.mxu1 %v6650_v5  ;;  %4763 = vmatpush.msra.mxu2 %v6730_v32  ;;  %v6889_v5 = vld [vmem:[%s14824_s8 + $0x17e8] sm:$0xff]  ;;  %v6710_v62 = vld [vmem:[%s14824_s8 + $0x1250] sm:$0xff] }
 0x6b7   : > { %4630 = vmatpush.msrb.mxu0 %v6836_v22  ;;  %4699 = vmatpush.msrb.mxu3 %v6773_v26  ;;  %v12213_v28 = vpop.f32.mrf.mxu0  ;;  %v6826_v22 = vld [vmem:[%s14824_s8 + $0x15f0] sm:$0xff]  ;;  %v6699_v26 = vld [vmem:[%s14824_s8 + $0x11f8] sm:$0xff] }
 0x6b8   : > { %4745 = vmatpush.msra.mxu1 %v6646_v34  ;;  %4764 = vmatpush.msra.mxu2 %v6726_v51  ;;  %v3783_v51 = vadd.f32 %v11810_v49, %v11780_v60  ;;  %v6695_v60 = vld [vmem:[%s14824_s8 + $0x11d8] sm:$0xff] }
 0x6b9   : > { %4631 = vmatpush.msrb.mxu0 %v6832_v47  ;;  %4700 = vmatpush.msrb.mxu3 %v6769_v54  ;;  %v6885_v47 = vld [vmem:[%s14824_s8 + $0x17c8] sm:$0xff]  ;;  %v6822_v54 = vld [vmem:[%s14824_s8 + $0x15d0] sm:$0xff] }
 0x6ba   : > { %4746 = vmatpush.msra.mxu1 %v6642_v16  ;;  %4765 = vmatpush.msra.mxu2 %v6722_v15  ;;  %v3806_v49 = vadd.f32 %v11976_v52, %v3783_v51  ;;  %v6881_v16 = vld [vmem:[%s14824_s8 + $0x17a8] sm:$0xff]  ;;  %v6818_v15 = vld [vmem:[%s14824_s8 + $0x15b0] sm:$0xff]  ;;  %v6691_v52 = vld [vmem:[%s14824_s8 + $0x11b8] sm:$0xff]  ;;  %v4127_v55 = vpop.f32.mrf.mxu1 }
 0x6bb   : > { %4632 = vmatpush.msrb.mxu0 %v6828_v35  ;;  %4701 = vmatpush.msrb.mxu3 %v6765_v40  ;;  %v4147_v32 = vpop.f32.mrf.mxu2  ;;  %v6706_v40 = vld [vmem:[%s14824_s8 + $0x1230] sm:$0xff] }
 0x6bc   : > { %4747 = vmatpush.msra.mxu1 %v6638_v33  ;;  %4766 = vmatpush.msra.mxu2 %v6718_v43  ;;  %v12221_v34 = vadd.f32 %v4147_v32, %v4125_v41  ;;  %v3829_v35 = vadd.f32 %v3828_v36, %v3806_v49  ;;  %v6877_v33 = vld [vmem:[%s14824_s8 + $0x1788] sm:$0xff]  ;;  %v6814_v43 = vld [vmem:[%s14824_s8 + $0x1590] sm:$0xff]  ;;  %v6687_v36 = vld [vmem:[%s14824_s8 + $0x1198] sm:$0xff] }
 0x6bd   : > { %4633 = vmatmul.f32.vlgmr.msrb.gmra.mxu0 %v11746_v6  ;;  %4702 = vmatmul.f32.vlgmr.msrb.gmra.mxu3 %v11556_v61  ;;  %v12265_v41 = vpop.f32.mrf.mxu3  ;;  %v6869_v49 = vld [vmem:[%s14824_s8 + $0x1748] sm:$0xff] }
 0x6be   : > { %4709 = vmatpush.msra.mxu0 %v6889_v5  ;;  %4748 = vmatmul.f32.vlgmr.msra.gmra.mxu1 %v11366_v7  ;;  %v6702_v5 = vld [vmem:[%s14824_s8 + $0x1210] sm:$0xff]  ;;  %v4128_v32 = vadd.f32 %v4127_v55, %v3829_v35  ;;  %v6675_v35 = vld [vmem:[%s14824_s8 + $0x1138] sm:$0xff] }
 0x6bf   : > { %4778 = vmatpush.msra.mxu3 %v6826_v22  ;;  %4824 = vmatpush.msrb.mxu1 %v6699_v26  ;;  %v6873_v22 = vld [vmem:[%s14824_s8 + $0x1768] sm:$0xff]  ;;  %v6802_v55 = vld [vmem:[%s14824_s8 + $0x1530] sm:$0xff] }
 0x6c0   : > { %4767 = vmatpush.msra.mxu2 %v6714_v21  ;;  %4710 = vmatpush.msra.mxu0 %v6885_v47  ;;  %v12275_v21 = vpop.f32.mrf.mxu0  ;;  %v6810_v47 = vld [vmem:[%s14824_s8 + $0x1570] sm:$0xff] }
 0x6c1   : > { %4779 = vmatpush.msra.mxu3 %v6822_v54  ;;  %4825 = vmatpush.msrb.mxu1 %v6695_v60  ;;  %v6683_v54 = vld [vmem:[%s14824_s8 + $0x1178] sm:$0xff] }
 0x6c2   : > { %4768 = vmatpush.msra.mxu2 %v6710_v62  ;;  %4711 = vmatpush.msra.mxu0 %v6881_v16  ;;  %v6763_v60 = vld [vmem:[%s14824_s8 + $0x13f8] sm:$0xff]  ;;  %v6806_v62 = vld [vmem:[%s14824_s8 + $0x1550] sm:$0xff] }
 0x6c3   : > { %4780 = vmatpush.msra.mxu3 %v6818_v15  ;;  %4826 = vmatpush.msrb.mxu1 %v6691_v52  ;;  %v6679_v16 = vld [vmem:[%s14824_s8 + $0x1158] sm:$0xff]  ;;  %v6865_v52 = vld [vmem:[%s14824_s8 + $0x1728] sm:$0xff] }
 0x6c4   : > { %4769 = vmatpush.msra.mxu2 %v6706_v40  ;;  %4712 = vmatpush.msra.mxu0 %v6877_v33  ;;  %v4150_v26 = vpop.f32.mrf.mxu2  ;;  %v6759_v15 = vld [vmem:[%s14824_s8 + $0x13d8] sm:$0xff]  ;;  %v6861_v33 = vld [vmem:[%s14824_s8 + $0x1708] sm:$0xff] }
 0x6c5   : > { %4781 = vmatpush.msra.mxu3 %v6814_v43  ;;  %4827 = vmatpush.msrb.mxu1 %v6687_v36  ;;  %v12273_v51 = vadd.f32 %v4150_v26, %v4128_v32  ;;  %v6755_v40 = vld [vmem:[%s14824_s8 + $0x13b8] sm:$0xff]  ;;  %v6798_v43 = vld [vmem:[%s14824_s8 + $0x1510] sm:$0xff] }
 0x6c6   : > { %4770 = vmatpush.msra.mxu2 %v6702_v5  ;;  %4636 = vmatmul.f32.gmra.mxu0 %v11805_v30  ;;  %v6671_v36 = vld [vmem:[%s14824_s8 + $0x1118] sm:$0xff]  ;;  %v12323_v5 = vpop.f32.mrf.mxu3 }
 0x6c7   : > { %4705 = vmatmul.f32.gmra.mxu3 %v11614_v1  ;;  %4713 = vmatpush.msra.mxu0 %v6873_v22  ;;  %v6751_v32 = vld [vmem:[%s14824_s8 + $0x1398] sm:$0xff]  ;;  %v6857_v22 = vld [vmem:[%s14824_s8 + $0x16e8] sm:$0xff] }
 0x6c8   : > { %4751 = vmatmul.f32.gmra.mxu1 %v11431_v45  ;;  %4771 = vmatmul.f32.vlgmr.msra.gmra.mxu2 %v11402_v0  ;;  %v12331_v26 = vpop.f32.mrf.mxu0 }
 0x6c9   : > { %4782 = vmatpush.msra.mxu3 %v6810_v47  ;;  %4828 = vmatpush.msrb.mxu1 %v6683_v54  ;;  %v6794_v47 = vld [vmem:[%s14824_s8 + $0x14f0] sm:$0xff]  ;;  %v6667_v54 = vld [vmem:[%s14824_s8 + $0x10f8] sm:$0xff] }
 0x6ca   : > { %4847 = vmatpush.msrb.mxu2 %v6763_v60  ;;  %4714 = vmatpush.msra.mxu0 %v6869_v49  ;;  %v6747_v60 = vld [vmem:[%s14824_s8 + $0x1378] sm:$0xff]  ;;  %v6853_v49 = vld [vmem:[%s14824_s8 + $0x16c8] sm:$0xff] }
 0x6cb   : > { %4783 = vmatpush.msra.mxu3 %v6806_v62  ;;  %4829 = vmatpush.msrb.mxu1 %v6679_v16  ;;  %v6790_v62 = vld [vmem:[%s14824_s8 + $0x14d0] sm:$0xff]  ;;  %v6663_v16 = vld [vmem:[%s14824_s8 + $0x10d8] sm:$0xff] }
 0x6cc   : > { %4848 = vmatpush.msrb.mxu2 %v6759_v15  ;;  %4715 = vmatpush.msra.mxu0 %v6865_v52  ;;  %v6743_v15 = vld [vmem:[%s14824_s8 + $0x1358] sm:$0xff]  ;;  %v6849_v52 = vld [vmem:[%s14824_s8 + $0x16a8] sm:$0xff] }
 0x6cd   : > { %4784 = vmatpush.msra.mxu3 %v6802_v55  ;;  %4830 = vmatpush.msrb.mxu1 %v6675_v35  ;;  %v6786_v55 = vld [vmem:[%s14824_s8 + $0x14b0] sm:$0xff]  ;;  %v6659_v35 = vld [vmem:[%s14824_s8 + $0x10b8] sm:$0xff] }
 0x6ce   : > { %4849 = vmatpush.msrb.mxu2 %v6755_v40  ;;  %4716 = vmatpush.msra.mxu0 %v6861_v33  ;;  %v6739_v40 = vld [vmem:[%s14824_s8 + $0x1338] sm:$0xff]  ;;  %v6845_v33 = vld [vmem:[%s14824_s8 + $0x1688] sm:$0xff] }
 0x6cf   : > { %4785 = vmatpush.msra.mxu3 %v6798_v43  ;;  %4831 = vmatpush.msrb.mxu1 %v6671_v36  ;;  %v6782_v43 = vld [vmem:[%s14824_s8 + $0x1490] sm:$0xff] }
 0x6d0   : > { %4850 = vmatpush.msrb.mxu2 %v6751_v32  ;;  %4717 = vmatpush.msra.mxu0 %v6857_v22  ;;  %v6655_v32 = vld [vmem:[%s14824_s8 + $0x1098] sm:$0xff] }
 0x6d1   : > { %4774 = vmatmul.f32.gmra.mxu2 %v11464_v13  ;;  %4786 = vmatpush.msra.mxu3 %v6794_v47  ;;  %v6735_v22 = vld [vmem:[%s14824_s8 + $0x1318] sm:$0xff] }
 0x6d2   : > { %4832 = vmatpush.msrb.mxu1 %v6667_v54  ;;  %4851 = vmatpush.msrb.mxu2 %v6747_v60  ;;  %v6841_v54 = vld [vmem:[%s14824_s8 + $0x1668] sm:$0xff]  ;;  %v6778_v60 = vld [vmem:[%s14824_s8 + $0x1470] sm:$0xff] }
 0x6d3   : > { %4718 = vmatpush.msra.mxu0 %v6853_v49  ;;  %4787 = vmatpush.msra.mxu3 %v6790_v62  ;;  %v6651_v49 = vld [vmem:[%s14824_s8 + $0x1078] sm:$0xff]  ;;  %v3872_v62 = vadd.f32 %v11862_v37, %v11826_v42 }
 0x6d4   : > { %4833 = vmatpush.msrb.mxu1 %v6663_v16  ;;  %4852 = vmatpush.msrb.mxu2 %v6743_v15  ;;  %v4170_v36 = vpop.f32.mrf.mxu3  ;;  %v12396_v16 = vpop.f32.mrf.mxu0  ;;  %v6837_v15 = vld [vmem:[%s14824_s8 + $0x1648] sm:$0xff]  ;;  %v6727_v42 = vld [vmem:[%s14824_s8 + $0x12d8] sm:$0xff] }
 0x6d5   : > { %4719 = vmatpush.msra.mxu0 %v6849_v52  ;;  %4788 = vmatpush.msra.mxu3 %v6786_v55  ;;  %v12380_v47 = vadd.f32 %v4170_v36, %v12221_v34  ;;  %v6731_v34 = vld [vmem:[%s14824_s8 + $0x12f8] sm:$0xff]  ;;  %v6774_v52 = vld [vmem:[%s14824_s8 + $0x1450] sm:$0xff]  ;;  %v3895_v37 = vadd.f32 %v12026_v19, %v3872_v62 }
 0x6d6   : > { %4834 = vmatpush.msrb.mxu1 %v6659_v35  ;;  %4853 = vmatpush.msrb.mxu2 %v6739_v40  ;;  %v6647_v55 = vld [vmem:[%s14824_s8 + $0x1058] sm:$0xff]  ;;  %v6833_v35 = vld [vmem:[%s14824_s8 + $0x1628] sm:$0xff]  ;;  %v6770_v40 = vld [vmem:[%s14824_s8 + $0x1430] sm:$0xff] }
 0x6d7   : > { %4720 = vmatpush.msra.mxu0 %v6845_v33  ;;  %4789 = vmatpush.msra.mxu3 %v6782_v43  ;;  %v4216_v33 = vpop.f32.mrf.mxu1  ;;  %v6643_v43 = vld [vmem:[%s14824_s8 + $0x1038] sm:$0xff]  ;;  %v3918_v36 = vadd.f32 %v12213_v28, %v3895_v37 }
 0x6d8   : > { %4835 = vmatpush.msrb.mxu1 %v6655_v32  ;;  %4854 = vmatpush.msrb.mxu2 %v6735_v22  ;;  %v6723_v19 = vld [vmem:[%s14824_s8 + $0x12b8] sm:$0xff]  ;;  %v6829_v32 = vld [vmem:[%s14824_s8 + $0x1608] sm:$0xff]  ;;  %v6766_v22 = vld [vmem:[%s14824_s8 + $0x1410] sm:$0xff] }
 0x6d9   : > { %4721 = vmatpush.msra.mxu0 %v6841_v54  ;;  %4790 = vmatpush.msra.mxu3 %v6778_v60  ;;  %v6639_v54 = vld [vmem:[%s14824_s8 + $0x1018] sm:$0xff]  ;;  %v4217_v60 = vadd.f32 %v4216_v33, %v3918_v36 }
 0x6da   : > { %4836 = vmatpush.msrb.mxu1 %v6651_v49  ;;  %4855 = vmatpush.msrb.mxu2 %v6731_v34  ;;  %v6719_v28 = vld [vmem:[%s14824_s8 + $0x1298] sm:$0xff]  ;;  %v6890_v34 = vld [vmem:[%s14824_s8 + $0x17f0] sm:$0xff] }
 0x6db   : > { %4722 = vmatpush.msra.mxu0 %v6837_v15  ;;  %4791 = vmatpush.msra.mxu3 %v6774_v52  ;;  %v6827_v52 = vld [vmem:[%s14824_s8 + $0x15f8] sm:$0xff] }
 0x6dc   : > { %4837 = vmatpush.msrb.mxu1 %v6647_v55  ;;  %4856 = vmatpush.msrb.mxu2 %v6727_v42  ;;  %v12445_v55 = vpop.f32.mrf.mxu0  ;;  %v6715_v42 = vld [vmem:[%s14824_s8 + $0x1278] sm:$0xff] }
 0x6dd   : > { %4723 = vmatpush.msra.mxu0 %v6833_v35  ;;  %4792 = vmatpush.msra.mxu3 %v6770_v40  ;;  %v3875_v35 = vadd.f32 %v11928_v10, %v11894_v17  ;;  %v6823_v40 = vld [vmem:[%s14824_s8 + $0x15d8] sm:$0xff]  ;;  %v6882_v10 = vld [vmem:[%s14824_s8 + $0x17b0] sm:$0xff] }
 0x6de   : > { %4838 = vmatpush.msrb.mxu1 %v6643_v43  ;;  %4857 = vmatpush.msrb.mxu2 %v6723_v19  ;;  %v4173_v49 = vpop.f32.mrf.mxu3  ;;  %v6711_v33 = vld [vmem:[%s14824_s8 + $0x1258] sm:$0xff] }
 0x6df   : > { %4724 = vmatpush.msra.mxu0 %v6829_v32  ;;  %4793 = vmatpush.msra.mxu3 %v6766_v22  ;;  %v12440_v62 = vadd.f32 %v4173_v49, %v12273_v51  ;;  %v4239_v15 = vpop.f32.mrf.mxu2  ;;  %v6886_v51 = vld [vmem:[%s14824_s8 + $0x17d0] sm:$0xff]  ;;  %v3898_v17 = vadd.f32 %v12086_v27, %v3875_v35  ;;  %v6707_v43 = vld [vmem:[%s14824_s8 + $0x1238] sm:$0xff]  ;;  %v4219_v19 = vpop.f32.mrf.mxu1 }
 0x6e0   : > { %4839 = vmatpush.msrb.mxu1 %v6639_v54  ;;  %4858 = vmatpush.msrb.mxu2 %v6719_v28  ;;  %v12450_v37 = vadd.f32 %v4239_v15, %v4217_v60  ;;  %v6878_v27 = vld [vmem:[%s14824_s8 + $0x1790] sm:$0xff]  ;;  %v6815_v32 = vld [vmem:[%s14824_s8 + $0x1598] sm:$0xff] }
 0x6e1   : > { %4725 = vmatmul.f32.vlgmr.msra.gmra.mxu0 %v11746_v6  ;;  %4794 = vmatmul.f32.vlgmr.msra.gmra.mxu3 %v11556_v61  ;;  %v3921_v36 = vadd.f32 %v12275_v21, %v3898_v17  ;;  %v6703_v22 = vld [vmem:[%s14824_s8 + $0x1218] sm:$0xff]  ;;  %v6874_v21 = vld [vmem:[%s14824_s8 + $0x1770] sm:$0xff] }
 0x6e2   : > { %4801 = vmatpush.msrb.mxu0 %v6890_v34  ;;  %4840 = vmatmul.f32.vlgmr.msrb.gmra.mxu1 %v11366_v7  ;;  %v6819_v7 = vld [vmem:[%s14824_s8 + $0x15b8] sm:$0xff]  ;;  %v6870_v15 = vld [vmem:[%s14824_s8 + $0x1750] sm:$0xff] }
 0x6e3   : > { %4870 = vmatpush.msrb.mxu3 %v6827_v52  ;;  %4859 = vmatpush.msrb.mxu2 %v6715_v42  ;;  %v4220_v54 = vadd.f32 %v4219_v19, %v3921_v36  ;;  %v6811_v60 = vld [vmem:[%s14824_s8 + $0x1578] sm:$0xff]  ;;  %v6866_v42 = vld [vmem:[%s14824_s8 + $0x1730] sm:$0xff] }
 0x6e4   : > { %4802 = vmatpush.msrb.mxu0 %v6886_v51  ;;  %v12496_v34 = vpop.f32.mrf.mxu0  ;;  %v6807_v52 = vld [vmem:[%s14824_s8 + $0x1558] sm:$0xff]  ;;  %v6858_v51 = vld [vmem:[%s14824_s8 + $0x16f0] sm:$0xff] }
 0x6e5   : > { %4871 = vmatpush.msrb.mxu3 %v6823_v40  ;;  %4860 = vmatpush.msrb.mxu2 %v6711_v33  ;;  %v6803_v35 = vld [vmem:[%s14824_s8 + $0x1538] sm:$0xff]  ;;  %v6854_v33 = vld [vmem:[%s14824_s8 + $0x16d0] sm:$0xff] }
 0x6e6   : > { %4803 = vmatpush.msrb.mxu0 %v6882_v10  ;;  %v6795_v40 = vld [vmem:[%s14824_s8 + $0x14f8] sm:$0xff]  ;;  %v6846_v36 = vld [vmem:[%s14824_s8 + $0x1690] sm:$0xff] }
 0x6e7   : > { %4872 = vmatpush.msrb.mxu3 %v6819_v7  ;;  %4861 = vmatpush.msrb.mxu2 %v6707_v43  ;;  %v6791_v10 = vld [vmem:[%s14824_s8 + $0x14d8] sm:$0xff]  ;;  %v6850_v43 = vld [vmem:[%s14824_s8 + $0x16b0] sm:$0xff] }
 0x6e8   : > { %4804 = vmatpush.msrb.mxu0 %v6878_v27  ;;  %v4242_v28 = vpop.f32.mrf.mxu2  ;;  %v6787_v19 = vld [vmem:[%s14824_s8 + $0x14b8] sm:$0xff] }
 0x6e9   : > { %4873 = vmatpush.msrb.mxu3 %v6815_v32  ;;  %4862 = vmatpush.msrb.mxu2 %v6703_v22  ;;  %v12492_v49 = vadd.f32 %v4242_v28, %v4220_v54  ;;  %v6779_v32 = vld [vmem:[%s14824_s8 + $0x1478] sm:$0xff]  ;;  %v6838_v54 = vld [vmem:[%s14824_s8 + $0x1650] sm:$0xff] }
 0x6ea   : > { %4728 = vmatmul.f32.gmra.mxu0 %v11805_v30  ;;  %4797 = vmatmul.f32.gmra.mxu3 %v11614_v1 }
 0x6eb   : > { %4805 = vmatpush.msrb.mxu0 %v6874_v21  ;;  %4843 = vmatmul.f32.gmra.mxu1 %v11431_v45  ;;  %v6862_v45 = vld [vmem:[%s14824_s8 + $0x1710] sm:$0xff]  ;;  %v6775_v21 = vld [vmem:[%s14824_s8 + $0x1458] sm:$0xff] }
 0x6ec   : > { %4863 = vmatmul.f32.vlgmr.msrb.gmra.mxu2 %v11402_v0  ;;  %4874 = vmatpush.msrb.mxu3 %v6811_v60  ;;  %v6799_v0 = vld [vmem:[%s14824_s8 + $0x1518] sm:$0xff]  ;;  %v6834_v60 = vld [vmem:[%s14824_s8 + $0x1630] sm:$0xff] }
 0x6ed   : > { %4806 = vmatpush.msrb.mxu0 %v6870_v15 }
 0x6ee   : > { %4875 = vmatpush.msrb.mxu3 %v6807_v52  ;;  %v6830_v52 = vld [vmem:[%s14824_s8 + $0x1610] sm:$0xff] }
 0x6ef   : > { %4807 = vmatpush.msrb.mxu0 %v6866_v42  ;;  %v6767_v42 = vld [vmem:[%s14824_s8 + $0x1418] sm:$0xff] }
 0x6f0   : > { %4876 = vmatpush.msrb.mxu3 %v6803_v35  ;;  %v6887_v35 = vld [vmem:[%s14824_s8 + $0x17d8] sm:$0xff] }
 0x6f1   : > { %4808 = vmatpush.msrb.mxu0 %v6862_v45 }
 0x6f2   : > { %4877 = vmatpush.msrb.mxu3 %v6799_v0  ;;  %v4193_v17 = vpop.f32.mrf.mxu0 }
 0x6f3   : > { %4809 = vmatpush.msrb.mxu0 %v6858_v51  ;;  %v12531_v7 = vadd.f32 %v4193_v17, %v12380_v47  ;;  %v6842_v47 = vld [vmem:[%s14824_s8 + $0x1670] sm:$0xff]  ;;  %v6883_v51 = vld [vmem:[%s14824_s8 + $0x17b8] sm:$0xff] }
 0x6f4   : > { %4866 = vmatmul.f32.gmra.mxu2 %v11464_v13  ;;  %4878 = vmatpush.msrb.mxu3 %v6795_v40  ;;  %v6783_v13 = vld [vmem:[%s14824_s8 + $0x1498] sm:$0xff] }
 0x6f5   : > { %4810 = vmatpush.msrb.mxu0 %v6854_v33  ;;  %v6879_v40 = vld [vmem:[%s14824_s8 + $0x1798] sm:$0xff] }
 0x6f6   : > { %4879 = vmatpush.msrb.mxu3 %v6791_v10  ;;  %v6875_v33 = vld [vmem:[%s14824_s8 + $0x1778] sm:$0xff] }
 0x6f7   : > { %4811 = vmatpush.msrb.mxu0 %v6850_v43  ;;  %v6863_v17 = vld [vmem:[%s14824_s8 + $0x1718] sm:$0xff] }
 0x6f8   : > { %4880 = vmatpush.msrb.mxu3 %v6787_v19  ;;  %v4262_v27 = vpop.f32.mrf.mxu3  ;;  %v6859_v10 = vld [vmem:[%s14824_s8 + $0x16f8] sm:$0xff] }
 0x6f9   : > { %4812 = vmatpush.msrb.mxu0 %v6846_v36  ;;  %v4263_v22 = vadd.f32 %v4262_v27, %v12450_v37  ;;  %v6771_v37 = vld [vmem:[%s14824_s8 + $0x1438] sm:$0xff] }
 0x6fa   : > { %4881 = vmatpush.msrb.mxu3 %v6783_v13  ;;  %v6851_v43 = vld [vmem:[%s14824_s8 + $0x16b8] sm:$0xff] }
 0x6fb   : > { %4813 = vmatpush.msrb.mxu0 %v6842_v47  ;;  %v4196_v28 = vpop.f32.mrf.mxu0  ;;  %v6847_v19 = vld [vmem:[%s14824_s8 + $0x1698] sm:$0xff] }
 0x6fc   : > { %4882 = vmatpush.msrb.mxu3 %v6779_v32  ;;  %v12563_v15 = vadd.f32 %v4196_v28, %v12440_v62  ;;  %v6891_v62 = vld [vmem:[%s14824_s8 + $0x17f8] sm:$0xff] }
 0x6fd   : > { %4814 = vmatpush.msrb.mxu0 %v6838_v54  ;;  %v6843_v47 = vld [vmem:[%s14824_s8 + $0x1678] sm:$0xff] }
 0x6fe   : > { %4883 = vmatpush.msrb.mxu3 %v6775_v21  ;;  %v6839_v27 = vld [vmem:[%s14824_s8 + $0x1658] sm:$0xff] }
 0x6ff   : > { %4815 = vmatpush.msrb.mxu0 %v6834_v60  ;;  %v6835_v32 = vld [vmem:[%s14824_s8 + $0x1638] sm:$0xff]  ;;  %v4565_v60 = vpop.f32.mrf.mxu1 }
 0x700   : > { %4884 = vmatpush.msrb.mxu3 %v6771_v37 }
 0x701   : > { %4816 = vmatpush.msrb.mxu0 %v6830_v52  ;;  %v3596_v52 = vadd.f32 %v11522_v3, %v11496_v8 }
 0x702   : > { %4885 = vmatpush.msrb.mxu3 %v6767_v42  ;;  %4817 = vmatmul.f32.vlgmr.msrb.gmra.mxu0 %v11746_v6  ;;  %v4265_v45 = vpop.f32.mrf.mxu3  ;;  %v3599_v42 = vadd.f32 %v11582_v63, %v11554_v56 }
 0x703   : > { %4886 = vmatmul.f32.vlgmr.msrb.gmra.mxu3 %v11556_v61  ;;  %4893 = vmatpush.msra.mxu0 %v6891_v62  ;;  %v4266_v0 = vadd.f32 %v4265_v45, %v12492_v49  ;;  %v6871_v61 = vld [vmem:[%s14824_s8 + $0x1758] sm:$0xff]  ;;  %v4588_v28 = vpop.f32.mrf.mxu2  ;;  %v3619_v62 = vadd.f32 %v11678_v12, %v3596_v52  ;;  %v12712_v52 = vld [vmem:[%s14837_s21 + $0x100] sm:$0xff] }
 0x704   : > { %v6867_v49 = vld [vmem:[%s14824_s8 + $0x1738] sm:$0xff] }
 0x705   : > { %4894 = vmatpush.msra.mxu0 %v6887_v35  ;;  %v3622_v35 = vadd.f32 %v11744_v58, %v3599_v42 }
 0x707   : > { %4895 = vmatpush.msra.mxu0 %v6883_v51 }
 0x709   : > { %4896 = vmatpush.msra.mxu0 %v6879_v40 }
 0x70a   : > { %4820 = vmatmul.f32.gmra.mxu0 %v11805_v30 }
 0x70b   : > { %4889 = vmatmul.f32.gmra.mxu3 %v11614_v1  ;;  %4897 = vmatpush.msra.mxu0 %v6875_v33  ;;  %v6855_v1 = vld [vmem:[%s14824_s8 + $0x16d8] sm:$0xff]  ;;  %v4589_v33 = vadd.f32 %v4588_v28, %v4565_v60  ;;  %v12702_v28 = vld [vmem:[%s14837_s21 + $0x120] sm:$0xff]  ;;  %v3688_v60 = vadd.f32 %v11634_v59, %v11598_v53 }
 0x70c   : > { %v4591_v51 = vpop.f32.mrf.mxu2 }
 0x70d   : > { %4898 = vmatpush.msra.mxu0 %v6871_v61  ;;  %v4568_v61 = vpop.f32.mrf.mxu1  ;;  %v3711_v42 = vadd.f32 %v11794_v23, %v3688_v60  ;;  %v12841_v60 = vld [vmem:[%s14837_s21 + $0x380] sm:$0xff] }
 0x70e   : > { %v4592_v63 = vadd.f32 %v4591_v51, %v4568_v61 }
 0x70f   : > { %4899 = vmatpush.msra.mxu0 %v6867_v49  ;;  %v3734_v53 = vadd.f32 %v11983_v39, %v3711_v42 }
 0x711   : > { %4900 = vmatpush.msra.mxu0 %v6863_v17  ;;  %v4033_v23 = vadd.f32 %v12058_v14, %v3734_v53  ;;  %v12744_v14 = vld [vmem:[%s14837_s21 + $0x80] sm:$0xff]  ;;  %v12859_v53 = vld [vmem:[%s14837_s21 + $0x108] sm:$0xff] }
 0x712   : > { %15509 = vst [vmem:[#allocation27_spill] sm:$0xff] %v12859_v53 }
 0x713   : > { %4901 = vmatpush.msra.mxu0 %v6859_v10  ;;  %v4056_v51 = vadd.f32 %v12097_v50, %v4033_v23  ;;  %v12752_v50 = vld [vmem:[%s14837_s21 + $0x60] sm:$0xff] }
 0x714   : > { %v12877_v23 = vld [vmem:[%s14837_s21 + $0x320] sm:$0xff] }
 0x715   : > { %4902 = vmatpush.msra.mxu0 %v6855_v1 }
 0x716   : > { %v4285_v36 = vpop.f32.mrf.mxu0 }
 0x717   : > { %4903 = vmatpush.msra.mxu0 %v6851_v43  ;;  %v12615_v13 = vadd.f32 %v4285_v36, %v4263_v22  ;;  %v6831_v22 = vld [vmem:[%s14824_s8 + $0x1618] sm:$0xff]  ;;  %v12684_v36 = vld [vmem:[%s14837_s21 + $0x180] sm:$0xff] }
 0x719   : > { %4904 = vmatpush.msra.mxu0 %v6847_v19  ;;  %v12678_v19 = vld [vmem:[%s14837_s21 + $0x1a0] sm:$0xff] }
 0x71b   : > { %4905 = vmatpush.msra.mxu0 %v6843_v47  ;;  %v12690_v47 = vld [vmem:[%s14837_s21 + $0x160] sm:$0xff] }
 0x71c   : > { %v4611_v37 = vpop.f32.mrf.mxu3 }
 0x71d   : > { %4906 = vmatpush.msra.mxu0 %v6839_v27  ;;  %v4612_v12 = vadd.f32 %v4611_v37, %v4589_v33  ;;  %v3691_v37 = vadd.f32 %v11698_v20, %v11664_v44  ;;  %v12728_v44 = vld [vmem:[%s14837_s21 + $0xc0] sm:$0xff] }
 0x71f   : > { %4907 = vmatpush.msra.mxu0 %v6835_v32  ;;  %v4288_v54 = vpop.f32.mrf.mxu0  ;;  %v12696_v32 = vld [vmem:[%s14837_s21 + $0x140] sm:$0xff] }
 0x720   : > { %v12629_v21 = vadd.f32 %v4288_v54, %v4266_v0  ;;  %v3642_v0 = vadd.f32 %v11870_v38, %v3619_v62  ;;  %v3714_v62 = vadd.f32 %v11854_v2, %v3691_v37 }
 0x721   : > { %4908 = vmatpush.msra.mxu0 %v6831_v22  ;;  %v4657_v22 = vpop.f32.mrf.mxu1 }
 0x722   : > { %4909 = vmatmul.f32.vlgmr.msra.gmra.mxu0 %v11746_v6  ;;  %v3645_v6 = vadd.f32 %v11936_v25, %v3622_v35  ;;  %v3737_v59 = vadd.f32 %v12042_v24, %v3714_v62  ;;  %v12847_v62 = vld [vmem:[%s14837_s21 + $0x128] sm:$0xff] }
 0x723   : > { %15508 = vst [vmem:[#allocation10_spill] sm:$0xff] %v12847_v62 }
 0x724   : > { %v3944_v40 = vadd.f32 %v12012_v31, %v3645_v6  ;;  %v4036_v2 = vadd.f32 %v12126_v48, %v3737_v59  ;;  %v12736_v6 = vld [vmem:[%s14837_s21 + $0xa0] sm:$0xff]  ;;  %v4079_v48 = vadd.f32 %v12265_v41, %v4056_v51  ;;  %v12895_v51 = vld [vmem:[%s14837_s21 + $0xa8] sm:$0xff] }
 0x725   : > { %v12760_v41 = vld [vmem:[%s14837_s21 + $0x40] sm:$0xff]  ;;  %15512 = vst [vmem:[#allocation13_spill] sm:$0xff] %v12895_v51 }
 0x726   : > { %v4614_v8 = vpop.f32.mrf.mxu3  ;;  %v3967_v56 = vadd.f32 %v12040_v57, %v3944_v40  ;;  %v12865_v59 = vld [vmem:[%s14837_s21 + $0x340] sm:$0xff] }
 0x727   : > { %v4615_v49 = vadd.f32 %v4614_v8, %v4592_v63  ;;  %v4680_v27 = vpop.f32.mrf.mxu2 }
 0x728   : > { %v3990_v38 = vadd.f32 %v12208_v29, %v3967_v56  ;;  %v4102_v56 = vadd.f32 %v12445_v55, %v4079_v48 }
 0x729   : > { %v4660_v39 = vpop.f32.mrf.mxu1 }
 0x72a   : > { %4912 = vmatmul.f32.gmra.mxu0 %v11805_v30  ;;  %v3941_v30 = vadd.f32 %v11950_v46, %v3642_v0  ;;  %v12650_v46 = vld [vmem:[%s14825_s9] sm:$0xf]  ;;  %v4681_v0 = vadd.f32 %v4680_v27, %v4657_v22 }
 0x72b   : > { %v4925_v43 = vperm.slane %v12650_v46, 0  ;;  %v12829_v27 = vld [vmem:[%s14837_s21 + $0x3a0] sm:$0xff] }
 0x72c   : > { %v3964_v3 = vadd.f32 %v11978_v11, %v3941_v30  ;;  %v4013_v11 = vadd.f32 %v12396_v16, %v3990_v38  ;;  %v12672_v16 = vld [vmem:[%s14837_s21 + $0x1c0] sm:$0xff]  ;;  %v4059_v30 = vadd.f32 %v12160_v4, %v4036_v2  ;;  %v4926_v38 = vperm.slane %v12650_v46, 1 }
 0x72e   : > { %v3987_v58 = vadd.f32 %v12140_v9, %v3964_v3  ;;  %v4082_v61 = vadd.f32 %v12323_v5, %v4059_v30 }
 0x730   : > { %v4010_v17 = vadd.f32 %v12331_v26, %v3987_v58  ;;  %v12666_v26 = vld [vmem:[%s14837_s21 + $0x1e0] sm:$0xff]  ;;  %v4683_v20 = vpop.f32.mrf.mxu2  ;;  %v4105_v63 = vadd.f32 %v12496_v34, %v4082_v61  ;;  %v12907_v61 = vld [vmem:[%s14837_s21 + $0x88] sm:$0xff] }
 0x731   : > { %v4684_v40 = vadd.f32 %v4683_v20, %v4660_v39  ;;  %v12775_v34 = vld [vmem:[%s14837_s21] sm:$0xff]  ;;  %v12871_v20 = vld [vmem:[%s14837_s21 + $0xe8] sm:$0xff]  ;;  %15513 = vst [vmem:[#allocation14_spill] sm:$0xff] %v12907_v61 }
 0x732   : > { %15510 = vst [vmem:[#allocation11_spill] sm:$0xff] %v12871_v20  ;;  %v12889_v39 = vld [vmem:[%s14837_s21 + $0x300] sm:$0xff] }
 0x73a   : > { %v4634_v45 = vpop.f32.mrf.mxu0 }
 0x73b   : > { %v4635_v25 = vadd.f32 %v4634_v45, %v4612_v12  ;;  %v12720_v45 = vld [vmem:[%s14837_s21 + $0xe0] sm:$0xff]  ;;  %v4749_v37 = vpop.f32.mrf.mxu1 }
 0x73d   : > { %v4916_v57 = vadd.f32 %v4635_v25, %v4010_v17  ;;  %v12781_v25 = vld [vmem:[%s14837_s21 + $0x1e8] sm:$0xff] }
 0x73e   : > { %v12790_v17 = vld [vmem:[%s14837_s21 + $0x1c8] sm:$0xff] }
 0x73f   : > { %v12658_v29 = vadd.f32 %v4925_v43, %v4916_v57  ;;  %v12811_v57 = vld [vmem:[%s14837_s21 + $0x188] sm:$0xff] }
 0x740   : > { %v4703_v54 = vpop.f32.mrf.mxu3 }
 0x741   : > { %v4704_v33 = vadd.f32 %v4703_v54, %v4681_v0  ;;  %v12835_v54 = vld [vmem:[%s14837_s21 + $0x148] sm:$0xff] }
 0x742   : > { %15507 = vst [vmem:[#allocation25_spill] sm:$0xff] %v12835_v54  ;;  %v12883_v0 = vld [vmem:[%s14837_s21 + $0xc8] sm:$0xff] }
 0x743   : > { %v4637_v31 = vpop.f32.mrf.mxu0  ;;  %15511 = vst [vmem:[#allocation12_spill] sm:$0xff] %v12883_v0 }
 0x744   : > { %v4638_v10 = vadd.f32 %v4637_v31, %v4615_v49  ;;  %v12767_v49 = vld [vmem:[%s14837_s21 + $0x20] sm:$0xff] }
 0x746   : > { %v4920_v1 = vadd.f32 %v4638_v10, %v4013_v11  ;;  %v12799_v11 = vld [vmem:[%s14837_s21 + $0x1a8] sm:$0xff]  ;;  %v12805_v10 = vld [vmem:[%s14837_s21 + $0x3e0] sm:$0xff] }
 0x748   : > { %v12655_v9 = vadd.f32 %v4925_v43, %v4920_v1  ;;  %v12817_v1 = vld [vmem:[%s14837_s21 + $0x3c0] sm:$0xff]  ;;  %v12823_v43 = vld [vmem:[%s14837_s21 + $0x168] sm:$0xff] }
 0x74a   : > { %4957 = vmatpush.msra.mxu1 %v12655_v9  ;;  %v4706_v24 = vpop.f32.mrf.mxu3 }
 0x74b   : > { %v4707_v8 = vadd.f32 %v4706_v24, %v4684_v40  ;;  %v4772_v22 = vpop.f32.mrf.mxu2  ;;  %v12901_v40 = vld [vmem:[%s14837_s21 + $0x2e0] sm:$0xff] }
 0x74c   : > { %4958 = vmatpush.msra.mxu1 %v12658_v29  ;;  %v4773_v30 = vadd.f32 %v4772_v22, %v4749_v37  ;;  %v12937_v37 = vld [vmem:[%s14837_s21 + $0x280] sm:$0xff] }
 0x74d   : > { %6892 = vmatmul.msk.f32.vlgmr.msra.gmra.mxu1 %vm1029_vm9, %v15356_v18 }
 0x74e   : > { %5023 = vmatpush.msrb.mxu1 %v12666_v26 }
 0x750   : > { %5024 = vmatpush.msrb.mxu1 %v12672_v16 }
 0x752   : > { %5025 = vmatpush.msrb.mxu1 %v12678_v19 }
 0x754   : > { %5026 = vmatpush.msrb.mxu1 %v12684_v36  ;;  %v4775_v24 = vpop.f32.mrf.mxu2 }
 0x756   : > { %5027 = vmatpush.msrb.mxu1 %v12690_v47 }
 0x758   : > { %5028 = vmatpush.msrb.mxu1 %v12696_v32 }
 0x75a   : > { %5029 = vmatpush.msrb.mxu1 %v12702_v28 }
 0x75c   : > { %5030 = vmatpush.msrb.mxu1 %v12712_v52 }
 0x75e   : > { %v4726_v35 = vpop.f32.mrf.mxu0  ;;  %5031 = vmatpush.msrb.mxu1 %v12720_v45 }
 0x75f   : > { %v4727_v3 = vadd.f32 %v4726_v35, %v4704_v33  ;;  %v12853_v35 = vld [vmem:[%s14837_s21 + $0x360] sm:$0xff]  ;;  %v4752_v33 = vpop.f32.mrf.mxu1 }
 0x760   : > { %5032 = vmatpush.msrb.mxu1 %v12728_v44 }
 0x761   : > { %v4917_v5 = vadd.f32 %v4727_v3, %v4102_v56  ;;  %v12919_v56 = vld [vmem:[%s14837_s21 + $0x68] sm:$0xff] }
 0x762   : > { %5033 = vmatpush.msrb.mxu1 %v12736_v6  ;;  %15514 = vst [vmem:[#allocation16_spill] sm:$0xff] %v12919_v56 }
 0x763   : > { %v12785_v31 = vadd.f32 %v4926_v38, %v4917_v5  ;;  %v12925_v5 = vld [vmem:[%s14837_s21 + $0x2a0] sm:$0xff] }
 0x764   : > { %5034 = vmatpush.msrb.mxu1 %v12744_v14  ;;  %v4795_v42 = vpop.f32.mrf.mxu3 }
 0x765   : > { %v4796_v3 = vadd.f32 %v4795_v42, %v4773_v30  ;;  %v12943_v42 = vld [vmem:[%s14837_s21 + $0x28] sm:$0xff]  ;;  %v4927_v30 = vperm.slane %v12650_v46, 2 }
 0x766   : > { %5035 = vmatpush.msrb.mxu1 %v12752_v50  ;;  %15516 = vst [vmem:[#allocation21_spill] sm:$0xff] %v12943_v42 }
 0x767   : > { %v4729_v4 = vpop.f32.mrf.mxu0 }
 0x768   : > { %v4730_v12 = vadd.f32 %v4729_v4, %v4707_v8  ;;  %5036 = vmatpush.msrb.mxu1 %v12760_v41  ;;  %v4776_v8 = vadd.f32 %v4775_v24, %v4752_v33  ;;  %v12913_v4 = vld [vmem:[%s14837_s21 + $0x2c0] sm:$0xff] }
 0x769   : > { %v12952_v33 = vld [vmem:[%s14837_s21 + $0x260] sm:$0xff] }
 0x76a   : > { %v4921_v58 = vadd.f32 %v4730_v12, %v4105_v63  ;;  %5037 = vmatpush.msrb.mxu1 %v12767_v49 }
 0x76c   : > { %v12770_v55 = vadd.f32 %v4926_v38, %v4921_v58  ;;  %5038 = vmatpush.msrb.mxu1 %v12775_v34  ;;  %v12931_v38 = vld [vmem:[%s14837_s21 + $0x48] sm:$0xff] }
 0x76d   : > { %v4798_v48 = vpop.f32.mrf.mxu3  ;;  %15515 = vst [vmem:[#allocation19_spill] sm:$0xff] %v12931_v38 }
 0x76e   : > { %5103 = vmatpush.msra.mxu1 %v12781_v25  ;;  %4977 = vmatpush.msra.mxu2 %v12770_v55  ;;  %v4799_v63 = vadd.f32 %v4798_v48, %v4776_v8  ;;  %v12958_v48 = vld [vmem:[%s14837_s21 + $0x8] sm:$0xff] }
 0x76f   : > { %15517 = vst [vmem:[#allocation22_spill] sm:$0xff] %v12958_v48 }
 0x770   : > { %5104 = vmatpush.msra.mxu1 %v12790_v17  ;;  %4978 = vmatpush.msra.mxu2 %v12785_v31 }
 0x771   : > { %6893 = vmatmul.msk.f32.vlgmr.msra.gmra.mxu2 %vm1029_vm9, %v15356_v18 }
 0x772   : > { %5105 = vmatpush.msra.mxu1 %v12799_v11  ;;  %5043 = vmatpush.msrb.mxu2 %v12805_v10 }
 0x774   : > { %5106 = vmatpush.msra.mxu1 %v12811_v57  ;;  %5044 = vmatpush.msrb.mxu2 %v12817_v1 }
 0x776   : > { %5107 = vmatpush.msra.mxu1 %v12823_v43  ;;  %5045 = vmatpush.msrb.mxu2 %v12829_v27 }
 0x778   : > { %5108 = vmatpush.msra.mxu1 %v12835_v54  ;;  %5046 = vmatpush.msrb.mxu2 %v12841_v60 }
 0x77a   : > { %5109 = vmatpush.msra.mxu1 %v12847_v62  ;;  %5047 = vmatpush.msrb.mxu2 %v12853_v35 }
 0x77c   : > { %5110 = vmatpush.msra.mxu1 %v12859_v53  ;;  %5048 = vmatpush.msrb.mxu2 %v12865_v59  ;;  %v13074_v53 = vld [vmem:[%s14837_s21 + $0x308] sm:$0xff] }
 0x77d   : > { %15528 = vst [vmem:[#allocation31_spill] sm:$0xff] %v13074_v53 }
 0x77e   : > { %5111 = vmatpush.msra.mxu1 %v12871_v20  ;;  %5049 = vmatpush.msrb.mxu2 %v12877_v23  ;;  %v13056_v20 = vld [vmem:[%s14837_s21 + $0x540] sm:$0xff] }
 0x77f   : > { %v4818_v2 = vpop.f32.mrf.mxu0  ;;  %15525 = vst [vmem:[#allocation18_spill] sm:$0xff] %v13056_v20 }
 0x780   : > { %5112 = vmatpush.msra.mxu1 %v12883_v0  ;;  %5050 = vmatpush.msrb.mxu2 %v12889_v39  ;;  %v4819_v12 = vadd.f32 %v4818_v2, %v4796_v3  ;;  %v12975_v3 = vld [vmem:[%s14837_s21 + $0x220] sm:$0xff] }
 0x781   : > { %v13044_v0 = vld [vmem:[%s14837_s21 + $0x560] sm:$0xff] }
 0x782   : > { %5113 = vmatpush.msra.mxu1 %v12895_v51  ;;  %5051 = vmatpush.msrb.mxu2 %v12901_v40  ;;  %v4918_v2 = vadd.f32 %v4819_v12, %v12531_v7  ;;  %v12966_v7 = vld [vmem:[%s14837_s21 + $0x240] sm:$0xff]  ;;  %v12990_v12 = vld [vmem:[%s14837_s21 + $0x3e8] sm:$0xff]  ;;  %15523 = vst [vmem:[#allocation17_spill] sm:$0xff] %v13044_v0 }
 0x783   : > { %15518 = vst [vmem:[#allocation23_spill] sm:$0xff] %v12990_v12  ;;  %v13038_v51 = vld [vmem:[%s14837_s21 + $0x368] sm:$0xff] }
 0x784   : > { %5114 = vmatpush.msra.mxu1 %v12907_v61  ;;  %5052 = vmatpush.msrb.mxu2 %v12913_v4  ;;  %15522 = vst [vmem:[#allocation15_spill] sm:$0xff] %v13038_v51 }
 0x786   : > { %5115 = vmatpush.msra.mxu1 %v12919_v56  ;;  %5053 = vmatpush.msrb.mxu2 %v12925_v5  ;;  %v4841_v56 = vpop.f32.mrf.mxu1  ;;  %v4887_v61 = vpop.f32.mrf.mxu3 }
 0x787   : > { %v4821_v58 = vpop.f32.mrf.mxu0 }
 0x788   : > { %5116 = vmatpush.msra.mxu1 %v12931_v38  ;;  %v4822_v22 = vadd.f32 %v4821_v58, %v4799_v63  ;;  %5054 = vmatpush.msrb.mxu2 %v12937_v37  ;;  %v12982_v63 = vld [vmem:[%s14837_s21 + $0x200] sm:$0xff] }
 0x789   : > { %v12996_v58 = vld [vmem:[%s14837_s21 + $0x5e0] sm:$0xff] }
 0x78a   : > { %5117 = vmatpush.msra.mxu1 %v12943_v42  ;;  %v4922_v24 = vadd.f32 %v4822_v22, %v12563_v15  ;;  %5055 = vmatpush.msrb.mxu2 %v12952_v33  ;;  %v12970_v15 = vadd.f32 %v4927_v30, %v4918_v2  ;;  %v13002_v22 = vld [vmem:[%s14837_s21 + $0x3c8] sm:$0xff]  ;;  %v13008_v2 = vld [vmem:[%s14837_s21 + $0x5c0] sm:$0xff] }
 0x78b   : > { %15519 = vst [vmem:[#allocation24_spill] sm:$0xff] %v13002_v22  ;;  %v13026_v42 = vld [vmem:[%s14837_s21 + $0x388] sm:$0xff]  ;;  %v13032_v38 = vld [vmem:[%s14837_s21 + $0x580] sm:$0xff] }
 0x78c   : > { %5118 = vmatpush.msra.mxu1 %v12958_v48  ;;  %v12961_v8 = vadd.f32 %v4927_v30, %v4922_v24  ;;  %5056 = vmatpush.msrb.mxu2 %v12966_v7  ;;  %v13014_v24 = vld [vmem:[%s14837_s21 + $0x3a8] sm:$0xff]  ;;  %v13020_v30 = vld [vmem:[%s14837_s21 + $0x5a0] sm:$0xff]  ;;  %v4864_v48 = vpop.f32.mrf.mxu2  ;;  %15521 = vst [vmem:[#allocation28_spill] sm:$0xff] %v13026_v42 }
 0x78d   : > { %15520 = vst [vmem:[#allocation26_spill] sm:$0xff] %v13014_v24  ;;  %v4865_v62 = vadd.f32 %v4864_v48, %v4841_v56  ;;  %v13104_v56 = vld [vmem:[%s14837_s21 + $0x4c0] sm:$0xff]  ;;  %v13110_v48 = vld [vmem:[%s14837_s21 + $0x2a8] sm:$0xff] }
 0x78e   : > { %4997 = vmatpush.msra.mxu3 %v12961_v8  ;;  %5057 = vmatpush.msrb.mxu2 %v12975_v3  ;;  %15533 = vst [vmem:[#allocation38_spill] sm:$0xff] %v13104_v56 }
 0x78f   : > { %15534 = vst [vmem:[#allocation36_spill] sm:$0xff] %v13110_v48 }
 0x790   : > { %4998 = vmatpush.msra.mxu3 %v12970_v15  ;;  %5058 = vmatpush.msrb.mxu2 %v12982_v63 }
 0x791   : > { %6894 = vmatmul.msk.f32.vlgmr.msra.gmra.mxu3 %vm1029_vm9, %v15356_v18 }
 0x792   : > { %5123 = vmatpush.msra.mxu2 %v12990_v12  ;;  %5063 = vmatpush.msrb.mxu3 %v12996_v58  ;;  %v4890_v12 = vpop.f32.mrf.mxu3 }
 0x794   : > { %5124 = vmatpush.msra.mxu2 %v13002_v22  ;;  %5064 = vmatpush.msrb.mxu3 %v13008_v2  ;;  %v13080_v22 = vld [vmem:[%s14837_s21 + $0x500] sm:$0xff] }
 0x795   : > { %15529 = vst [vmem:[#allocation32_spill] sm:$0xff] %v13080_v22 }
 0x796   : > { %5125 = vmatpush.msra.mxu2 %v13014_v24  ;;  %5065 = vmatpush.msrb.mxu3 %v13020_v30  ;;  %v13068_v24 = vld [vmem:[%s14837_s21 + $0x520] sm:$0xff] }
 0x797   : > { %15527 = vst [vmem:[#allocation20_spill] sm:$0xff] %v13068_v24 }
 0x798   : > { %5126 = vmatpush.msra.mxu2 %v13026_v42  ;;  %5066 = vmatpush.msrb.mxu3 %v13032_v38  ;;  %v13050_v42 = vld [vmem:[%s14837_s21 + $0x348] sm:$0xff] }
 0x799   : > { %15524 = vst [vmem:[#allocation29_spill] sm:$0xff] %v13050_v42 }
 0x79a   : > { %5127 = vmatpush.msra.mxu2 %v13038_v51  ;;  %5067 = vmatpush.msrb.mxu3 %v13044_v0  ;;  %v13062_v51 = vld [vmem:[%s14837_s21 + $0x328] sm:$0xff]  ;;  %v4888_v0 = vadd.f32 %v4887_v61, %v4865_v62  ;;  %v13116_v62 = vld [vmem:[%s14837_s21 + $0x4a0] sm:$0xff] }
 0x79b   : > { %15526 = vst [vmem:[#allocation30_spill] sm:$0xff] %v13062_v51 }
 0x79c   : > { %5128 = vmatpush.msra.mxu2 %v13050_v42  ;;  %5068 = vmatpush.msrb.mxu3 %v13056_v20  ;;  %v4844_v20 = vpop.f32.mrf.mxu1  ;;  %15535 = vst [vmem:[#allocation41_spill] sm:$0xff] %v13116_v62 }
 0x79e   : > { %5129 = vmatpush.msra.mxu2 %v13062_v51  ;;  %5069 = vmatpush.msrb.mxu3 %v13068_v24  ;;  %v4867_v51 = vpop.f32.mrf.mxu2  ;;  %v13086_v24 = vld [vmem:[%s14837_s21 + $0x2e8] sm:$0xff] }
 0x79f   : > { %v4910_v42 = vpop.f32.mrf.mxu0  ;;  %15530 = vst [vmem:[#allocation33_spill] sm:$0xff] %v13086_v24  ;;  %v4868_v54 = vadd.f32 %v4867_v51, %v4844_v20  ;;  %v13122_v51 = vld [vmem:[%s14837_s21 + $0x288] sm:$0xff] }
 0x7a0   : > { %5130 = vmatpush.msra.mxu2 %v13074_v53  ;;  %5070 = vmatpush.msrb.mxu3 %v13080_v22  ;;  %v13092_v53 = vld [vmem:[%s14837_s21 + $0x4e0] sm:$0xff]  ;;  %v13098_v22 = vld [vmem:[%s14837_s21 + $0x2c8] sm:$0xff]  ;;  %15536 = vst [vmem:[#allocation39_spill] sm:$0xff] %v13122_v51 }
 0x7a1   : > { %15531 = vst [vmem:[#allocation34_spill] sm:$0xff] %v13092_v53 }
 0x7a2   : > { %5131 = vmatpush.msra.mxu2 %v13086_v24  ;;  %5071 = vmatpush.msrb.mxu3 %v13092_v53  ;;  %15532 = vst [vmem:[#allocation35_spill] sm:$0xff] %v13098_v22  ;;  %v4891_v24 = vadd.f32 %v4890_v12, %v4868_v54  ;;  %v4911_v53 = vadd.f32 %v4910_v42, %v4888_v0  ;;  %v13128_v54 = vld [vmem:[%s14837_s21 + $0x480] sm:$0xff]  ;;  %v13134_v0 = vld [vmem:[%s14837_s21 + $0x268] sm:$0xff] }
 0x7a3   : > { %15537 = vst [vmem:[#allocation44_spill] sm:$0xff] %v13128_v54 }
 0x7a4   : > { %5132 = vmatpush.msra.mxu2 %v13098_v22  ;;  %5072 = vmatpush.msrb.mxu3 %v13104_v56  ;;  %15538 = vst [vmem:[#allocation42_spill] sm:$0xff] %v13134_v0  ;;  %v4919_v42 = vadd.f32 %v4911_v53, %v12615_v13  ;;  %v13157_v13 = vld [vmem:[%s14837_s21 + $0x440] sm:$0xff] }
 0x7a5   : > { %15542 = vst [vmem:[#allocation48_spill] sm:$0xff] %v13157_v13  ;;  %v13172_v53 = vld [vmem:[%s14837_s21 + $0x420] sm:$0xff] }
 0x7a6   : > { %5133 = vmatpush.msra.mxu2 %v13110_v48  ;;  %5073 = vmatpush.msrb.mxu3 %v13116_v62  ;;  %15545 = vst [vmem:[#allocation59_spill] sm:$0xff] %v13172_v53  ;;  %v13961_v48 = vld [vmem:[%s14837_s21 + $0x238] sm:$0xff] }
 0x7a7   : > { %v4913_v20 = vpop.f32.mrf.mxu0  ;;  %15673 = vst [vmem:[#allocation168_spill] sm:$0xff] %v13961_v48 }
 0x7a8   : > { %5134 = vmatpush.msra.mxu2 %v13122_v51  ;;  %v4914_v61 = vadd.f32 %v4913_v20, %v4891_v24  ;;  %5074 = vmatpush.msrb.mxu3 %v13128_v54  ;;  %v4928_v24 = vperm.slane %v12650_v46, 3  ;;  %v13143_v20 = vld [vmem:[%s14837_s21 + $0x460] sm:$0xff]  ;;  %v13149_v51 = vld [vmem:[%s14837_s21 + $0x248] sm:$0xff] }
 0x7a9   : > { %15539 = vst [vmem:[#allocation47_spill] sm:$0xff] %v13143_v20 }
 0x7aa   : > { %5135 = vmatpush.msra.mxu2 %v13134_v0  ;;  %v4923_v12 = vadd.f32 %v4914_v61, %v12629_v21  ;;  %5075 = vmatpush.msrb.mxu3 %v13143_v20  ;;  %15540 = vst [vmem:[#allocation45_spill] sm:$0xff] %v13149_v51  ;;  %v13163_v21 = vld [vmem:[%s14837_s21 + $0x228] sm:$0xff]  ;;  %v13167_v46 = vadd.f32 %v4928_v24, %v4919_v42  ;;  %v13185_v42 = vld [vmem:[%s14837_s21 + $0x400] sm:$0xff] }
 0x7ab   : > { %15543 = vst [vmem:[#allocation55_spill] sm:$0xff] %v13163_v21  ;;  %v13178_v61 = vld [vmem:[%s14837_s21 + $0x208] sm:$0xff] }
 0x7ac   : > { %5136 = vmatpush.msra.mxu2 %v13149_v51  ;;  %v13152_v0 = vadd.f32 %v4928_v24, %v4923_v12  ;;  %5076 = vmatpush.msrb.mxu3 %v13157_v13  ;;  %15544 = vst [vmem:[#allocation52_spill] sm:$0xff] %v13167_v46  ;;  %v13193_v12 = vld [vmem:[%s14837_s21 + $0x5e8] sm:$0xff]  ;;  %v13199_v24 = vld [vmem:[%s14837_s21 + $0x7e0] sm:$0xff] }
 0x7ad   : > { %15546 = vst [vmem:[#allocation56_spill] sm:$0xff] %v13178_v61  ;;  %v13217_v51 = vld [vmem:[%s14837_s21 + $0x5a8] sm:$0xff] }
 0x7ae   : > { %15541 = vst [vmem:[#allocation51_spill] sm:$0xff] %v13152_v0  ;;  %5137 = vmatpush.msra.mxu2 %v13163_v21  ;;  %5017 = vmatpush.msrb.mxu0 %v13152_v0  ;;  %v13211_v21 = vld [vmem:[%s14837_s21 + $0x7c0] sm:$0xff] }
 0x7af   : > { %5077 = vmatpush.msrb.mxu3 %v13172_v53  ;;  %15547 = vst [vmem:[#allocation63_spill] sm:$0xff] %v13185_v42 }
 0x7b0   : > { %5138 = vmatpush.msra.mxu2 %v13178_v61  ;;  %5018 = vmatpush.msrb.mxu0 %v13167_v46  ;;  %15548 = vst [vmem:[#allocation60_spill] sm:$0xff] %v13193_v12  ;;  %v13205_v61 = vld [vmem:[%s14837_s21 + $0x5c8] sm:$0xff] }
 0x7b1   : > { %5078 = vmatpush.msrb.mxu3 %v13185_v42  ;;  %6895 = vmatmul.msk.f32.vlgmr.msrb.gmra.mxu0 %vm1029_vm9, %v15356_v18  ;;  %15549 = vst [vmem:[#allocation67_spill] sm:$0xff] %v13199_v24  ;;  %v13633_v42 = vld [vmem:[%s14837_s21 + $0x3d0] sm:$0xff] }
 0x7b2   : > { %5083 = vmatpush.msra.mxu0 %v13199_v24  ;;  %15550 = vst [vmem:[#allocation64_spill] sm:$0xff] %v13205_v61  ;;  %v13370_v24 = vld [vmem:[%s14837_s21 + $0x428] sm:$0xff] }
 0x7b3   : > { %5143 = vmatpush.msra.mxu3 %v13193_v12  ;;  %15551 = vst [vmem:[#allocation71_spill] sm:$0xff] %v13211_v21  ;;  %v13223_v12 = vld [vmem:[%s14837_s21 + $0x7a0] sm:$0xff] }
 0x7b4   : > { %5084 = vmatpush.msra.mxu0 %v13211_v21  ;;  %15552 = vst [vmem:[#allocation68_spill] sm:$0xff] %v13217_v51  ;;  %v13235_v21 = vld [vmem:[%s14837_s21 + $0x780] sm:$0xff] }
 0x7b5   : > { %5144 = vmatpush.msra.mxu3 %v13205_v61  ;;  %15553 = vst [vmem:[#allocation75_spill] sm:$0xff] %v13223_v12  ;;  %v13229_v61 = vld [vmem:[%s14837_s21 + $0x588] sm:$0xff] }
 0x7b6   : > { %5085 = vmatpush.msra.mxu0 %v13223_v12  ;;  %15554 = vst [vmem:[#allocation73_spill] sm:$0xff] %v13229_v61  ;;  %v13247_v12 = vld [vmem:[%s14837_s21 + $0x760] sm:$0xff] }
 0x7b7   : > { %5145 = vmatpush.msra.mxu3 %v13217_v51  ;;  %15555 = vst [vmem:[#allocation79_spill] sm:$0xff] %v13235_v21  ;;  %v13241_v51 = vld [vmem:[%s14837_s21 + $0x568] sm:$0xff] }
 0x7b8   : > { %5086 = vmatpush.msra.mxu0 %v13235_v21  ;;  %15556 = vst [vmem:[#allocation77_spill] sm:$0xff] %v13241_v51  ;;  %v13259_v21 = vld [vmem:[%s14837_s21 + $0x740] sm:$0xff] }
 0x7b9   : > { %5146 = vmatpush.msra.mxu3 %v13229_v61  ;;  %15557 = vst [vmem:[#allocation83_spill] sm:$0xff] %v13247_v12  ;;  %v13253_v61 = vld [vmem:[%s14837_s21 + $0x548] sm:$0xff] }
 0x7ba   : > { %5087 = vmatpush.msra.mxu0 %v13247_v12  ;;  %15558 = vst [vmem:[#allocation81_spill] sm:$0xff] %v13253_v61  ;;  %v13271_v12 = vld [vmem:[%s14837_s21 + $0x720] sm:$0xff] }
 0x7bb   : > { %5147 = vmatpush.msra.mxu3 %v13241_v51  ;;  %15559 = vst [vmem:[#allocation87_spill] sm:$0xff] %v13259_v21  ;;  %v13265_v51 = vld [vmem:[%s14837_s21 + $0x528] sm:$0xff] }
 0x7bc   : > { %5088 = vmatpush.msra.mxu0 %v13259_v21  ;;  %15560 = vst [vmem:[#allocation37_spill] sm:$0xff] %v13265_v51  ;;  %v13283_v21 = vld [vmem:[%s14837_s21 + $0x700] sm:$0xff] }
 0x7bd   : > { %5148 = vmatpush.msra.mxu3 %v13253_v61  ;;  %15561 = vst [vmem:[#allocation85_spill] sm:$0xff] %v13271_v12  ;;  %v13277_v61 = vld [vmem:[%s14837_s21 + $0x508] sm:$0xff] }
 0x7be   : > { %5089 = vmatpush.msra.mxu0 %v13271_v12  ;;  %15562 = vst [vmem:[#allocation91_spill] sm:$0xff] %v13277_v61  ;;  %v13295_v12 = vld [vmem:[%s14837_s21 + $0x6e0] sm:$0xff] }
 0x7bf   : > { %5149 = vmatpush.msra.mxu3 %v13265_v51  ;;  %15563 = vst [vmem:[#allocation40_spill] sm:$0xff] %v13283_v21  ;;  %v13289_v51 = vld [vmem:[%s14837_s21 + $0x4e8] sm:$0xff] }
 0x7c0   : > { %5090 = vmatpush.msra.mxu0 %v13283_v21  ;;  %15564 = vst [vmem:[#allocation89_spill] sm:$0xff] %v13289_v51  ;;  %v13307_v21 = vld [vmem:[%s14837_s21 + $0x6c0] sm:$0xff] }
 0x7c1   : > { %5150 = vmatpush.msra.mxu3 %v13277_v61  ;;  %15565 = vst [vmem:[#allocation95_spill] sm:$0xff] %v13295_v12  ;;  %v13301_v61 = vld [vmem:[%s14837_s21 + $0x4c8] sm:$0xff] }
 0x7c2   : > { %5091 = vmatpush.msra.mxu0 %v13295_v12  ;;  %15566 = vst [vmem:[#allocation43_spill] sm:$0xff] %v13301_v61  ;;  %v13319_v12 = vld [vmem:[%s14837_s21 + $0x6a0] sm:$0xff] }
 0x7c3   : > { %5151 = vmatpush.msra.mxu3 %v13289_v51  ;;  %15567 = vst [vmem:[#allocation93_spill] sm:$0xff] %v13307_v21  ;;  %v13313_v51 = vld [vmem:[%s14837_s21 + $0x4a8] sm:$0xff] }
 0x7c4   : > { %5092 = vmatpush.msra.mxu0 %v13307_v21  ;;  %15568 = vst [vmem:[#allocation99_spill] sm:$0xff] %v13313_v51  ;;  %v13331_v21 = vld [vmem:[%s14837_s21 + $0x680] sm:$0xff] }
 0x7c5   : > { %5152 = vmatpush.msra.mxu3 %v13301_v61  ;;  %15569 = vst [vmem:[#allocation96_spill] sm:$0xff] %v13319_v12  ;;  %v13325_v61 = vld [vmem:[%s14837_s21 + $0x488] sm:$0xff] }
 0x7c6   : > { %5093 = vmatpush.msra.mxu0 %v13319_v12  ;;  %15570 = vst [vmem:[#allocation46_spill] sm:$0xff] %v13325_v61 }
 0x7c7   : > { %5153 = vmatpush.msra.mxu3 %v13313_v51  ;;  %15571 = vst [vmem:[#allocation103_spill] sm:$0xff] %v13331_v21  ;;  %v13337_v51 = vld [vmem:[%s14837_s21 + $0x468] sm:$0xff] }
 0x7c8   : > { %5094 = vmatpush.msra.mxu0 %v13331_v21  ;;  %15572 = vst [vmem:[#allocation100_spill] sm:$0xff] %v13337_v51  ;;  %v13352_v21 = vld [vmem:[%s14837_s21 + $0x448] sm:$0xff] }
 0x7c9   : > { %5154 = vmatpush.msra.mxu3 %v13325_v61  ;;  %v13345_v61 = vld [vmem:[%s14837_s21 + $0x660] sm:$0xff]  ;;  %15574 = vst [vmem:[#allocation107_spill] sm:$0xff] %v13352_v21 }
 0x7ca   : > { %v13340_v12 = vpop.f32.mrf.mxu1  ;;  %15573 = vst [vmem:[#allocation49_spill] sm:$0xff] %v13345_v61  ;;  %5095 = vmatpush.msra.mxu0 %v13345_v61  ;;  %v13364_v61 = vld [vmem:[%s14837_s21 + $0x640] sm:$0xff] }
 0x7cb   : > { %5155 = vmatpush.msra.mxu3 %v13337_v51  ;;  %5039 = vmatmul.f32.vlgmr.msrb.gmra.mxu1 %v13340_v12  ;;  %v13358_v51 = vld [vmem:[%s14837_s21 + $0x1f0] sm:$0xff]  ;;  %15576 = vst [vmem:[#allocation53_spill] sm:$0xff] %v13364_v61 }
 0x7cc   : > { %15575 = vst [vmem:[#allocation104_spill] sm:$0xff] %v13358_v51  ;;  %5183 = vmatpush.msrb.mxu1 %v13358_v51  ;;  %5096 = vmatpush.msra.mxu0 %v13364_v61  ;;  %v13382_v51 = vld [vmem:[%s14837_s21 + $0x620] sm:$0xff]  ;;  %v13388_v61 = vld [vmem:[%s14837_s21 + $0x408] sm:$0xff] }
 0x7cd   : > { %5156 = vmatpush.msra.mxu3 %v13352_v21  ;;  %15577 = vst [vmem:[#allocation111_spill] sm:$0xff] %v13370_v24  ;;  %v13376_v21 = vld [vmem:[%s14837_s21 + $0x1d0] sm:$0xff] }
 0x7ce   : > { %15578 = vst [vmem:[#allocation108_spill] sm:$0xff] %v13376_v21  ;;  %5184 = vmatpush.msrb.mxu1 %v13376_v21  ;;  %5097 = vmatpush.msra.mxu0 %v13382_v51  ;;  %v13400_v21 = vld [vmem:[%s14837_s21 + $0x600] sm:$0xff] }
 0x7cf   : > { %5157 = vmatpush.msra.mxu3 %v13370_v24  ;;  %15579 = vst [vmem:[#allocation57_spill] sm:$0xff] %v13382_v51  ;;  %v13394_v24 = vld [vmem:[%s14837_s21 + $0x1b0] sm:$0xff]  ;;  %v13406_v51 = vld [vmem:[%s14837_s21 + $0x7e8] sm:$0xff] }
 0x7d0   : > { %15580 = vst [vmem:[#allocation115_spill] sm:$0xff] %v13388_v61  ;;  %5185 = vmatpush.msrb.mxu1 %v13394_v24  ;;  %5098 = vmatpush.msra.mxu0 %v13400_v21 }
 0x7d1   : > { %5158 = vmatpush.msra.mxu3 %v13388_v61  ;;  %15581 = vst [vmem:[#allocation112_spill] sm:$0xff] %v13394_v24  ;;  %v13412_v61 = vld [vmem:[%s14837_s21 + $0x190] sm:$0xff]  ;;  %v13419_v24 = vld [vmem:[%s14837_s21 + $0x7c8] sm:$0xff] }
 0x7d2   : > { %15582 = vst [vmem:[#allocation61_spill] sm:$0xff] %v13400_v21  ;;  %5163 = vmatpush.msrb.mxu0 %v13406_v51  ;;  %5186 = vmatpush.msrb.mxu1 %v13412_v61  ;;  %v13437_v21 = vld [vmem:[%s14837_s21 + $0x150] sm:$0xff] }
 0x7d3   : > { %15583 = vst [vmem:[#allocation119_spill] sm:$0xff] %v13406_v51  ;;  %5119 = vmatmul.f32.vlgmr.msra.gmra.mxu1 %v13340_v12  ;;  %v13425_v51 = vld [vmem:[%s14837_s21 + $0x170] sm:$0xff] }
 0x7d4   : > { %15584 = vst [vmem:[#allocation65_spill] sm:$0xff] %v13412_v61  ;;  %5164 = vmatpush.msrb.mxu0 %v13419_v24  ;;  %5187 = vmatpush.msrb.mxu1 %v13425_v51  ;;  %v13431_v61 = vld [vmem:[%s14837_s21 + $0x7a8] sm:$0xff] }
 0x7d5   : > { %15585 = vst [vmem:[#allocation116_spill] sm:$0xff] %v13419_v24  ;;  %v13443_v24 = vld [vmem:[%s14837_s21 + $0x788] sm:$0xff] }
 0x7d6   : > { %15586 = vst [vmem:[#allocation123_spill] sm:$0xff] %v13425_v51  ;;  %5165 = vmatpush.msrb.mxu0 %v13431_v61  ;;  %5188 = vmatpush.msrb.mxu1 %v13437_v21  ;;  %v13449_v51 = vld [vmem:[%s14837_s21 + $0x130] sm:$0xff] }
 0x7d7   : > { %15587 = vst [vmem:[#allocation69_spill] sm:$0xff] %v13431_v61  ;;  %v13455_v61 = vld [vmem:[%s14837_s21 + $0x768] sm:$0xff] }
 0x7d8   : > { %15588 = vst [vmem:[#allocation120_spill] sm:$0xff] %v13437_v21  ;;  %5166 = vmatpush.msrb.mxu0 %v13443_v24  ;;  %5189 = vmatpush.msrb.mxu1 %v13449_v51  ;;  %v13461_v21 = vld [vmem:[%s14837_s21 + $0x110] sm:$0xff] }
 0x7d9   : > { %15589 = vst [vmem:[#allocation127_spill] sm:$0xff] %v13443_v24  ;;  %v13467_v24 = vld [vmem:[%s14837_s21 + $0x748] sm:$0xff] }
 0x7da   : > { %15590 = vst [vmem:[#allocation74_spill] sm:$0xff] %v13449_v51  ;;  %5167 = vmatpush.msrb.mxu0 %v13455_v61  ;;  %5190 = vmatpush.msrb.mxu1 %v13461_v21  ;;  %v13473_v51 = vld [vmem:[%s14837_s21 + $0xf0] sm:$0xff] }
 0x7db   : > { %15591 = vst [vmem:[#allocation124_spill] sm:$0xff] %v13455_v61  ;;  %v13479_v61 = vld [vmem:[%s14837_s21 + $0x728] sm:$0xff] }
 0x7dc   : > { %15592 = vst [vmem:[#allocation131_spill] sm:$0xff] %v13461_v21  ;;  %5168 = vmatpush.msrb.mxu0 %v13467_v24  ;;  %5191 = vmatpush.msrb.mxu1 %v13473_v51  ;;  %v13485_v21 = vld [vmem:[%s14837_s21 + $0xd0] sm:$0xff] }
 0x7dd   : > { %15593 = vst [vmem:[#allocation78_spill] sm:$0xff] %v13467_v24  ;;  %v13491_v24 = vld [vmem:[%s14837_s21 + $0x708] sm:$0xff] }
 0x7de   : > { %15594 = vst [vmem:[#allocation128_spill] sm:$0xff] %v13473_v51  ;;  %5169 = vmatpush.msrb.mxu0 %v13479_v61  ;;  %5192 = vmatpush.msrb.mxu1 %v13485_v21  ;;  %v13497_v51 = vld [vmem:[%s14837_s21 + $0xb0] sm:$0xff] }
 0x7df   : > { %15595 = vst [vmem:[#allocation82_spill] sm:$0xff] %v13479_v61  ;;  %v13503_v61 = vld [vmem:[%s14837_s21 + $0x6e8] sm:$0xff] }
 0x7e0   : > { %15596 = vst [vmem:[#allocation132_spill] sm:$0xff] %v13485_v21  ;;  %5170 = vmatpush.msrb.mxu0 %v13491_v24  ;;  %5193 = vmatpush.msrb.mxu1 %v13497_v51  ;;  %v13509_v21 = vld [vmem:[%s14837_s21 + $0x90] sm:$0xff] }
 0x7e1   : > { %15597 = vst [vmem:[#allocation86_spill] sm:$0xff] %v13491_v24  ;;  %v13515_v24 = vld [vmem:[%s14837_s21 + $0x6c8] sm:$0xff] }
 0x7e2   : > { %15598 = vst [vmem:[#allocation135_spill] sm:$0xff] %v13497_v51  ;;  %5171 = vmatpush.msrb.mxu0 %v13503_v61  ;;  %5194 = vmatpush.msrb.mxu1 %v13509_v21  ;;  %v13521_v51 = vld [vmem:[%s14837_s21 + $0x70] sm:$0xff] }
 0x7e3   : > { %15599 = vst [vmem:[#allocation90_spill] sm:$0xff] %v13503_v61  ;;  %v13527_v61 = vld [vmem:[%s14837_s21 + $0x6a8] sm:$0xff] }
 0x7e4   : > { %15600 = vst [vmem:[#allocation137_spill] sm:$0xff] %v13509_v21  ;;  %5172 = vmatpush.msrb.mxu0 %v13515_v24  ;;  %5195 = vmatpush.msrb.mxu1 %v13521_v51  ;;  %v13533_v21 = vld [vmem:[%s14837_s21 + $0x50] sm:$0xff] }
 0x7e5   : > { %15601 = vst [vmem:[#allocation94_spill] sm:$0xff] %v13515_v24  ;;  %v13539_v24 = vld [vmem:[%s14837_s21 + $0x688] sm:$0xff] }
 0x7e6   : > { %15602 = vst [vmem:[#allocation97_spill] sm:$0xff] %v13521_v51  ;;  %5173 = vmatpush.msrb.mxu0 %v13527_v61  ;;  %5196 = vmatpush.msrb.mxu1 %v13533_v21  ;;  %v13545_v51 = vld [vmem:[%s14837_s21 + $0x30] sm:$0xff] }
 0x7e7   : > { %15603 = vst [vmem:[#allocation139_spill] sm:$0xff] %v13527_v61  ;;  %v13551_v61 = vld [vmem:[%s14837_s21 + $0x668] sm:$0xff] }
 0x7e8   : > { %15604 = vst [vmem:[#allocation101_spill] sm:$0xff] %v13533_v21  ;;  %5174 = vmatpush.msrb.mxu0 %v13539_v24  ;;  %5197 = vmatpush.msrb.mxu1 %v13545_v51  ;;  %v13557_v21 = vld [vmem:[%s14837_s21 + $0x10] sm:$0xff] }
 0x7e9   : > { %15605 = vst [vmem:[#allocation141_spill] sm:$0xff] %v13539_v24  ;;  %v13563_v24 = vld [vmem:[%s14837_s21 + $0x1f8] sm:$0xff] }
 0x7ea   : > { %15606 = vst [vmem:[#allocation105_spill] sm:$0xff] %v13545_v51  ;;  %5175 = vmatpush.msrb.mxu0 %v13551_v61  ;;  %5198 = vmatpush.msrb.mxu1 %v13557_v21  ;;  %v13569_v51 = vld [vmem:[%s14837_s21 + $0x648] sm:$0xff] }
 0x7eb   : > { %15607 = vst [vmem:[#allocation143_spill] sm:$0xff] %v13551_v61  ;;  %5199 = vmatmul.f32.vlgmr.msrb.gmra.mxu1 %v13340_v12  ;;  %v13594_v61 = vld [vmem:[%s14837_s21 + $0x608] sm:$0xff] }
 0x7ec   : > { %15608 = vst [vmem:[#allocation109_spill] sm:$0xff] %v13557_v21  ;;  %5263 = vmatpush.msra.mxu1 %v13563_v24  ;;  %5176 = vmatpush.msrb.mxu0 %v13569_v51  ;;  %v13576_v21 = vld [vmem:[%s14837_s21 + $0x1d8] sm:$0xff] }
 0x7ed   : > { %15609 = vst [vmem:[#allocation145_spill] sm:$0xff] %v13563_v24  ;;  %v13582_v24 = vld [vmem:[%s14837_s21 + $0x628] sm:$0xff] }
 0x7ee   : > { %15610 = vst [vmem:[#allocation113_spill] sm:$0xff] %v13569_v51  ;;  %5264 = vmatpush.msra.mxu1 %v13576_v21  ;;  %5177 = vmatpush.msrb.mxu0 %v13582_v24  ;;  %v13588_v51 = vld [vmem:[%s14837_s21 + $0x1b8] sm:$0xff] }
 0x7ef   : > { %15611 = vst [vmem:[#allocation117_spill] sm:$0xff] %v13576_v21  ;;  %v13600_v21 = vld [vmem:[%s14837_s21 + $0x198] sm:$0xff] }
 0x7f0   : > { %15612 = vst [vmem:[#allocation121_spill] sm:$0xff] %v13582_v24  ;;  %5265 = vmatpush.msra.mxu1 %v13588_v51  ;;  %5178 = vmatpush.msrb.mxu0 %v13594_v61  ;;  %v13606_v24 = vld [vmem:[%s14837_s21 + $0x178] sm:$0xff] }
 0x7f1   : > { %15613 = vst [vmem:[#allocation125_spill] sm:$0xff] %v13588_v51 }
 0x7f2   : > { %15614 = vst [vmem:[#allocation50_spill] sm:$0xff] %v13594_v61  ;;  %5266 = vmatpush.msra.mxu1 %v13600_v21  ;;  %v13615_v61 = vld [vmem:[%s14837_s21 + $0x158] sm:$0xff] }
 0x7f3   : > { %15615 = vst [vmem:[#allocation129_spill] sm:$0xff] %v13600_v21  ;;  %v13621_v21 = vld [vmem:[%s14837_s21 + $0x3f0] sm:$0xff] }
 0x7f4   : > { %15616 = vst [vmem:[#allocation54_spill] sm:$0xff] %v13606_v24  ;;  %5267 = vmatpush.msra.mxu1 %v13606_v24  ;;  %v13609_v51 = vpop.f32.mrf.mxu2  ;;  %v13627_v24 = vld [vmem:[%s14837_s21 + $0x138] sm:$0xff] }
 0x7f5   : > { %5059 = vmatmul.f32.vlgmr.msrb.gmra.mxu2 %v13609_v51  ;;  %15617 = vst [vmem:[#allocation133_spill] sm:$0xff] %v13615_v61 }
 0x7f6   : > { %5268 = vmatpush.msra.mxu1 %v13615_v61  ;;  %15618 = vst [vmem:[#allocation58_spill] sm:$0xff] %v13621_v21  ;;  %5203 = vmatpush.msrb.mxu2 %v13621_v21  ;;  %v13639_v61 = vld [vmem:[%s14837_s21 + $0x118] sm:$0xff]  ;;  %v13645_v21 = vld [vmem:[%s14837_s21 + $0x3b0] sm:$0xff] }
 0x7f7   : > { %15619 = vst [vmem:[#allocation136_spill] sm:$0xff] %v13627_v24 }
 0x7f8   : > { %5269 = vmatpush.msra.mxu1 %v13627_v24  ;;  %15620 = vst [vmem:[#allocation62_spill] sm:$0xff] %v13633_v42  ;;  %5204 = vmatpush.msrb.mxu2 %v13633_v42  ;;  %v13651_v24 = vld [vmem:[%s14837_s21 + $0xf8] sm:$0xff]  ;;  %v13657_v42 = vld [vmem:[%s14837_s21 + $0x390] sm:$0xff] }
 0x7f9   : > { %15621 = vst [vmem:[#allocation138_spill] sm:$0xff] %v13639_v61 }
 0x7fa   : > { %5270 = vmatpush.msra.mxu1 %v13639_v61  ;;  %15622 = vst [vmem:[#allocation66_spill] sm:$0xff] %v13645_v21  ;;  %5205 = vmatpush.msrb.mxu2 %v13645_v21  ;;  %v13664_v61 = vld [vmem:[%s14837_s21 + $0xd8] sm:$0xff]  ;;  %v13682_v21 = vld [vmem:[%s14837_s21 + $0x350] sm:$0xff] }
 0x7fb   : > { %15623 = vst [vmem:[#allocation140_spill] sm:$0xff] %v13651_v24 }
 0x7fc   : > { %5271 = vmatpush.msra.mxu1 %v13651_v24  ;;  %15624 = vst [vmem:[#allocation70_spill] sm:$0xff] %v13657_v42  ;;  %5206 = vmatpush.msrb.mxu2 %v13657_v42  ;;  %v13670_v24 = vld [vmem:[%s14837_s21 + $0x370] sm:$0xff]  ;;  %v13676_v42 = vld [vmem:[%s14837_s21 + $0xb8] sm:$0xff] }
 0x7fd   : > { %5139 = vmatmul.f32.vlgmr.msra.gmra.mxu2 %v13609_v51  ;;  %15625 = vst [vmem:[#allocation142_spill] sm:$0xff] %v13664_v61 }
 0x7fe   : > { %5272 = vmatpush.msra.mxu1 %v13664_v61  ;;  %15626 = vst [vmem:[#allocation72_spill] sm:$0xff] %v13670_v24  ;;  %5207 = vmatpush.msrb.mxu2 %v13670_v24  ;;  %v13688_v61 = vld [vmem:[%s14837_s21 + $0x98] sm:$0xff]  ;;  %v13694_v24 = vld [vmem:[%s14837_s21 + $0x330] sm:$0xff] }
 0x7ff   : > { %15627 = vst [vmem:[#allocation144_spill] sm:$0xff] %v13676_v42 }
 0x800   : > { %5273 = vmatpush.msra.mxu1 %v13676_v42  ;;  %15628 = vst [vmem:[#allocation76_spill] sm:$0xff] %v13682_v21  ;;  %5208 = vmatpush.msrb.mxu2 %v13682_v21  ;;  %v13700_v42 = vld [vmem:[%s14837_s21 + $0x78] sm:$0xff]  ;;  %v13706_v21 = vld [vmem:[%s14837_s21 + $0x310] sm:$0xff] }
 0x801   : > { %15629 = vst [vmem:[#allocation146_spill] sm:$0xff] %v13688_v61 }
 0x802   : > { %5274 = vmatpush.msra.mxu1 %v13688_v61  ;;  %15630 = vst [vmem:[#allocation80_spill] sm:$0xff] %v13694_v24  ;;  %5209 = vmatpush.msrb.mxu2 %v13694_v24  ;;  %v13712_v61 = vld [vmem:[%s14837_s21 + $0x58] sm:$0xff]  ;;  %v13718_v24 = vld [vmem:[%s14837_s21 + $0x2f0] sm:$0xff] }
 0x803   : > { %15631 = vst [vmem:[#allocation84_spill] sm:$0xff] %v13700_v42 }
 0x804   : > { %5275 = vmatpush.msra.mxu1 %v13700_v42  ;;  %15632 = vst [vmem:[#allocation88_spill] sm:$0xff] %v13706_v21  ;;  %5210 = vmatpush.msrb.mxu2 %v13706_v21  ;;  %v13724_v42 = vld [vmem:[%s14837_s21 + $0x38] sm:$0xff]  ;;  %v13730_v21 = vld [vmem:[%s14837_s21 + $0x2d0] sm:$0xff] }
 0x805   : > { %15633 = vst [vmem:[#allocation92_spill] sm:$0xff] %v13712_v61 }
 0x806   : > { %5276 = vmatpush.msra.mxu1 %v13712_v61  ;;  %15634 = vst [vmem:[#allocation98_spill] sm:$0xff] %v13718_v24  ;;  %5211 = vmatpush.msrb.mxu2 %v13718_v24  ;;  %v13736_v61 = vld [vmem:[%s14837_s21 + $0x18] sm:$0xff]  ;;  %v13742_v24 = vld [vmem:[%s14837_s21 + $0x2b0] sm:$0xff] }
 0x807   : > { %15635 = vst [vmem:[#allocation102_spill] sm:$0xff] %v13724_v42 }
 0x808   : > { %5277 = vmatpush.msra.mxu1 %v13724_v42  ;;  %15636 = vst [vmem:[#allocation106_spill] sm:$0xff] %v13730_v21  ;;  %5212 = vmatpush.msrb.mxu2 %v13730_v21  ;;  %v13749_v42 = vld [vmem:[%s14837_s21 + $0x290] sm:$0xff] }
 0x809   : > { %15637 = vst [vmem:[#allocation110_spill] sm:$0xff] %v13736_v61  ;;  %v13813_v21 = vld [vmem:[%s14837_s21 + $0x5b0] sm:$0xff] }
 0x80a   : > { %5278 = vmatpush.msra.mxu1 %v13736_v61  ;;  %15638 = vst [vmem:[#allocation114_spill] sm:$0xff] %v13742_v24  ;;  %5213 = vmatpush.msrb.mxu2 %v13742_v24  ;;  %v13755_v61 = vld [vmem:[%s14837_s21 + $0x270] sm:$0xff] }
 0x80b   : > { %5279 = vmatmul.f32.vlgmr.msra.gmra.mxu1 %v13340_v12  ;;  %15639 = vst [vmem:[#allocation118_spill] sm:$0xff] %v13749_v42  ;;  %v13761_v24 = vld [vmem:[%s14837_s21 + $0x250] sm:$0xff] }
 0x80c   : > { %5214 = vmatpush.msrb.mxu2 %v13749_v42  ;;  %15640 = vst [vmem:[#allocation122_spill] sm:$0xff] %v13755_v61  ;;  %v13767_v12 = vld [vmem:[%s14837_s21 + $0x230] sm:$0xff] }
 0x80d   : > { %15641 = vst [vmem:[#allocation126_spill] sm:$0xff] %v13761_v24 }
 0x80e   : > { %5215 = vmatpush.msrb.mxu2 %v13755_v61  ;;  %15642 = vst [vmem:[#allocation130_spill] sm:$0xff] %v13767_v12  ;;  %v13775_v61 = vld [vmem:[%s14837_s21 + $0x210] sm:$0xff] }
 0x80f   : > { %15643 = vst [vmem:[#allocation134_spill] sm:$0xff] %v13775_v61 }
 0x810   : > { %5216 = vmatpush.msrb.mxu2 %v13761_v24  ;;  %v13782_v24 = vld [vmem:[%s14837_s21 + $0x3f8] sm:$0xff]  ;;  %15649 = vst [vmem:[#allocation8_spill] sm:$0xff] %v13813_v21 }
 0x811   : > { %15644 = vst [vmem:[#allocation2_spill] sm:$0xff] %v13782_v24 }
 0x812   : > { %5217 = vmatpush.msrb.mxu2 %v13767_v12  ;;  %v13788_v12 = vld [vmem:[%s14837_s21 + $0x5f0] sm:$0xff] }
 0x813   : > { %15645 = vst [vmem:[#allocation3_spill] sm:$0xff] %v13788_v12 }
 0x814   : > { %v13770_v42 = vpop.f32.mrf.mxu3  ;;  %5218 = vmatpush.msrb.mxu2 %v13775_v61  ;;  %v13795_v61 = vld [vmem:[%s14837_s21 + $0x3d8] sm:$0xff] }
 0x815   : > { %5079 = vmatmul.f32.vlgmr.msrb.gmra.mxu3 %v13770_v42  ;;  %5219 = vmatmul.f32.vlgmr.msrb.gmra.mxu2 %v13609_v51  ;;  %15646 = vst [vmem:[#allocation4_spill] sm:$0xff] %v13795_v61 }
 0x816   : > { %5283 = vmatpush.msra.mxu2 %v13782_v24  ;;  %5223 = vmatpush.msrb.mxu3 %v13788_v12  ;;  %v13801_v24 = vld [vmem:[%s14837_s21 + $0x5d0] sm:$0xff]  ;;  %v13807_v12 = vld [vmem:[%s14837_s21 + $0x3b8] sm:$0xff] }
 0x817   : > { %15647 = vst [vmem:[#allocation5_spill] sm:$0xff] %v13801_v24 }
 0x818   : > { %5284 = vmatpush.msra.mxu2 %v13795_v61  ;;  %5224 = vmatpush.msrb.mxu3 %v13801_v24  ;;  %15648 = vst [vmem:[#allocation6_spill] sm:$0xff] %v13807_v12  ;;  %v13819_v61 = vld [vmem:[%s14837_s21 + $0x398] sm:$0xff]  ;;  %v13825_v24 = vld [vmem:[%s14837_s21 + $0x590] sm:$0xff] }
 0x819   : > { %15650 = vst [vmem:[#allocation7_spill] sm:$0xff] %v13819_v61 }
 0x81a   : > { %5285 = vmatpush.msra.mxu2 %v13807_v12  ;;  %5225 = vmatpush.msrb.mxu3 %v13813_v21  ;;  %15651 = vst [vmem:[#allocation9_spill] sm:$0xff] %v13825_v24  ;;  %v13831_v12 = vld [vmem:[%s14837_s21 + $0x378] sm:$0xff] }
 0x81b   : > { %15652 = vst [vmem:[#allocation147_spill] sm:$0xff] %v13831_v12  ;;  %v13856_v21 = vld [vmem:[%s14837_s21 + $0x338] sm:$0xff] }
 0x81c   : > { %5286 = vmatpush.msra.mxu2 %v13819_v61  ;;  %5226 = vmatpush.msrb.mxu3 %v13825_v24  ;;  %v13838_v61 = vld [vmem:[%s14837_s21 + $0x570] sm:$0xff]  ;;  %v13844_v24 = vld [vmem:[%s14837_s21 + $0x358] sm:$0xff]  ;;  %15656 = vst [vmem:[#allocation151_spill] sm:$0xff] %v13856_v21 }
 0x81d   : > { %5159 = vmatmul.f32.vlgmr.msra.gmra.mxu3 %v13770_v42  ;;  %15653 = vst [vmem:[#allocation148_spill] sm:$0xff] %v13838_v61 }
 0x81e   : > { %5287 = vmatpush.msra.mxu2 %v13831_v12  ;;  %5227 = vmatpush.msrb.mxu3 %v13838_v61  ;;  %15654 = vst [vmem:[#allocation149_spill] sm:$0xff] %v13844_v24  ;;  %v13850_v12 = vld [vmem:[%s14837_s21 + $0x550] sm:$0xff] }
 0x81f   : > { %15655 = vst [vmem:[#allocation150_spill] sm:$0xff] %v13850_v12  ;;  %v13862_v61 = vld [vmem:[%s14837_s21 + $0x530] sm:$0xff] }
 0x820   : > { %5288 = vmatpush.msra.mxu2 %v13844_v24  ;;  %5228 = vmatpush.msrb.mxu3 %v13850_v12  ;;  %15657 = vst [vmem:[#allocation152_spill] sm:$0xff] %v13862_v61  ;;  %v13868_v24 = vld [vmem:[%s14837_s21 + $0x318] sm:$0xff]  ;;  %v13874_v12 = vld [vmem:[%s14837_s21 + $0x510] sm:$0xff] }
 0x821   : > { %15658 = vst [vmem:[#allocation153_spill] sm:$0xff] %v13868_v24 }
 0x822   : > { %5289 = vmatpush.msra.mxu2 %v13856_v21  ;;  %5229 = vmatpush.msrb.mxu3 %v13862_v61  ;;  %15659 = vst [vmem:[#allocation154_spill] sm:$0xff] %v13874_v12  ;;  %v13880_v21 = vld [vmem:[%s14837_s21 + $0x2f8] sm:$0xff]  ;;  %v13886_v61 = vld [vmem:[%s14837_s21 + $0x4f0] sm:$0xff] }
 0x823   : > { %15660 = vst [vmem:[#allocation155_spill] sm:$0xff] %v13880_v21 }
 0x824   : > { %5290 = vmatpush.msra.mxu2 %v13868_v24  ;;  %5230 = vmatpush.msrb.mxu3 %v13874_v12  ;;  %15661 = vst [vmem:[#allocation156_spill] sm:$0xff] %v13886_v61  ;;  %v13892_v24 = vld [vmem:[%s14837_s21 + $0x2d8] sm:$0xff]  ;;  %v13898_v12 = vld [vmem:[%s14837_s21 + $0x4d0] sm:$0xff] }
 0x825   : > { %15662 = vst [vmem:[#allocation157_spill] sm:$0xff] %v13892_v24 }
 0x826   : > { %5291 = vmatpush.msra.mxu2 %v13880_v21  ;;  %5231 = vmatpush.msrb.mxu3 %v13886_v61  ;;  %15663 = vst [vmem:[#allocation158_spill] sm:$0xff] %v13898_v12  ;;  %v13904_v21 = vld [vmem:[%s14837_s21 + $0x2b8] sm:$0xff]  ;;  %v13910_v61 = vld [vmem:[%s14837_s21 + $0x4b0] sm:$0xff] }
 0x827   : > { %15664 = vst [vmem:[#allocation159_spill] sm:$0xff] %v13904_v21 }
 0x828   : > { %5292 = vmatpush.msra.mxu2 %v13892_v24  ;;  %5232 = vmatpush.msrb.mxu3 %v13898_v12  ;;  %15665 = vst [vmem:[#allocation160_spill] sm:$0xff] %v13910_v61  ;;  %v13916_v24 = vld [vmem:[%s14837_s21 + $0x298] sm:$0xff]  ;;  %v13922_v12 = vld [vmem:[%s14837_s21 + $0x490] sm:$0xff] }
 0x829   : > { %15666 = vst [vmem:[#allocation161_spill] sm:$0xff] %v13916_v24 }
 0x82a   : > { %5293 = vmatpush.msra.mxu2 %v13904_v21  ;;  %5233 = vmatpush.msrb.mxu3 %v13910_v61  ;;  %15667 = vst [vmem:[#allocation162_spill] sm:$0xff] %v13922_v12  ;;  %v13928_v21 = vld [vmem:[%s14837_s21 + $0x278] sm:$0xff] }
 0x82b   : > { %15668 = vst [vmem:[#allocation163_spill] sm:$0xff] %v13928_v21 }
 0x82c   : > { %5294 = vmatpush.msra.mxu2 %v13916_v24  ;;  %5234 = vmatpush.msrb.mxu3 %v13922_v12  ;;  %v13936_v24 = vld [vmem:[%s14837_s21 + $0x470] sm:$0xff]  ;;  %v13943_v12 = vld [vmem:[%s14837_s21 + $0x258] sm:$0xff] }
 0x82d   : > { %15669 = vst [vmem:[#allocation164_spill] sm:$0xff] %v13936_v24 }
 0x82e   : > { %5295 = vmatpush.msra.mxu2 %v13928_v21  ;;  %v13931_v61 = vpop.f32.mrf.mxu0  ;;  %5235 = vmatpush.msrb.mxu3 %v13936_v24  ;;  %15670 = vst [vmem:[#allocation165_spill] sm:$0xff] %v13943_v12  ;;  %v13949_v21 = vld [vmem:[%s14837_s21 + $0x7f0] sm:$0xff] }
 0x82f   : > { %5099 = vmatmul.f32.vlgmr.msra.gmra.mxu0 %v13931_v61  ;;  %15671 = vst [vmem:[#allocation166_spill] sm:$0xff] %v13949_v21  ;;  %v13955_v24 = vld [vmem:[%s14837_s21 + $0x450] sm:$0xff] }
 0x830   : > { %5296 = vmatpush.msra.mxu2 %v13943_v12  ;;  %5243 = vmatpush.msra.mxu0 %v13949_v21  ;;  %15672 = vst [vmem:[#allocation167_spill] sm:$0xff] %v13955_v24  ;;  %v13967_v12 = vld [vmem:[%s14837_s21 + $0x7d0] sm:$0xff] }
 0x831   : > { %5236 = vmatpush.msrb.mxu3 %v13955_v24  ;;  %15674 = vst [vmem:[#allocation169_spill] sm:$0xff] %v13967_v12  ;;  %v13973_v21 = vld [vmem:[%s14837_s21 + $0x430] sm:$0xff]  ;;  %v13979_v24 = vld [vmem:[%s14837_s21 + $0x218] sm:$0xff] }
 0x832   : > { %5297 = vmatpush.msra.mxu2 %v13961_v48  ;;  %5244 = vmatpush.msra.mxu0 %v13967_v12  ;;  %15675 = vst [vmem:[#allocation170_spill] sm:$0xff] %v13973_v21  ;;  %v13985_v48 = vld [vmem:[%s14837_s21 + $0x7b0] sm:$0xff] }
 0x833   : > { %5237 = vmatpush.msrb.mxu3 %v13973_v21  ;;  %15676 = vst [vmem:[#allocation171_spill] sm:$0xff] %v13979_v24  ;;  %v13991_v12 = vld [vmem:[%s14837_s21 + $0x410] sm:$0xff] }
 0x834   : > { %5298 = vmatpush.msra.mxu2 %v13979_v24  ;;  %15677 = vst [vmem:[#allocation172_spill] sm:$0xff] %v13985_v48  ;;  %5245 = vmatpush.msra.mxu0 %v13985_v48  ;;  %v13999_v24 = vld [vmem:[%s14837_s21 + $0x790] sm:$0xff]  ;;  %v14005_v48 = vld [vmem:[%s14837_s21 + $0x5f8] sm:$0xff] }
 0x835   : > { %15678 = vst [vmem:[#allocation173_spill] sm:$0xff] %v13991_v12  ;;  %5238 = vmatpush.msrb.mxu3 %v13991_v12  ;;  %5299 = vmatmul.f32.vlgmr.msra.gmra.mxu2 %v13609_v51  ;;  %v14012_v51 = vld [vmem:[%s14837_s21 + $0x770] sm:$0xff]  ;;  %v14030_v12 = vld [vmem:[%s14837_s21 + $0x5b8] sm:$0xff] }
 0x836   : > { %5239 = vmatmul.f32.vlgmr.msrb.gmra.mxu3 %v13770_v42  ;;  %15679 = vst [vmem:[#allocation174_spill] sm:$0xff] %v13999_v24  ;;  %5246 = vmatpush.msra.mxu0 %v13999_v24  ;;  %v14018_v24 = vld [vmem:[%s14837_s21 + $0x5d8] sm:$0xff] }
 0x837   : > { %15680 = vst [vmem:[#allocation175_spill] sm:$0xff] %v14005_v48  ;;  %5303 = vmatpush.msra.mxu3 %v14005_v48  ;;  %5179 = vmatmul.f32.vlgmr.msrb.gmra.mxu0 %v13931_v61  ;;  %v14024_v48 = vld [vmem:[%s14837_s21 + $0x750] sm:$0xff] }
 0x838   : > { %15681 = vst [vmem:[#allocation176_spill] sm:$0xff] %v14012_v51  ;;  %5247 = vmatpush.msra.mxu0 %v14012_v51  ;;  %v14036_v51 = vld [vmem:[%s14837_s21 + $0x730] sm:$0xff] }
 0x839   : > { %15682 = vst [vmem:[#allocation177_spill] sm:$0xff] %v14018_v24  ;;  %5304 = vmatpush.msra.mxu3 %v14018_v24  ;;  %v14042_v24 = vld [vmem:[%s14837_s21 + $0x598] sm:$0xff] }
 0x83a   : > { %15683 = vst [vmem:[#allocation178_spill] sm:$0xff] %v14024_v48  ;;  %5248 = vmatpush.msra.mxu0 %v14024_v48  ;;  %v14048_v48 = vld [vmem:[%s14837_s21 + $0x710] sm:$0xff] }
 0x83b   : > { %15684 = vst [vmem:[#allocation179_spill] sm:$0xff] %v14030_v12  ;;  %5305 = vmatpush.msra.mxu3 %v14030_v12  ;;  %v14054_v12 = vld [vmem:[%s14837_s21 + $0x578] sm:$0xff] }
 0x83c   : > { %15685 = vst [vmem:[#allocation180_spill] sm:$0xff] %v14036_v51  ;;  %5249 = vmatpush.msra.mxu0 %v14036_v51  ;;  %v14060_v51 = vld [vmem:[%s14837_s21 + $0x6f0] sm:$0xff] }
 0x83d   : > { %15686 = vst [vmem:[#allocation181_spill] sm:$0xff] %v14042_v24  ;;  %5306 = vmatpush.msra.mxu3 %v14042_v24  ;;  %v14066_v24 = vld [vmem:[%s14837_s21 + $0x558] sm:$0xff] }
 0x83e   : > { %15687 = vst [vmem:[#allocation182_spill] sm:$0xff] %v14048_v48  ;;  %5250 = vmatpush.msra.mxu0 %v14048_v48  ;;  %v14072_v48 = vld [vmem:[%s14837_s21 + $0x6d0] sm:$0xff] }
 0x83f   : > { %15688 = vst [vmem:[#allocation183_spill] sm:$0xff] %v14054_v12  ;;  %5307 = vmatpush.msra.mxu3 %v14054_v12  ;;  %v14078_v12 = vld [vmem:[%s14837_s21 + $0x538] sm:$0xff] }
 0x840   : > { %15689 = vst [vmem:[#allocation184_spill] sm:$0xff] %v14060_v51  ;;  %5251 = vmatpush.msra.mxu0 %v14060_v51  ;;  %v14084_v51 = vld [vmem:[%s14837_s21 + $0x6b0] sm:$0xff] }
 0x841   : > { %15690 = vst [vmem:[#allocation185_spill] sm:$0xff] %v14066_v24  ;;  %5308 = vmatpush.msra.mxu3 %v14066_v24  ;;  %v14090_v24 = vld [vmem:[%s14837_s21 + $0x518] sm:$0xff] }
 0x842   : > { %15691 = vst [vmem:[#allocation186_spill] sm:$0xff] %v14072_v48  ;;  %5252 = vmatpush.msra.mxu0 %v14072_v48  ;;  %v14096_v48 = vld [vmem:[%s14837_s21 + $0x690] sm:$0xff] }
 0x843   : > { %15692 = vst [vmem:[#allocation187_spill] sm:$0xff] %v14078_v12  ;;  %5309 = vmatpush.msra.mxu3 %v14078_v12  ;;  %v14102_v12 = vld [vmem:[%s14837_s21 + $0x4f8] sm:$0xff] }
 0x844   : > { %15693 = vst [vmem:[#allocation188_spill] sm:$0xff] %v14084_v51  ;;  %5253 = vmatpush.msra.mxu0 %v14084_v51  ;;  %v14108_v51 = vld [vmem:[%s14837_s21 + $0x670] sm:$0xff] }
 0x845   : > { %15694 = vst [vmem:[#allocation189_spill] sm:$0xff] %v14090_v24  ;;  %5310 = vmatpush.msra.mxu3 %v14090_v24  ;;  %v14114_v24 = vld [vmem:[%s14837_s21 + $0x4d8] sm:$0xff] }
 0x846   : > { %15695 = vst [vmem:[#allocation190_spill] sm:$0xff] %v14096_v48  ;;  %5254 = vmatpush.msra.mxu0 %v14096_v48  ;;  %v14120_v48 = vld [vmem:[%s14837_s21 + $0x650] sm:$0xff] }
 0x847   : > { %15696 = vst [vmem:[#allocation191_spill] sm:$0xff] %v14102_v12  ;;  %5311 = vmatpush.msra.mxu3 %v14102_v12  ;;  %v14126_v12 = vld [vmem:[%s14837_s21 + $0x4b8] sm:$0xff] }
 0x848   : > { %15697 = vst [vmem:[#allocation192_spill] sm:$0xff] %v14108_v51  ;;  %5255 = vmatpush.msra.mxu0 %v14108_v51  ;;  %v14132_v51 = vld [vmem:[%s14837_s21 + $0x630] sm:$0xff] }
 0x849   : > { %15698 = vst [vmem:[#allocation193_spill] sm:$0xff] %v14114_v24  ;;  %5312 = vmatpush.msra.mxu3 %v14114_v24  ;;  %v14138_v24 = vld [vmem:[%s14837_s21 + $0x498] sm:$0xff] }
 0x84a   : > { %15699 = vst [vmem:[#allocation194_spill] sm:$0xff] %v14120_v48  ;;  %5256 = vmatpush.msra.mxu0 %v14120_v48  ;;  %v14144_v48 = vld [vmem:[%s14837_s21 + $0x610] sm:$0xff] }
 0x84b   : > { %15700 = vst [vmem:[#allocation195_spill] sm:$0xff] %v14126_v12  ;;  %5313 = vmatpush.msra.mxu3 %v14126_v12  ;;  %v14150_v12 = vld [vmem:[%s14837_s21 + $0x478] sm:$0xff] }
 0x84c   : > { %15701 = vst [vmem:[#allocation196_spill] sm:$0xff] %v14132_v51  ;;  %5257 = vmatpush.msra.mxu0 %v14132_v51  ;;  %v14175_v51 = vld [vmem:[%s14837_s21 + $0x438] sm:$0xff] }
 0x84d   : > { %15702 = vst [vmem:[#allocation197_spill] sm:$0xff] %v14138_v24  ;;  %5314 = vmatpush.msra.mxu3 %v14138_v24  ;;  %v14157_v24 = vld [vmem:[%s14837_s21 + $0x7f8] sm:$0xff] }
 0x84e   : > { %15703 = vst [vmem:[#allocation198_spill] sm:$0xff] %v14144_v48  ;;  %5258 = vmatpush.msra.mxu0 %v14144_v48  ;;  %v14163_v48 = vld [vmem:[%s14837_s21 + $0x458] sm:$0xff] }
 0x84f   : > { %15704 = vst [vmem:[#allocation199_spill] sm:$0xff] %v14150_v12  ;;  %5315 = vmatpush.msra.mxu3 %v14150_v12  ;;  %5259 = vmatmul.f32.vlgmr.msra.gmra.mxu0 %v13931_v61  ;;  %v14169_v12 = vld [vmem:[%s14837_s21 + $0x7d8] sm:$0xff] }
 0x850   : > { %15705 = vst [vmem:[#allocation200_spill] sm:$0xff] %v14157_v24  ;;  %5323 = vmatpush.msrb.mxu0 %v14157_v24  ;;  %v14181_v24 = vld [vmem:[%s14837_s21 + $0x7b8] sm:$0xff] }
 0x851   : > { %15706 = vst [vmem:[#allocation201_spill] sm:$0xff] %v14163_v48  ;;  %5316 = vmatpush.msra.mxu3 %v14163_v48  ;;  %v14187_v48 = vld [vmem:[%s14837_s21 + $0x418] sm:$0xff] }
 0x852   : > { %15707 = vst [vmem:[#allocation202_spill] sm:$0xff] %v14169_v12  ;;  %5324 = vmatpush.msrb.mxu0 %v14169_v12 }
 0x853   : > { %15708 = vst [vmem:[#allocation203_spill] sm:$0xff] %v14175_v51  ;;  %5317 = vmatpush.msra.mxu3 %v14175_v51  ;;  %v14194_v51 = vld [vmem:[%s14837_s21 + $0x798] sm:$0xff] }
 0x854   : > { %15709 = vst [vmem:[#allocation204_spill] sm:$0xff] %v14181_v24  ;;  %5325 = vmatpush.msrb.mxu0 %v14181_v24  ;;  %v14200_v24 = vld [vmem:[%s14837_s21 + $0x778] sm:$0xff] }
 0x855   : > { %15710 = vst [vmem:[#allocation205_spill] sm:$0xff] %v14187_v48  ;;  %5318 = vmatpush.msra.mxu3 %v14187_v48  ;;  %v14206_v48 = vld [vmem:[%s14837_s21 + $0x758] sm:$0xff] }
 0x856   : > { %5319 = vmatmul.f32.vlgmr.msra.gmra.mxu3 %v13770_v42  ;;  %15711 = vst [vmem:[#allocation206_spill] sm:$0xff] %v14194_v51  ;;  %5326 = vmatpush.msrb.mxu0 %v14194_v51  ;;  %v14212_v42 = vld [vmem:[%s14837_s21 + $0x738] sm:$0xff] }
 0x857   : > { %15712 = vst [vmem:[#allocation207_spill] sm:$0xff] %v14200_v24  ;;  %v14218_v51 = vld [vmem:[%s14837_s21 + $0x718] sm:$0xff] }
 0x858   : > { %5327 = vmatpush.msrb.mxu0 %v14200_v24  ;;  %15713 = vst [vmem:[#allocation208_spill] sm:$0xff] %v14206_v48  ;;  %v14224_v24 = vld [vmem:[%s14837_s21 + $0x6f8] sm:$0xff] }
 0x859   : > { %15714 = vst [vmem:[#allocation209_spill] sm:$0xff] %v14212_v42 }
 0x85a   : > { %5328 = vmatpush.msrb.mxu0 %v14206_v48  ;;  %15715 = vst [vmem:[#allocation210_spill] sm:$0xff] %v14218_v51  ;;  %v14230_v48 = vld [vmem:[%s14837_s21 + $0x6d8] sm:$0xff] }
 0x85b   : > { %15716 = vst [vmem:[#allocation211_spill] sm:$0xff] %v14224_v24 }
 0x85c   : > { %5329 = vmatpush.msrb.mxu0 %v14212_v42  ;;  %15717 = vst [vmem:[#allocation212_spill] sm:$0xff] %v14230_v48  ;;  %v14236_v42 = vld [vmem:[%s14837_s21 + $0x6b8] sm:$0xff] }
 0x85d   : > { %15718 = vst [vmem:[#allocation213_spill] sm:$0xff] %v14236_v42 }
 0x85e   : > { %5330 = vmatpush.msrb.mxu0 %v14218_v51  ;;  %v14242_v51 = vld [vmem:[%s14837_s21 + $0x698] sm:$0xff] }
 0x85f   : > { %15719 = vst [vmem:[#allocation214_spill] sm:$0xff] %v14242_v51 }
 0x860   : > { %5331 = vmatpush.msrb.mxu0 %v14224_v24  ;;  %v14248_v24 = vld [vmem:[%s14837_s21 + $0x678] sm:$0xff] }
 0x861   : > { %15720 = vst [vmem:[#allocation215_spill] sm:$0xff] %v14248_v24 }
 0x862   : > { %5332 = vmatpush.msrb.mxu0 %v14230_v48  ;;  %v14254_v48 = vld [vmem:[%s14837_s21 + $0x658] sm:$0xff] }
 0x863   : > { %15721 = vst [vmem:[#allocation216_spill] sm:$0xff] %v14254_v48 }
 0x864   : > { %5333 = vmatpush.msrb.mxu0 %v14236_v42  ;;  %v14260_v42 = vld [vmem:[%s14837_s21 + $0x638] sm:$0xff] }
 0x865   : > { %15722 = vst [vmem:[#allocation217_spill] sm:$0xff] %v14260_v42 }
 0x866   : > { %5334 = vmatpush.msrb.mxu0 %v14242_v51  ;;  %v14266_v51 = vld [vmem:[%s14837_s21 + $0x618] sm:$0xff] }
 0x867   : > { %15723 = vst [vmem:[#allocation218_spill] sm:$0xff] %v14266_v51 }
 0x868   : > { %5335 = vmatpush.msrb.mxu0 %v14248_v24  ;;  %v5040_v24 = vpop.f32.mrf.mxu1 }
 0x86a   : > { %5336 = vmatpush.msrb.mxu0 %v14254_v48 }
 0x86c   : > { %5337 = vmatpush.msrb.mxu0 %v14260_v42 }
 0x86e   : > { %5338 = vmatpush.msrb.mxu0 %v14266_v51 }
 0x86f   : > { %5339 = vmatmul.f32.vlgmr.msrb.gmra.mxu0 %v13931_v61 }
 0x870   : > { %v5120_v20 = vpop.f32.mrf.mxu1 }
 0x878   : > { %v5060_v12 = vpop.f32.mrf.mxu2 }
 0x879   : > { %v5061_v21 = vadd.f32 %v5060_v12, %v5040_v24 }
 0x880   : > { %v5140_v0 = vpop.f32.mrf.mxu2 }
 0x881   : > { %v5141_v46 = vadd.f32 %v5140_v0, %v5120_v20 }
 0x898   : > { %v5080_v48 = vpop.f32.mrf.mxu3 }
 0x899   : > { %v5081_v53 = vadd.f32 %v5080_v48, %v5061_v21 }
 0x8a0   : > { %v5160_v54 = vpop.f32.mrf.mxu3 }
 0x8a1   : > { %v5161_v51 = vadd.f32 %v5160_v54, %v5141_v46  ;;  %v15750_v46 = vld [vmem:[#allocation47_spill] sm:$0xff] }
 0x8ac   : > { %v5100_v22 = vpop.f32.mrf.mxu0 }
 0x8ad   : > { %v5101_v13 = vadd.f32 %v5100_v22, %v5081_v53  ;;  %v15751_v53 = vld [vmem:[#allocation19_spill] sm:$0xff] }
 0x8af   : > { %v5343_v42 = vperm.slane %v5101_v13, 0  ;;  %v15749_v13 = vld [vmem:[#allocation51_spill] sm:$0xff] }
 0x8b1   : > { %v14271_v62 = vsub.f32 %v12658_v29, %v5343_v42  ;;  %v14274_v56 = vsub.f32 %v12655_v9, %v5343_v42 }
 0x8b3   : > { %v5359_v61 = vmul.f32 %v14274_v56, %v14274_v56  ;;  %v5355_v22 = vmul.f32 %v14271_v62, %v14271_v62 }
 0x8b4   : > { %v5180_v24 = vpop.f32.mrf.mxu0 }
 0x8b5   : > { %v5181_v12 = vadd.f32 %v5180_v24, %v5161_v51  ;;  %5377 = vmatpush.msrb.mxu1 %v5359_v61  ;;  %v15752_v51 = vld [vmem:[#allocation33_spill] sm:$0xff]  ;;  %v15753_v61 = vld [vmem:[#allocation48_spill] sm:$0xff] }
 0x8b6   : > { %v15754_v24 = vld [vmem:[#allocation21_spill] sm:$0xff] }
 0x8b7   : > { %v5344_v48 = vperm.slane %v5181_v12, 0  ;;  %5378 = vmatpush.msrb.mxu1 %v5355_v22  ;;  %v15755_v12 = vld [vmem:[#allocation35_spill] sm:$0xff] }
 0x8b8   : > { %6896 = vmatmul.msk.f32.vlgmr.msrb.gmra.mxu1 %vm1029_vm9, %v15356_v18 }
 0x8b9   : > { %v14283_v29 = vsub.f32 %v12785_v31, %v5344_v48  ;;  %v14286_v9 = vsub.f32 %v12770_v55, %v5344_v48  ;;  %5443 = vmatpush.msra.mxu1 %v12666_v26  ;;  %v5220_v26 = vpop.f32.mrf.mxu2  ;;  %v15730_v31 = vld [vmem:[#allocation20_spill] sm:$0xff]  ;;  %v15756_v48 = vld [vmem:[#allocation59_spill] sm:$0xff] }
 0x8bb   : > { %v5360_v54 = vmul.f32 %v14286_v9, %v14286_v9  ;;  %5444 = vmatpush.msra.mxu1 %v12672_v16  ;;  %v5356_v0 = vmul.f32 %v14283_v29, %v14283_v29  ;;  %v5200_v16 = vpop.f32.mrf.mxu1 }
 0x8bd   : > { %5397 = vmatpush.msrb.mxu2 %v5360_v54  ;;  %5445 = vmatpush.msra.mxu1 %v12678_v19  ;;  %v5240_v19 = vpop.f32.mrf.mxu3  ;;  %v15757_v54 = vld [vmem:[#allocation22_spill] sm:$0xff] }
 0x8bf   : > { %5398 = vmatpush.msrb.mxu2 %v5356_v0  ;;  %5446 = vmatpush.msra.mxu1 %v12684_v36  ;;  %v5221_v36 = vadd.f32 %v5220_v26, %v5200_v16  ;;  %v15758_v0 = vld [vmem:[#allocation36_spill] sm:$0xff]  ;;  %v15759_v26 = vld [vmem:[#allocation63_spill] sm:$0xff] }
 0x8c0   : > { %6897 = vmatmul.msk.f32.vlgmr.msrb.gmra.mxu2 %vm1029_vm9, %v15356_v18  ;;  %v15760_v16 = vld [vmem:[#allocation39_spill] sm:$0xff] }
 0x8c1   : > { %5447 = vmatpush.msra.mxu1 %v12690_v47  ;;  %5463 = vmatpush.msra.mxu2 %v12805_v10  ;;  %v5241_v47 = vadd.f32 %v5240_v19, %v5221_v36  ;;  %v15732_v10 = vld [vmem:[#allocation26_spill] sm:$0xff]  ;;  %v15761_v19 = vld [vmem:[#allocation67_spill] sm:$0xff]  ;;  %v15762_v36 = vld [vmem:[#allocation60_spill] sm:$0xff] }
 0x8c3   : > { %5448 = vmatpush.msra.mxu1 %v12696_v32  ;;  %5464 = vmatpush.msra.mxu2 %v12817_v1  ;;  %v5280_v1 = vpop.f32.mrf.mxu1 }
 0x8c5   : > { %5449 = vmatpush.msra.mxu1 %v12702_v28  ;;  %5465 = vmatpush.msra.mxu2 %v12829_v27  ;;  %v15734_v27 = vld [vmem:[#allocation11_spill] sm:$0xff] }
 0x8c7   : > { %5450 = vmatpush.msra.mxu1 %v12712_v52  ;;  %5466 = vmatpush.msra.mxu2 %v12841_v60  ;;  %v15735_v60 = vld [vmem:[#allocation28_spill] sm:$0xff] }
 0x8c9   : > { %5451 = vmatpush.msra.mxu1 %v12720_v45  ;;  %5467 = vmatpush.msra.mxu2 %v12853_v35 }
 0x8cb   : > { %5452 = vmatpush.msra.mxu1 %v12728_v44  ;;  %5468 = vmatpush.msra.mxu2 %v12865_v59  ;;  %v15736_v59 = vld [vmem:[#allocation34_spill] sm:$0xff] }
 0x8cc   : > { %v5260_v32 = vpop.f32.mrf.mxu0 }
 0x8cd   : > { %v5261_v28 = vadd.f32 %v5260_v32, %v5241_v47  ;;  %5453 = vmatpush.msra.mxu1 %v12736_v6  ;;  %5469 = vmatpush.msra.mxu2 %v12877_v23  ;;  %v15737_v23 = vld [vmem:[#allocation12_spill] sm:$0xff]  ;;  %v15763_v47 = vld [vmem:[#allocation42_spill] sm:$0xff]  ;;  %v15764_v32 = vld [vmem:[#allocation71_spill] sm:$0xff] }
 0x8cf   : > { %v5345_v52 = vperm.slane %v5261_v28, 0  ;;  %5454 = vmatpush.msra.mxu1 %v12744_v14  ;;  %5470 = vmatpush.msra.mxu2 %v12889_v39  ;;  %v15724_v14 = vld [vmem:[#allocation17_spill] sm:$0xff]  ;;  %v15738_v39 = vld [vmem:[#allocation15_spill] sm:$0xff]  ;;  %v15765_v28 = vld [vmem:[#allocation64_spill] sm:$0xff] }
 0x8d1   : > { %v14315_v45 = vsub.f32 %v12970_v15, %v5345_v52  ;;  %v14318_v55 = vsub.f32 %v12961_v8, %v5345_v52  ;;  %5455 = vmatpush.msra.mxu1 %v12752_v50  ;;  %5471 = vmatpush.msra.mxu2 %v12901_v40  ;;  %v15725_v50 = vld [vmem:[#allocation25_spill] sm:$0xff]  ;;  %v15744_v15 = vld [vmem:[#allocation30_spill] sm:$0xff] }
 0x8d2   : > { %v15742_v8 = vld [vmem:[#allocation41_spill] sm:$0xff] }
 0x8d3   : > { %v5361_v44 = vmul.f32 %v14318_v55, %v14318_v55  ;;  %5456 = vmatpush.msra.mxu1 %v12760_v41  ;;  %5472 = vmatpush.msra.mxu2 %v12913_v4  ;;  %v5357_v6 = vmul.f32 %v14315_v45, %v14315_v45  ;;  %v15726_v41 = vld [vmem:[#allocation23_spill] sm:$0xff]  ;;  %v15739_v4 = vld [vmem:[#allocation38_spill] sm:$0xff]  ;;  %v15766_v52 = vld [vmem:[#allocation45_spill] sm:$0xff] }
 0x8d5   : > { %5417 = vmatpush.msrb.mxu3 %v5361_v44  ;;  %5457 = vmatpush.msra.mxu1 %v12767_v49  ;;  %v15727_v49 = vld [vmem:[#allocation18_spill] sm:$0xff]  ;;  %v15767_v44 = vld [vmem:[#allocation75_spill] sm:$0xff] }
 0x8d6   : > { %5473 = vmatpush.msra.mxu2 %v12925_v5 }
 0x8d7   : > { %5418 = vmatpush.msrb.mxu3 %v5357_v6  ;;  %5458 = vmatpush.msra.mxu1 %v12775_v34  ;;  %v15728_v34 = vld [vmem:[#allocation10_spill] sm:$0xff]  ;;  %v15768_v6 = vld [vmem:[#allocation68_spill] sm:$0xff] }
 0x8d8   : > { %6898 = vmatmul.msk.f32.vlgmr.msrb.gmra.mxu3 %vm1029_vm9, %v15356_v18  ;;  %5474 = vmatpush.msra.mxu2 %v12937_v37  ;;  %v15741_v37 = vld [vmem:[#allocation29_spill] sm:$0xff] }
 0x8d9   : > { %5523 = vmatpush.msrb.mxu1 %v12781_v25  ;;  %5483 = vmatpush.msra.mxu3 %v12996_v58  ;;  %v15729_v25 = vld [vmem:[#allocation24_spill] sm:$0xff] }
 0x8da   : > { %5475 = vmatpush.msra.mxu2 %v12952_v33  ;;  %v15746_v58 = vld [vmem:[#allocation16_spill] sm:$0xff] }
 0x8db   : > { %5524 = vmatpush.msrb.mxu1 %v12790_v17  ;;  %5484 = vmatpush.msra.mxu3 %v13008_v2  ;;  %v5300_v17 = vpop.f32.mrf.mxu2  ;;  %v15747_v2 = vld [vmem:[#allocation31_spill] sm:$0xff] }
 0x8dc   : > { %5476 = vmatpush.msra.mxu2 %v12966_v7  ;;  %v5301_v35 = vadd.f32 %v5300_v17, %v5280_v1  ;;  %v15743_v7 = vld [vmem:[#allocation14_spill] sm:$0xff]  ;;  %v15777_v17 = vld [vmem:[#allocation85_spill] sm:$0xff]  ;;  %v15781_v1 = vld [vmem:[#allocation95_spill] sm:$0xff] }
 0x8dd   : > { %5525 = vmatpush.msrb.mxu1 %v12799_v11  ;;  %5485 = vmatpush.msra.mxu3 %v13020_v30  ;;  %v15731_v11 = vld [vmem:[#allocation27_spill] sm:$0xff]  ;;  %v15748_v30 = vld [vmem:[#allocation52_spill] sm:$0xff] }
 0x8de   : > { %5477 = vmatpush.msra.mxu2 %v12975_v3 }
 0x8df   : > { %5526 = vmatpush.msrb.mxu1 %v12811_v57  ;;  %5486 = vmatpush.msra.mxu3 %v13032_v38  ;;  %v15733_v57 = vld [vmem:[#allocation32_spill] sm:$0xff]  ;;  %v15740_v38 = vld [vmem:[#allocation13_spill] sm:$0xff] }
 0x8e0   : > { %5478 = vmatpush.msra.mxu2 %v12982_v63  ;;  %v15745_v63 = vld [vmem:[#allocation44_spill] sm:$0xff] }
 0x8e1   : > { %5527 = vmatpush.msrb.mxu1 %v12823_v43  ;;  %5487 = vmatpush.msra.mxu3 %v15724_v14  ;;  %v5320_v43 = vpop.f32.mrf.mxu3  ;;  %v15769_v14 = vld [vmem:[#allocation55_spill] sm:$0xff] }
 0x8e2   : > { %5543 = vmatpush.msrb.mxu2 %v15726_v41  ;;  %v5321_v40 = vadd.f32 %v5320_v43, %v5301_v35  ;;  %v15772_v41 = vld [vmem:[#allocation56_spill] sm:$0xff]  ;;  %v15782_v43 = vld [vmem:[#allocation89_spill] sm:$0xff] }
 0x8e3   : > { %5528 = vmatpush.msrb.mxu1 %v15725_v50  ;;  %5488 = vmatpush.msra.mxu3 %v15727_v49  ;;  %v15771_v50 = vld [vmem:[#allocation73_spill] sm:$0xff]  ;;  %v15773_v49 = vld [vmem:[#allocation83_spill] sm:$0xff]  ;;  %v15785_v35 = vld [vmem:[#allocation96_spill] sm:$0xff] }
 0x8e4   : > { %5544 = vmatpush.msrb.mxu2 %v15729_v25  ;;  %v15775_v25 = vld [vmem:[#allocation87_spill] sm:$0xff] }
 0x8e5   : > { %5529 = vmatpush.msrb.mxu1 %v15728_v34  ;;  %5489 = vmatpush.msra.mxu3 %v15730_v31  ;;  %v15774_v34 = vld [vmem:[#allocation77_spill] sm:$0xff] }
 0x8e6   : > { %5545 = vmatpush.msrb.mxu2 %v15732_v10  ;;  %v15776_v31 = vld [vmem:[#allocation81_spill] sm:$0xff]  ;;  %v15779_v10 = vld [vmem:[#allocation40_spill] sm:$0xff] }
 0x8e7   : > { %5530 = vmatpush.msrb.mxu1 %v15731_v11  ;;  %5490 = vmatpush.msra.mxu3 %v15733_v57  ;;  %v15778_v11 = vld [vmem:[#allocation37_spill] sm:$0xff]  ;;  %v15780_v57 = vld [vmem:[#allocation91_spill] sm:$0xff] }
 0x8e8   : > { %5546 = vmatpush.msrb.mxu2 %v15735_v60  ;;  %v15784_v60 = vld [vmem:[#allocation43_spill] sm:$0xff] }
 0x8e9   : > { %5531 = vmatpush.msrb.mxu1 %v15734_v27  ;;  %5491 = vmatpush.msra.mxu3 %v15736_v59  ;;  %v15783_v27 = vld [vmem:[#allocation93_spill] sm:$0xff]  ;;  %v15786_v59 = vld [vmem:[#allocation99_spill] sm:$0xff] }
 0x8ea   : > { %5547 = vmatpush.msrb.mxu2 %v15738_v39  ;;  %v15788_v39 = vld [vmem:[#allocation46_spill] sm:$0xff] }
 0x8eb   : > { %5532 = vmatpush.msrb.mxu1 %v15737_v23  ;;  %5492 = vmatpush.msra.mxu3 %v15739_v4  ;;  %v15787_v23 = vld [vmem:[#allocation103_spill] sm:$0xff]  ;;  %v15790_v4 = vld [vmem:[#allocation100_spill] sm:$0xff] }
 0x8ec   : > { %v5340_v5 = vpop.f32.mrf.mxu0  ;;  %5548 = vmatpush.msrb.mxu2 %v15741_v37  ;;  %v15793_v37 = vld [vmem:[#allocation57_spill] sm:$0xff] }
 0x8ed   : > { %5533 = vmatpush.msrb.mxu1 %v15740_v38  ;;  %v5341_v33 = vadd.f32 %v5340_v5, %v5321_v40  ;;  %5493 = vmatpush.msra.mxu3 %v15742_v8  ;;  %v15789_v40 = vld [vmem:[#allocation49_spill] sm:$0xff]  ;;  %v15792_v38 = vld [vmem:[#allocation107_spill] sm:$0xff] }
 0x8ee   : > { %5549 = vmatpush.msrb.mxu2 %v15744_v15  ;;  %v15791_v5 = vld [vmem:[#allocation53_spill] sm:$0xff]  ;;  %v15797_v15 = vld [vmem:[#allocation119_spill] sm:$0xff] }
 0x8ef   : > { %5534 = vmatpush.msrb.mxu1 %v15743_v7  ;;  %v5346_v3 = vperm.slane %v5341_v33, 0  ;;  %5494 = vmatpush.msra.mxu3 %v15745_v63  ;;  %v15794_v33 = vld [vmem:[#allocation111_spill] sm:$0xff]  ;;  %v15795_v8 = vld [vmem:[#allocation61_spill] sm:$0xff] }
 0x8f0   : > { %5550 = vmatpush.msrb.mxu2 %v15747_v2  ;;  %v15796_v7 = vld [vmem:[#allocation115_spill] sm:$0xff]  ;;  %v15799_v63 = vld [vmem:[#allocation69_spill] sm:$0xff]  ;;  %v15801_v2 = vld [vmem:[#allocation124_spill] sm:$0xff] }
 0x8f1   : > { %5535 = vmatpush.msrb.mxu1 %v15746_v58  ;;  %v14372_v20 = vsub.f32 %v15748_v30, %v5346_v3  ;;  %v14375_v21 = vsub.f32 %v15749_v13, %v5346_v3  ;;  %5495 = vmatpush.msra.mxu3 %v15750_v46  ;;  %v15798_v3 = vld [vmem:[#allocation116_spill] sm:$0xff]  ;;  %v15800_v58 = vld [vmem:[#allocation127_spill] sm:$0xff]  ;;  %v15802_v30 = vld [vmem:[#allocation78_spill] sm:$0xff] }
 0x8f2   : > { %5551 = vmatpush.msrb.mxu2 %v15752_v51  ;;  %v15803_v13 = vld [vmem:[#allocation82_spill] sm:$0xff] }
 0x8f3   : > { %5536 = vmatpush.msrb.mxu1 %v15751_v53  ;;  %v5362_v42 = vmul.f32 %v14375_v21, %v14375_v21  ;;  %5496 = vmatpush.msra.mxu3 %v15753_v61  ;;  %v5358_v22 = vmul.f32 %v14372_v20, %v14372_v20  ;;  %v15804_v46 = vld [vmem:[#allocation86_spill] sm:$0xff]  ;;  %v15808_v61 = vld [vmem:[#allocation141_spill] sm:$0xff] }
 0x8f4   : > { %5552 = vmatpush.msrb.mxu2 %v15755_v12  ;;  %v15805_v53 = vld [vmem:[#allocation90_spill] sm:$0xff]  ;;  %v15810_v12 = vld [vmem:[#allocation113_spill] sm:$0xff] }
 0x8f5   : > { %5537 = vmatpush.msrb.mxu1 %v15754_v24  ;;  %5437 = vmatpush.msra.mxu0 %v5362_v42  ;;  %v15806_v51 = vld [vmem:[#allocation94_spill] sm:$0xff]  ;;  %v15807_v42 = vld [vmem:[#allocation139_spill] sm:$0xff] }
 0x8f6   : > { %5497 = vmatpush.msra.mxu3 %v15756_v48  ;;  %5553 = vmatpush.msrb.mxu2 %v15758_v0  ;;  %v15809_v24 = vld [vmem:[#allocation143_spill] sm:$0xff]  ;;  %v15813_v0 = vld [vmem:[#allocation104_spill] sm:$0xff] }
 0x8f7   : > { %5538 = vmatpush.msrb.mxu1 %v15757_v54  ;;  %5438 = vmatpush.msra.mxu0 %v5358_v22  ;;  %v15811_v22 = vld [vmem:[#allocation121_spill] sm:$0xff]  ;;  %v15812_v54 = vld [vmem:[#allocation50_spill] sm:$0xff] }
 0x8f8   : > { %5498 = vmatpush.msra.mxu3 %v15759_v26  ;;  %6899 = vmatmul.msk.f32.vlgmr.msra.gmra.mxu0 %vm1029_vm9, %v15356_v18  ;;  %v15770_v18 = vld [vmem:[#allocation79_spill] sm:$0xff]  ;;  %v15814_v26 = vld [vmem:[#allocation108_spill] sm:$0xff] }
 0x8f9   : > { %5554 = vmatpush.msrb.mxu2 %v15760_v16  ;;  %5503 = vmatpush.msrb.mxu0 %v15761_v19  ;;  %v15815_v16 = vld [vmem:[#allocation112_spill] sm:$0xff]  ;;  %v15816_v19 = vld [vmem:[#allocation65_spill] sm:$0xff] }
 0x8fa   : > { %5563 = vmatpush.msrb.mxu3 %v15762_v36  ;;  %v15817_v36 = vld [vmem:[#allocation123_spill] sm:$0xff] }
 0x8fb   : > { %5555 = vmatpush.msrb.mxu2 %v15763_v47  ;;  %5504 = vmatpush.msrb.mxu0 %v15764_v32  ;;  %v15818_v47 = vld [vmem:[#allocation120_spill] sm:$0xff]  ;;  %v15819_v32 = vld [vmem:[#allocation74_spill] sm:$0xff] }
 0x8fc   : > { %5564 = vmatpush.msrb.mxu3 %v15765_v28 }
 0x8fd   : > { %5556 = vmatpush.msrb.mxu2 %v15766_v52  ;;  %5505 = vmatpush.msrb.mxu0 %v15767_v44  ;;  %v15820_v52 = vld [vmem:[#allocation131_spill] sm:$0xff]  ;;  %v15821_v44 = vld [vmem:[#allocation58_spill] sm:$0xff] }
 0x8fe   : > { %5565 = vmatpush.msrb.mxu3 %v15768_v6  ;;  %v15822_v6 = vld [vmem:[#allocation128_spill] sm:$0xff] }
 0x8ff   : > { %5557 = vmatpush.msrb.mxu2 %v15769_v14  ;;  %5506 = vmatpush.msrb.mxu0 %v15770_v18  ;;  %v15823_v14 = vld [vmem:[#allocation62_spill] sm:$0xff]  ;;  %v15824_v18 = vld [vmem:[#allocation132_spill] sm:$0xff] }
 0x900   : > { %5566 = vmatpush.msrb.mxu3 %v15771_v50  ;;  %v15825_v50 = vld [vmem:[#allocation66_spill] sm:$0xff] }
 0x901   : > { %5558 = vmatpush.msrb.mxu2 %v15772_v41  ;;  %5507 = vmatpush.msrb.mxu0 %v15773_v49  ;;  %v15826_v41 = vld [vmem:[#allocation135_spill] sm:$0xff]  ;;  %v15827_v49 = vld [vmem:[#allocation70_spill] sm:$0xff] }
 0x902   : > { %5567 = vmatpush.msrb.mxu3 %v15774_v34  ;;  %v15828_v34 = vld [vmem:[#allocation137_spill] sm:$0xff] }
 0x903   : > { %5508 = vmatpush.msrb.mxu0 %v15775_v25  ;;  %v15829_v25 = vld [vmem:[#allocation72_spill] sm:$0xff] }
 0x904   : > { %5568 = vmatpush.msrb.mxu3 %v15776_v31  ;;  %v15830_v31 = vld [vmem:[#allocation97_spill] sm:$0xff] }
 0x905   : > { %5509 = vmatpush.msrb.mxu0 %v15777_v17  ;;  %v15831_v17 = vld [vmem:[#allocation76_spill] sm:$0xff] }
 0x906   : > { %5569 = vmatpush.msrb.mxu3 %v15778_v11  ;;  %v15832_v11 = vld [vmem:[#allocation101_spill] sm:$0xff] }
 0x907   : > { %5510 = vmatpush.msrb.mxu0 %v15779_v10  ;;  %v15833_v10 = vld [vmem:[#allocation80_spill] sm:$0xff] }
 0x908   : > { %5570 = vmatpush.msrb.mxu3 %v15780_v57  ;;  %v15834_v57 = vld [vmem:[#allocation105_spill] sm:$0xff] }
 0x909   : > { %5511 = vmatpush.msrb.mxu0 %v15781_v1  ;;  %v15835_v1 = vld [vmem:[#allocation88_spill] sm:$0xff] }
 0x90a   : > { %5571 = vmatpush.msrb.mxu3 %v15782_v43  ;;  %v15836_v43 = vld [vmem:[#allocation109_spill] sm:$0xff] }
 0x90b   : > { %5512 = vmatpush.msrb.mxu0 %v15783_v27  ;;  %v15837_v27 = vld [vmem:[#allocation98_spill] sm:$0xff] }
 0x90c   : > { %5572 = vmatpush.msrb.mxu3 %v15784_v60  ;;  %v15838_v60 = vld [vmem:[#allocation145_spill] sm:$0xff] }
 0x90d   : > { %5513 = vmatpush.msrb.mxu0 %v15785_v35  ;;  %v15839_v35 = vld [vmem:[#allocation106_spill] sm:$0xff] }
 0x90e   : > { %5573 = vmatpush.msrb.mxu3 %v15786_v59  ;;  %v15840_v59 = vld [vmem:[#allocation117_spill] sm:$0xff] }
 0x90f   : > { %5514 = vmatpush.msrb.mxu0 %v15787_v23  ;;  %v15841_v23 = vld [vmem:[#allocation114_spill] sm:$0xff] }
 0x910   : > { %5574 = vmatpush.msrb.mxu3 %v15788_v39  ;;  %v15842_v39 = vld [vmem:[#allocation125_spill] sm:$0xff] }
 0x911   : > { %5515 = vmatpush.msrb.mxu0 %v15789_v40 }
 0x912   : > { %5575 = vmatpush.msrb.mxu3 %v15790_v4  ;;  %v15843_v4 = vld [vmem:[#allocation118_spill] sm:$0xff] }
 0x913   : > { %5516 = vmatpush.msrb.mxu0 %v15791_v5  ;;  %v15844_v5 = vld [vmem:[#allocation129_spill] sm:$0xff] }
 0x914   : > { %5576 = vmatpush.msrb.mxu3 %v15792_v38  ;;  %v15845_v38 = vld [vmem:[#allocation3_spill] sm:$0xff] }
 0x915   : > { %5517 = vmatpush.msrb.mxu0 %v15793_v37  ;;  %v15846_v37 = vld [vmem:[#allocation122_spill] sm:$0xff] }
 0x916   : > { %5577 = vmatpush.msrb.mxu3 %v15794_v33  ;;  %v15847_v33 = vld [vmem:[#allocation54_spill] sm:$0xff] }
 0x917   : > { %5518 = vmatpush.msrb.mxu0 %v15795_v8  ;;  %v15848_v8 = vld [vmem:[#allocation5_spill] sm:$0xff] }
 0x918   : > { %5578 = vmatpush.msrb.mxu3 %v15796_v7  ;;  %v15849_v7 = vld [vmem:[#allocation126_spill] sm:$0xff] }
 0x919   : > { %5583 = vmatpush.msra.mxu0 %v15797_v15  ;;  %v15850_v15 = vld [vmem:[#allocation133_spill] sm:$0xff] }
 0x91b   : > { %5584 = vmatpush.msra.mxu0 %v15798_v3  ;;  %v15851_v3 = vld [vmem:[#allocation8_spill] sm:$0xff] }
 0x91d   : > { %5585 = vmatpush.msra.mxu0 %v15799_v63  ;;  %v15852_v63 = vld [vmem:[#allocation130_spill] sm:$0xff] }
 0x91f   : > { %5586 = vmatpush.msra.mxu0 %v15800_v58  ;;  %v15853_v58 = vld [vmem:[#allocation136_spill] sm:$0xff] }
 0x921   : > { %5587 = vmatpush.msra.mxu0 %v15801_v2  ;;  %v15854_v2 = vld [vmem:[#allocation9_spill] sm:$0xff] }
 0x923   : > { %5588 = vmatpush.msra.mxu0 %v15802_v30  ;;  %v15855_v30 = vld [vmem:[#allocation134_spill] sm:$0xff] }
 0x925   : > { %5589 = vmatpush.msra.mxu0 %v15803_v13  ;;  %v15856_v13 = vld [vmem:[#allocation138_spill] sm:$0xff] }
 0x927   : > { %5590 = vmatpush.msra.mxu0 %v15804_v46  ;;  %v15857_v46 = vld [vmem:[#allocation2_spill] sm:$0xff] }
 0x929   : > { %5591 = vmatpush.msra.mxu0 %v15805_v53  ;;  %v15858_v53 = vld [vmem:[#allocation148_spill] sm:$0xff] }
 0x92b   : > { %5592 = vmatpush.msra.mxu0 %v15806_v51  ;;  %v15859_v51 = vld [vmem:[#allocation140_spill] sm:$0xff] }
 0x92d   : > { %5593 = vmatpush.msra.mxu0 %v15807_v42  ;;  %v15860_v42 = vld [vmem:[#allocation4_spill] sm:$0xff] }
 0x92f   : > { %5594 = vmatpush.msra.mxu0 %v15808_v61  ;;  %v15861_v61 = vld [vmem:[#allocation150_spill] sm:$0xff] }
 0x931   : > { %5595 = vmatpush.msra.mxu0 %v15809_v24  ;;  %v15862_v24 = vld [vmem:[#allocation142_spill] sm:$0xff] }
 0x933   : > { %5596 = vmatpush.msra.mxu0 %v15810_v12  ;;  %v15863_v12 = vld [vmem:[#allocation6_spill] sm:$0xff] }
 0x935   : > { %5597 = vmatpush.msra.mxu0 %v15811_v22  ;;  %v14445_v48 = vpop.f32.mrf.mxu1  ;;  %v15864_v22 = vld [vmem:[#allocation152_spill] sm:$0xff] }
 0x936   : > { %5459 = vmatmul.f32.vlgmr.msra.gmra.mxu1 %v14445_v48 }
 0x937   : > { %5598 = vmatpush.msra.mxu0 %v15812_v54  ;;  %5603 = vmatpush.msra.mxu1 %v15813_v0  ;;  %v15865_v54 = vld [vmem:[#allocation144_spill] sm:$0xff]  ;;  %v15866_v0 = vld [vmem:[#allocation7_spill] sm:$0xff] }
 0x939   : > { %5604 = vmatpush.msra.mxu1 %v15814_v26  ;;  %v15867_v26 = vld [vmem:[#allocation154_spill] sm:$0xff] }
 0x93b   : > { %5605 = vmatpush.msra.mxu1 %v15815_v16  ;;  %v15868_v16 = vld [vmem:[#allocation146_spill] sm:$0xff] }
 0x93d   : > { %5606 = vmatpush.msra.mxu1 %v15816_v19  ;;  %v15869_v19 = vld [vmem:[#allocation147_spill] sm:$0xff] }
 0x93e   : > { %5539 = vmatmul.f32.vlgmr.msrb.gmra.mxu1 %v14445_v48 }
 0x93f   : > { %5607 = vmatpush.msra.mxu1 %v15817_v36  ;;  %v15870_v36 = vld [vmem:[#allocation156_spill] sm:$0xff] }
 0x941   : > { %5608 = vmatpush.msra.mxu1 %v15818_v47  ;;  %v15871_v47 = vld [vmem:[#allocation84_spill] sm:$0xff] }
 0x943   : > { %5609 = vmatpush.msra.mxu1 %v15819_v32  ;;  %v14457_v28 = vpop.f32.mrf.mxu2  ;;  %v15872_v32 = vld [vmem:[#allocation158_spill] sm:$0xff] }
 0x944   : > { %5479 = vmatmul.f32.vlgmr.msra.gmra.mxu2 %v14457_v28 }
 0x945   : > { %5610 = vmatpush.msra.mxu1 %v15820_v52  ;;  %5623 = vmatpush.msra.mxu2 %v15821_v44  ;;  %v15873_v52 = vld [vmem:[#allocation149_spill] sm:$0xff]  ;;  %v15874_v44 = vld [vmem:[#allocation92_spill] sm:$0xff] }
 0x947   : > { %5611 = vmatpush.msra.mxu1 %v15822_v6  ;;  %5624 = vmatpush.msra.mxu2 %v15823_v14  ;;  %v15875_v6 = vld [vmem:[#allocation160_spill] sm:$0xff]  ;;  %v15876_v14 = vld [vmem:[#allocation151_spill] sm:$0xff] }
 0x949   : > { %5612 = vmatpush.msra.mxu1 %v15824_v18  ;;  %5625 = vmatpush.msra.mxu2 %v15825_v50  ;;  %v15877_v18 = vld [vmem:[#allocation102_spill] sm:$0xff] }
 0x94a   : > { %v15878_v50 = vld [vmem:[#allocation162_spill] sm:$0xff] }
 0x94b   : > { %5613 = vmatpush.msra.mxu1 %v15826_v41  ;;  %5626 = vmatpush.msra.mxu2 %v15827_v49  ;;  %v15879_v41 = vld [vmem:[#allocation153_spill] sm:$0xff]  ;;  %v15880_v49 = vld [vmem:[#allocation110_spill] sm:$0xff] }
 0x94c   : > { %5559 = vmatmul.f32.vlgmr.msrb.gmra.mxu2 %v14457_v28 }
 0x94d   : > { %5614 = vmatpush.msra.mxu1 %v15828_v34  ;;  %5627 = vmatpush.msra.mxu2 %v15829_v25  ;;  %v15881_v25 = vld [vmem:[#allocation164_spill] sm:$0xff] }
 0x94f   : > { %5615 = vmatpush.msra.mxu1 %v15830_v31  ;;  %5628 = vmatpush.msra.mxu2 %v15831_v17  ;;  %v15882_v31 = vld [vmem:[#allocation155_spill] sm:$0xff]  ;;  %v15883_v17 = vld [vmem:[#allocation166_spill] sm:$0xff] }
 0x951   : > { %5616 = vmatpush.msra.mxu1 %v15832_v11  ;;  %5629 = vmatpush.msra.mxu2 %v15833_v10  ;;  %v15884_v11 = vld [vmem:[#allocation167_spill] sm:$0xff]  ;;  %v15885_v10 = vld [vmem:[#allocation157_spill] sm:$0xff] }
 0x953   : > { %5617 = vmatpush.msra.mxu1 %v15834_v57  ;;  %5630 = vmatpush.msra.mxu2 %v15835_v1  ;;  %v6037_v57 = vld [vmem:[%s14828_s12 + $0xe0] sm:$0xff]  ;;  %v15886_v1 = vld [vmem:[#allocation169_spill] sm:$0xff] }
 0x955   : > { %5618 = vmatpush.msra.mxu1 %v15836_v43  ;;  %5631 = vmatpush.msra.mxu2 %v15837_v27  ;;  %v15887_v43 = vld [vmem:[#allocation170_spill] sm:$0xff]  ;;  %v15888_v27 = vld [vmem:[#allocation159_spill] sm:$0xff] }
 0x956   : > { %5619 = vmatmul.f32.vlgmr.msra.gmra.mxu1 %v14445_v48 }
 0x957   : > { %5683 = vmatpush.msrb.mxu1 %v15838_v60  ;;  %5632 = vmatpush.msra.mxu2 %v15839_v35  ;;  %v15889_v60 = vld [vmem:[#allocation172_spill] sm:$0xff]  ;;  %v15891_v35 = vld [vmem:[#allocation161_spill] sm:$0xff] }
 0x959   : > { %5684 = vmatpush.msrb.mxu1 %v15840_v59  ;;  %5633 = vmatpush.msra.mxu2 %v15841_v23  ;;  %v15892_v59 = vld [vmem:[#allocation174_spill] sm:$0xff]  ;;  %v15893_v23 = vld [vmem:[#allocation175_spill] sm:$0xff] }
 0x95b   : > { %5685 = vmatpush.msrb.mxu1 %v15842_v39  ;;  %v14485_v40 = vpop.f32.mrf.mxu3  ;;  %5634 = vmatpush.msra.mxu2 %v15843_v4  ;;  %v6033_v39 = vld [vmem:[%s14828_s12 + $0xc0] sm:$0xff]  ;;  %v15894_v4 = vld [vmem:[#allocation163_spill] sm:$0xff] }
 0x95c   : > { %5499 = vmatmul.f32.vlgmr.msra.gmra.mxu3 %v14485_v40 }
 0x95d   : > { %5686 = vmatpush.msrb.mxu1 %v15844_v5  ;;  %5643 = vmatpush.msra.mxu3 %v15845_v38  ;;  %v15895_v5 = vld [vmem:[#allocation176_spill] sm:$0xff]  ;;  %v15896_v38 = vld [vmem:[#allocation177_spill] sm:$0xff] }
 0x95e   : > { %5635 = vmatpush.msra.mxu2 %v15846_v37  ;;  %v6029_v37 = vld [vmem:[%s14828_s12 + $0xa0] sm:$0xff] }
 0x95f   : > { %5687 = vmatpush.msrb.mxu1 %v15847_v33  ;;  %5644 = vmatpush.msra.mxu3 %v15848_v8  ;;  %v15897_v33 = vld [vmem:[#allocation165_spill] sm:$0xff]  ;;  %v15898_v8 = vld [vmem:[#allocation178_spill] sm:$0xff] }
 0x960   : > { %5636 = vmatpush.msra.mxu2 %v15849_v7  ;;  %v15899_v7 = vld [vmem:[#allocation179_spill] sm:$0xff] }
 0x961   : > { %5688 = vmatpush.msrb.mxu1 %v15850_v15  ;;  %5645 = vmatpush.msra.mxu3 %v15851_v3  ;;  %v6025_v15 = vld [vmem:[%s14828_s12 + $0x80] sm:$0xff]  ;;  %v15900_v3 = vld [vmem:[#allocation168_spill] sm:$0xff] }
 0x962   : > { %5637 = vmatpush.msra.mxu2 %v15852_v63  ;;  %v15901_v63 = vld [vmem:[#allocation180_spill] sm:$0xff] }
 0x963   : > { %5689 = vmatpush.msrb.mxu1 %v15853_v58  ;;  %5646 = vmatpush.msra.mxu3 %v15854_v2  ;;  %v15902_v58 = vld [vmem:[#allocation181_spill] sm:$0xff]  ;;  %v6038_v2 = vld [vmem:[%s14828_s12 + $0xe8] sm:$0xff] }
 0x964   : > { %5638 = vmatpush.msra.mxu2 %v15855_v30  ;;  %5579 = vmatmul.f32.vlgmr.msrb.gmra.mxu3 %v14485_v40  ;;  %v15903_v30 = vld [vmem:[#allocation171_spill] sm:$0xff] }
 0x965   : > { %5690 = vmatpush.msrb.mxu1 %v15856_v13  ;;  %5647 = vmatpush.msra.mxu3 %v15858_v53  ;;  %v6021_v13 = vld [vmem:[%s14828_s12 + $0x60] sm:$0xff]  ;;  %v6034_v53 = vld [vmem:[%s14828_s12 + $0xc8] sm:$0xff] }
 0x966   : > { %5703 = vmatpush.msrb.mxu2 %v15857_v46  ;;  %v15904_v46 = vld [vmem:[#allocation182_spill] sm:$0xff] }
 0x967   : > { %5639 = vmatmul.f32.vlgmr.msra.gmra.mxu2 %v14457_v28  ;;  %5691 = vmatpush.msrb.mxu1 %v15859_v51  ;;  %v15905_v51 = vld [vmem:[#allocation183_spill] sm:$0xff] }
 0x968   : > { %5704 = vmatpush.msrb.mxu2 %v15860_v42  ;;  %5648 = vmatpush.msra.mxu3 %v15861_v61  ;;  %v6017_v42 = vld [vmem:[%s14828_s12 + $0x40] sm:$0xff]  ;;  %v15906_v61 = vld [vmem:[#allocation184_spill] sm:$0xff] }
 0x969   : > { %5692 = vmatpush.msrb.mxu1 %v15862_v24  ;;  %v6030_v24 = vld [vmem:[%s14828_s12 + $0xa8] sm:$0xff] }
 0x96a   : > { %5705 = vmatpush.msrb.mxu2 %v15863_v12  ;;  %5649 = vmatpush.msra.mxu3 %v15864_v22  ;;  %v15907_v12 = vld [vmem:[#allocation185_spill] sm:$0xff]  ;;  %v15908_v22 = vld [vmem:[#allocation186_spill] sm:$0xff] }
 0x96b   : > { %5693 = vmatpush.msrb.mxu1 %v15865_v54  ;;  %v6026_v54 = vld [vmem:[%s14828_s12 + $0x88] sm:$0xff] }
 0x96c   : > { %5706 = vmatpush.msrb.mxu2 %v15866_v0  ;;  %5650 = vmatpush.msra.mxu3 %v15867_v26  ;;  %v15909_v0 = vld [vmem:[#allocation187_spill] sm:$0xff]  ;;  %v6009_v26 = vld [vmem:[%s14828_s12] sm:$0xff] }
 0x96d   : > { %5694 = vmatpush.msrb.mxu1 %v15868_v16  ;;  %v15910_v16 = vld [vmem:[#allocation188_spill] sm:$0xff] }
 0x96e   : > { %5707 = vmatpush.msrb.mxu2 %v15869_v19  ;;  %5651 = vmatpush.msra.mxu3 %v15870_v36  ;;  %v6022_v19 = vld [vmem:[%s14828_s12 + $0x68] sm:$0xff]  ;;  %v15911_v36 = vld [vmem:[#allocation189_spill] sm:$0xff] }
 0x96f   : > { %5695 = vmatpush.msrb.mxu1 %v15871_v47  ;;  %v15912_v47 = vld [vmem:[#allocation190_spill] sm:$0xff] }
 0x970   : > { %5652 = vmatpush.msra.mxu3 %v15872_v32  ;;  %5708 = vmatpush.msrb.mxu2 %v15873_v52  ;;  %v6018_v32 = vld [vmem:[%s14828_s12 + $0x48] sm:$0xff] }
 0x971   : > { %5696 = vmatpush.msrb.mxu1 %v15874_v44  ;;  %v15913_v52 = vld [vmem:[#allocation191_spill] sm:$0xff]  ;;  %v15914_v44 = vld [vmem:[#allocation192_spill] sm:$0xff] }
 0x972   : > { %5653 = vmatpush.msra.mxu3 %v15875_v6  ;;  %5709 = vmatpush.msrb.mxu2 %v15876_v14  ;;  %v6014_v6 = vld [vmem:[%s14828_s12 + $0x28] sm:$0xff]  ;;  %v14615_v14 = vld [vmem:[%s7618_s24] sm:$0xff] }
 0x973   : > { %5697 = vmatpush.msrb.mxu1 %v15877_v18  ;;  %v15915_v18 = vld [vmem:[#allocation193_spill] sm:$0xff] }
 0x974   : > { %5654 = vmatpush.msra.mxu3 %v15878_v50  ;;  %5710 = vmatpush.msrb.mxu2 %v15879_v41  ;;  %v15916_v50 = vld [vmem:[#allocation194_spill] sm:$0xff]  ;;  %v6010_v41 = vld [vmem:[%s14828_s12 + $0x8] sm:$0xff] }
 0x975   : > { %5698 = vmatpush.msrb.mxu1 %v15880_v49  ;;  %v14528_v34 = vpop.f32.mrf.mxu0  ;;  %v15917_v49 = vld [vmem:[#allocation195_spill] sm:$0xff] }
 0x976   : > { %5655 = vmatpush.msra.mxu3 %v15881_v25  ;;  %5711 = vmatpush.msrb.mxu2 %v15882_v31  ;;  %v15918_v25 = vld [vmem:[#allocation196_spill] sm:$0xff]  ;;  %v15919_v31 = vld [vmem:[#allocation197_spill] sm:$0xff] }
 0x977   : > { %5519 = vmatmul.f32.vlgmr.msrb.gmra.mxu0 %v14528_v34  ;;  %5699 = vmatmul.f32.vlgmr.msrb.gmra.mxu1 %v14445_v48  ;;  %v15890_v48 = vld [vmem:[#allocation173_spill] sm:$0xff] }
 0x978   : > { %5663 = vmatpush.msrb.mxu0 %v15883_v17  ;;  %5656 = vmatpush.msra.mxu3 %v15884_v11  ;;  %v15920_v17 = vld [vmem:[#allocation198_spill] sm:$0xff]  ;;  %v15921_v11 = vld [vmem:[#allocation199_spill] sm:$0xff] }
 0x979   : > { %5712 = vmatpush.msrb.mxu2 %v15885_v10  ;;  %6059 = vmatpush.msra.mxu1 %v6037_v57  ;;  %v15922_v10 = vld [vmem:[#allocation200_spill] sm:$0xff]  ;;  %v7357_v57 = vld [vmem:[%s7618_s24 + $0x8] sm:$0xff] }
 0x97a   : > { %5664 = vmatpush.msrb.mxu0 %v15886_v1  ;;  %5657 = vmatpush.msra.mxu3 %v15887_v43  ;;  %v15923_v1 = vld [vmem:[#allocation201_spill] sm:$0xff]  ;;  %v15924_v43 = vld [vmem:[#allocation202_spill] sm:$0xff] }
 0x97b   : > { %5713 = vmatpush.msrb.mxu2 %v15888_v27  ;;  %6060 = vmatpush.msra.mxu1 %v6033_v39  ;;  %v15925_v27 = vld [vmem:[#allocation203_spill] sm:$0xff] }
 0x97c   : > { %5665 = vmatpush.msrb.mxu0 %v15889_v60  ;;  %5658 = vmatpush.msra.mxu3 %v15890_v48  ;;  %v15926_v60 = vld [vmem:[#allocation204_spill] sm:$0xff]  ;;  %v15929_v39 = vld [vmem:[#allocation207_spill] sm:$0xff] }
 0x97d   : > { %5714 = vmatpush.msrb.mxu2 %v15891_v35  ;;  %5659 = vmatmul.f32.vlgmr.msra.gmra.mxu3 %v14485_v40  ;;  %v6039_v48 = vld [vmem:[%s14828_s12 + $0xf0] sm:$0xff]  ;;  %v15927_v35 = vld [vmem:[#allocation205_spill] sm:$0xff] }
 0x97e   : > { %5666 = vmatpush.msrb.mxu0 %v15892_v59  ;;  %5723 = vmatpush.msrb.mxu3 %v15893_v23  ;;  %v15928_v59 = vld [vmem:[#allocation206_spill] sm:$0xff]  ;;  %v6035_v23 = vld [vmem:[%s14828_s12 + $0xd0] sm:$0xff] }
 0x97f   : > { %5715 = vmatpush.msrb.mxu2 %v15894_v4  ;;  %5599 = vmatmul.f32.vlgmr.msra.gmra.mxu0 %v14528_v34  ;;  %v6031_v4 = vld [vmem:[%s14828_s12 + $0xb0] sm:$0xff] }
 0x980   : > { %5667 = vmatpush.msrb.mxu0 %v15895_v5  ;;  %5724 = vmatpush.msrb.mxu3 %v15896_v38  ;;  %v15930_v5 = vld [vmem:[#allocation208_spill] sm:$0xff]  ;;  %v15931_v38 = vld [vmem:[#allocation209_spill] sm:$0xff] }
 0x981   : > { %5716 = vmatpush.msrb.mxu2 %v15897_v33  ;;  %6061 = vmatpush.msra.mxu1 %v6029_v37  ;;  %v6023_v37 = vld [vmem:[%s14828_s12 + $0x70] sm:$0xff]  ;;  %v15932_v33 = vld [vmem:[#allocation210_spill] sm:$0xff] }
 0x982   : > { %5668 = vmatpush.msrb.mxu0 %v15898_v8  ;;  %5725 = vmatpush.msrb.mxu3 %v15899_v7  ;;  %v6019_v8 = vld [vmem:[%s14828_s12 + $0x50] sm:$0xff]  ;;  %v15933_v7 = vld [vmem:[#allocation211_spill] sm:$0xff] }
 0x983   : > { %5717 = vmatpush.msrb.mxu2 %v15900_v3  ;;  %6062 = vmatpush.msra.mxu1 %v6025_v15  ;;  %v6015_v15 = vld [vmem:[%s14828_s12 + $0x30] sm:$0xff] }
 0x984   : > { %5669 = vmatpush.msrb.mxu0 %v15901_v63  ;;  %5726 = vmatpush.msrb.mxu3 %v15902_v58  ;;  %v15934_v3 = vld [vmem:[#allocation212_spill] sm:$0xff]  ;;  %v15935_v58 = vld [vmem:[#allocation213_spill] sm:$0xff] }
 0x985   : > { %5718 = vmatpush.msrb.mxu2 %v15903_v30  ;;  %6063 = vmatpush.msra.mxu1 %v6021_v13  ;;  %v6011_v63 = vld [vmem:[%s14828_s12 + $0x10] sm:$0xff]  ;;  %v15937_v30 = vld [vmem:[#allocation215_spill] sm:$0xff] }
 0x986   : > { %5670 = vmatpush.msrb.mxu0 %v15904_v46  ;;  %5719 = vmatmul.f32.vlgmr.msrb.gmra.mxu2 %v14457_v28  ;;  %v6013_v28 = vld [vmem:[%s14828_s12 + $0x20] sm:$0xff]  ;;  %v15938_v13 = vld [vmem:[#allocation216_spill] sm:$0xff]  ;;  %v15939_v46 = vld [vmem:[#allocation217_spill] sm:$0xff] }
 0x987   : > { %5727 = vmatpush.msrb.mxu3 %v15905_v51  ;;  %6082 = vmatpush.msra.mxu2 %v6038_v2  ;;  %v15936_v2 = vld [vmem:[#allocation214_spill] sm:$0xff] }
 0x988   : > { %5671 = vmatpush.msrb.mxu0 %v15906_v61  ;;  %6064 = vmatpush.msra.mxu1 %v6017_v42  ;;  %v15940_v51 = vld [vmem:[#allocation218_spill] sm:$0xff]  ;;  %v6036_v42 = vld [vmem:[%s14828_s12 + $0xd8] sm:$0xff] }
 0x989   : > { %5728 = vmatpush.msrb.mxu3 %v15907_v12  ;;  %6083 = vmatpush.msra.mxu2 %v6034_v53  ;;  %v6040_v53 = vld [vmem:[%s14828_s12 + $0xf8] sm:$0xff] }
 0x98a   : > { %5672 = vmatpush.msrb.mxu0 %v15908_v22  ;;  %6065 = vmatpush.msra.mxu1 %v6013_v28  ;;  %v6032_v61 = vld [vmem:[%s14828_s12 + $0xb8] sm:$0xff] }
 0x98b   : > { %5729 = vmatpush.msrb.mxu3 %v15909_v0  ;;  %6084 = vmatpush.msra.mxu2 %v6030_v24  ;;  %v6028_v24 = vld [vmem:[%s14828_s12 + $0x98] sm:$0xff] }
 0x98c   : > { %5673 = vmatpush.msrb.mxu0 %v15910_v16  ;;  %6066 = vmatpush.msra.mxu1 %v6009_v26  ;;  %v6024_v12 = vld [vmem:[%s14828_s12 + $0x78] sm:$0xff] }
 0x98d   : > { %5730 = vmatpush.msrb.mxu3 %v15911_v36  ;;  %6085 = vmatpush.msra.mxu2 %v6026_v54  ;;  %v6016_v28 = vld [vmem:[%s14828_s12 + $0x38] sm:$0xff] }
 0x98e   : > { %5674 = vmatpush.msrb.mxu0 %v15912_v47  ;;  %6908 = vmatmul.msk.f32.vlgmr.msra.gmra.mxu1 %vm1153_vm10, %v14615_v14  ;;  %v6012_v22 = vld [vmem:[%s14828_s12 + $0x18] sm:$0xff] }
 0x98f   : > { %5731 = vmatpush.msrb.mxu3 %v15913_v52  ;;  %6086 = vmatpush.msra.mxu2 %v6022_v19 }
 0x990   : > { %5675 = vmatpush.msrb.mxu0 %v15914_v44 }
 0x991   : > { %5732 = vmatpush.msrb.mxu3 %v15915_v18  ;;  %6087 = vmatpush.msra.mxu2 %v6018_v32 }
 0x992   : > { %5676 = vmatpush.msrb.mxu0 %v15916_v50 }
 0x993   : > { %5733 = vmatpush.msrb.mxu3 %v15917_v49  ;;  %6088 = vmatpush.msra.mxu2 %v6014_v6 }
 0x994   : > { %5677 = vmatpush.msrb.mxu0 %v15918_v25 }
 0x995   : > { %5734 = vmatpush.msrb.mxu3 %v15919_v31  ;;  %6089 = vmatpush.msra.mxu2 %v6010_v41 }
 0x996   : > { %5678 = vmatpush.msrb.mxu0 %v15920_v17  ;;  %6910 = vmatmul.msk.f32.vlgmr.msra.gmra.mxu2 %vm1153_vm10, %v14615_v14 }
 0x997   : > { %5735 = vmatpush.msrb.mxu3 %v15921_v11  ;;  %5679 = vmatmul.f32.vlgmr.msrb.gmra.mxu0 %v14528_v34 }
 0x998   : > { %5743 = vmatpush.msra.mxu0 %v15922_v10  ;;  %6909 = vmatmul.msk.f32.gmra.mxu1 %vm1153_vm10, %v7357_v57 }
 0x999   : > { %5736 = vmatpush.msrb.mxu3 %v15923_v1 }
 0x99a   : > { %5744 = vmatpush.msra.mxu0 %v15924_v43 }
 0x99b   : > { %5737 = vmatpush.msrb.mxu3 %v15925_v27  ;;  %v14713_v27 = vld [vmem:[%s14826_s10] sm:$0xf] }
 0x99c   : > { %5745 = vmatpush.msra.mxu0 %v15926_v60 }
 0x99d   : > { %5738 = vmatpush.msrb.mxu3 %v15927_v35  ;;  %v14718_v35 = vld [vmem:[%s14827_s11] sm:$0xf] }
 0x99e   : > { %5739 = vmatmul.f32.vlgmr.msrb.gmra.mxu3 %v14485_v40  ;;  %5746 = vmatpush.msra.mxu0 %v15928_v59  ;;  %v6027_v40 = vld [vmem:[%s14828_s12 + $0x90] sm:$0xff] }
 0x99f   : > { %6911 = vmatmul.msk.f32.gmra.mxu2 %vm1153_vm10, %v7357_v57  ;;  %6105 = vmatpush.msra.mxu3 %v6039_v48 }
 0x9a0   : > { %5747 = vmatpush.msra.mxu0 %v15929_v39 }
 0x9a1   : > { %6106 = vmatpush.msra.mxu3 %v6035_v23  ;;  %v5816_v23 = vperm.slane %v14713_v27, 0 }
 0x9a2   : > { %5748 = vmatpush.msra.mxu0 %v15930_v5 }
 0x9a3   : > { %6107 = vmatpush.msra.mxu3 %v6031_v4 }
 0x9a4   : > { %5749 = vmatpush.msra.mxu0 %v15931_v38 }
 0x9a5   : > { %6108 = vmatpush.msra.mxu3 %v6027_v40  ;;  %v5833_v40 = vperm.slane %v14718_v35, 0 }
 0x9a6   : > { %5750 = vmatpush.msra.mxu0 %v15932_v33 }
 0x9a7   : > { %6109 = vmatpush.msra.mxu3 %v6023_v37 }
 0x9a8   : > { %5751 = vmatpush.msra.mxu0 %v15933_v7 }
 0x9a9   : > { %6110 = vmatpush.msra.mxu3 %v6019_v8 }
 0x9aa   : > { %5752 = vmatpush.msra.mxu0 %v15934_v3 }
 0x9ab   : > { %6111 = vmatpush.msra.mxu3 %v6015_v15 }
 0x9ac   : > { %5753 = vmatpush.msra.mxu0 %v15935_v58 }
 0x9ad   : > { %6112 = vmatpush.msra.mxu3 %v6011_v63 }
 0x9ae   : > { %5754 = vmatpush.msra.mxu0 %v15936_v2  ;;  %6912 = vmatmul.msk.f32.vlgmr.msra.gmra.mxu3 %vm1153_vm10, %v14615_v14 }
 0x9b0   : > { %5755 = vmatpush.msra.mxu0 %v15937_v30 }
 0x9b2   : > { %5756 = vmatpush.msra.mxu0 %v15938_v13 }
 0x9b3   : > { %v5460_v54 = vpop.f32.mrf.mxu1 }
 0x9b4   : > { %5757 = vmatpush.msra.mxu0 %v15939_v46  ;;  %v5461_v0 = vadd.f32 1e-05, %v5460_v54 }
 0x9b6   : > { %5758 = vmatpush.msra.mxu0 %v15940_v51  ;;  %6913 = vmatmul.msk.f32.gmra.mxu3 %vm1153_vm10, %v7357_v57  ;;  %v5834_v51 = vperm.slane %v14718_v35, 1 }
 0x9b7   : > { %5759 = vmatmul.f32.vlgmr.msra.gmra.mxu0 %v14528_v34  ;;  %v6020_v34 = vld [vmem:[%s14828_s12 + $0x58] sm:$0xff] }
 0x9b8   : > { %6128 = vmatpush.msrb.mxu0 %v6040_v53  ;;  %v5817_v53 = vperm.slane %v14713_v27, 1 }
 0x9ba   : > { %6129 = vmatpush.msrb.mxu0 %v6036_v42 }
 0x9bb   : > { %v5540_v47 = vpop.f32.mrf.mxu1 }
 0x9bc   : > { %6130 = vmatpush.msrb.mxu0 %v6032_v61  ;;  %v5541_v32 = vadd.f32 1e-05, %v5540_v47 }
 0x9be   : > { %6131 = vmatpush.msrb.mxu0 %v6028_v24 }
 0x9c0   : > { %6132 = vmatpush.msrb.mxu0 %v6024_v12 }
 0x9c2   : > { %6133 = vmatpush.msrb.mxu0 %v6020_v34 }
 0x9c4   : > { %6134 = vmatpush.msrb.mxu0 %v6016_v28 }
 0x9c6   : > { %6135 = vmatpush.msrb.mxu0 %v6012_v22 }
 0x9c7   : > { %6914 = vmatmul.msk.f32.vlgmr.msrb.gmra.mxu0 %vm1153_vm10, %v14615_v14  ;;  %v5480_v26 = vpop.f32.mrf.mxu2 }
 0x9c8   : > { %v5481_v16 = vadd.f32 %v5480_v26, %v5461_v0 }
 0x9cf   : > { %6915 = vmatmul.msk.f32.gmra.mxu0 %vm1153_vm10, %v7357_v57  ;;  %v5560_v6 = vpop.f32.mrf.mxu2 }
 0x9d0   : > { %v5561_v18 = vadd.f32 %v5560_v6, %v5541_v32 }
 0x9d3   : > { %v5620_v39 = vpop.f32.mrf.mxu1 }
 0x9d4   : > { %v5621_v37 = vadd.f32 1e-05, %v5620_v39 }
 0x9df   : > { %v5500_v19 = vpop.f32.mrf.mxu3 }
 0x9e0   : > { %v5501_v36 = vadd.f32 %v5500_v19, %v5481_v16 }
 0x9e7   : > { %v5580_v50 = vpop.f32.mrf.mxu3 }
 0x9e8   : > { %v5581_v41 = vadd.f32 %v5580_v50, %v5561_v18 }
 0x9ea   : > { %v5640_v8 = vpop.f32.mrf.mxu2 }
 0x9eb   : > { %v5641_v2 = vadd.f32 %v5640_v8, %v5621_v37 }
 0x9f4   : > { %v5520_v52 = vpop.f32.mrf.mxu0  ;;  %v5700_v12 = vpop.f32.mrf.mxu1 }
 0x9f5   : > { %v5521_v44 = vadd.f32 %v5520_v52, %v5501_v36 }
 0x9f7   : > { %6977 = vrsqrt.f32 %v5521_v44  ;;  %vm5769_vm10 = vweird.f32 %v5521_v44 }
 0x9fc   : > { %v5600_v49 = vpop.f32.mrf.mxu0 }
 0x9fd   : > { %v6978_v25 = vpop.eup %6977  ;;  %v5601_v14 = vadd.f32 %v5600_v49, %v5581_v41  ;;  %v5701_v41 = vadd.f32 1e-05, %v5700_v12 }
 0x9fe   : > { %v5764_v31 = vmul.f32 %v6978_v25, %v5521_v44  ;;  %vm5770_vm9 = vweird.f32 %v6978_v25 }
 0x9ff   : > { %6979 = vrsqrt.f32 %v5601_v14  ;;  %vm5771_vm13 = vmor %vm5769_vm10, %vm5770_vm9  ;;  %vm5779_vm15 = vweird.f32 %v5601_v14 }
 0xa00   : > { %v5765_v17 = vmul.f32 %v6978_v25, %v5764_v31 }
 0xa02   : > { %v5766_v11 = vmul.f32 0.5, %v5765_v17 }
 0xa04   : > { %v5767_v10 = vsub.f32 1.5, %v5766_v11 }
 0xa05   : > { %v6980_v57 = vpop.eup %6979 }
 0xa06   : > { %v5768_v1 = vmul.f32 %v6978_v25, %v5767_v10  ;;  %v5774_v43 = vmul.f32 %v6980_v57, %v5601_v14  ;;  %vm5780_vm14 = vweird.f32 %v6980_v57 }
 0xa07   : > { %vm5781_vm0 = vmor %vm5779_vm15, %vm5780_vm14 }
 0xa08   : > { %v5772_v60 = vsel %vm5771_vm13, %v6978_v25, %v5768_v1  ;;  %v5775_v48 = vmul.f32 %v6980_v57, %v5774_v43  ;;  %v5818_v43 = vperm.slane %v14713_v27, 2 }
 0xa09   : > { %v5803_v59 = vperm.slane %v5772_v60, 0  ;;  %v5720_v18 = vpop.f32.mrf.mxu2  ;;  %v5835_v60 = vperm.slane %v14718_v35, 2 }
 0xa0a   : > { %v5776_v4 = vmul.f32 0.5, %v5775_v48  ;;  %v14746_v31 = vadd.f32 %v5720_v18, %v5701_v41 }
 0xa0b   : > { %v5807_v5 = vmul.f32 %v5803_v59, %v14271_v62  ;;  %v5811_v38 = vmul.f32 %v5803_v59, %v14274_v56  ;;  %v5660_v62 = vpop.f32.mrf.mxu3  ;;  %v6068_v52 = vpop.f32.mrf.mxu1 }
 0xa0c   : > { %v5777_v33 = vsub.f32 1.5, %v5776_v4  ;;  %v5661_v42 = vadd.f32 %v5660_v62, %v5641_v2 }
 0xa0d   : > { %v5824_v7 = vmul.f32 %v5816_v23, %v5807_v5  ;;  %v5828_v15 = vmul.f32 %v5816_v23, %v5811_v38 }
 0xa0e   : > { %v5778_v3 = vmul.f32 %v6980_v57, %v5777_v33 }
 0xa0f   : > { %v14724_v63 = vadd.f32 %v5833_v40, %v5824_v7  ;;  %v14726_v58 = vadd.f32 %v5833_v40, %v5828_v15 }
 0xa10   : > { %v5782_v30 = vsel %vm5781_vm0, %v6980_v57, %v5778_v3 }
 0xa11   : > { %v5804_v13 = vperm.slane %v5782_v30, 0  ;;  %v6900_v46 = vmul.f32 -1.442695, %v14724_v63  ;;  %v6904_v56 = vmul.f32 -1.442695, %v14726_v58 }
 0xa13   : > { %6981 = vpow2.f32 %v6900_v46  ;;  %v5808_v61 = vmul.f32 %v5804_v13, %v14283_v29  ;;  %v5812_v24 = vmul.f32 %v5804_v13, %v14286_v9  ;;  %v14743_v9 = vld [vmem:[%s14829_s13] sm:$0xf] }
 0xa14   : > { %v5680_v34 = vpop.f32.mrf.mxu0  ;;  %6983 = vpow2.f32 %v6904_v56  ;;  %v6043_v50 = vperm.slane %v14743_v9, 0  ;;  %v6044_v5 = vperm.slane %v14743_v9, 1 }
 0xa15   : > { %v5681_v28 = vadd.f32 %v5680_v34, %v5661_v42  ;;  %v5825_v22 = vmul.f32 %v5817_v53, %v5808_v61  ;;  %v5829_v54 = vmul.f32 %v5817_v53, %v5812_v24  ;;  %v6071_v33 = vpop.f32.mrf.mxu1 }
 0xa16   : > { %v6069_v1 = vadd.f32 %v6068_v52, %v6043_v50  ;;  %v6072_v46 = vadd.f32 %v6071_v33, %v6043_v50 }
 0xa17   : > { %6985 = vrsqrt.f32 %v5681_v28  ;;  %v14734_v0 = vadd.f32 %v5834_v51, %v5825_v22  ;;  %v14736_v26 = vadd.f32 %v5834_v51, %v5829_v54  ;;  %vm5789_vm2 = vweird.f32 %v5681_v28 }
 0xa19   : > { %v6982_v16 = vpop.eup %6981  ;;  %v6901_v19 = vmul.f32 -1.442695, %v14734_v0  ;;  %v6905_v29 = vmul.f32 -1.442695, %v14736_v26  ;;  %v6091_v56 = vpop.f32.mrf.mxu2 }
 0xa1a   : > { %v6984_v36 = vpop.eup %6983  ;;  %v5873_v47 = vadd.f32 1.0, %v6982_v16 }
 0xa1b   : > { %v5877_v32 = vadd.f32 1.0, %v6984_v36  ;;  %6987 = vpow2.f32 %v6901_v19 }
 0xa1c   : > { %6989 = vrcp.f32 %v5873_v47  ;;  %v5890_v4 = vand.u32 2147483647, %v5873_v47  ;;  %v5892_v38 = vand.u32 2147483648, %v5873_v47  ;;  %vm5886_vm6 = vweird.f32 %v5873_v47 }
 0xa1d   : > { %v6986_v44 = vpop.eup %6985  ;;  %6991 = vrcp.f32 %v5877_v32  ;;  %v5950_v15 = vand.u32 2147483647, %v5877_v32  ;;  %v5952_v3 = vand.u32 2147483648, %v5877_v32  ;;  %vm5946_vm11 = vweird.f32 %v5877_v32 }
 0xa1e   : > { %v5784_v6 = vmul.f32 %v6986_v44, %v5681_v28  ;;  %6993 = vpow2.f32 %v6905_v29  ;;  %vm5790_vm1 = vweird.f32 %v6986_v44  ;;  %vm5891_vm8 = vcmp.eq.f32.partialorder %v5890_v4, 8.507059e+37 }
 0xa1f   : > { %vm5791_vm3 = vmor %vm5789_vm2, %vm5790_vm1  ;;  %v5893_v51 = vor.u32 1.1754944e-38, %v5892_v38  ;;  %vm5951_vm9 = vcmp.eq.f32.partialorder %v5950_v15, 8.507059e+37  ;;  %v5953_v24 = vor.u32 1.1754944e-38, %v5952_v3 }
 0xa20   : > { %v5785_v49 = vmul.f32 %v6986_v44, %v5784_v6 }
 0xa21   : > { %v6988_v25 = vpop.eup %6987  ;;  %v5740_v16 = vpop.f32.mrf.mxu3 }
 0xa22   : > { %v6990_v14 = vpop.eup %6989  ;;  %v5786_v17 = vmul.f32 0.5, %v5785_v49  ;;  %v14748_v11 = vadd.f32 1.0, %v6988_v25  ;;  %v5741_v50 = vadd.f32 %v5740_v16, %v14746_v31 }
 0xa23   : > { %v6992_v10 = vpop.eup %6991  ;;  %v5882_v57 = vmul.f32 %v6990_v14, %v5873_v47  ;;  %vm5887_vm4 = vweird.f32 %v6990_v14 }
 0xa24   : > { %v5787_v48 = vsub.f32 1.5, %v5786_v17  ;;  %v5942_v59 = vmul.f32 %v6992_v10, %v5877_v32  ;;  %6995 = vrcp.f32 %v14748_v11  ;;  %v6994_v23 = vpop.eup %6993  ;;  %vm5947_vm5 = vweird.f32 %v6992_v10  ;;  %vm5888_vm7 = vmor %vm5886_vm6, %vm5887_vm4 }
 0xa25   : > { %v5883_v39 = vsub.f32 1.0, %v5882_v57  ;;  %v14754_v8 = vadd.f32 1.0, %v6994_v23  ;;  %vm5948_vm12 = vmor %vm5946_vm11, %vm5947_vm5  ;;  %v5905_v22 = vand.u32 2147483647, %v14748_v11  ;;  %vm5901_vm13 = vweird.f32 %v14748_v11 }
 0xa26   : > { %v5788_v40 = vmul.f32 %v6986_v44, %v5787_v48  ;;  %v5943_v37 = vsub.f32 1.0, %v5942_v59  ;;  %v6094_v59 = vpop.f32.mrf.mxu2 }
 0xa27   : > { %v5884_v7 = vmul.f32 %v6990_v14, %v5883_v39  ;;  %6997 = vrcp.f32 %v14754_v8  ;;  %vm5906_vm14 = vcmp.eq.f32.partialorder %v5905_v22, 8.507059e+37  ;;  %vm5961_vm1 = vweird.f32 %v14754_v8 }
 0xa28   : > { %v5792_v2 = vsel %vm5791_vm3, %v6986_v44, %v5788_v40  ;;  %v5944_v30 = vmul.f32 %v6992_v10, %v5943_v37  ;;  %v5907_v44 = vand.u32 2147483648, %v14748_v11  ;;  %v6095_v37 = vadd.f32 %v6094_v59, %v6044_v5 }
 0xa29   : > { %v5805_v62 = vperm.slane %v5792_v2, 0  ;;  %v5885_v13 = vadd.f32 %v6990_v14, %v5884_v7 }
 0xa2a   : > { %v6996_v53 = vpop.eup %6995  ;;  %v5945_v42 = vadd.f32 %v6992_v10, %v5944_v30  ;;  %v5908_v17 = vor.u32 1.1754944e-38, %v5907_v44 }
 0xa2b   : > { %v5889_v61 = vsel %vm5888_vm7, %v6990_v14, %v5885_v13  ;;  %v5897_v12 = vmul.f32 %v6996_v53, %v14748_v11  ;;  %v5809_v54 = vmul.f32 %v5805_v62, %v14315_v45  ;;  %v5813_v32 = vmul.f32 %v5805_v62, %v14318_v55 }
 0xa2c   : > { %v5894_v34 = vsel %vm5891_vm8, %v5893_v51, %v5889_v61  ;;  %v5949_v28 = vsel %vm5948_vm12, %v6992_v10, %v5945_v42  ;;  %v6092_v45 = vadd.f32 %v6091_v56, %v6044_v5  ;;  %vm5902_vm10 = vweird.f32 %v6996_v53 }
 0xa2d   : > { %v6001_v19 = vmul.f32 %v5894_v34, %v14724_v63  ;;  %v5954_v36 = vsel %vm5951_vm9, %v5953_v24, %v5949_v28  ;;  %v5898_v47 = vsub.f32 1.0, %v5897_v12  ;;  %v6998_v29 = vpop.eup %6997  ;;  %v5826_v63 = vmul.f32 %v5818_v43, %v5809_v54  ;;  %vm5903_vm15 = vmor %vm5901_vm13, %vm5902_vm10 }
 0xa2e   : > { %v6005_v52 = vmul.f32 %v5954_v36, %v14726_v58  ;;  %v5957_v18 = vmul.f32 %v6998_v29, %v14754_v8  ;;  %v5830_v49 = vmul.f32 %v5818_v43, %v5813_v32  ;;  %v5967_v10 = vand.u32 2147483648, %v14754_v8 }
 0xa2f   : > { %v6143_v6 = vadd.f32 %v6069_v1, %v6001_v19  ;;  %v5899_v55 = vmul.f32 %v6996_v53, %v5898_v47  ;;  %v14779_v58 = vadd.f32 %v5835_v60, %v5826_v63  ;;  %vm5962_vm0 = vweird.f32 %v6998_v29 }
 0xa30   : > { %v6147_v41 = vadd.f32 %v6072_v46, %v6005_v52  ;;  %v5958_v14 = vsub.f32 1.0, %v5957_v18  ;;  %v14790_v57 = vadd.f32 %v5835_v60, %v5830_v49  ;;  %v5965_v43 = vand.u32 2147483647, %v14754_v8  ;;  %vm5963_vm2 = vmor %vm5961_vm1, %vm5962_vm0 }
 0xa31   : > { %6151 = vst [vmem:[%s14767_s29] sm:$0xff] %v6143_v6  ;;  %v5900_v25 = vadd.f32 %v6996_v53, %v5899_v55  ;;  %v6902_v31 = vmul.f32 -1.442695, %v14779_v58  ;;  %v5968_v60 = vor.u32 1.1754944e-38, %v5967_v10  ;;  %v6114_v5 = vpop.f32.mrf.mxu3  ;;  %v6045_v28 = vperm.slane %v14743_v9, 2 }
 0xa32   : > { %6155 = vst [vmem:[%s14767_s29 + $0x20] sm:$0xff] %v6147_v41  ;;  %v5959_v48 = vmul.f32 %v6998_v29, %v5958_v14  ;;  %v6906_v39 = vmul.f32 -1.442695, %v14790_v57  ;;  %vm5966_vm3 = vcmp.eq.f32.partialorder %v5965_v43, 8.507059e+37  ;;  %v5819_v54 = vperm.slane %v14713_v27, 3 }
 0xa33   : > { %v5904_v1 = vsel %vm5903_vm15, %v6996_v53, %v5900_v25  ;;  %6999 = vpow2.f32 %v6902_v31  ;;  %v6115_v41 = vadd.f32 %v6114_v5, %v6045_v28 }
 0xa34   : > { %v5909_v11 = vsel %vm5906_vm14, %v5908_v17, %v5904_v1  ;;  %v5760_v23 = vpop.f32.mrf.mxu0  ;;  %v5960_v38 = vadd.f32 %v6998_v29, %v5959_v48  ;;  %7001 = vpow2.f32 %v6906_v39 }
 0xa35   : > { %v6002_v4 = vmul.f32 %v5909_v11, %v14734_v0  ;;  %v5761_v40 = vadd.f32 %v5760_v23, %v5741_v50 }
 0xa36   : > { %v5964_v7 = vsel %vm5963_vm2, %v6998_v29, %v5960_v38  ;;  %v5836_v29 = vperm.slane %v14718_v35, 3 }
 0xa37   : > { %v6144_v33 = vadd.f32 %v6092_v45, %v6002_v4  ;;  %7003 = vrsqrt.f32 %v5761_v40  ;;  %v5969_v15 = vsel %vm5966_vm3, %v5968_v60, %v5964_v7  ;;  %vm5799_vm5 = vweird.f32 %v5761_v40 }
 0xa38   : > { %v6006_v3 = vmul.f32 %v5969_v15, %v14736_v26 }
 0xa39   : > { %6152 = vst [vmem:[%s14767_s29 + $0x8] sm:$0xff] %v6144_v33  ;;  %v7000_v0 = vpop.eup %6999  ;;  %v6117_v55 = vpop.f32.mrf.mxu3 }
 0xa3a   : > { %v6148_v2 = vadd.f32 %v6095_v37, %v6006_v3  ;;  %v5875_v30 = vadd.f32 1.0, %v7000_v0  ;;  %v7002_v62 = vpop.eup %7001  ;;  %v6118_v31 = vadd.f32 %v6117_v55, %v6045_v28 }
 0xa3b   : > { %v5879_v46 = vadd.f32 1.0, %v7002_v62 }
 0xa3c   : > { %6156 = vst [vmem:[%s14767_s29 + $0x28] sm:$0xff] %v6148_v2  ;;  %7005 = vrcp.f32 %v5875_v30  ;;  %v5922_v34 = vand.u32 2147483648, %v5875_v30  ;;  %v5920_v36 = vand.u32 2147483647, %v5875_v30  ;;  %vm5916_vm8 = vweird.f32 %v5875_v30 }
 0xa3d   : > { %v7004_v8 = vpop.eup %7003  ;;  %7007 = vrcp.f32 %v5879_v46  ;;  %v5980_v45 = vand.u32 2147483647, %v5879_v46  ;;  %v5982_v63 = vand.u32 2147483648, %v5879_v46  ;;  %vm5976_vm10 = vweird.f32 %v5879_v46 }
 0xa3e   : > { %v5794_v13 = vmul.f32 %v7004_v8, %v5761_v40  ;;  %vm5800_vm4 = vweird.f32 %v7004_v8  ;;  %v5923_v44 = vor.u32 1.1754944e-38, %v5922_v34  ;;  %vm5921_vm9 = vcmp.eq.f32.partialorder %v5920_v36, 8.507059e+37 }
 0xa3f   : > { %vm5801_vm6 = vmor %vm5799_vm5, %vm5800_vm4  ;;  %v5983_v10 = vor.u32 1.1754944e-38, %v5982_v63  ;;  %vm5981_vm14 = vcmp.eq.f32.partialorder %v5980_v45, 8.507059e+37 }
 0xa40   : > { %v5795_v56 = vmul.f32 %v7004_v8, %v5794_v13 }
 0xa42   : > { %v5796_v53 = vmul.f32 0.5, %v5795_v56  ;;  %v7006_v51 = vpop.eup %7005  ;;  %v6046_v56 = vperm.slane %v14743_v9, 3 }
 0xa43   : > { %v5912_v61 = vmul.f32 %v7006_v51, %v5875_v30  ;;  %v7008_v24 = vpop.eup %7007  ;;  %vm5917_vm7 = vweird.f32 %v7006_v51 }
 0xa44   : > { %v5797_v42 = vsub.f32 1.5, %v5796_v53  ;;  %v5972_v22 = vmul.f32 %v7008_v24, %v5879_v46  ;;  %vm5918_vm11 = vmor %vm5916_vm8, %vm5917_vm7  ;;  %vm5977_vm12 = vweird.f32 %v7008_v24  ;;  %v6137_v60 = vpop.f32.mrf.mxu0 }
 0xa45   : > { %v5913_v26 = vsub.f32 1.0, %v5912_v61  ;;  %vm5978_vm13 = vmor %vm5976_vm10, %vm5977_vm12  ;;  %v6138_v28 = vadd.f32 %v6137_v60, %v6046_v56 }
 0xa46   : > { %v5798_v12 = vmul.f32 %v7004_v8, %v5797_v42  ;;  %v5973_v32 = vsub.f32 1.0, %v5972_v22 }
 0xa47   : > { %v5914_v19 = vmul.f32 %v7006_v51, %v5913_v26 }
 0xa48   : > { %v5802_v16 = vsel %vm5801_vm6, %v7004_v8, %v5798_v12  ;;  %v5974_v6 = vmul.f32 %v7008_v24, %v5973_v32 }
 0xa49   : > { %v5806_v47 = vperm.slane %v5802_v16, 0  ;;  %v5915_v52 = vadd.f32 %v7006_v51, %v5914_v19 }
 0xa4a   : > { %v5975_v25 = vadd.f32 %v7008_v24, %v5974_v6 }
 0xa4b   : > { %v5810_v18 = vmul.f32 %v5806_v47, %v14372_v20  ;;  %v5814_v27 = vmul.f32 %v5806_v47, %v14375_v21  ;;  %v5919_v50 = vsel %vm5918_vm11, %v7006_v51, %v5915_v52 }
 0xa4c   : > { %v5924_v49 = vsel %vm5921_vm9, %v5923_v44, %v5919_v50  ;;  %v5979_v1 = vsel %vm5978_vm13, %v7008_v24, %v5975_v25  ;;  %v6140_v5 = vpop.f32.mrf.mxu0 }
 0xa4d   : > { %v5827_v35 = vmul.f32 %v5819_v54, %v5810_v18  ;;  %v5831_v14 = vmul.f32 %v5819_v54, %v5814_v27  ;;  %v6003_v17 = vmul.f32 %v5924_v49, %v14779_v58  ;;  %v5984_v43 = vsel %vm5981_vm14, %v5983_v10, %v5979_v1 }
 0xa4e   : > { %v6007_v59 = vmul.f32 %v5984_v43, %v14790_v57  ;;  %v6141_v26 = vadd.f32 %v6140_v5, %v6046_v56 }
 0xa4f   : > { %v5844_v20 = vadd.f32 %v5836_v29, %v5827_v35  ;;  %v5848_v48 = vadd.f32 %v5836_v29, %v5831_v14  ;;  %v6145_v21 = vadd.f32 %v6115_v41, %v6003_v17 }
 0xa50   : > { %v6149_v39 = vadd.f32 %v6118_v31, %v6007_v59 }
 0xa51   : > { %v6903_v11 = vmul.f32 -1.442695, %v5844_v20  ;;  %v6907_v23 = vmul.f32 -1.442695, %v5848_v48  ;;  %6153 = vst [vmem:[%s14767_s29 + $0x10] sm:$0xff] %v6145_v21 }
 0xa52   : > { %6157 = vst [vmem:[%s14767_s29 + $0x30] sm:$0xff] %v6149_v39 }
 0xa53   : > { %7009 = vpow2.f32 %v6903_v11 }
 0xa54   : > { %7011 = vpow2.f32 %v6907_v23 }
 0xa59   : > { %v7010_v58 = vpop.eup %7009 }
 0xa5a   : > { %v7012_v4 = vpop.eup %7011  ;;  %v5876_v40 = vadd.f32 1.0, %v7010_v58 }
 0xa5b   : > { %v5880_v38 = vadd.f32 1.0, %v7012_v4 }
 0xa5c   : > { %7013 = vrcp.f32 %v5876_v40  ;;  %v5937_v57 = vand.u32 2147483648, %v5876_v40  ;;  %v5935_v30 = vand.u32 2147483647, %v5876_v40  ;;  %vm5931_vm1 = vweird.f32 %v5876_v40 }
 0xa5d   : > { %7015 = vrcp.f32 %v5880_v38  ;;  %v5997_v62 = vand.u32 2147483648, %v5880_v38  ;;  %v5995_v13 = vand.u32 2147483647, %v5880_v38  ;;  %vm5991_vm3 = vweird.f32 %v5880_v38 }
 0xa5e   : > { %v5938_v53 = vor.u32 1.1754944e-38, %v5937_v57  ;;  %vm5936_vm4 = vcmp.eq.f32.partialorder %v5935_v30, 8.507059e+37 }
 0xa5f   : > { %v5998_v61 = vor.u32 1.1754944e-38, %v5997_v62  ;;  %vm5996_vm6 = vcmp.eq.f32.partialorder %v5995_v13, 8.507059e+37 }
 0xa62   : > { %v7014_v37 = vpop.eup %7013 }
 0xa63   : > { %v7016_v33 = vpop.eup %7015  ;;  %v5927_v7 = vmul.f32 %v7014_v37, %v5876_v40  ;;  %vm5932_vm15 = vweird.f32 %v7014_v37 }
 0xa64   : > { %v5987_v15 = vmul.f32 %v7016_v33, %v5880_v38  ;;  %vm5992_vm0 = vweird.f32 %v7016_v33  ;;  %vm5933_vm2 = vmor %vm5931_vm1, %vm5932_vm15 }
 0xa65   : > { %v5928_v3 = vsub.f32 1.0, %v5927_v7  ;;  %vm5993_vm5 = vmor %vm5991_vm3, %vm5992_vm0 }
 0xa66   : > { %v5988_v0 = vsub.f32 1.0, %v5987_v15 }
 0xa67   : > { %v5929_v2 = vmul.f32 %v7014_v37, %v5928_v3 }
 0xa68   : > { %v5989_v8 = vmul.f32 %v7016_v33, %v5988_v0 }
 0xa69   : > { %v5930_v46 = vadd.f32 %v7014_v37, %v5929_v2 }
 0xa6a   : > { %v5990_v51 = vadd.f32 %v7016_v33, %v5989_v8 }
 0xa6b   : > { %v5934_v42 = vsel %vm5933_vm2, %v7014_v37, %v5930_v46 }
 0xa6c   : > { %v5939_v24 = vsel %vm5936_vm4, %v5938_v53, %v5934_v42  ;;  %v5994_v12 = vsel %vm5993_vm5, %v7016_v33, %v5990_v51 }
 0xa6d   : > { %v6004_v34 = vmul.f32 %v5939_v24, %v5844_v20  ;;  %v5999_v22 = vsel %vm5996_vm6, %v5998_v61, %v5994_v12 }
 0xa6e   : > { %v6008_v54 = vmul.f32 %v5999_v22, %v5848_v48 }
 0xa6f   : > { %v6146_v9 = vadd.f32 %v6138_v28, %v6004_v34 }
 0xa70   : > { %v6150_v16 = vadd.f32 %v6141_v26, %v6008_v54 }
 0xa71   : > { %6154 = vst [vmem:[%s14767_s29 + $0x18] sm:$0xff] %v6146_v9 }
 0xa72   : > { %6158 = vst [vmem:[%s14767_s29 + $0x38] sm:$0xff] %v6150_v16 }
 0xa73 PF: > { %s32_s3 = sadd.s32 1, %s7364_s3  }
 0xa74   : > { %p29_p4 = scmp.ge.s32.totalorder %s32_s3, 4  }
 0xa76   :  { %31 = sbr.rel (!%p29_p4) target bundleno = 8 (0x8), region = 149 }

</bundles_post_ra>
